<compile_context>
chip_gen: v7x
topology: tpu7x:2x2x1
jax: 0.10.0
libtpu: 0.0.40
codegen_flags: <defaults>
</compile_context>

<pallas_src>
import functools

import jax
import jax.numpy as jnp
from jax.experimental import pallas as pl
from jax.experimental.pallas import tpu as pltpu


# -----------------------------------------------------------------------------
# Fused Pallas kernel (one batch element per grid step)
# -----------------------------------------------------------------------------
def _unet_encoder_kernel(x_ref, w1_ref, w2_ref, o1_ref, o2_ref,
                         xpad, pat1, ppad, pat2,
                         *, K, pool_k, pool_s, neg_slope):
    """Fused: pad -> conv1 -> (LeakyReLU -> MaxPool -> pad) -> conv2.

    x_ref : (1, H,  W,  Cin)       input tile (NHWC)
    w1_ref: (K*K*Cin, C1)          conv1 weight, flattened [kh, kw, cin] major->minor
    w2_ref: (K*K*C1,  C2)          conv2 weight, same flattening
    o1_ref: (1, H1, W1, C1)        conv1 output
    o2_ref: (1, H2, W2, C2)        conv2 output
    xpad  : (H+2, W+2, Cin)        VMEM scratch, zero-padded input
    pat1  : (H1, W1, K*K*Cin)      VMEM scratch, conv1 im2col patches
    ppad  : (P+2, P+2, C1)         VMEM scratch, zero-padded pooled activation
    pat2  : (H2, W2, K*K*C1)       VMEM scratch, conv2 im2col patches
    """
    _, H, W, CIN = x_ref.shape
    _, H1, W1, C1 = o1_ref.shape
    _, H2, W2, C2 = o2_ref.shape
    P = (H1 - pool_k) // pool_s + 1          # pooled spatial size

    # ---------------- pad input inside VMEM (no jnp.pad in the wrapper) -------
    xpad[...] = jnp.zeros_like(xpad)
    xpad[pl.ds(1, H), pl.ds(1, W), :] = x_ref[0].astype(xpad.dtype)

    # ---------------- conv1: im2col + single MXU matmul -----------------------
    # pat1[h, w, (kh*K + kw)*Cin + c] = xpad[h + kh, w + kw, c]
    for kh in range(K):
        for kw in range(K):
            idx = kh * K + kw
            pat1[:, :, pl.ds(idx * CIN, CIN)] = xpad[pl.ds(kh, H1), pl.ds(kw, W1), :]
    patches1 = pat1[...].reshape(H1 * W1, K * K * CIN)          # (H1*W1, 64)
    out1_2d = jnp.dot(patches1, w1_ref[...],
                      preferred_element_type=jnp.float32)       # (H1*W1, C1)
    out1 = out1_2d.reshape(H1, W1, C1)
    o1_ref[0] = out1.astype(o1_ref.dtype)                       # pre-activation output

    # ---------------- LeakyReLU(0.2) + MaxPool(k=4, s=2), no strided refs -----
    a = jnp.where(out1 >= 0, out1, neg_slope * out1)            # (H1, W1, C1)

    # rows: max over 4 consecutive rows (stride-1 windows, contiguous slices)
    nh = H1 - pool_k + 1
    hm = jnp.maximum(jnp.maximum(a[0:nh], a[1:nh + 1]),
                     jnp.maximum(a[2:nh + 2], a[3:nh + 3]))     # (nh, W1, C1)
    # keep every pool_s-th row via a leading-dim-only reshape (layout-safe)
    hsel = hm[:P * pool_s].reshape(P, pool_s, W1, C1)[:, 0]     # (P, W1, C1)

    # cols: max over 4 consecutive cols (contiguous slices along sublane axis)
    nw = W1 - pool_k + 1
    wm = jnp.maximum(jnp.maximum(hsel[:, 0:nw], hsel[:, 1:nw + 1]),
                     jnp.maximum(hsel[:, 2:nw + 2], hsel[:, 3:nw + 3]))  # (P, nw, C1)

    # stride-2 column select fused with the conv2 zero-padding: write the P
    # selected columns straight into the padded VMEM buffer.
    ppad[...] = jnp.zeros_like(ppad)
    for q in range(P):
        ppad[pl.ds(1, P), pl.ds(1 + q, 1), :] = (
            wm[:, pool_s * q:pool_s * q + 1, :].astype(ppad.dtype))

    # ---------------- conv2: im2col + single MXU matmul (contraction = 1024) --
    for kh in range(K):
        for kw in range(K):
            idx = kh * K + kw
            pat2[:, :, pl.ds(idx * C1, C1)] = ppad[pl.ds(kh, H2), pl.ds(kw, W2), :]
    patches2 = pat2[...].reshape(H2 * W2, K * K * C1)           # (H2*W2, 1024)
    out2_2d = jnp.dot(patches2, w2_ref[...],
                      preferred_element_type=jnp.float32)       # (H2*W2, C2)
    o2_ref[0] = out2_2d.reshape(H2, W2, C2).astype(o2_ref.dtype)


# -----------------------------------------------------------------------------
# Wrapper
# -----------------------------------------------------------------------------
@jax.jit
def unet_encoder_forward(x_nchw, w1_hwio, w2_hwio):
    """Returns [out1, out2] in NCHW, matching the PyTorch module's output list."""
    N, CIN, H, W = x_nchw.shape
    K, _, _, C1 = w1_hwio.shape
    C2 = w2_hwio.shape[-1]
    H1, W1 = H - 1, W - 1                       # conv k=4, s=1, p=1
    P = (H1 - 4) // 2 + 1                       # maxpool k=4, s=2
    H2, W2 = P - 1, P - 1                       # conv k=4, s=1, p=1

    x_nhwc = jnp.transpose(x_nchw, (0, 2, 3, 1))
    w1f = w1_hwio.reshape(K * K * CIN, C1)      # [kh, kw, cin] -> rows
    w2f = w2_hwio.reshape(K * K * C1, C2)

    kernel = functools.partial(_unet_encoder_kernel,
                               K=K, pool_k=4, pool_s=2, neg_slope=0.2)

    out1, out2 = pl.pallas_call(
        kernel,
        out_shape=(jax.ShapeDtypeStruct((N, H1, W1, C1), x_nchw.dtype),
                   jax.ShapeDtypeStruct((N, H2, W2, C2), x_nchw.dtype)),
        grid=(N,),
        in_specs=[
            pl.BlockSpec((1, H, W, CIN), lambda b: (b, 0, 0, 0)),
            pl.BlockSpec((K * K * CIN, C1), lambda b: (0, 0)),   # constant block:
            pl.BlockSpec((K * K * C1, C2), lambda b: (0, 0)),    # weights DMA'd once
        ],
        out_specs=[
            pl.BlockSpec((1, H1, W1, C1), lambda b: (b, 0, 0, 0)),
            pl.BlockSpec((1, H2, W2, C2), lambda b: (b, 0, 0, 0)),
        ],
        scratch_shapes=[
            pltpu.VMEM((H + 2, W + 2, CIN), jnp.float32),      # padded input
            pltpu.VMEM((H1, W1, K * K * CIN), jnp.float32),    # conv1 patches
            pltpu.VMEM((P + 2, P + 2, C1), jnp.float32),       # padded pooled
            pltpu.VMEM((H2, W2, K * K * C1), jnp.float32),     # conv2 patches
        ],
        compiler_params=pltpu.CompilerParams(
            dimension_semantics=("parallel",)),                # 2 TCs on v7x
    )(x_nhwc, w1f, w2f)

    return [jnp.transpose(out1, (0, 3, 1, 2)),
            jnp.transpose(out2, (0, 3, 1, 2))]


# -----------------------------------------------------------------------------
# Pure-JAX reference (for correctness check)
# -----------------------------------------------------------------------------
def reference_forward(x_nchw, w1_hwio, w2_hwio):
    dn = ("NHWC", "HWIO", "NHWC")
    x = jnp.transpose(x_nchw, (0, 2, 3, 1))
    out1 = jax.lax.conv_general_dilated(
        x, w1_hwio, (1, 1), ((1, 1), (1, 1)), dimension_numbers=dn)
    a = jnp.where(out1 >= 0, out1, 0.2 * out1)
    p = jax.lax.reduce_window(
        a, -jnp.inf, jax.lax.max, (1, 4, 4, 1), (1, 2, 2, 1), "VALID")
    out2 = jax.lax.conv_general_dilated(
        p, w2_hwio, (1, 1), ((1, 1), (1, 1)), dimension_numbers=dn)
    return [jnp.transpose(out1, (0, 3, 1, 2)),
            jnp.transpose(out2, (0, 3, 1, 2))]


# -----------------------------------------------------------------------------
# Main
# -----------------------------------------------------------------------------
if __name__ == "__main__":
    # n_downsample = 2, input_dim = 4 (default norm_layer=BatchNorm2d => bias=False)
    N, CIN, H, W = 2, 4, 16, 16
    INNER = 64

    key = jax.random.PRNGKey(0)
    kx, kw1, kw2 = jax.random.split(key, 3)
    x = jax.random.normal(kx, (N, CIN, H, W), jnp.float32)                # NCHW input
    w1 = jax.random.normal(kw1, (4, 4, CIN, INNER), jnp.float32) * 0.05   # HWIO
    w2 = jax.random.normal(kw2, (4, 4, INNER, 2 * INNER), jnp.float32) * 0.05

    outs = jax.block_until_ready(unet_encoder_forward(x, w1, w2))
    refs = jax.block_until_ready(reference_forward(x, w1, w2))

    H1, W1 = H - 1, W - 1
    P = (H1 - 4) // 2 + 1
    H2, W2 = P - 1, P - 1
    assert outs[0].shape == (N, INNER, H1, W1), outs[0].shape
    assert outs[1].shape == (N, 2 * INNER, H2, W2), outs[1].shape

    for got, ref in zip(outs, refs):
        scale = jnp.maximum(jnp.max(jnp.abs(ref)), 1e-6)
        err = float(jnp.max(jnp.abs(got - ref)) / scale)
        assert err < 1e-4, f"mismatch: rel err {err}"   # all-f32 path: tight tol

    print("KERNEL_OK")
</pallas_src>

<mosaic_0001>
module attributes {stable_mosaic.version = 11 : i64} {
  func.func @_unet_encoder_kernel(%arg0: i32, %arg1: memref<1x16x16x4xf32, #tpu.memory_space<vmem>>, %arg2: memref<64x64xf32, #tpu.memory_space<vmem>>, %arg3: memref<1024x128xf32, #tpu.memory_space<vmem>>, %arg4: memref<1x15x15x64xf32, #tpu.memory_space<vmem>>, %arg5: memref<1x5x5x128xf32, #tpu.memory_space<vmem>>, %arg6: memref<18x18x4xf32, #tpu.memory_space<vmem>>, %arg7: memref<15x15x64xf32, #tpu.memory_space<vmem>>, %arg8: memref<8x8x64xf32, #tpu.memory_space<vmem>>, %arg9: memref<5x5x1024xf32, #tpu.memory_space<vmem>>) attributes {dimension_semantics = [#tpu.dimension_semantics<parallel>], iteration_bounds = array<i64: 2>, scalar_prefetch = 0 : i64, scratch_operands = 4 : i64, tpu.core_type = #tpu.core_type<tc>, window_params = [{transform_indices = @transform_0, window_bounds = array<i64: 1, 16, 16, 4>}, {pipeline_mode = #tpu.pipeline_mode<synchronous>, transform_indices = @transform_1, window_bounds = array<i64: 64, 64>}, {pipeline_mode = #tpu.pipeline_mode<synchronous>, transform_indices = @transform_2, window_bounds = array<i64: 1024, 128>}, {transform_indices = @transform_3, window_bounds = array<i64: 1, 15, 15, 64>}, {transform_indices = @transform_4, window_bounds = array<i64: 1, 5, 5, 128>}]} {
    %cst = arith.constant 0.000000e+00 : f32
    %0 = vector.broadcast %cst : f32 to vector<18x18x4xf32>
    %c0 = arith.constant 0 : index
    %c0_0 = arith.constant 0 : index
    %c0_1 = arith.constant 0 : index
    %1 = vector.load %arg6[%c0, %c0_0, %c0_1] : memref<18x18x4xf32, #tpu.memory_space<vmem>>, vector<18x18x4xf32>
    tpu.vector_store %arg6[%c0, %c0_0, %c0_1], %0 {strides = array<i32>} : memref<18x18x4xf32, #tpu.memory_space<vmem>>, vector<18x18x4xf32>,
    %c0_2 = arith.constant 0 : index
    %c0_3 = arith.constant 0 : index
    %c0_4 = arith.constant 0 : index
    %c0_5 = arith.constant 0 : index
    %2 = vector.load %arg1[%c0_2, %c0_3, %c0_4, %c0_5] : memref<1x16x16x4xf32, #tpu.memory_space<vmem>>, vector<1x16x16x4xf32>
    %3 = vector.shape_cast %2 : vector<1x16x16x4xf32> to vector<16x16x4xf32>
    %c1 = arith.constant 1 : index
    %c1_6 = arith.constant 1 : index
    %c0_7 = arith.constant 0 : index
    %4 = vector.load %arg6[%c1, %c1_6, %c0_7] : memref<18x18x4xf32, #tpu.memory_space<vmem>>, vector<16x16x4xf32>
    tpu.vector_store %arg6[%c1, %c1_6, %c0_7], %3 {strides = array<i32>} : memref<18x18x4xf32, #tpu.memory_space<vmem>>, vector<16x16x4xf32>,
    %c0_8 = arith.constant 0 : index
    %c0_9 = arith.constant 0 : index
    %c0_10 = arith.constant 0 : index
    %5 = vector.load %arg6[%c0_8, %c0_9, %c0_10] : memref<18x18x4xf32, #tpu.memory_space<vmem>>, vector<15x15x4xf32>
    %c0_11 = arith.constant 0 : index
    %c0_12 = arith.constant 0 : index
    %c0_13 = arith.constant 0 : index
    %6 = vector.load %arg7[%c0_11, %c0_12, %c0_13] : memref<15x15x64xf32, #tpu.memory_space<vmem>>, vector<15x15x4xf32>
    tpu.vector_store %arg7[%c0_11, %c0_12, %c0_13], %5 {strides = array<i32>} : memref<15x15x64xf32, #tpu.memory_space<vmem>>, vector<15x15x4xf32>,
    %c0_14 = arith.constant 0 : index
    %c1_15 = arith.constant 1 : index
    %c0_16 = arith.constant 0 : index
    %7 = vector.load %arg6[%c0_14, %c1_15, %c0_16] : memref<18x18x4xf32, #tpu.memory_space<vmem>>, vector<15x15x4xf32>
    %c0_17 = arith.constant 0 : index
    %c0_18 = arith.constant 0 : index
    %c4 = arith.constant 4 : index
    %8 = vector.load %arg7[%c0_17, %c0_18, %c4] : memref<15x15x64xf32, #tpu.memory_space<vmem>>, vector<15x15x4xf32>
    tpu.vector_store %arg7[%c0_17, %c0_18, %c4], %7 {strides = array<i32>} : memref<15x15x64xf32, #tpu.memory_space<vmem>>, vector<15x15x4xf32>,
    %c0_19 = arith.constant 0 : index
    %c2 = arith.constant 2 : index
    %c0_20 = arith.constant 0 : index
    %9 = vector.load %arg6[%c0_19, %c2, %c0_20] : memref<18x18x4xf32, #tpu.memory_space<vmem>>, vector<15x15x4xf32>
    %c0_21 = arith.constant 0 : index
    %c0_22 = arith.constant 0 : index
    %c8 = arith.constant 8 : index
    %10 = vector.load %arg7[%c0_21, %c0_22, %c8] : memref<15x15x64xf32, #tpu.memory_space<vmem>>, vector<15x15x4xf32>
    tpu.vector_store %arg7[%c0_21, %c0_22, %c8], %9 {strides = array<i32>} : memref<15x15x64xf32, #tpu.memory_space<vmem>>, vector<15x15x4xf32>,
    %c0_23 = arith.constant 0 : index
    %c3 = arith.constant 3 : index
    %c0_24 = arith.constant 0 : index
    %11 = vector.load %arg6[%c0_23, %c3, %c0_24] : memref<18x18x4xf32, #tpu.memory_space<vmem>>, vector<15x15x4xf32>
    %c0_25 = arith.constant 0 : index
    %c0_26 = arith.constant 0 : index
    %c12 = arith.constant 12 : index
    %12 = vector.load %arg7[%c0_25, %c0_26, %c12] : memref<15x15x64xf32, #tpu.memory_space<vmem>>, vector<15x15x4xf32>
    tpu.vector_store %arg7[%c0_25, %c0_26, %c12], %11 {strides = array<i32>} : memref<15x15x64xf32, #tpu.memory_space<vmem>>, vector<15x15x4xf32>,
    %c1_27 = arith.constant 1 : index
    %c0_28 = arith.constant 0 : index
    %c0_29 = arith.constant 0 : index
    %13 = vector.load %arg6[%c1_27, %c0_28, %c0_29] : memref<18x18x4xf32, #tpu.memory_space<vmem>>, vector<15x15x4xf32>
    %c0_30 = arith.constant 0 : index
    %c0_31 = arith.constant 0 : index
    %c16 = arith.constant 16 : index
    %14 = vector.load %arg7[%c0_30, %c0_31, %c16] : memref<15x15x64xf32, #tpu.memory_space<vmem>>, vector<15x15x4xf32>
    tpu.vector_store %arg7[%c0_30, %c0_31, %c16], %13 {strides = array<i32>} : memref<15x15x64xf32, #tpu.memory_space<vmem>>, vector<15x15x4xf32>,
    %c1_32 = arith.constant 1 : index
    %c1_33 = arith.constant 1 : index
    %c0_34 = arith.constant 0 : index
    %15 = vector.load %arg6[%c1_32, %c1_33, %c0_34] : memref<18x18x4xf32, #tpu.memory_space<vmem>>, vector<15x15x4xf32>
    %c0_35 = arith.constant 0 : index
    %c0_36 = arith.constant 0 : index
    %c20 = arith.constant 20 : index
    %16 = vector.load %arg7[%c0_35, %c0_36, %c20] : memref<15x15x64xf32, #tpu.memory_space<vmem>>, vector<15x15x4xf32>
    tpu.vector_store %arg7[%c0_35, %c0_36, %c20], %15 {strides = array<i32>} : memref<15x15x64xf32, #tpu.memory_space<vmem>>, vector<15x15x4xf32>,
    %c1_37 = arith.constant 1 : index
    %c2_38 = arith.constant 2 : index
    %c0_39 = arith.constant 0 : index
    %17 = vector.load %arg6[%c1_37, %c2_38, %c0_39] : memref<18x18x4xf32, #tpu.memory_space<vmem>>, vector<15x15x4xf32>
    %c0_40 = arith.constant 0 : index
    %c0_41 = arith.constant 0 : index
    %c24 = arith.constant 24 : index
    %18 = vector.load %arg7[%c0_40, %c0_41, %c24] : memref<15x15x64xf32, #tpu.memory_space<vmem>>, vector<15x15x4xf32>
    tpu.vector_store %arg7[%c0_40, %c0_41, %c24], %17 {strides = array<i32>} : memref<15x15x64xf32, #tpu.memory_space<vmem>>, vector<15x15x4xf32>,
    %c1_42 = arith.constant 1 : index
    %c3_43 = arith.constant 3 : index
    %c0_44 = arith.constant 0 : index
    %19 = vector.load %arg6[%c1_42, %c3_43, %c0_44] : memref<18x18x4xf32, #tpu.memory_space<vmem>>, vector<15x15x4xf32>
    %c0_45 = arith.constant 0 : index
    %c0_46 = arith.constant 0 : index
    %c28 = arith.constant 28 : index
    %20 = vector.load %arg7[%c0_45, %c0_46, %c28] : memref<15x15x64xf32, #tpu.memory_space<vmem>>, vector<15x15x4xf32>
    tpu.vector_store %arg7[%c0_45, %c0_46, %c28], %19 {strides = array<i32>} : memref<15x15x64xf32, #tpu.memory_space<vmem>>, vector<15x15x4xf32>,
    %c2_47 = arith.constant 2 : index
    %c0_48 = arith.constant 0 : index
    %c0_49 = arith.constant 0 : index
    %21 = vector.load %arg6[%c2_47, %c0_48, %c0_49] : memref<18x18x4xf32, #tpu.memory_space<vmem>>, vector<15x15x4xf32>
    %c0_50 = arith.constant 0 : index
    %c0_51 = arith.constant 0 : index
    %c32 = arith.constant 32 : index
    %22 = vector.load %arg7[%c0_50, %c0_51, %c32] : memref<15x15x64xf32, #tpu.memory_space<vmem>>, vector<15x15x4xf32>
    tpu.vector_store %arg7[%c0_50, %c0_51, %c32], %21 {strides = array<i32>} : memref<15x15x64xf32, #tpu.memory_space<vmem>>, vector<15x15x4xf32>,
    %c2_52 = arith.constant 2 : index
    %c1_53 = arith.constant 1 : index
    %c0_54 = arith.constant 0 : index
    %23 = vector.load %arg6[%c2_52, %c1_53, %c0_54] : memref<18x18x4xf32, #tpu.memory_space<vmem>>, vector<15x15x4xf32>
    %c0_55 = arith.constant 0 : index
    %c0_56 = arith.constant 0 : index
    %c36 = arith.constant 36 : index
    %24 = vector.load %arg7[%c0_55, %c0_56, %c36] : memref<15x15x64xf32, #tpu.memory_space<vmem>>, vector<15x15x4xf32>
    tpu.vector_store %arg7[%c0_55, %c0_56, %c36], %23 {strides = array<i32>} : memref<15x15x64xf32, #tpu.memory_space<vmem>>, vector<15x15x4xf32>,
    %c2_57 = arith.constant 2 : index
    %c2_58 = arith.constant 2 : index
    %c0_59 = arith.constant 0 : index
    %25 = vector.load %arg6[%c2_57, %c2_58, %c0_59] : memref<18x18x4xf32, #tpu.memory_space<vmem>>, vector<15x15x4xf32>
    %c0_60 = arith.constant 0 : index
    %c0_61 = arith.constant 0 : index
    %c40 = arith.constant 40 : index
    %26 = vector.load %arg7[%c0_60, %c0_61, %c40] : memref<15x15x64xf32, #tpu.memory_space<vmem>>, vector<15x15x4xf32>
    tpu.vector_store %arg7[%c0_60, %c0_61, %c40], %25 {strides = array<i32>} : memref<15x15x64xf32, #tpu.memory_space<vmem>>, vector<15x15x4xf32>,
    %c2_62 = arith.constant 2 : index
    %c3_63 = arith.constant 3 : index
    %c0_64 = arith.constant 0 : index
    %27 = vector.load %arg6[%c2_62, %c3_63, %c0_64] : memref<18x18x4xf32, #tpu.memory_space<vmem>>, vector<15x15x4xf32>
    %c0_65 = arith.constant 0 : index
    %c0_66 = arith.constant 0 : index
    %c44 = arith.constant 44 : index
    %28 = vector.load %arg7[%c0_65, %c0_66, %c44] : memref<15x15x64xf32, #tpu.memory_space<vmem>>, vector<15x15x4xf32>
    tpu.vector_store %arg7[%c0_65, %c0_66, %c44], %27 {strides = array<i32>} : memref<15x15x64xf32, #tpu.memory_space<vmem>>, vector<15x15x4xf32>,
    %c3_67 = arith.constant 3 : index
    %c0_68 = arith.constant 0 : index
    %c0_69 = arith.constant 0 : index
    %29 = vector.load %arg6[%c3_67, %c0_68, %c0_69] : memref<18x18x4xf32, #tpu.memory_space<vmem>>, vector<15x15x4xf32>
    %c0_70 = arith.constant 0 : index
    %c0_71 = arith.constant 0 : index
    %c48 = arith.constant 48 : index
    %30 = vector.load %arg7[%c0_70, %c0_71, %c48] : memref<15x15x64xf32, #tpu.memory_space<vmem>>, vector<15x15x4xf32>
    tpu.vector_store %arg7[%c0_70, %c0_71, %c48], %29 {strides = array<i32>} : memref<15x15x64xf32, #tpu.memory_space<vmem>>, vector<15x15x4xf32>,
    %c3_72 = arith.constant 3 : index
    %c1_73 = arith.constant 1 : index
    %c0_74 = arith.constant 0 : index
    %31 = vector.load %arg6[%c3_72, %c1_73, %c0_74] : memref<18x18x4xf32, #tpu.memory_space<vmem>>, vector<15x15x4xf32>
    %c0_75 = arith.constant 0 : index
    %c0_76 = arith.constant 0 : index
    %c52 = arith.constant 52 : index
    %32 = vector.load %arg7[%c0_75, %c0_76, %c52] : memref<15x15x64xf32, #tpu.memory_space<vmem>>, vector<15x15x4xf32>
    tpu.vector_store %arg7[%c0_75, %c0_76, %c52], %31 {strides = array<i32>} : memref<15x15x64xf32, #tpu.memory_space<vmem>>, vector<15x15x4xf32>,
    %c3_77 = arith.constant 3 : index
    %c2_78 = arith.constant 2 : index
    %c0_79 = arith.constant 0 : index
    %33 = vector.load %arg6[%c3_77, %c2_78, %c0_79] : memref<18x18x4xf32, #tpu.memory_space<vmem>>, vector<15x15x4xf32>
    %c0_80 = arith.constant 0 : index
    %c0_81 = arith.constant 0 : index
    %c56 = arith.constant 56 : index
    %34 = vector.load %arg7[%c0_80, %c0_81, %c56] : memref<15x15x64xf32, #tpu.memory_space<vmem>>, vector<15x15x4xf32>
    tpu.vector_store %arg7[%c0_80, %c0_81, %c56], %33 {strides = array<i32>} : memref<15x15x64xf32, #tpu.memory_space<vmem>>, vector<15x15x4xf32>,
    %c3_82 = arith.constant 3 : index
    %c3_83 = arith.constant 3 : index
    %c0_84 = arith.constant 0 : index
    %35 = vector.load %arg6[%c3_82, %c3_83, %c0_84] : memref<18x18x4xf32, #tpu.memory_space<vmem>>, vector<15x15x4xf32>
    %c0_85 = arith.constant 0 : index
    %c0_86 = arith.constant 0 : index
    %c60 = arith.constant 60 : index
    %36 = vector.load %arg7[%c0_85, %c0_86, %c60] : memref<15x15x64xf32, #tpu.memory_space<vmem>>, vector<15x15x4xf32>
    tpu.vector_store %arg7[%c0_85, %c0_86, %c60], %35 {strides = array<i32>} : memref<15x15x64xf32, #tpu.memory_space<vmem>>, vector<15x15x4xf32>,
    %c0_87 = arith.constant 0 : index
    %c0_88 = arith.constant 0 : index
    %c0_89 = arith.constant 0 : index
    %37 = vector.load %arg7[%c0_87, %c0_88, %c0_89] : memref<15x15x64xf32, #tpu.memory_space<vmem>>, vector<15x15x64xf32>
    %38 = vector.shape_cast %37 : vector<15x15x64xf32> to vector<225x64xf32>
    %c0_90 = arith.constant 0 : index
    %c0_91 = arith.constant 0 : index
    %39 = vector.load %arg2[%c0_90, %c0_91] : memref<64x64xf32, #tpu.memory_space<vmem>>, vector<64x64xf32>
    %cst_92 = arith.constant dense<0.000000e+00> : vector<225x64xf32>
    %40 = tpu.matmul %38, %39, %cst_92 {dimension_numbers = #tpu.dot_dimension_numbers<[1], [0], [0], [1], [0, 0, 1, 1], [], []>} : vector<225x64xf32>, vector<64x64xf32>, vector<225x64xf32> -> vector<225x64xf32>
    %41 = vector.shape_cast %40 : vector<225x64xf32> to vector<15x15x64xf32>
    %c0_93 = arith.constant 0 : index
    %c0_94 = arith.constant 0 : index
    %c0_95 = arith.constant 0 : index
    %c0_96 = arith.constant 0 : index
    %42 = vector.load %arg4[%c0_93, %c0_94, %c0_95, %c0_96] : memref<1x15x15x64xf32, #tpu.memory_space<vmem>>, vector<1x15x15x64xf32>
    %43 = vector.shape_cast %42 : vector<1x15x15x64xf32> to vector<15x15x64xf32>
    %44 = vector.shape_cast %41 : vector<15x15x64xf32> to vector<1x15x15x64xf32>
    tpu.vector_store %arg4[%c0_93, %c0_94, %c0_95, %c0_96], %44 {strides = array<i32>} : memref<1x15x15x64xf32, #tpu.memory_space<vmem>>, vector<1x15x15x64xf32>,
    %cst_97 = arith.constant 0.000000e+00 : f32
    %45 = vector.broadcast %cst_97 : f32 to vector<15x15x64xf32>
    %46 = arith.cmpf oge, %41, %45 : vector<15x15x64xf32>
    %cst_98 = arith.constant 2.000000e-01 : f32
    %47 = vector.broadcast %cst_98 : f32 to vector<15x15x64xf32>
    %48 = arith.mulf %47, %41 : vector<15x15x64xf32>
    %49 = arith.select %46, %41, %48 : vector<15x15x64xi1>, vector<15x15x64xf32>
    %50 = vector.extract_strided_slice %49 {offsets = [0, 0, 0], sizes = [12, 15, 64], strides = [1, 1, 1]} : vector<15x15x64xf32> to vector<12x15x64xf32>
    %51 = vector.extract_strided_slice %49 {offsets = [1, 0, 0], sizes = [12, 15, 64], strides = [1, 1, 1]} : vector<15x15x64xf32> to vector<12x15x64xf32>
    %52 = arith.maximumf %50, %51 : vector<12x15x64xf32>
    %53 = vector.extract_strided_slice %49 {offsets = [2, 0, 0], sizes = [12, 15, 64], strides = [1, 1, 1]} : vector<15x15x64xf32> to vector<12x15x64xf32>
    %54 = vector.extract_strided_slice %49 {offsets = [3, 0, 0], sizes = [12, 15, 64], strides = [1, 1, 1]} : vector<15x15x64xf32> to vector<12x15x64xf32>
    %55 = arith.maximumf %53, %54 : vector<12x15x64xf32>
    %56 = arith.maximumf %52, %55 : vector<12x15x64xf32>
    %57 = vector.shape_cast %56 : vector<12x15x64xf32> to vector<6x2x15x64xf32>
    %58 = vector.extract_strided_slice %57 {offsets = [0, 0, 0, 0], sizes = [6, 1, 15, 64], strides = [1, 1, 1, 1]} : vector<6x2x15x64xf32> to vector<6x1x15x64xf32>
    %59 = vector.shape_cast %58 : vector<6x1x15x64xf32> to vector<6x15x64xf32>
    %60 = vector.extract_strided_slice %59 {offsets = [0, 0, 0], sizes = [6, 12, 64], strides = [1, 1, 1]} : vector<6x15x64xf32> to vector<6x12x64xf32>
    %61 = vector.extract_strided_slice %59 {offsets = [0, 1, 0], sizes = [6, 12, 64], strides = [1, 1, 1]} : vector<6x15x64xf32> to vector<6x12x64xf32>
    %62 = arith.maximumf %60, %61 : vector<6x12x64xf32>
    %63 = vector.extract_strided_slice %59 {offsets = [0, 2, 0], sizes = [6, 12, 64], strides = [1, 1, 1]} : vector<6x15x64xf32> to vector<6x12x64xf32>
    %64 = vector.extract_strided_slice %59 {offsets = [0, 3, 0], sizes = [6, 12, 64], strides = [1, 1, 1]} : vector<6x15x64xf32> to vector<6x12x64xf32>
    %65 = arith.maximumf %63, %64 : vector<6x12x64xf32>
    %66 = arith.maximumf %62, %65 : vector<6x12x64xf32>
    %cst_99 = arith.constant 0.000000e+00 : f32
    %67 = vector.broadcast %cst_99 : f32 to vector<8x8x64xf32>
    %c0_100 = arith.constant 0 : index
    %c0_101 = arith.constant 0 : index
    %c0_102 = arith.constant 0 : index
    %68 = vector.load %arg8[%c0_100, %c0_101, %c0_102] : memref<8x8x64xf32, #tpu.memory_space<vmem>>, vector<8x8x64xf32>
    tpu.vector_store %arg8[%c0_100, %c0_101, %c0_102], %67 {strides = array<i32>} : memref<8x8x64xf32, #tpu.memory_space<vmem>>, vector<8x8x64xf32>,
    %69 = vector.extract_strided_slice %66 {offsets = [0, 0, 0], sizes = [6, 1, 64], strides = [1, 1, 1]} : vector<6x12x64xf32> to vector<6x1x64xf32>
    %c1_103 = arith.constant 1 : index
    %c1_104 = arith.constant 1 : index
    %c0_105 = arith.constant 0 : index
    %70 = vector.load %arg8[%c1_103, %c1_104, %c0_105] : memref<8x8x64xf32, #tpu.memory_space<vmem>>, vector<6x1x64xf32>
    tpu.vector_store %arg8[%c1_103, %c1_104, %c0_105], %69 {strides = array<i32>} : memref<8x8x64xf32, #tpu.memory_space<vmem>>, vector<6x1x64xf32>,
    %71 = vector.extract_strided_slice %66 {offsets = [0, 2, 0], sizes = [6, 1, 64], strides = [1, 1, 1]} : vector<6x12x64xf32> to vector<6x1x64xf32>
    %c1_106 = arith.constant 1 : index
    %c2_107 = arith.constant 2 : index
    %c0_108 = arith.constant 0 : index
    %72 = vector.load %arg8[%c1_106, %c2_107, %c0_108] : memref<8x8x64xf32, #tpu.memory_space<vmem>>, vector<6x1x64xf32>
    tpu.vector_store %arg8[%c1_106, %c2_107, %c0_108], %71 {strides = array<i32>} : memref<8x8x64xf32, #tpu.memory_space<vmem>>, vector<6x1x64xf32>,
    %73 = vector.extract_strided_slice %66 {offsets = [0, 4, 0], sizes = [6, 1, 64], strides = [1, 1, 1]} : vector<6x12x64xf32> to vector<6x1x64xf32>
    %c1_109 = arith.constant 1 : index
    %c3_110 = arith.constant 3 : index
    %c0_111 = arith.constant 0 : index
    %74 = vector.load %arg8[%c1_109, %c3_110, %c0_111] : memref<8x8x64xf32, #tpu.memory_space<vmem>>, vector<6x1x64xf32>
    tpu.vector_store %arg8[%c1_109, %c3_110, %c0_111], %73 {strides = array<i32>} : memref<8x8x64xf32, #tpu.memory_space<vmem>>, vector<6x1x64xf32>,
    %75 = vector.extract_strided_slice %66 {offsets = [0, 6, 0], sizes = [6, 1, 64], strides = [1, 1, 1]} : vector<6x12x64xf32> to vector<6x1x64xf32>
    %c1_112 = arith.constant 1 : index
    %c4_113 = arith.constant 4 : index
    %c0_114 = arith.constant 0 : index
    %76 = vector.load %arg8[%c1_112, %c4_113, %c0_114] : memref<8x8x64xf32, #tpu.memory_space<vmem>>, vector<6x1x64xf32>
    tpu.vector_store %arg8[%c1_112, %c4_113, %c0_114], %75 {strides = array<i32>} : memref<8x8x64xf32, #tpu.memory_space<vmem>>, vector<6x1x64xf32>,
    %77 = vector.extract_strided_slice %66 {offsets = [0, 8, 0], sizes = [6, 1, 64], strides = [1, 1, 1]} : vector<6x12x64xf32> to vector<6x1x64xf32>
    %c1_115 = arith.constant 1 : index
    %c5 = arith.constant 5 : index
    %c0_116 = arith.constant 0 : index
    %78 = vector.load %arg8[%c1_115, %c5, %c0_116] : memref<8x8x64xf32, #tpu.memory_space<vmem>>, vector<6x1x64xf32>
    tpu.vector_store %arg8[%c1_115, %c5, %c0_116], %77 {strides = array<i32>} : memref<8x8x64xf32, #tpu.memory_space<vmem>>, vector<6x1x64xf32>,
    %79 = vector.extract_strided_slice %66 {offsets = [0, 10, 0], sizes = [6, 1, 64], strides = [1, 1, 1]} : vector<6x12x64xf32> to vector<6x1x64xf32>
    %c1_117 = arith.constant 1 : index
    %c6 = arith.constant 6 : index
    %c0_118 = arith.constant 0 : index
    %80 = vector.load %arg8[%c1_117, %c6, %c0_118] : memref<8x8x64xf32, #tpu.memory_space<vmem>>, vector<6x1x64xf32>
    tpu.vector_store %arg8[%c1_117, %c6, %c0_118], %79 {strides = array<i32>} : memref<8x8x64xf32, #tpu.memory_space<vmem>>, vector<6x1x64xf32>,
    %c0_119 = arith.constant 0 : index
    %c0_120 = arith.constant 0 : index
    %c0_121 = arith.constant 0 : index
    %81 = vector.load %arg8[%c0_119, %c0_120, %c0_121] : memref<8x8x64xf32, #tpu.memory_space<vmem>>, vector<5x5x64xf32>
    %c0_122 = arith.constant 0 : index
    %c0_123 = arith.constant 0 : index
    %c0_124 = arith.constant 0 : index
    %82 = vector.load %arg9[%c0_122, %c0_123, %c0_124] : memref<5x5x1024xf32, #tpu.memory_space<vmem>>, vector<5x5x64xf32>
    tpu.vector_store %arg9[%c0_122, %c0_123, %c0_124], %81 {strides = array<i32>} : memref<5x5x1024xf32, #tpu.memory_space<vmem>>, vector<5x5x64xf32>,
    %c0_125 = arith.constant 0 : index
    %c1_126 = arith.constant 1 : index
    %c0_127 = arith.constant 0 : index
    %83 = vector.load %arg8[%c0_125, %c1_126, %c0_127] : memref<8x8x64xf32, #tpu.memory_space<vmem>>, vector<5x5x64xf32>
    %c0_128 = arith.constant 0 : index
    %c0_129 = arith.constant 0 : index
    %c64 = arith.constant 64 : index
    %84 = vector.load %arg9[%c0_128, %c0_129, %c64] : memref<5x5x1024xf32, #tpu.memory_space<vmem>>, vector<5x5x64xf32>
    tpu.vector_store %arg9[%c0_128, %c0_129, %c64], %83 {strides = array<i32>} : memref<5x5x1024xf32, #tpu.memory_space<vmem>>, vector<5x5x64xf32>,
    %c0_130 = arith.constant 0 : index
    %c2_131 = arith.constant 2 : index
    %c0_132 = arith.constant 0 : index
    %85 = vector.load %arg8[%c0_130, %c2_131, %c0_132] : memref<8x8x64xf32, #tpu.memory_space<vmem>>, vector<5x5x64xf32>
    %c0_133 = arith.constant 0 : index
    %c0_134 = arith.constant 0 : index
    %c128 = arith.constant 128 : index
    %86 = vector.load %arg9[%c0_133, %c0_134, %c128] : memref<5x5x1024xf32, #tpu.memory_space<vmem>>, vector<5x5x64xf32>
    tpu.vector_store %arg9[%c0_133, %c0_134, %c128], %85 {strides = array<i32>} : memref<5x5x1024xf32, #tpu.memory_space<vmem>>, vector<5x5x64xf32>,
    %c0_135 = arith.constant 0 : index
    %c3_136 = arith.constant 3 : index
    %c0_137 = arith.constant 0 : index
    %87 = vector.load %arg8[%c0_135, %c3_136, %c0_137] : memref<8x8x64xf32, #tpu.memory_space<vmem>>, vector<5x5x64xf32>
    %c0_138 = arith.constant 0 : index
    %c0_139 = arith.constant 0 : index
    %c192 = arith.constant 192 : index
    %88 = vector.load %arg9[%c0_138, %c0_139, %c192] : memref<5x5x1024xf32, #tpu.memory_space<vmem>>, vector<5x5x64xf32>
    tpu.vector_store %arg9[%c0_138, %c0_139, %c192], %87 {strides = array<i32>} : memref<5x5x1024xf32, #tpu.memory_space<vmem>>, vector<5x5x64xf32>,
    %c1_140 = arith.constant 1 : index
    %c0_141 = arith.constant 0 : index
    %c0_142 = arith.constant 0 : index
    %89 = vector.load %arg8[%c1_140, %c0_141, %c0_142] : memref<8x8x64xf32, #tpu.memory_space<vmem>>, vector<5x5x64xf32>
    %c0_143 = arith.constant 0 : index
    %c0_144 = arith.constant 0 : index
    %c256 = arith.constant 256 : index
    %90 = vector.load %arg9[%c0_143, %c0_144, %c256] : memref<5x5x1024xf32, #tpu.memory_space<vmem>>, vector<5x5x64xf32>
    tpu.vector_store %arg9[%c0_143, %c0_144, %c256], %89 {strides = array<i32>} : memref<5x5x1024xf32, #tpu.memory_space<vmem>>, vector<5x5x64xf32>,
    %c1_145 = arith.constant 1 : index
    %c1_146 = arith.constant 1 : index
    %c0_147 = arith.constant 0 : index
    %91 = vector.load %arg8[%c1_145, %c1_146, %c0_147] : memref<8x8x64xf32, #tpu.memory_space<vmem>>, vector<5x5x64xf32>
    %c0_148 = arith.constant 0 : index
    %c0_149 = arith.constant 0 : index
    %c320 = arith.constant 320 : index
    %92 = vector.load %arg9[%c0_148, %c0_149, %c320] : memref<5x5x1024xf32, #tpu.memory_space<vmem>>, vector<5x5x64xf32>
    tpu.vector_store %arg9[%c0_148, %c0_149, %c320], %91 {strides = array<i32>} : memref<5x5x1024xf32, #tpu.memory_space<vmem>>, vector<5x5x64xf32>,
    %c1_150 = arith.constant 1 : index
    %c2_151 = arith.constant 2 : index
    %c0_152 = arith.constant 0 : index
    %93 = vector.load %arg8[%c1_150, %c2_151, %c0_152] : memref<8x8x64xf32, #tpu.memory_space<vmem>>, vector<5x5x64xf32>
    %c0_153 = arith.constant 0 : index
    %c0_154 = arith.constant 0 : index
    %c384 = arith.constant 384 : index
    %94 = vector.load %arg9[%c0_153, %c0_154, %c384] : memref<5x5x1024xf32, #tpu.memory_space<vmem>>, vector<5x5x64xf32>
    tpu.vector_store %arg9[%c0_153, %c0_154, %c384], %93 {strides = array<i32>} : memref<5x5x1024xf32, #tpu.memory_space<vmem>>, vector<5x5x64xf32>,
    %c1_155 = arith.constant 1 : index
    %c3_156 = arith.constant 3 : index
    %c0_157 = arith.constant 0 : index
    %95 = vector.load %arg8[%c1_155, %c3_156, %c0_157] : memref<8x8x64xf32, #tpu.memory_space<vmem>>, vector<5x5x64xf32>
    %c0_158 = arith.constant 0 : index
    %c0_159 = arith.constant 0 : index
    %c448 = arith.constant 448 : index
    %96 = vector.load %arg9[%c0_158, %c0_159, %c448] : memref<5x5x1024xf32, #tpu.memory_space<vmem>>, vector<5x5x64xf32>
    tpu.vector_store %arg9[%c0_158, %c0_159, %c448], %95 {strides = array<i32>} : memref<5x5x1024xf32, #tpu.memory_space<vmem>>, vector<5x5x64xf32>,
    %c2_160 = arith.constant 2 : index
    %c0_161 = arith.constant 0 : index
    %c0_162 = arith.constant 0 : index
    %97 = vector.load %arg8[%c2_160, %c0_161, %c0_162] : memref<8x8x64xf32, #tpu.memory_space<vmem>>, vector<5x5x64xf32>
    %c0_163 = arith.constant 0 : index
    %c0_164 = arith.constant 0 : index
    %c512 = arith.constant 512 : index
    %98 = vector.load %arg9[%c0_163, %c0_164, %c512] : memref<5x5x1024xf32, #tpu.memory_space<vmem>>, vector<5x5x64xf32>
    tpu.vector_store %arg9[%c0_163, %c0_164, %c512], %97 {strides = array<i32>} : memref<5x5x1024xf32, #tpu.memory_space<vmem>>, vector<5x5x64xf32>,
    %c2_165 = arith.constant 2 : index
    %c1_166 = arith.constant 1 : index
    %c0_167 = arith.constant 0 : index
    %99 = vector.load %arg8[%c2_165, %c1_166, %c0_167] : memref<8x8x64xf32, #tpu.memory_space<vmem>>, vector<5x5x64xf32>
    %c0_168 = arith.constant 0 : index
    %c0_169 = arith.constant 0 : index
    %c576 = arith.constant 576 : index
    %100 = vector.load %arg9[%c0_168, %c0_169, %c576] : memref<5x5x1024xf32, #tpu.memory_space<vmem>>, vector<5x5x64xf32>
    tpu.vector_store %arg9[%c0_168, %c0_169, %c576], %99 {strides = array<i32>} : memref<5x5x1024xf32, #tpu.memory_space<vmem>>, vector<5x5x64xf32>,
    %c2_170 = arith.constant 2 : index
    %c2_171 = arith.constant 2 : index
    %c0_172 = arith.constant 0 : index
    %101 = vector.load %arg8[%c2_170, %c2_171, %c0_172] : memref<8x8x64xf32, #tpu.memory_space<vmem>>, vector<5x5x64xf32>
    %c0_173 = arith.constant 0 : index
    %c0_174 = arith.constant 0 : index
    %c640 = arith.constant 640 : index
    %102 = vector.load %arg9[%c0_173, %c0_174, %c640] : memref<5x5x1024xf32, #tpu.memory_space<vmem>>, vector<5x5x64xf32>
    tpu.vector_store %arg9[%c0_173, %c0_174, %c640], %101 {strides = array<i32>} : memref<5x5x1024xf32, #tpu.memory_space<vmem>>, vector<5x5x64xf32>,
    %c2_175 = arith.constant 2 : index
    %c3_176 = arith.constant 3 : index
    %c0_177 = arith.constant 0 : index
    %103 = vector.load %arg8[%c2_175, %c3_176, %c0_177] : memref<8x8x64xf32, #tpu.memory_space<vmem>>, vector<5x5x64xf32>
    %c0_178 = arith.constant 0 : index
    %c0_179 = arith.constant 0 : index
    %c704 = arith.constant 704 : index
    %104 = vector.load %arg9[%c0_178, %c0_179, %c704] : memref<5x5x1024xf32, #tpu.memory_space<vmem>>, vector<5x5x64xf32>
    tpu.vector_store %arg9[%c0_178, %c0_179, %c704], %103 {strides = array<i32>} : memref<5x5x1024xf32, #tpu.memory_space<vmem>>, vector<5x5x64xf32>,
    %c3_180 = arith.constant 3 : index
    %c0_181 = arith.constant 0 : index
    %c0_182 = arith.constant 0 : index
    %105 = vector.load %arg8[%c3_180, %c0_181, %c0_182] : memref<8x8x64xf32, #tpu.memory_space<vmem>>, vector<5x5x64xf32>
    %c0_183 = arith.constant 0 : index
    %c0_184 = arith.constant 0 : index
    %c768 = arith.constant 768 : index
    %106 = vector.load %arg9[%c0_183, %c0_184, %c768] : memref<5x5x1024xf32, #tpu.memory_space<vmem>>, vector<5x5x64xf32>
    tpu.vector_store %arg9[%c0_183, %c0_184, %c768], %105 {strides = array<i32>} : memref<5x5x1024xf32, #tpu.memory_space<vmem>>, vector<5x5x64xf32>,
    %c3_185 = arith.constant 3 : index
    %c1_186 = arith.constant 1 : index
    %c0_187 = arith.constant 0 : index
    %107 = vector.load %arg8[%c3_185, %c1_186, %c0_187] : memref<8x8x64xf32, #tpu.memory_space<vmem>>, vector<5x5x64xf32>
    %c0_188 = arith.constant 0 : index
    %c0_189 = arith.constant 0 : index
    %c832 = arith.constant 832 : index
    %108 = vector.load %arg9[%c0_188, %c0_189, %c832] : memref<5x5x1024xf32, #tpu.memory_space<vmem>>, vector<5x5x64xf32>
    tpu.vector_store %arg9[%c0_188, %c0_189, %c832], %107 {strides = array<i32>} : memref<5x5x1024xf32, #tpu.memory_space<vmem>>, vector<5x5x64xf32>,
    %c3_190 = arith.constant 3 : index
    %c2_191 = arith.constant 2 : index
    %c0_192 = arith.constant 0 : index
    %109 = vector.load %arg8[%c3_190, %c2_191, %c0_192] : memref<8x8x64xf32, #tpu.memory_space<vmem>>, vector<5x5x64xf32>
    %c0_193 = arith.constant 0 : index
    %c0_194 = arith.constant 0 : index
    %c896 = arith.constant 896 : index
    %110 = vector.load %arg9[%c0_193, %c0_194, %c896] : memref<5x5x1024xf32, #tpu.memory_space<vmem>>, vector<5x5x64xf32>
    tpu.vector_store %arg9[%c0_193, %c0_194, %c896], %109 {strides = array<i32>} : memref<5x5x1024xf32, #tpu.memory_space<vmem>>, vector<5x5x64xf32>,
    %c3_195 = arith.constant 3 : index
    %c3_196 = arith.constant 3 : index
    %c0_197 = arith.constant 0 : index
    %111 = vector.load %arg8[%c3_195, %c3_196, %c0_197] : memref<8x8x64xf32, #tpu.memory_space<vmem>>, vector<5x5x64xf32>
    %c0_198 = arith.constant 0 : index
    %c0_199 = arith.constant 0 : index
    %c960 = arith.constant 960 : index
    %112 = vector.load %arg9[%c0_198, %c0_199, %c960] : memref<5x5x1024xf32, #tpu.memory_space<vmem>>, vector<5x5x64xf32>
    tpu.vector_store %arg9[%c0_198, %c0_199, %c960], %111 {strides = array<i32>} : memref<5x5x1024xf32, #tpu.memory_space<vmem>>, vector<5x5x64xf32>,
    %c0_200 = arith.constant 0 : index
    %c0_201 = arith.constant 0 : index
    %c0_202 = arith.constant 0 : index
    %113 = vector.load %arg9[%c0_200, %c0_201, %c0_202] : memref<5x5x1024xf32, #tpu.memory_space<vmem>>, vector<5x5x1024xf32>
    %114 = vector.shape_cast %113 : vector<5x5x1024xf32> to vector<25x1024xf32>
    %c0_203 = arith.constant 0 : index
    %c0_204 = arith.constant 0 : index
    %115 = vector.load %arg3[%c0_203, %c0_204] : memref<1024x128xf32, #tpu.memory_space<vmem>>, vector<1024x128xf32>
    %cst_205 = arith.constant dense<0.000000e+00> : vector<25x128xf32>
    %116 = tpu.matmul %114, %115, %cst_205 {dimension_numbers = #tpu.dot_dimension_numbers<[1], [0], [0], [1], [0, 0, 1, 1], [], []>} : vector<25x1024xf32>, vector<1024x128xf32>, vector<25x128xf32> -> vector<25x128xf32>
    %117 = vector.shape_cast %116 : vector<25x128xf32> to vector<5x5x128xf32>
    %c0_206 = arith.constant 0 : index
    %c0_207 = arith.constant 0 : index
    %c0_208 = arith.constant 0 : index
    %c0_209 = arith.constant 0 : index
    %118 = vector.load %arg5[%c0_206, %c0_207, %c0_208, %c0_209] : memref<1x5x5x128xf32, #tpu.memory_space<vmem>>, vector<1x5x5x128xf32>
    %119 = vector.shape_cast %118 : vector<1x5x5x128xf32> to vector<5x5x128xf32>
    %120 = vector.shape_cast %117 : vector<5x5x128xf32> to vector<1x5x5x128xf32>
    tpu.vector_store %arg5[%c0_206, %c0_207, %c0_208, %c0_209], %120 {strides = array<i32>} : memref<1x5x5x128xf32, #tpu.memory_space<vmem>>, vector<1x5x5x128xf32>,
    return
  }
  func.func @transform_0(%arg0: i32) -> (i32, i32, i32, i32) {
    %c0_i32 = arith.constant 0 : i32
    %c0_i32_0 = arith.constant 0 : i32
    %c0_i32_1 = arith.constant 0 : i32
    %c0_i32_2 = arith.constant 0 : i32
    return %arg0, %c0_i32, %c0_i32_0, %c0_i32_1 : i32, i32, i32, i32
  }
  func.func @transform_1(%arg0: i32) -> (i32, i32) {
    %c0_i32 = arith.constant 0 : i32
    %c0_i32_0 = arith.constant 0 : i32
    %c0_i32_1 = arith.constant 0 : i32
    return %c0_i32, %c0_i32_0 : i32, i32
  }
  func.func @transform_2(%arg0: i32) -> (i32, i32) {
    %c0_i32 = arith.constant 0 : i32
    %c0_i32_0 = arith.constant 0 : i32
    %c0_i32_1 = arith.constant 0 : i32
    return %c0_i32, %c0_i32_0 : i32, i32
  }
  func.func @transform_3(%arg0: i32) -> (i32, i32, i32, i32) {
    %c0_i32 = arith.constant 0 : i32
    %c0_i32_0 = arith.constant 0 : i32
    %c0_i32_1 = arith.constant 0 : i32
    %c0_i32_2 = arith.constant 0 : i32
    return %arg0, %c0_i32, %c0_i32_0, %c0_i32_1 : i32, i32, i32, i32
  }
  func.func @transform_4(%arg0: i32) -> (i32, i32, i32, i32) {
    %c0_i32 = arith.constant 0 : i32
    %c0_i32_0 = arith.constant 0 : i32
    %c0_i32_1 = arith.constant 0 : i32
    %c0_i32_2 = arith.constant 0 : i32
    return %arg0, %c0_i32, %c0_i32_0, %c0_i32_1 : i32, i32, i32, i32
  }
}

</mosaic_0001>

<bundles_post_ra>
// kernel: unet_encoder_forward.1
= control target key start
LH: loop header
LB: loop body
LE: loop exit
PB: predicated region body
PF: predicated region fallthrough
CT: control target
= control target key end

     0   :  { %10 = vsyncpa [#allocation7], 0  ;;  %s13545_s15 = smov 0   ;;  %s18556_s0 = inlined_call_operand.vmem [shape: f32[2,16,16,4], index: 0, kind: input, shape index: {}]   ;;  %s18557_s1 = inlined_call_operand.vmem [shape: f32[64,64], index: 1, kind: input, shape index: {}]   ;;  %s18558_s2 = inlined_call_operand.hbm [shape: f32[1024,128], index: 2, kind: input, shape index: {}]   ;;  %s18559_s3 = inlined_call_operand.vmem [shape: f32[2,15,15,64], index: 3, kind: output, shape index: {0}]   ;;  %s18560_s4 = inlined_call_operand.vmem [shape: f32[2,5,5,128], index: 4, kind: output, shape index: {1}]  }
   0x1 LB: > { %s13551_s16 = sadd.s32 4294967295, %s13495_s15   ;;  %p12757_p0 = scmp.ge.s32.totalorder %s13495_s15, 1  ;;  %s13495_s15 = sphi %s13545_s15, %s16_s15  }
   0x2   : > { %p141_p1 = scmp.lt.s32.totalorder %s13495_s15, 3  ;;  %s13497_s17 = smov [#allocation6]  }
   0x3   : > { %s156_s18 = sshll.u32 %s13497_s17, 4  ;;  %p18561_p3 = scmp.eq.s32.totalorder %s13551_s16, 0  ;;  %s157_s18 = int_to_ptr.vmem [resolvable:$true] %s156_s18 }
   0x4   : > { %p13555_p2 = pnand %p12757_p0, %p141_p1  ;;  %s13457_s23 = scalar_lea.hbm %s18558_s2, 16384 }
   0x5   : > { %p13458_p6 = scmp.ne.s32.totalorder %s18558_s2, %s13457_s23  ;;  %p13464_p10 = scmp.lt.u32.totalorder %s13457_s23, %s18558_s2 }
   0x6   : > { %s18614_s19 = scalar_select %p13555_p2, 1, 0 }
   0x7   : > { %p13356_p4 = pneg %p13555_p2 }
   0x9   : > { %p13564_p5 = pnand %p18561_p3, %p13356_p4 }
   0xb   : > { %p13459_p7 = pneg %p13564_p5 }
   0xd   : > { %p13460_p8 = pnand %p13459_p7, %p13458_p6 }
   0xf   : > { %p13461_p9 = pneg %p13460_p8 }
  0x11   : > { %p13466_p11 = pnand %p13464_p10, %p13461_p9 }
  0x13   : > { %13469 = shalt.err (!%p13466_p11)
}
  0x14   : > { %s13470_s28 = scalar_lea.vmem %s157_s18, 16384  ;;  %p13478_p1 = scmp.lt.s32.totalorder %s157_s18, %s157_s18 }
  0x15   : > { %p13471_p12 = scmp.ne.s32.totalorder %s157_s18, %s13470_s28  ;;  %p13479_p4 = scmp.lt.s32.totalorder %s13470_s28, %s13470_s28 }
  0x17   : > { %p13473_p13 = pnand %p13471_p12, %p13459_p7  ;;  %p13480_p3 = por %p13479_p4, %p13478_p1 }
  0x19   : > { %p13474_p0 = pneg %p13473_p13 }
  0x1b   : > { %p13481_p2 = pnand %p13480_p3, %p13474_p0 }
  0x1d   : > { %13484 = shalt.err (!%p13481_p2)
}
  0x1e   : > { %s13498_s29 = smov 128   ;;  %s13499_s30 = smov 8  }
  0x1f   : > { %13359 = dma.hbm_to_vmem [thread:$0]  (!%p13564_p5), %s18558_s2, 16384, %s157_s18, [#allocation7], %s13498_s29, %s13498_s29, %s13499_s30  }
  0x20   : > { %p18616_p6 = scmp.ne.s32.totalorder %s18614_s19, 0 }
  0x22   : > { %180 = sbr.rel (%p18616_p6) target bundleno = 1807 (0x70f), region = 32 }
  0x29   : > { %p18617_p8 = scmp.eq.s32.totalorder %s13551_s16, 0 }
  0x2b   : > { %13490 = dma.done.wait (%p18617_p8), [#allocation7], 16384   ;;  %p18618_p7 = pmov %p18617_p8 }
  0x2c   : > { %vm18563_vm0 = vcmask 31744   ;;  %p211_p2 = scmp.lt.s32.totalorder %s13551_s16, 1  ;;  %v18589_v0 = vmov 0.0   ;;  %vm229_vm1 = vcmask 25600   ;;  %s13501_s11 = smov 4   ;;  %vm378_vm2 = vcmask 30720  }
  0x2d   : > { %13492 = vsyncadd (%p18618_p7), [#allocation7], 4294950912  ;;  %227 = vst.msk [vmem:[#allocation2] sm:$0xff] %vm18563_vm0, %v18589_v0  ;;  %s13502_s12 = smov 8   ;;  %vm558_vm3 = vcmask 64544   ;;  %vm560_vm4 = vcmask 63520  }
  0x2e   : > { %228 = vst.msk [vmem:[#allocation2 + $0x8] sm:$0xff] %vm18563_vm0, %v18589_v0  ;;  %231 = vst.msk [vmem:[#allocation2 + $0x18] sm:$0xff] %vm18563_vm0, %v18589_v0  ;;  %s18981_s16 = smov (!%p211_p2, %s13551_s16), 1  ;;  %s13503_s13 = smov 12   ;;  %vm740_vm5 = vcmask 97344   ;;  %vm742_vm6 = vcmask 96320  }
  0x2f   : > { %232 = vst.msk [vmem:[#allocation2 + $0x20] sm:$0xff] %vm18563_vm0, %v18589_v0  ;;  %234 = vst.msk [vmem:[#allocation2 + $0x30] sm:$0xff] %vm18563_vm0, %v18589_v0  ;;  %s12877_s7 = sshll.u32 %s18981_s16, 8  ;;  %s13504_s14 = smov 16   ;;  %vm18566_vm7 = vmmov 0   ;;  %vm6049_vm8 = vcmask 523264  }
  0x30   : > { %235 = vst.msk [vmem:[#allocation2 + $0x38] sm:$0xff] %vm18563_vm0, %v18589_v0  ;;  %237 = vst.msk [vmem:[#allocation2 + $0x48] sm:$0xff] %vm18563_vm0, %v18589_v0  ;;  %s13708_s10 = scalar_lea.vmem %s18556_s0, %s12877_s7  ;;  %s13505_s17 = smov 24   ;;  %13107 = vmatprep.mubr.msk.f32.mxu0 %vm18566_vm7, %v18589_v0  ;;  %vm18565_vm9 = vcmask 130144   ;;  %vm18564_vm10 = vcmask 129120   ;;  %vm18581_vm11 = vcmask 162944  }
  0x31   : > { %238 = vst.msk [vmem:[#allocation2 + $0x50] sm:$0xff] %vm18563_vm0, %v18589_v0  ;;  %240 = vst.msk [vmem:[#allocation2 + $0x60] sm:$0xff] %vm18563_vm0, %v18589_v0  ;;  %v282_v1 = vld [vmem:[%s13708_s10] sm:$0xff]  ;;  %v284_v2 = vld [vmem:[%s13708_s10 + $0x10] sm:$0xff]  ;;  %s13506_s18 = smov 20   ;;  %s13507_s19 = smov 28  }
  0x32   : > { %241 = vst.msk [vmem:[#allocation2 + $0x68] sm:$0xff] %vm18563_vm0, %v18589_v0  ;;  %243 = vst.msk [vmem:[#allocation2 + $0x78] sm:$0xff] %vm18563_vm0, %v18589_v0  ;;  %v283_v3 = vld [vmem:[%s13708_s10 + $0x8] sm:$0xff]  ;;  %v286_v6 = vld [vmem:[%s13708_s10 + $0x20] sm:$0xff]  ;;  %s13508_s20 = smov 32   ;;  %s13509_s21 = smov 36  }
  0x33   : > { %244 = vst.msk [vmem:[#allocation2 + $0x80] sm:$0xff] %vm18563_vm0, %v18589_v0  ;;  %246 = vst.msk [vmem:[#allocation2 + $0x90] sm:$0xff] %vm18563_vm0, %v18589_v0  ;;  %v285_v7 = vld [vmem:[%s13708_s10 + $0x18] sm:$0xff]  ;;  %v288_v8 = vld [vmem:[%s13708_s10 + $0x30] sm:$0xff]  ;;  %s13510_s22 = smov 40   ;;  %s13511_s23 = smov 44  }
  0x34   : > { %247 = vst.msk [vmem:[#allocation2 + $0x98] sm:$0xff] %vm18563_vm0, %v18589_v0  ;;  %249 = vst.msk [vmem:[#allocation2 + $0xa8] sm:$0xff] %vm18563_vm0, %v18589_v0  ;;  %v287_v9 = vld [vmem:[%s13708_s10 + $0x28] sm:$0xff]  ;;  %v290_v10 = vld [vmem:[%s13708_s10 + $0x40] sm:$0xff]  ;;  %s13512_s24 = smov 48   ;;  %s13513_s25 = smov 52  }
  0x35   : > { %250 = vst.msk [vmem:[#allocation2 + $0xb0] sm:$0xff] %vm18563_vm0, %v18589_v0  ;;  %252 = vst.msk [vmem:[#allocation2 + $0xc0] sm:$0xff] %vm18563_vm0, %v18589_v0  ;;  %v408_v4 = vld [vmem:[#allocation2 + $0x1] sm:$0xff]  ;;  %v409_v5 = vld [vmem:[#allocation2 + $0x9] sm:$0x7f]  ;;  %s13514_s26 = smov 56  }
  0x36   : > { %253 = vst.msk [vmem:[#allocation2 + $0xc8] sm:$0xff] %vm18563_vm0, %v18589_v0  ;;  %255 = vst.msk [vmem:[#allocation2 + $0xd8] sm:$0xff] %vm18563_vm0, %v18589_v0  ;;  %468 = vrot.lane.b32.xlu0 %v408_v4, %s13501_s11  ;;  %v289_v11 = vld [vmem:[%s13708_s10 + $0x38] sm:$0xff]  ;;  %v292_v12 = vld [vmem:[%s13708_s10 + $0x50] sm:$0xff]  ;;  %s13516_s9 = smov 60   ;;  %vm18579_vm12 = vcmask 195744  }
  0x37   : > { %256 = vst.msk [vmem:[#allocation2 + $0xe0] sm:$0xff] %vm18563_vm0, %v18589_v0  ;;  %258 = vst.msk [vmem:[#allocation2 + $0xf0] sm:$0xff] %vm18563_vm0, %v18589_v0  ;;  %v291_v13 = vld [vmem:[%s13708_s10 + $0x48] sm:$0xff]  ;;  %v294_v14 = vld [vmem:[%s13708_s10 + $0x60] sm:$0xff]  ;;  %vm18588_vm13 = vcmask 161920   ;;  %vm18578_vm14 = vcmask 228544  }
  0x38   : > { %259 = vst.msk [vmem:[#allocation2 + $0xf8] sm:$0xff] %vm18563_vm0, %v18589_v0  ;;  %261 = vst.msk [vmem:[#allocation2 + $0x108] sm:$0xff] %vm18563_vm0, %v18589_v0  ;;  %v293_v15 = vld [vmem:[%s13708_s10 + $0x58] sm:$0xff]  ;;  %v296_v16 = vld [vmem:[%s13708_s10 + $0x70] sm:$0xff]  ;;  %vm18570_vm15 = vcmask 261344   ;;  %vm18569_vm7 = vcmask 325920  }
  0x39   : > { %262 = vst.msk [vmem:[#allocation2 + $0x110] sm:$0xff] %vm18563_vm0, %v18589_v0  ;;  %264 = vst.msk [vmem:[#allocation2 + $0x120] sm:$0xff] %vm18563_vm0, %v18589_v0  ;;  %v295_v17 = vld [vmem:[%s13708_s10 + $0x68] sm:$0xff]  ;;  %v298_v18 = vld [vmem:[%s13708_s10 + $0x80] sm:$0xff]  ;;  %s13350_s7 = smul.u32 240, %s18981_s16 }
  0x3a   : > { %265 = vst.msk [vmem:[#allocation2 + $0x128] sm:$0xff] %vm18563_vm0, %v18589_v0  ;;  %267 = vst.msk [vmem:[#allocation2 + $0x138] sm:$0xff] %vm18563_vm0, %v18589_v0  ;;  %470 = vrot.lane.b32.xlu0 %v409_v5, %s13501_s11  ;;  %v297_v19 = vld [vmem:[%s13708_s10 + $0x78] sm:$0xff]  ;;  %v300_v20 = vld [vmem:[%s13708_s10 + $0x90] sm:$0xff] }
  0x3b   : > { %268 = vst.msk [vmem:[#allocation2 + $0x140] sm:$0xff] %vm18563_vm0, %v18589_v0  ;;  %270 = vst.msk [vmem:[#allocation2 + $0x150] sm:$0xff] %vm18563_vm0, %v18589_v0  ;;  %v299_v21 = vld [vmem:[%s13708_s10 + $0x88] sm:$0xff]  ;;  %v302_v22 = vld [vmem:[%s13708_s10 + $0xa0] sm:$0xff] }
  0x3c   : > { %271 = vst.msk [vmem:[#allocation2 + $0x158] sm:$0xff] %vm18563_vm0, %v18589_v0  ;;  %273 = vst.msk [vmem:[#allocation2 + $0x168] sm:$0xff] %vm18563_vm0, %v18589_v0  ;;  %v301_v23 = vld [vmem:[%s13708_s10 + $0x98] sm:$0xff]  ;;  %v304_v24 = vld [vmem:[%s13708_s10 + $0xb0] sm:$0xff] }
  0x3d   : > { %274 = vst.msk [vmem:[#allocation2 + $0x170] sm:$0xff] %vm18563_vm0, %v18589_v0  ;;  %276 = vst.msk [vmem:[#allocation2 + $0x180] sm:$0xff] %vm18563_vm0, %v18589_v0  ;;  %v303_v27 = vld [vmem:[%s13708_s10 + $0xa8] sm:$0xff]  ;;  %v306_v28 = vld [vmem:[%s13708_s10 + $0xc0] sm:$0xff] }
  0x3e   : > { %277 = vst.msk [vmem:[#allocation2 + $0x188] sm:$0xff] %vm18563_vm0, %v18589_v0  ;;  %279 = vst.msk [vmem:[#allocation2 + $0x198] sm:$0xff] %vm18563_vm0, %v18589_v0  ;;  %v305_v33 = vld [vmem:[%s13708_s10 + $0xb8] sm:$0xff]  ;;  %v308_v34 = vld [vmem:[%s13708_s10 + $0xd0] sm:$0xff] }
  0x3f   : > { %280 = vst.msk [vmem:[#allocation2 + $0x1a0] sm:$0xff] %vm18563_vm0, %v18589_v0  ;;  %315 = vst.msk [vmem:[#allocation2 + $0x19] sm:$0xff] %vm18563_vm0, %v282_v1  ;;  %v307_v35 = vld [vmem:[%s13708_s10 + $0xc8] sm:$0xff]  ;;  %v309_v37 = vld [vmem:[%s13708_s10 + $0xd8] sm:$0xff] }
  0x40   : > { %233 = vst.msk [vmem:[#allocation2 + $0x28] sm:$0x3] %vm229_vm1, %v18589_v0  ;;  %230 = vst.msk [vmem:[#allocation2 + $0x10] sm:$0x3] %vm229_vm1, %v18589_v0  ;;  %v347_v43 = vld [vmem:[#allocation2] sm:$0xff] }
  0x41   : > { %236 = vst.msk [vmem:[#allocation2 + $0x40] sm:$0x3] %vm229_vm1, %v18589_v0  ;;  %239 = vst.msk [vmem:[#allocation2 + $0x58] sm:$0x3] %vm229_vm1, %v18589_v0  ;;  %v348_v44 = vld [vmem:[#allocation2 + $0x8] sm:$0x7f] }
  0x42   : > { %242 = vst.msk [vmem:[#allocation2 + $0x70] sm:$0x3] %vm229_vm1, %v18589_v0  ;;  %245 = vst.msk [vmem:[#allocation2 + $0x88] sm:$0x3] %vm229_vm1, %v18589_v0 }
  0x43   : > { %248 = vst.msk [vmem:[#allocation2 + $0xa0] sm:$0x3] %vm229_vm1, %v18589_v0  ;;  %251 = vst.msk [vmem:[#allocation2 + $0xb8] sm:$0x3] %vm229_vm1, %v18589_v0 }
  0x44   : > { %254 = vst.msk [vmem:[#allocation2 + $0xd0] sm:$0x3] %vm229_vm1, %v18589_v0  ;;  %257 = vst.msk [vmem:[#allocation2 + $0xe8] sm:$0x3] %vm229_vm1, %v18589_v0 }
  0x45   : > { %260 = vst.msk [vmem:[#allocation2 + $0x100] sm:$0x3] %vm229_vm1, %v18589_v0  ;;  %263 = vst.msk [vmem:[#allocation2 + $0x118] sm:$0x3] %vm229_vm1, %v18589_v0 }
  0x46   : > { %266 = vst.msk [vmem:[#allocation2 + $0x130] sm:$0x3] %vm229_vm1, %v18589_v0  ;;  %269 = vst.msk [vmem:[#allocation2 + $0x148] sm:$0x3] %vm229_vm1, %v18589_v0  ;;  %v13753_v25 = vld [vmem:[#allocation2 + $0x19] sm:$0xff] }
  0x47   : > { %272 = vst.msk [vmem:[#allocation2 + $0x160] sm:$0x3] %vm229_vm1, %v18589_v0  ;;  %275 = vst.msk [vmem:[#allocation2 + $0x178] sm:$0x3] %vm229_vm1, %v18589_v0  ;;  %472 = vrot.lane.b32.xlu1 %v13753_v25, %s13501_s11  ;;  %v13794_v46 = vld [vmem:[#allocation2 + $0x18] sm:$0xff] }
  0x48   : > { %278 = vst.msk [vmem:[#allocation2 + $0x190] sm:$0x3] %vm229_vm1, %v18589_v0  ;;  %281 = vst.msk [vmem:[#allocation2 + $0x1a8] sm:$0x3] %vm229_vm1, %v18589_v0  ;;  %vm18605_vm1 = vcmask 194720  }
  0x49   : > { %317 = vst.msk [vmem:[#allocation2 + $0x31] sm:$0xff] %vm18563_vm0, %v284_v2  ;;  %316 = vst.msk [vmem:[#allocation2 + $0x21] sm:$0xff] %vm18563_vm0, %v283_v3 }
  0x4a   : > { %319 = vst.msk [vmem:[#allocation2 + $0x49] sm:$0xff] %vm18563_vm0, %v286_v6  ;;  %318 = vst.msk [vmem:[#allocation2 + $0x39] sm:$0xff] %vm18563_vm0, %v285_v7 }
  0x4b   : > { %321 = vst.msk [vmem:[#allocation2 + $0x61] sm:$0xff] %vm18563_vm0, %v288_v8  ;;  %320 = vst.msk [vmem:[#allocation2 + $0x51] sm:$0xff] %vm18563_vm0, %v287_v9 }
  0x4c   : > { %323 = vst.msk [vmem:[#allocation2 + $0x79] sm:$0xff] %vm18563_vm0, %v290_v10  ;;  %322 = vst.msk [vmem:[#allocation2 + $0x69] sm:$0xff] %vm18563_vm0, %v289_v11 }
  0x4d   : > { %325 = vst.msk [vmem:[#allocation2 + $0x91] sm:$0xff] %vm18563_vm0, %v292_v12  ;;  %324 = vst.msk [vmem:[#allocation2 + $0x81] sm:$0xff] %vm18563_vm0, %v291_v13 }
  0x4e   : > { %327 = vst.msk [vmem:[#allocation2 + $0xa9] sm:$0xff] %vm18563_vm0, %v294_v14  ;;  %326 = vst.msk [vmem:[#allocation2 + $0x99] sm:$0xff] %vm18563_vm0, %v293_v15 }
  0x4f   : > { %329 = vst.msk [vmem:[#allocation2 + $0xc1] sm:$0xff] %vm18563_vm0, %v296_v16  ;;  %328 = vst.msk [vmem:[#allocation2 + $0xb1] sm:$0xff] %vm18563_vm0, %v295_v17 }
  0x50   : > { %331 = vst.msk [vmem:[#allocation2 + $0xd9] sm:$0xff] %vm18563_vm0, %v298_v18  ;;  %330 = vst.msk [vmem:[#allocation2 + $0xc9] sm:$0xff] %vm18563_vm0, %v297_v19  ;;  %v13755_v26 = vld [vmem:[#allocation2 + $0x31] sm:$0xff]  ;;  %v411_v29 = vld [vmem:[#allocation2 + $0x21] sm:$0x7f] }
  0x51   : > { %333 = vst.msk [vmem:[#allocation2 + $0xf1] sm:$0xff] %vm18563_vm0, %v300_v20  ;;  %332 = vst.msk [vmem:[#allocation2 + $0xe1] sm:$0xff] %vm18563_vm0, %v299_v21  ;;  %476 = vrot.lane.b32.xlu0 %v13755_v26, %s13501_s11  ;;  %v13768_v30 = vld [vmem:[#allocation2 + $0x49] sm:$0xff]  ;;  %474 = vrot.lane.b32.xlu1 %v411_v29, %s13501_s11  ;;  %v413_v31 = vld [vmem:[#allocation2 + $0x39] sm:$0x7f] }
  0x52   : > { %335 = vst.msk [vmem:[#allocation2 + $0x109] sm:$0xff] %vm18563_vm0, %v302_v22  ;;  %334 = vst.msk [vmem:[#allocation2 + $0xf9] sm:$0xff] %vm18563_vm0, %v301_v23  ;;  %v13773_v32 = vld [vmem:[#allocation2 + $0x61] sm:$0xff]  ;;  %v415_v36 = vld [vmem:[#allocation2 + $0x51] sm:$0x7f] }
  0x53   : > { %337 = vst.msk [vmem:[#allocation2 + $0x121] sm:$0xff] %vm18563_vm0, %v304_v24  ;;  %336 = vst.msk [vmem:[#allocation2 + $0x111] sm:$0xff] %vm18563_vm0, %v303_v27  ;;  %v418_v38 = vld [vmem:[#allocation2 + $0x79] sm:$0xff]  ;;  %v417_v39 = vld [vmem:[#allocation2 + $0x69] sm:$0x7f] }
  0x54   : > { %339 = vst.msk [vmem:[#allocation2 + $0x139] sm:$0xff] %vm18563_vm0, %v306_v28  ;;  %338 = vst.msk [vmem:[#allocation2 + $0x129] sm:$0xff] %vm18563_vm0, %v305_v33  ;;  %v420_v40 = vld [vmem:[#allocation2 + $0x91] sm:$0xff]  ;;  %v419_v41 = vld [vmem:[#allocation2 + $0x81] sm:$0x7f] }
  0x55   : > { %480 = vrot.lane.b32.xlu0 %v13768_v30, %s13501_s11  ;;  %478 = vrot.lane.b32.xlu1 %v413_v31, %s13501_s11  ;;  %341 = vst.msk [vmem:[#allocation2 + $0x151] sm:$0xff] %vm18563_vm0, %v308_v34  ;;  %340 = vst.msk [vmem:[#allocation2 + $0x141] sm:$0xff] %vm18563_vm0, %v307_v35  ;;  %v422_v42 = vld [vmem:[#allocation2 + $0xa9] sm:$0xff]  ;;  %v421_v45 = vld [vmem:[#allocation2 + $0x99] sm:$0x7f] }
  0x56   : > { %342 = vst.msk [vmem:[#allocation2 + $0x159] sm:$0xff] %vm18563_vm0, %v309_v37  ;;  %377 = vst.msk [vmem:[#allocation3] sm:$0xff] %vm18563_vm0, %v347_v43  ;;  %v13796_v47 = vld [vmem:[#allocation2 + $0x30] sm:$0xff]  ;;  %v424_v48 = vld [vmem:[#allocation2 + $0xc1] sm:$0xff] }
  0x57   : > { %379 = vst.msk [vmem:[#allocation3 + $0x8] sm:$0x7f] %vm378_vm2, %v348_v44  ;;  %v350_v49 = vld [vmem:[#allocation2 + $0x20] sm:$0x7f]  ;;  %v13802_v50 = vld [vmem:[#allocation2 + $0x48] sm:$0xff]  ;;  %v13814_v55 = vld [vmem:[#allocation2 + $0x78] sm:$0xff] }
  0x58   : > { %380 = vst.msk [vmem:[#allocation3 + $0x10] sm:$0xff] %vm18563_vm0, %v13794_v46  ;;  %382 = vst.msk [vmem:[#allocation3 + $0x20] sm:$0xff] %vm18563_vm0, %v13796_v47  ;;  %v352_v51 = vld [vmem:[#allocation2 + $0x38] sm:$0x7f]  ;;  %v13809_v52 = vld [vmem:[#allocation2 + $0x60] sm:$0xff] }
  0x59   : > { %484 = vrot.lane.b32.xlu0 %v13773_v32, %s13501_s11  ;;  %482 = vrot.lane.b32.xlu1 %v415_v36, %s13501_s11  ;;  %381 = vst.msk [vmem:[#allocation3 + $0x18] sm:$0x7f] %vm378_vm2, %v350_v49  ;;  %383 = vst.msk [vmem:[#allocation3 + $0x28] sm:$0x7f] %vm378_vm2, %v352_v51  ;;  %v423_v53 = vld [vmem:[#allocation2 + $0xb1] sm:$0x7f] }
  0x5a   : > { %384 = vst.msk [vmem:[#allocation3 + $0x30] sm:$0xff] %vm18563_vm0, %v13802_v50  ;;  %386 = vst.msk [vmem:[#allocation3 + $0x40] sm:$0xff] %vm18563_vm0, %v13809_v52  ;;  %v354_v54 = vld [vmem:[#allocation2 + $0x50] sm:$0x7f]  ;;  %v426_v56 = vld [vmem:[#allocation2 + $0xd9] sm:$0xff] }
  0x5b   : > { %385 = vst.msk [vmem:[#allocation3 + $0x38] sm:$0x7f] %vm378_vm2, %v354_v54  ;;  %v356_v57 = vld [vmem:[#allocation2 + $0x68] sm:$0x7f]  ;;  %v13819_v58 = vld [vmem:[#allocation2 + $0x90] sm:$0xff]  ;;  %v363_v63 = vld [vmem:[#allocation2 + $0xc0] sm:$0xff] }
  0x5c   : > { %388 = vst.msk [vmem:[#allocation3 + $0x50] sm:$0xff] %vm18563_vm0, %v13814_v55  ;;  %390 = vst.msk [vmem:[#allocation3 + $0x60] sm:$0xff] %vm18563_vm0, %v13819_v58  ;;  %v358_v59 = vld [vmem:[#allocation2 + $0x80] sm:$0x7f]  ;;  %v361_v60 = vld [vmem:[#allocation2 + $0xa8] sm:$0xff] }
  0x5d   : > { %488 = vrot.lane.b32.xlu0 %v418_v38, %s13501_s11  ;;  %486 = vrot.lane.b32.xlu1 %v417_v39, %s13501_s11  ;;  %387 = vst.msk [vmem:[#allocation3 + $0x48] sm:$0x7f] %vm378_vm2, %v356_v57  ;;  %389 = vst.msk [vmem:[#allocation3 + $0x58] sm:$0x7f] %vm378_vm2, %v358_v59  ;;  %v425_v61 = vld [vmem:[#allocation2 + $0xc9] sm:$0x7f] }
  0x5e   : > { %392 = vst.msk [vmem:[#allocation3 + $0x70] sm:$0xff] %vm18563_vm0, %v361_v60  ;;  %v360_v62 = vld [vmem:[#allocation2 + $0x98] sm:$0x7f]  ;;  %394 = vst.msk [vmem:[#allocation3 + $0x80] sm:$0xff] %vm18563_vm0, %v363_v63  ;;  %v362_v2 = vld [vmem:[#allocation2 + $0xb0] sm:$0x7f] }
  0x5f   : > { %v428_v1 = vld [vmem:[#allocation2 + $0xf1] sm:$0xff]  ;;  %391 = vst.msk [vmem:[#allocation3 + $0x68] sm:$0x7f] %vm378_vm2, %v360_v62  ;;  %393 = vst.msk [vmem:[#allocation3 + $0x78] sm:$0x7f] %vm378_vm2, %v362_v2  ;;  %v369_v8 = vld [vmem:[#allocation2 + $0x108] sm:$0xff] }
  0x60   : > { %v365_v3 = vld [vmem:[#allocation2 + $0xd8] sm:$0xff]  ;;  %v364_v4 = vld [vmem:[#allocation2 + $0xc8] sm:$0x7f]  ;;  %v367_v5 = vld [vmem:[#allocation2 + $0xf0] sm:$0xff]  ;;  %400 = vst.msk [vmem:[#allocation3 + $0xb0] sm:$0xff] %vm18563_vm0, %v369_v8 }
  0x61   : > { %492 = vrot.lane.b32.xlu0 %v420_v40, %s13501_s11  ;;  %490 = vrot.lane.b32.xlu1 %v419_v41, %s13501_s11  ;;  %396 = vst.msk [vmem:[#allocation3 + $0x90] sm:$0xff] %vm18563_vm0, %v365_v3  ;;  %v427_v6 = vld [vmem:[#allocation2 + $0xe1] sm:$0x7f]  ;;  %398 = vst.msk [vmem:[#allocation3 + $0xa0] sm:$0xff] %vm18563_vm0, %v367_v5  ;;  %v368_v9 = vld [vmem:[#allocation2 + $0xf8] sm:$0x7f] }
  0x62   : > { %395 = vst.msk [vmem:[#allocation3 + $0x88] sm:$0x7f] %vm378_vm2, %v364_v4  ;;  %v366_v7 = vld [vmem:[#allocation2 + $0xe0] sm:$0x7f]  ;;  %v370_v11 = vld [vmem:[#allocation2 + $0x110] sm:$0x7f] }
  0x63   : > { %397 = vst.msk [vmem:[#allocation3 + $0x98] sm:$0x7f] %vm378_vm2, %v366_v7  ;;  %v371_v10 = vld [vmem:[#allocation2 + $0x120] sm:$0xff]  ;;  %v430_v12 = vld [vmem:[#allocation2 + $0x109] sm:$0xff]  ;;  %399 = vst.msk [vmem:[#allocation3 + $0xa8] sm:$0x7f] %vm378_vm2, %v368_v9 }
  0x64   : > { %402 = vst.msk [vmem:[#allocation3 + $0xc0] sm:$0xff] %vm18563_vm0, %v371_v10  ;;  %v373_v13 = vld [vmem:[#allocation2 + $0x138] sm:$0xff]  ;;  %v372_v14 = vld [vmem:[#allocation2 + $0x128] sm:$0x7f]  ;;  %v375_v15 = vld [vmem:[#allocation2 + $0x150] sm:$0xff] }
  0x65   : > { %496 = vrot.lane.b32.xlu0 %v422_v42, %s13501_s11  ;;  %494 = vrot.lane.b32.xlu1 %v421_v45, %s13501_s11  ;;  %401 = vst.msk [vmem:[#allocation3 + $0xb8] sm:$0x7f] %vm378_vm2, %v370_v11  ;;  %403 = vst.msk [vmem:[#allocation3 + $0xc8] sm:$0x7f] %vm378_vm2, %v372_v14  ;;  %v429_v16 = vld [vmem:[#allocation2 + $0xf9] sm:$0x7f] }
  0x66   : > { %404 = vst.msk [vmem:[#allocation3 + $0xd0] sm:$0xff] %vm18563_vm0, %v373_v13  ;;  %406 = vst.msk [vmem:[#allocation3 + $0xe0] sm:$0xff] %vm18563_vm0, %v375_v15  ;;  %v374_v17 = vld [vmem:[#allocation2 + $0x140] sm:$0x7f]  ;;  %v431_v19 = vld [vmem:[#allocation2 + $0x111] sm:$0x7f] }
  0x67   : > { %v432_v18 = vld [vmem:[#allocation2 + $0x121] sm:$0xff]  ;;  %405 = vst.msk [vmem:[#allocation3 + $0xd8] sm:$0x7f] %vm378_vm2, %v374_v17  ;;  %v376_v20 = vld [vmem:[#allocation2 + $0x158] sm:$0x7f]  ;;  %v13866_v35 = vld [vmem:[#allocation2 + $0x4a] sm:$0xff] }
  0x68   : > { %v434_v21 = vld [vmem:[#allocation2 + $0x139] sm:$0xff]  ;;  %407 = vst.msk [vmem:[#allocation3 + $0xe8] sm:$0x7f] %vm378_vm2, %v376_v20  ;;  %v433_v22 = vld [vmem:[#allocation2 + $0x129] sm:$0x7f]  ;;  %v436_v23 = vld [vmem:[#allocation2 + $0x151] sm:$0xff] }
  0x69   : > { %500 = vrot.lane.b32.xlu0 %v424_v48, %s13501_s11  ;;  %498 = vrot.lane.b32.xlu1 %v423_v53, %s13501_s11  ;;  %v435_v24 = vld [vmem:[#allocation2 + $0x141] sm:$0x7f]  ;;  %v437_v28 = vld [vmem:[#allocation2 + $0x159] sm:$0x7f]  ;;  %v591_v31 = vld [vmem:[#allocation2 + $0xa] sm:$0x7f] }
  0x6a   : > { %v590_v27 = vld [vmem:[#allocation2 + $0x2] sm:$0xff]  ;;  %v13856_v29 = vld [vmem:[#allocation2 + $0x1a] sm:$0xff]  ;;  %v13861_v33 = vld [vmem:[#allocation2 + $0x32] sm:$0xff]  ;;  %10293 = vst.msk [vmem:[#allocation4] sm:$0xff] %vm6049_vm8, %v18589_v0  ;;  %vm18571_vm2 = vcmask 294144   ;;  %vm18587_vm0 = vcmask 392544  }
  0x6b   : > { %v593_v34 = vld [vmem:[#allocation2 + $0x22] sm:$0x7f]  ;;  %v595_v36 = vld [vmem:[#allocation2 + $0x3a] sm:$0x7f]  ;;  %v597_v38 = vld [vmem:[#allocation2 + $0x52] sm:$0x7f] }
  0x6c   : > { %v13871_v37 = vld [vmem:[#allocation2 + $0x62] sm:$0xff]  ;;  %v13876_v39 = vld [vmem:[#allocation2 + $0x7a] sm:$0xff]  ;;  %v599_v40 = vld [vmem:[#allocation2 + $0x6a] sm:$0x7f]  ;;  %10294 = vst.msk [vmem:[#allocation4 + $0x8] sm:$0xff] %vm6049_vm8, %v18589_v0 }
  0x6d   : > { %504 = vrot.lane.b32.xlu0 %v426_v56, %s13501_s11  ;;  %502 = vrot.lane.b32.xlu1 %v425_v61, %s13501_s11  ;;  %v602_v41 = vld [vmem:[#allocation2 + $0x92] sm:$0xff]  ;;  %v601_v42 = vld [vmem:[#allocation2 + $0x82] sm:$0x7f]  ;;  %v604_v43 = vld [vmem:[#allocation2 + $0xaa] sm:$0xff]  ;;  %10295 = vst.msk [vmem:[#allocation4 + $0x10] sm:$0xff] %vm6049_vm8, %v18589_v0 }
  0x6e   : > { %v603_v44 = vld [vmem:[#allocation2 + $0x9a] sm:$0x7f]  ;;  %v606_v45 = vld [vmem:[#allocation2 + $0xc2] sm:$0xff]  ;;  %v605_v48 = vld [vmem:[#allocation2 + $0xb2] sm:$0x7f]  ;;  %10296 = vst.msk [vmem:[#allocation4 + $0x18] sm:$0xff] %vm6049_vm8, %v18589_v0 }
  0x6f   : > { %v608_v49 = vld [vmem:[#allocation2 + $0xda] sm:$0xff]  ;;  %v607_v51 = vld [vmem:[#allocation2 + $0xca] sm:$0x7f]  ;;  %v610_v53 = vld [vmem:[#allocation2 + $0xf2] sm:$0xff]  ;;  %10297 = vst.msk [vmem:[#allocation4 + $0x20] sm:$0xff] %vm6049_vm8, %v18589_v0 }
  0x70   : > { %v609_v54 = vld [vmem:[#allocation2 + $0xe2] sm:$0x7f]  ;;  %v612_v56 = vld [vmem:[#allocation2 + $0x10a] sm:$0xff]  ;;  %v611_v57 = vld [vmem:[#allocation2 + $0xfa] sm:$0x7f]  ;;  %10298 = vst.msk [vmem:[#allocation4 + $0x28] sm:$0xff] %vm6049_vm8, %v18589_v0 }
  0x71   : > { %508 = vrot.lane.b32.xlu0 %v428_v1, %s13501_s11  ;;  %506 = vrot.lane.b32.xlu1 %v427_v6, %s13501_s11  ;;  %v614_v59 = vld [vmem:[#allocation2 + $0x122] sm:$0xff]  ;;  %v613_v60 = vld [vmem:[#allocation2 + $0x112] sm:$0x7f]  ;;  %v616_v61 = vld [vmem:[#allocation2 + $0x13a] sm:$0xff]  ;;  %10299 = vst.msk [vmem:[#allocation4 + $0x30] sm:$0xff] %vm6049_vm8, %v18589_v0 }
  0x72   : > { %v615_v62 = vld [vmem:[#allocation2 + $0x12a] sm:$0x7f]  ;;  %v618_v63 = vld [vmem:[#allocation2 + $0x152] sm:$0xff]  ;;  %v617_v2 = vld [vmem:[#allocation2 + $0x142] sm:$0x7f]  ;;  %10300 = vst.msk [vmem:[#allocation4 + $0x38] sm:$0xff] %vm6049_vm8, %v18589_v0 }
  0x73   : > { %v772_v3 = vld [vmem:[#allocation2 + $0x3] sm:$0xff]  ;;  %v619_v5 = vld [vmem:[#allocation2 + $0x15a] sm:$0x7f]  ;;  %v773_v9 = vld [vmem:[#allocation2 + $0xb] sm:$0x7f] }
  0x74   : > { %v13903_v7 = vld [vmem:[#allocation2 + $0x1b] sm:$0xff]  ;;  %v13910_v11 = vld [vmem:[#allocation2 + $0x33] sm:$0xff]  ;;  %v775_v13 = vld [vmem:[#allocation2 + $0x23] sm:$0x7f] }
  0x75   : > { %512 = vrot.lane.b32.xlu0 %v430_v12, %s13501_s11  ;;  %510 = vrot.lane.b32.xlu1 %v429_v16, %s13501_s11  ;;  %v13917_v15 = vld [vmem:[#allocation2 + $0x4b] sm:$0xff]  ;;  %v777_v17 = vld [vmem:[#allocation2 + $0x3b] sm:$0x7f] }
  0x79   : > { %516 = vrot.lane.b32.xlu0 %v432_v18, %s13501_s11  ;;  %514 = vrot.lane.b32.xlu1 %v431_v19, %s13501_s11  ;;  %v13924_v19 = vld [vmem:[#allocation2 + $0x63] sm:$0xff] }
  0x7d   : > { %520 = vrot.lane.b32.xlu0 %v434_v21, %s13501_s11  ;;  %518 = vrot.lane.b32.xlu1 %v433_v22, %s13501_s11  ;;  %v779_v21 = vld [vmem:[#allocation2 + $0x53] sm:$0x7f] }
  0x81   : > { %524 = vrot.lane.b32.xlu0 %v436_v23, %s13501_s11  ;;  %522 = vrot.lane.b32.xlu1 %v435_v24, %s13501_s11  ;;  %v13931_v23 = vld [vmem:[#allocation2 + $0x7b] sm:$0xff] }
  0x85   : > { %650 = vrot.lane.b32.xlu0 %v590_v27, %s13502_s12  ;;  %526 = vrot.lane.b32.xlu1 %v437_v28, %s13501_s11  ;;  %v781_v27 = vld [vmem:[#allocation2 + $0x6b] sm:$0x7f] }
  0x89   : > { %654 = vrot.lane.b32.xlu0 %v13856_v29, %s13502_s12  ;;  %652 = vrot.lane.b32.xlu1 %v591_v31, %s13502_s12  ;;  %v13938_v31 = vld [vmem:[#allocation2 + $0x93] sm:$0xff] }
  0x8d   : > { %658 = vrot.lane.b32.xlu0 %v13861_v33, %s13502_s12  ;;  %656 = vrot.lane.b32.xlu1 %v593_v34, %s13502_s12 }
  0x91   : > { %662 = vrot.lane.b32.xlu0 %v13866_v35, %s13502_s12  ;;  %660 = vrot.lane.b32.xlu1 %v595_v36, %s13502_s12  ;;  %v783_v36 = vld [vmem:[#allocation2 + $0x83] sm:$0x7f] }
  0x95   : > { %666 = vrot.lane.b32.xlu0 %v13871_v37, %s13502_s12  ;;  %664 = vrot.lane.b32.xlu1 %v597_v38, %s13502_s12 }
  0x99   : > { %670 = vrot.lane.b32.xlu0 %v13876_v39, %s13502_s12  ;;  %668 = vrot.lane.b32.xlu1 %v599_v40, %s13502_s12 }
  0x9d   : > { %674 = vrot.lane.b32.xlu0 %v602_v41, %s13502_s12  ;;  %672 = vrot.lane.b32.xlu1 %v601_v42, %s13502_s12  ;;  %v785_v41 = vld [vmem:[#allocation2 + $0x9b] sm:$0x7f] }
  0xa1   : > { %678 = vrot.lane.b32.xlu0 %v604_v43, %s13502_s12  ;;  %676 = vrot.lane.b32.xlu1 %v603_v44, %s13502_s12 }
  0xa5   : > { %682 = vrot.lane.b32.xlu0 %v606_v45, %s13502_s12  ;;  %680 = vrot.lane.b32.xlu1 %v605_v48, %s13502_s12  ;;  %v955_v45 = vld [vmem:[#allocation2 + $0x20] sm:$0x7f] }
  0xa8   : > { %v469_v1 = vpop.permute.xlu0 %468 }
  0xa9   : > { %686 = vrot.lane.b32.xlu0 %v608_v49, %s13502_s12  ;;  %684 = vrot.lane.b32.xlu1 %v607_v51, %s13502_s12  ;;  %559 = vst.msk [vmem:[#allocation3] sm:$0xff] %vm558_vm3, %v469_v1  ;;  %v1137_v49 = vld [vmem:[#allocation2 + $0x21] sm:$0x7f]  ;;  %v1684_v1 = vld [vmem:[#allocation2 + $0x38] sm:$0x7f] }
  0xac   : > { %v471_v4 = vpop.permute.xlu0 %470 }
  0xad   : > { %690 = vrot.lane.b32.xlu0 %v610_v53, %s13502_s12  ;;  %688 = vrot.lane.b32.xlu1 %v609_v54, %s13502_s12  ;;  %561 = vst.msk [vmem:[#allocation3 + $0x8] sm:$0x7f] %vm560_vm4, %v471_v4 }
  0xb1   : > { %694 = vrot.lane.b32.xlu0 %v612_v56, %s13502_s12  ;;  %692 = vrot.lane.b32.xlu1 %v611_v57, %s13502_s12  ;;  %v1319_v56 = vld [vmem:[#allocation2 + $0x22] sm:$0x7f] }
  0xb5   : > { %698 = vrot.lane.b32.xlu0 %v614_v59, %s13502_s12  ;;  %696 = vrot.lane.b32.xlu1 %v613_v60, %s13502_s12  ;;  %v1501_v59 = vld [vmem:[#allocation2 + $0x23] sm:$0x7f] }
  0xb9   : > { %702 = vrot.lane.b32.xlu0 %v616_v61, %s13502_s12  ;;  %700 = vrot.lane.b32.xlu1 %v615_v62, %s13502_s12  ;;  %v473_v6 = vpop.permute.xlu1 %472 }
  0xba   : > { %562 = vst.msk [vmem:[#allocation3 + $0x10] sm:$0xff] %vm558_vm3, %v473_v6 }
  0xbd   : > { %706 = vrot.lane.b32.xlu0 %v618_v63, %s13502_s12  ;;  %704 = vrot.lane.b32.xlu1 %v617_v2, %s13502_s12  ;;  %v1866_v2 = vld [vmem:[#allocation2 + $0x39] sm:$0x7f] }
  0xc1   : > { %832 = vrot.lane.b32.xlu0 %v772_v3, %s13503_s13  ;;  %708 = vrot.lane.b32.xlu1 %v619_v5, %s13502_s12  ;;  %s14771_s12 = scalar_lea.vmem %s18559_s3, %s13350_s7 }
  0xc3   : > { %v477_v8 = vpop.permute.xlu0 %476  ;;  %v475_v10 = vpop.permute.xlu1 %474 }
  0xc4   : > { %564 = vst.msk [vmem:[#allocation3 + $0x20] sm:$0xff] %vm558_vm3, %v477_v8 }
  0xc5   : > { %836 = vrot.lane.b32.xlu0 %v13903_v7, %s13503_s13  ;;  %563 = vst.msk [vmem:[#allocation3 + $0x18] sm:$0x7f] %vm560_vm4, %v475_v10  ;;  %834 = vrot.lane.b32.xlu1 %v773_v9, %s13503_s13  ;;  %v2230_v9 = vld [vmem:[#allocation2 + $0x3b] sm:$0x7f] }
  0xc7   : > { %v481_v12 = vpop.permute.xlu0 %480  ;;  %v479_v14 = vpop.permute.xlu1 %478 }
  0xc8   : > { %566 = vst.msk [vmem:[#allocation3 + $0x30] sm:$0xff] %vm558_vm3, %v481_v12  ;;  %v957_v12 = vld [vmem:[#allocation2 + $0x38] sm:$0x7f] }
  0xc9   : > { %840 = vrot.lane.b32.xlu0 %v13910_v11, %s13503_s13  ;;  %565 = vst.msk [vmem:[#allocation3 + $0x28] sm:$0x7f] %vm560_vm4, %v479_v14  ;;  %838 = vrot.lane.b32.xlu1 %v775_v13, %s13503_s13  ;;  %v4655_v14 = vld [vmem:[%s18557_s1] sm:$0xff] }
  0xcb   : > { %v485_v16 = vpop.permute.xlu0 %484  ;;  %v483_v18 = vpop.permute.xlu1 %482 }
  0xcc   : > { %568 = vst.msk [vmem:[#allocation3 + $0x40] sm:$0xff] %vm558_vm3, %v485_v16  ;;  %v4656_v16 = vld [vmem:[%s18557_s1 + $0x8] sm:$0xff] }
  0xcd   : > { %844 = vrot.lane.b32.xlu0 %v13917_v15, %s13503_s13  ;;  %567 = vst.msk [vmem:[#allocation3 + $0x38] sm:$0x7f] %vm560_vm4, %v483_v18  ;;  %842 = vrot.lane.b32.xlu1 %v777_v17, %s13503_s13  ;;  %v13195_v17 = vpack.c.bf16 %v4656_v16, %v4655_v14  ;;  %v13515_v18 = vmov 0.0|0.0   ;;  %v2415_v14 = vld [vmem:[#allocation2 + $0x68] sm:$0x7f] }
  0xce   : > { %13194 = vmatprep.subr.bf16.mxu0 %v13515_v18 }
  0xcf   : > { %v489_v20 = vpop.permute.xlu0 %488  ;;  %v487_v22 = vpop.permute.xlu1 %486  ;;  %13196 = vmatpush3.bf16.msra.mxu0 %v13195_v17 }
  0xd0   : > { %570 = vst.msk [vmem:[#allocation3 + $0x50] sm:$0xff] %vm558_vm3, %v489_v20  ;;  %13197 = vmatprep.subr.bf16.mxu0 %v13515_v18 }
  0xd1   : > { %848 = vrot.lane.b32.xlu0 %v13924_v19, %s13503_s13  ;;  %569 = vst.msk [vmem:[#allocation3 + $0x48] sm:$0x7f] %vm560_vm4, %v487_v22  ;;  %846 = vrot.lane.b32.xlu1 %v779_v21, %s13503_s13  ;;  %v2413_v21 = vld [vmem:[#allocation2 + $0x50] sm:$0x7f] }
  0xd3   : > { %v493_v24 = vpop.permute.xlu0 %492  ;;  %v491_v28 = vpop.permute.xlu1 %490 }
  0xd4   : > { %572 = vst.msk [vmem:[#allocation3 + $0x60] sm:$0xff] %vm558_vm3, %v493_v24  ;;  %v4657_v24 = vld [vmem:[%s18557_s1 + $0x10] sm:$0xff] }
  0xd5   : > { %852 = vrot.lane.b32.xlu0 %v13931_v23, %s13503_s13  ;;  %571 = vst.msk [vmem:[#allocation3 + $0x58] sm:$0x7f] %vm560_vm4, %v491_v28  ;;  %850 = vrot.lane.b32.xlu1 %v781_v27, %s13503_s13  ;;  %v4658_v27 = vld [vmem:[%s18557_s1 + $0x18] sm:$0xff] }
  0xd6   : > { %v13198_v28 = vpack.c.bf16 %v4658_v27, %v4657_v24 }
  0xd7   : > { %v497_v34 = vpop.permute.xlu0 %496  ;;  %v495_v38 = vpop.permute.xlu1 %494 }
  0xd8   : > { %574 = vst.msk [vmem:[#allocation3 + $0x70] sm:$0xff] %vm558_vm3, %v497_v34  ;;  %13199 = vmatpush3.bf16.msra.mxu0 %v13198_v28  ;;  %v1688_v28 = vld [vmem:[#allocation2 + $0x68] sm:$0x7f] }
  0xd9   : > { %856 = vrot.lane.b32.xlu0 %v13938_v31, %s13503_s13  ;;  %573 = vst.msk [vmem:[#allocation3 + $0x68] sm:$0x7f] %vm560_vm4, %v495_v38  ;;  %854 = vrot.lane.b32.xlu1 %v783_v36, %s13503_s13  ;;  %v4659_v38 = vld [vmem:[%s18557_s1 + $0x20] sm:$0xff] }
  0xda   : > { %13200 = vmatprep.subr.bf16.mxu0 %v13515_v18 }
  0xdb   : > { %v501_v40 = vpop.permute.xlu0 %500  ;;  %v499_v42 = vpop.permute.xlu1 %498 }
  0xdc   : > { %576 = vst.msk [vmem:[#allocation3 + $0x80] sm:$0xff] %vm558_vm3, %v501_v40  ;;  %v4660_v40 = vld [vmem:[%s18557_s1 + $0x28] sm:$0xff] }
  0xdd   : > { %1014 = vrot.lane.b32.xlu0 %v13794_v46, %s13504_s14  ;;  %575 = vst.msk [vmem:[#allocation3 + $0x78] sm:$0x7f] %vm560_vm4, %v499_v42  ;;  %858 = vrot.lane.b32.xlu1 %v785_v41, %s13503_s13  ;;  %v13201_v41 = vpack.c.bf16 %v4660_v40, %v4659_v38  ;;  %v1139_v42 = vld [vmem:[#allocation2 + $0x39] sm:$0x7f] }
  0xdf   : > { %v505_v43 = vpop.permute.xlu0 %504  ;;  %v503_v44 = vpop.permute.xlu1 %502  ;;  %13202 = vmatpush3.bf16.msra.mxu0 %v13201_v41  ;;  %v14149_v41 = vld [vmem:[#allocation2 + $0x79] sm:$0xff] }
  0xe0   : > { %578 = vst.msk [vmem:[#allocation3 + $0x90] sm:$0xff] %vm558_vm3, %v505_v43  ;;  %13203 = vmatprep.subr.bf16.mxu0 %v13515_v18  ;;  %v1505_v18 = vld [vmem:[#allocation2 + $0x53] sm:$0x7f] }
  0xe1   : > { %1378 = vrot.lane.b32.xlu0 %v13856_v29, %s13505_s17  ;;  %577 = vst.msk [vmem:[#allocation3 + $0x88] sm:$0x7f] %vm560_vm4, %v503_v44  ;;  %1196 = vrot.lane.b32.xlu1 %v13753_v25, %s13506_s18 }
  0xe3   : > { %v509_v48 = vpop.permute.xlu0 %508  ;;  %v507_v46 = vpop.permute.xlu1 %506 }
  0xe4   : > { %580 = vst.msk [vmem:[#allocation3 + $0xa0] sm:$0xff] %vm558_vm3, %v509_v48  ;;  %v4662_v48 = vld [vmem:[%s18557_s1 + $0x38] sm:$0xff] }
  0xe5   : > { %1016 = vrot.lane.b32.xlu0 %v955_v45, %s13504_s14  ;;  %579 = vst.msk [vmem:[#allocation3 + $0x98] sm:$0x7f] %vm560_vm4, %v507_v46  ;;  %1560 = vrot.lane.b32.xlu1 %v13903_v7, %s13507_s19  ;;  %v2048_v7 = vld [vmem:[#allocation2 + $0x3a] sm:$0x7f]  ;;  %v4661_v45 = vld [vmem:[%s18557_s1 + $0x30] sm:$0xff] }
  0xe6   : > { %v13204_v46 = vpack.c.bf16 %v4662_v48, %v4661_v45  ;;  %v2961_v48 = vld [vmem:[#allocation2 + $0x6b] sm:$0x7f] }
  0xe7   : > { %v513_v51 = vpop.permute.xlu0 %512  ;;  %v511_v29 = vpop.permute.xlu1 %510 }
  0xe8   : > { %582 = vst.msk [vmem:[#allocation3 + $0xb0] sm:$0xff] %vm558_vm3, %v513_v51  ;;  %13205 = vmatpush3.bf16.msra.mxu0 %v13204_v46 }
  0xe9   : > { %1198 = vrot.lane.b32.xlu0 %v1137_v49, %s13506_s18  ;;  %581 = vst.msk [vmem:[#allocation3 + $0xa8] sm:$0x7f] %vm560_vm4, %v511_v29  ;;  %1743 = vrot.lane.b32.xlu1 %v13796_v47, %s13508_s20  ;;  %v2595_v49 = vld [vmem:[#allocation2 + $0x51] sm:$0x7f] }
  0xeb   : > { %v517_v53 = vpop.permute.xlu0 %516  ;;  %v515_v25 = vpop.permute.xlu1 %514 }
  0xec   : > { %584 = vst.msk [vmem:[#allocation3 + $0xc0] sm:$0xff] %vm558_vm3, %v517_v53  ;;  %v1321_v53 = vld [vmem:[#allocation2 + $0x3a] sm:$0x7f] }
  0xed   : > { %1018 = vrot.lane.b32.xlu0 %v13796_v47, %s13504_s14  ;;  %583 = vst.msk [vmem:[#allocation3 + $0xb8] sm:$0x7f] %vm560_vm4, %v515_v25  ;;  %1925 = vrot.lane.b32.xlu1 %v13755_v26, %s13509_s21 }
  0xef   : > { %v521_v54 = vpop.permute.xlu0 %520  ;;  %v519_v57 = vpop.permute.xlu1 %518 }
  0xf0   : > { %586 = vst.msk [vmem:[#allocation3 + $0xd0] sm:$0xff] %vm558_vm3, %v521_v54  ;;  %v2777_v54 = vld [vmem:[#allocation2 + $0x52] sm:$0x7f] }
  0xf1   : > { %2107 = vrot.lane.b32.xlu0 %v13861_v33, %s13510_s22  ;;  %585 = vst.msk [vmem:[#allocation3 + $0xc8] sm:$0x7f] %vm560_vm4, %v519_v57  ;;  %1380 = vrot.lane.b32.xlu1 %v1319_v56, %s13505_s17 }
  0xf3   : > { %v525_v47 = vpop.permute.xlu0 %524  ;;  %v523_v60 = vpop.permute.xlu1 %522 }
  0xf4   : > { %588 = vst.msk [vmem:[#allocation3 + $0xe0] sm:$0xff] %vm558_vm3, %v525_v47  ;;  %vm18585_vm3 = vcmask 326944  }
  0xf5   : > { %1562 = vrot.lane.b32.xlu0 %v1501_v59, %s13507_s19  ;;  %587 = vst.msk [vmem:[#allocation3 + $0xd8] sm:$0x7f] %vm560_vm4, %v523_v60  ;;  %1200 = vrot.lane.b32.xlu1 %v13755_v26, %s13506_s18  ;;  %v1503_v59 = vld [vmem:[#allocation2 + $0x3b] sm:$0x7f] }
  0xf7   : > { %v651_v61 = vpop.permute.xlu0 %650  ;;  %v527_v62 = vpop.permute.xlu1 %526 }
  0xf8   : > { %741 = vst.msk [vmem:[#allocation3] sm:$0xff] %vm740_vm5, %v651_v61 }
  0xf9   : > { %1382 = vrot.lane.b32.xlu0 %v13861_v33, %s13505_s17  ;;  %589 = vst.msk [vmem:[#allocation3 + $0xe8] sm:$0x7f] %vm560_vm4, %v527_v62  ;;  %2289 = vrot.lane.b32.xlu1 %v13910_v11, %s13511_s23  ;;  %vm18574_vm4 = vcmask 359744  }
  0xfb   : > { %v655_v63 = vpop.permute.xlu0 %654  ;;  %v653_v26 = vpop.permute.xlu1 %652 }
  0xfc   : > { %744 = vst.msk [vmem:[#allocation3 + $0x10] sm:$0xff] %vm740_vm5, %v655_v63  ;;  %v1686_v63 = vld [vmem:[#allocation2 + $0x50] sm:$0x7f] }
  0xfd   : > { %2472 = vrot.lane.b32.xlu0 %v13802_v50, %s13512_s24  ;;  %743 = vst.msk [vmem:[#allocation3 + $0x8] sm:$0x7f] %vm742_vm6, %v653_v26  ;;  %1745 = vrot.lane.b32.xlu1 %v1684_v1, %s13508_s20  ;;  %v1868_v26 = vld [vmem:[#allocation2 + $0x51] sm:$0x7f] }
  0xff   : > { %v659_v33 = vpop.permute.xlu0 %658  ;;  %v657_v3 = vpop.permute.xlu1 %656 }
 0x100   : > { %746 = vst.msk [vmem:[#allocation3 + $0x20] sm:$0xff] %vm740_vm5, %v659_v33  ;;  %v959_v33 = vld [vmem:[#allocation2 + $0x50] sm:$0x7f] }
 0x101   : > { %1927 = vrot.lane.b32.xlu0 %v1866_v2, %s13509_s21  ;;  %745 = vst.msk [vmem:[#allocation3 + $0x18] sm:$0x7f] %vm742_vm6, %v657_v3  ;;  %1564 = vrot.lane.b32.xlu1 %v13910_v11, %s13507_s19 }
 0x103   : > { %v663_v4 = vpop.permute.xlu0 %662  ;;  %v661_v5 = vpop.permute.xlu1 %660 }
 0x104   : > { %748 = vst.msk [vmem:[#allocation3 + $0x30] sm:$0xff] %vm740_vm5, %v663_v4 }
 0x105   : > { %1747 = vrot.lane.b32.xlu0 %v13802_v50, %s13508_s20  ;;  %747 = vst.msk [vmem:[#allocation3 + $0x28] sm:$0x7f] %vm742_vm6, %v661_v5  ;;  %2654 = vrot.lane.b32.xlu1 %v13768_v30, %s13513_s25  ;;  %v2050_v5 = vld [vmem:[#allocation2 + $0x52] sm:$0x7f] }
 0x107   : > { %v667_v6 = vpop.permute.xlu0 %666  ;;  %v665_v8 = vpop.permute.xlu1 %664 }
 0x108   : > { %750 = vst.msk [vmem:[#allocation3 + $0x40] sm:$0xff] %vm740_vm5, %v667_v6 }
 0x109   : > { %2836 = vrot.lane.b32.xlu0 %v13866_v35, %s13514_s26  ;;  %749 = vst.msk [vmem:[#allocation3 + $0x38] sm:$0x7f] %vm742_vm6, %v665_v8  ;;  %2109 = vrot.lane.b32.xlu1 %v2048_v7, %s13510_s22 }
 0x10b   : > { %v671_v10 = vpop.permute.xlu0 %670  ;;  %v669_v11 = vpop.permute.xlu1 %668 }
 0x10c   : > { %752 = vst.msk [vmem:[#allocation3 + $0x50] sm:$0xff] %vm740_vm5, %v671_v10  ;;  %v1323_v10 = vld [vmem:[#allocation2 + $0x52] sm:$0x7f] }
 0x10d   : > { %2291 = vrot.lane.b32.xlu0 %v2230_v9, %s13511_s23  ;;  %751 = vst.msk [vmem:[#allocation3 + $0x48] sm:$0x7f] %vm742_vm6, %v669_v11  ;;  %1929 = vrot.lane.b32.xlu1 %v13768_v30, %s13509_s21 }
 0x10f   : > { %v675_v13 = vpop.permute.xlu0 %674  ;;  %v673_v20 = vpop.permute.xlu1 %672 }
 0x110   : > { %754 = vst.msk [vmem:[#allocation3 + $0x60] sm:$0xff] %vm740_vm5, %v675_v13 }
 0x111   : > { %1020 = vrot.lane.b32.xlu0 %v957_v12, %s13504_s14  ;;  %753 = vst.msk [vmem:[#allocation3 + $0x58] sm:$0x7f] %vm742_vm6, %v673_v20  ;;  %3018 = vrot.lane.b32.xlu1 %v13917_v15, %s13516_s9  ;;  %v2232_v12 = vld [vmem:[#allocation2 + $0x53] sm:$0x7f] }
 0x113   : > { %v679_v22 = vpop.permute.xlu0 %678  ;;  %v677_v34 = vpop.permute.xlu1 %676 }
 0x114   : > { %756 = vst.msk [vmem:[#allocation3 + $0x70] sm:$0xff] %vm740_vm5, %v679_v22  ;;  %v2597_v22 = vld [vmem:[#allocation2 + $0x69] sm:$0x7f] }
 0x115   : > { %2474 = vrot.lane.b32.xlu0 %v2413_v21, %s13512_s24  ;;  %755 = vst.msk [vmem:[#allocation3 + $0x68] sm:$0x7f] %vm742_vm6, %v677_v34  ;;  %2111 = vrot.lane.b32.xlu1 %v13866_v35, %s13510_s22 }
 0x117   : > { %v683_v36 = vpop.permute.xlu0 %682  ;;  %v681_v43 = vpop.permute.xlu1 %680 }
 0x118   : > { %758 = vst.msk [vmem:[#allocation3 + $0x80] sm:$0xff] %vm740_vm5, %v683_v36  ;;  %v1142_v36 = vld [vmem:[#allocation2 + $0x61] sm:$0xff] }
 0x119   : > { %2293 = vrot.lane.b32.xlu0 %v13917_v15, %s13511_s23  ;;  %757 = vst.msk [vmem:[#allocation3 + $0x78] sm:$0x7f] %vm742_vm6, %v681_v43  ;;  %1202 = vrot.lane.b32.xlu1 %v1139_v42, %s13506_s18  ;;  %v1870_v43 = vld [vmem:[#allocation2 + $0x69] sm:$0x7f] }
 0x11b   : > { %v687_v44 = vpop.permute.xlu0 %686  ;;  %v685_v51 = vpop.permute.xlu1 %684 }
 0x11c   : > { %760 = vst.msk [vmem:[#allocation3 + $0x90] sm:$0xff] %vm740_vm5, %v687_v44 }
 0x11d   : > { %1022 = vrot.lane.b32.xlu0 %v13802_v50, %s13504_s14  ;;  %759 = vst.msk [vmem:[#allocation3 + $0x88] sm:$0x7f] %vm742_vm6, %v685_v51  ;;  %2656 = vrot.lane.b32.xlu1 %v2595_v49, %s13513_s25  ;;  %v2052_v51 = vld [vmem:[#allocation2 + $0x6a] sm:$0x7f] }
 0x11f   : > { %v691_v29 = vpop.permute.xlu0 %690  ;;  %v689_v50 = vpop.permute.xlu1 %688 }
 0x120   : > { %762 = vst.msk [vmem:[#allocation3 + $0xa0] sm:$0xff] %vm740_vm5, %v691_v29 }
 0x121   : > { %2476 = vrot.lane.b32.xlu0 %v13809_v52, %s13512_s24  ;;  %761 = vst.msk [vmem:[#allocation3 + $0x98] sm:$0x7f] %vm742_vm6, %v689_v50  ;;  %1384 = vrot.lane.b32.xlu1 %v1321_v53, %s13505_s17  ;;  %v2234_v53 = vld [vmem:[#allocation2 + $0x6b] sm:$0x7f] }
 0x123   : > { %v695_v25 = vpop.permute.xlu0 %694  ;;  %v693_v56 = vpop.permute.xlu1 %692 }
 0x124   : > { %764 = vst.msk [vmem:[#allocation3 + $0xb0] sm:$0xff] %vm740_vm5, %v695_v25  ;;  %v961_v25 = vld [vmem:[#allocation2 + $0x68] sm:$0x7f] }
 0x125   : > { %1204 = vrot.lane.b32.xlu0 %v13768_v30, %s13506_s18  ;;  %763 = vst.msk [vmem:[#allocation3 + $0xa8] sm:$0x7f] %vm742_vm6, %v693_v56  ;;  %2838 = vrot.lane.b32.xlu1 %v2777_v54, %s13514_s26  ;;  %v2959_v30 = vld [vmem:[#allocation2 + $0x53] sm:$0x7f]  ;;  %v2417_v56 = vld [vmem:[#allocation2 + $0x80] sm:$0x7f] }
 0x127   : > { %v699_v57 = vpop.permute.xlu0 %698  ;;  %v697_v47 = vpop.permute.xlu1 %696 }
 0x128   : > { %766 = vst.msk [vmem:[#allocation3 + $0xc0] sm:$0xff] %vm740_vm5, %v699_v57 }
 0x129   : > { %2658 = vrot.lane.b32.xlu0 %v13773_v32, %s13513_s25  ;;  %765 = vst.msk [vmem:[#allocation3 + $0xb8] sm:$0x7f] %vm742_vm6, %v697_v47  ;;  %1566 = vrot.lane.b32.xlu1 %v1503_v59, %s13507_s19  ;;  %v1143_v47 = vld [vmem:[#allocation2 + $0x69] sm:$0x7f] }
 0x12b   : > { %v703_v60 = vpop.permute.xlu0 %702  ;;  %v701_v61 = vpop.permute.xlu1 %700 }
 0x12c   : > { %768 = vst.msk [vmem:[#allocation3 + $0xd0] sm:$0xff] %vm740_vm5, %v703_v60 }
 0x12d   : > { %1386 = vrot.lane.b32.xlu0 %v13866_v35, %s13505_s17  ;;  %767 = vst.msk [vmem:[#allocation3 + $0xc8] sm:$0x7f] %vm742_vm6, %v701_v61  ;;  %3020 = vrot.lane.b32.xlu1 %v2959_v30, %s13516_s9  ;;  %v1325_v30 = vld [vmem:[#allocation2 + $0x6a] sm:$0x7f] }
 0x12f   : > { %v707_v62 = vpop.permute.xlu0 %706  ;;  %v705_v1 = vpop.permute.xlu1 %704 }
 0x130   : > { %770 = vst.msk [vmem:[#allocation3 + $0xe0] sm:$0xff] %vm740_vm5, %v707_v62  ;;  %vm18583_vm5 = vcmask 227520   ;;  %v2599_v62 = vld [vmem:[#allocation2 + $0x81] sm:$0x7f] }
 0x131   : > { %2840 = vrot.lane.b32.xlu0 %v13871_v37, %s13514_s26  ;;  %769 = vst.msk [vmem:[#allocation3 + $0xd8] sm:$0x7f] %vm742_vm6, %v705_v1  ;;  %1749 = vrot.lane.b32.xlu1 %v1686_v63, %s13508_s20  ;;  %v2781_v1 = vld [vmem:[#allocation2 + $0x82] sm:$0x7f] }
 0x133   : > { %v833_v2 = vpop.permute.xlu0 %832  ;;  %v709_v35 = vpop.permute.xlu1 %708 }
 0x134   : > { %923 = vst.msk [vmem:[#allocation3] sm:$0xff] %vm18565_vm9, %v833_v2  ;;  %v2053_v2 = vld [vmem:[#allocation2 + $0x7a] sm:$0xff] }
 0x135   : > { %1931 = vrot.lane.b32.xlu0 %v1868_v26, %s13509_s21  ;;  %771 = vst.msk [vmem:[#allocation3 + $0xe8] sm:$0x7f] %vm742_vm6, %v709_v35  ;;  %1568 = vrot.lane.b32.xlu1 %v13917_v15, %s13507_s19  ;;  %v1141_v15 = vld [vmem:[#allocation2 + $0x51] sm:$0x7f]  ;;  %vm18582_vm6 = vcmask 260320  }
 0x137   : > { %v837_v3 = vpop.permute.xlu0 %836  ;;  %v835_v4 = vpop.permute.xlu1 %834 }
 0x138   : > { %926 = vst.msk [vmem:[#allocation3 + $0x10] sm:$0xff] %vm18565_vm9, %v837_v3  ;;  %v1507_v3 = vld [vmem:[#allocation2 + $0x6b] sm:$0x7f] }
 0x139   : > { %1024 = vrot.lane.b32.xlu0 %v959_v33, %s13504_s14  ;;  %925 = vst.msk [vmem:[#allocation3 + $0x8] sm:$0x7f] %vm18564_vm10, %v835_v4  ;;  %3022 = vrot.lane.b32.xlu1 %v13924_v19, %s13516_s9 }
 0x13b   : > { %v841_v6 = vpop.permute.xlu0 %840  ;;  %v839_v7 = vpop.permute.xlu1 %838 }
 0x13c   : > { %928 = vst.msk [vmem:[#allocation3 + $0x20] sm:$0xff] %vm18565_vm9, %v841_v6  ;;  %v13518_v6 = vmov 1966171168  }
 0x13d   : > { %2113 = vrot.lane.b32.xlu0 %v2050_v5, %s13510_s22  ;;  %927 = vst.msk [vmem:[#allocation3 + $0x18] sm:$0x7f] %vm18564_vm10, %v839_v7  ;;  %1751 = vrot.lane.b32.xlu1 %v13809_v52, %s13508_s20  ;;  %v3202_v7 = vunpack.c.l.s4 %v13518_v6 }
 0x13f   : > { %v845_v8 = vpop.permute.xlu0 %844  ;;  %v843_v9 = vpop.permute.xlu1 %842 }
 0x140   : > { %930 = vst.msk [vmem:[#allocation3 + $0x30] sm:$0xff] %vm18565_vm9, %v845_v8  ;;  %v3204_v8 = vlaneseq }
 0x141   : > { %1933 = vrot.lane.b32.xlu0 %v13773_v32, %s13509_s21  ;;  %929 = vst.msk [vmem:[#allocation3 + $0x28] sm:$0x7f] %vm18564_vm10, %v843_v9  ;;  %1206 = vrot.lane.b32.xlu1 %v1141_v15, %s13506_s18  ;;  %v2963_v15 = vld [vmem:[#allocation2 + $0x83] sm:$0x7f] }
 0x143   : > { %v849_v11 = vpop.permute.xlu0 %848  ;;  %v847_v13 = vpop.permute.xlu1 %846 }
 0x144   : > { %932 = vst.msk [vmem:[#allocation3 + $0x40] sm:$0xff] %vm18565_vm9, %v849_v11  ;;  %v3203_v11 = vunpack.c.0.s8 %v3202_v7  ;;  %v1327_v7 = vld [vmem:[#allocation2 + $0x82] sm:$0x7f] }
 0x145   : > { %1388 = vrot.lane.b32.xlu0 %v1323_v10, %s13505_s17  ;;  %931 = vst.msk [vmem:[#allocation3 + $0x38] sm:$0x7f] %vm18564_vm10, %v847_v13  ;;  %2295 = vrot.lane.b32.xlu1 %v2232_v12, %s13511_s23  ;;  %v3205_v12 = vshrl.u32 %v3204_v8, 7  ;;  %v1690_v13 = vld [vmem:[#allocation2 + $0x80] sm:$0x7f] }
 0x147   : > { %v853_v16 = vpop.permute.xlu0 %852  ;;  %v851_v32 = vpop.permute.xlu1 %850 }
 0x148   : > { %934 = vst.msk [vmem:[#allocation3 + $0x50] sm:$0xff] %vm18565_vm9, %v853_v16  ;;  %v1872_v16 = vld [vmem:[#allocation2 + $0x81] sm:$0x7f] }
 0x149   : > { %2478 = vrot.lane.b32.xlu0 %v2415_v14, %s13512_s24  ;;  %933 = vst.msk [vmem:[#allocation3 + $0x48] sm:$0x7f] %vm18564_vm10, %v851_v32  ;;  %2115 = vrot.lane.b32.xlu1 %v13871_v37, %s13510_s22  ;;  %v14210_v32 = vsub.s32 %v3203_v11, %v3205_v12  ;;  %v2783_v11 = vld [vmem:[#allocation2 + $0x9a] sm:$0x7f] }
 0x14b   : > { %v857_v17 = vpop.permute.xlu0 %856  ;;  %v855_v20 = vpop.permute.xlu1 %854 }
 0x14c   : > { %936 = vst.msk [vmem:[#allocation3 + $0x60] sm:$0xff] %vm18565_vm9, %v857_v17  ;;  %vm18568_vm9 = vcmask 293120  }
 0x14d   : > { %2297 = vrot.lane.b32.xlu0 %v13924_v19, %s13511_s23  ;;  %935 = vst.msk [vmem:[#allocation3 + $0x58] sm:$0x7f] %vm18564_vm10, %v855_v20  ;;  %1570 = vrot.lane.b32.xlu1 %v1505_v18, %s13507_s19 }
 0x14f   : > { %v1015_v21 = vpop.permute.xlu0 %1014  ;;  %v859_v24 = vpop.permute.xlu1 %858 }
 0x150   : > { %1105 = vst.msk [vmem:[#allocation3] sm:$0xff] %vm18581_vm11, %v1015_v21 }
 0x151   : > { %1026 = vrot.lane.b32.xlu0 %v13809_v52, %s13504_s14  ;;  %937 = vst.msk [vmem:[#allocation3 + $0x68] sm:$0x7f] %vm18564_vm10, %v859_v24  ;;  %2660 = vrot.lane.b32.xlu1 %v2597_v22, %s13513_s25  ;;  %v2779_v52 = vld [vmem:[#allocation2 + $0x6a] sm:$0x7f]  ;;  %vm18575_vm10 = vcmask 425344   ;;  %v14221_v22 = vld [vmem:[#allocation2 + $0x91] sm:$0xff] }
 0x153   : > { %v1379_v27 = vpop.permute.xlu0 %1378  ;;  %v1197_v34 = vpop.permute.xlu1 %1196 }
 0x154   : > { %1287 = vst.msk [vmem:[#allocation3] sm:$0xff] %vm18579_vm12, %v1197_v34  ;;  %v14224_v34 = vld [vmem:[#allocation2 + $0x92] sm:$0xff] }
 0x155   : > { %2480 = vrot.lane.b32.xlu0 %v13814_v55, %s13512_s24  ;;  %1753 = vrot.lane.b32.xlu1 %v1688_v28, %s13508_s20  ;;  %1469 = vst.msk [vmem:[#allocation3] sm:$0xff] %vm18578_vm14, %v1379_v27 }
 0x157   : > { %v1017_v38 = vpop.permute.xlu0 %1016  ;;  %v1561_v40 = vpop.permute.xlu1 %1560 }
 0x158   : > { %1107 = vst.msk [vmem:[#allocation3 + $0x8] sm:$0x7f] %vm18588_vm13, %v1017_v38 }
 0x159   : > { %1208 = vrot.lane.b32.xlu0 %v1142_v36, %s13506_s18  ;;  %1651 = vst.msk [vmem:[#allocation3] sm:$0xff] %vm18570_vm15, %v1561_v40  ;;  %2842 = vrot.lane.b32.xlu1 %v2779_v52, %s13514_s26 }
 0x15b   : > { %v1199_v42 = vpop.permute.xlu0 %1198  ;;  %v1744_v44 = vpop.permute.xlu1 %1743 }
 0x15c   : > { %1289 = vst.msk [vmem:[#allocation3 + $0x8] sm:$0x7f] %vm18605_vm1, %v1199_v42 }
 0x15d   : > { %2662 = vrot.lane.b32.xlu0 %v14149_v41, %s13513_s25  ;;  %1834 = vst.msk [vmem:[#allocation3] sm:$0xff] %vm18571_vm2, %v1744_v44  ;;  %1935 = vrot.lane.b32.xlu1 %v1870_v43, %s13509_s21 }
 0x15f   : > { %v1019_v45 = vpop.permute.xlu0 %1018  ;;  %v1926_v46 = vpop.permute.xlu1 %1925 }
 0x160   : > { %1108 = vst.msk [vmem:[#allocation3 + $0x10] sm:$0xff] %vm18581_vm11, %v1019_v45 }
 0x161   : > { %1390 = vrot.lane.b32.xlu0 %v13871_v37, %s13505_s17  ;;  %2016 = vst.msk [vmem:[#allocation3] sm:$0xff] %vm18585_vm3, %v1926_v46  ;;  %3024 = vrot.lane.b32.xlu1 %v2961_v48, %s13516_s9  ;;  %v2236_v46 = vld [vmem:[#allocation2 + $0x83] sm:$0x7f] }
 0x163   : > { %v2108_v49 = vpop.permute.xlu0 %2107  ;;  %v1381_v29 = vpop.permute.xlu1 %1380 }
 0x164   : > { %2198 = vst.msk [vmem:[#allocation3] sm:$0xff] %vm18574_vm4, %v2108_v49 }
 0x165   : > { %2844 = vrot.lane.b32.xlu0 %v13876_v39, %s13514_s26  ;;  %1471 = vst.msk [vmem:[#allocation3 + $0x8] sm:$0x7f] %vm18583_vm5, %v1381_v29  ;;  %2117 = vrot.lane.b32.xlu1 %v2052_v51, %s13510_s22 }
 0x167   : > { %v1563_v37 = vpop.permute.xlu0 %1562  ;;  %v1201_v50 = vpop.permute.xlu1 %1200 }
 0x168   : > { %1653 = vst.msk [vmem:[#allocation3 + $0x8] sm:$0x7f] %vm18582_vm6, %v1563_v37 }
 0x169   : > { %2299 = vrot.lane.b32.xlu0 %v2234_v53, %s13511_s23  ;;  %1290 = vst.msk [vmem:[#allocation3 + $0x10] sm:$0xff] %vm18579_vm12, %v1201_v50  ;;  %1572 = vrot.lane.b32.xlu1 %v13924_v19, %s13507_s19 }
 0x16b   : > { %v1383_v54 = vpop.permute.xlu0 %1382  ;;  %v2290_v39 = vpop.permute.xlu1 %2289 }
 0x16c   : > { %1472 = vst.msk [vmem:[#allocation3 + $0x10] sm:$0xff] %vm18578_vm14, %v1383_v54 }
 0x16d   : > { %1028 = vrot.lane.b32.xlu0 %v961_v25, %s13504_s14  ;;  %2380 = vst.msk [vmem:[#allocation3] sm:$0xff] %vm18587_vm0, %v2290_v39  ;;  %3026 = vrot.lane.b32.xlu1 %v13931_v23, %s13516_s9 }
 0x16f   : > { %v2473_v57 = vpop.permute.xlu0 %2472  ;;  %v1746_v59 = vpop.permute.xlu1 %1745 }
 0x170   : > { %2563 = vst.msk [vmem:[#allocation3] sm:$0xff] %vm18575_vm10, %v2473_v57 }
 0x171   : > { %2482 = vrot.lane.b32.xlu0 %v2417_v56, %s13512_s24  ;;  %1836 = vst.msk [vmem:[#allocation3 + $0x8] sm:$0x7f] %vm18568_vm9, %v1746_v59  ;;  %1755 = vrot.lane.b32.xlu1 %v13814_v55, %s13508_s20  ;;  %vm18576_vm9 = vcmask 458144   ;;  %v963_v56 = vld [vmem:[#allocation2 + $0x80] sm:$0x7f] }
 0x173   : > { %v1928_v19 = vpop.permute.xlu0 %1927  ;;  %v1565_v60 = vpop.permute.xlu1 %1564 }
 0x174   : > { %2018 = vst.msk [vmem:[#allocation3 + $0x8] sm:$0x7f] %vm18569_vm7, %v1928_v19  ;;  %vm18580_vm7 = vcmask 490944  }
 0x175   : > { %1937 = vrot.lane.b32.xlu0 %v14149_v41, %s13509_s21  ;;  %1654 = vst.msk [vmem:[#allocation3 + $0x10] sm:$0xff] %vm18570_vm15, %v1565_v60  ;;  %1210 = vrot.lane.b32.xlu1 %v1143_v47, %s13506_s18  ;;  %vm18572_vm15 = vcmask 358720  }
 0x177   : > { %v1748_v61 = vpop.permute.xlu0 %1747  ;;  %v2655_v63 = vpop.permute.xlu1 %2654 }
 0x178   : > { %1837 = vst.msk [vmem:[#allocation3 + $0x10] sm:$0xff] %vm18571_vm2, %v1748_v61  ;;  %vm18573_vm2 = vcmask 391520  }
 0x179   : > { %1392 = vrot.lane.b32.xlu0 %v1325_v30, %s13505_s17  ;;  %2745 = vst.msk [vmem:[#allocation3] sm:$0xff] %vm18576_vm9, %v2655_v63  ;;  %2664 = vrot.lane.b32.xlu1 %v2599_v62, %s13513_s25  ;;  %v2419_v30 = vld [vmem:[#allocation2 + $0x98] sm:$0x7f] }
 0x17b   : > { %v2837_v26 = vpop.permute.xlu0 %2836  ;;  %v2110_v35 = vpop.permute.xlu1 %2109 }
 0x17c   : > { %2927 = vst.msk [vmem:[#allocation3] sm:$0xff] %vm18580_vm7, %v2837_v26 }
 0x17d   : > { %2846 = vrot.lane.b32.xlu0 %v2781_v1, %s13514_s26  ;;  %2200 = vst.msk [vmem:[#allocation3 + $0x8] sm:$0x7f] %vm18572_vm15, %v2110_v35  ;;  %2119 = vrot.lane.b32.xlu1 %v2053_v2, %s13510_s22  ;;  %vm3108_vm15 = vcmask 523744   ;;  %v2601_v35 = vld [vmem:[#allocation2 + $0x99] sm:$0x7f] }
 0x17f   : > { %v2292_v33 = vpop.permute.xlu0 %2291  ;;  %v1930_v4 = vpop.permute.xlu1 %1929 }
 0x180   : > { %2382 = vst.msk [vmem:[#allocation3 + $0x8] sm:$0x7f] %vm18573_vm2, %v2292_v33  ;;  %vm2564_vm2 = vcmask 424320  }
 0x181   : > { %2301 = vrot.lane.b32.xlu0 %v13931_v23, %s13511_s23  ;;  %2019 = vst.msk [vmem:[#allocation3 + $0x10] sm:$0xff] %vm18585_vm3, %v1930_v4  ;;  %1574 = vrot.lane.b32.xlu1 %v1507_v3, %s13507_s19 }
 0x183   : > { %v1021_v5 = vpop.permute.xlu0 %1020  ;;  %v3019_v9 = vpop.permute.xlu1 %3018 }
 0x184   : > { %1109 = vst.msk [vmem:[#allocation3 + $0x18] sm:$0x7f] %vm18588_vm13, %v1021_v5 }
 0x185   : > { %1030 = vrot.lane.b32.xlu0 %v13814_v55, %s13504_s14  ;;  %3109 = vst.msk [vmem:[#allocation3] sm:$0xff] %vm3108_vm15, %v3019_v9  ;;  %3028 = vrot.lane.b32.xlu1 %v2963_v15, %s13516_s9 }
 0x187   : > { %v2475_v10 = vpop.permute.xlu0 %2474  ;;  %v2112_v14 = vpop.permute.xlu1 %2111 }
 0x188   : > { %2565 = vst.msk [vmem:[#allocation3 + $0x8] sm:$0x7f] %vm2564_vm2, %v2475_v10 }
 0x189   : > { %2484 = vrot.lane.b32.xlu0 %v13819_v58, %s13512_s24  ;;  %2201 = vst.msk [vmem:[#allocation3 + $0x10] sm:$0xff] %vm18574_vm4, %v2112_v14  ;;  %1757 = vrot.lane.b32.xlu1 %v1690_v13, %s13508_s20  ;;  %vm18586_vm4 = vcmask 457120  }
 0x18b   : > { %v2294_v55 = vpop.permute.xlu0 %2293  ;;  %v1203_v17 = vpop.permute.xlu1 %1202 }
 0x18c   : > { %2383 = vst.msk [vmem:[#allocation3 + $0x10] sm:$0xff] %vm18587_vm0, %v2294_v55  ;;  %v3140_v18 = vld [vmem:[#allocation3] sm:$0xff] }
 0x18d   : > { %1939 = vrot.lane.b32.xlu0 %v1872_v16, %s13509_s21  ;;  %1291 = vst.msk [vmem:[#allocation3 + $0x18] sm:$0x7f] %vm18605_vm1, %v1203_v17  ;;  %v3200_v58 = vcombine.high %v3140_v18, %v3140_v18  ;;  %v3207_v21 = vrot.slane %v3140_v18, %v14210_v32  ;;  %1212 = vrot.lane.b32.xlu1 %v14149_v41, %s13506_s18  ;;  %v2054_v41 = vld [vmem:[#allocation2 + $0x82] sm:$0x7f]  ;;  %v2237_v16 = vld [vmem:[#allocation2 + $0x93] sm:$0xff] }
 0x18f   : > { %v1023_v20 = vpop.permute.xlu0 %1022  ;;  %v3214_v24 = vrot.slane %v3200_v58, %v14210_v32  ;;  %v3215_v27 = vcombine.high %v3207_v21, %v3207_v21  ;;  %v2657_v28 = vpop.permute.xlu1 %2656  ;;  %v3223_v52 = vrot.slane %v3207_v21, %v14210_v32 }
 0x190   : > { %1110 = vst.msk [vmem:[#allocation3 + $0x20] sm:$0xff] %vm18581_vm11, %v1023_v20  ;;  %v1509_v20 = vld [vmem:[#allocation2 + $0x83] sm:$0x7f] }
 0x191   : > { %1394 = vrot.lane.b32.xlu0 %v2053_v2, %s13505_s17  ;;  %2747 = vst.msk [vmem:[#allocation3 + $0x8] sm:$0x7f] %vm18586_vm4, %v2657_v28  ;;  %v3216_v38 = vcombine.high %v3214_v24, %v3214_v24  ;;  %v3237_v40 = vrot.slane %v3215_v27, %v14210_v32  ;;  %2666 = vrot.lane.b32.xlu1 %v14221_v22, %s13513_s25 }
 0x192   : > { %v3230_v42 = vrot.slane %v3214_v24, %v14210_v32 }
 0x193   : > { %v2477_v36 = vpop.permute.xlu0 %2476  ;;  %v3244_v43 = vrot.slane %v3216_v38, %v14210_v32  ;;  %v4663_v44 = vcombine.low %v3223_v52, %v3237_v40  ;;  %v12766_v45 = vcombine.high %v3223_v52, %v3237_v40  ;;  %v1385_v48 = vpop.permute.xlu1 %1384  ;;  %v2965_v52 = vld [vmem:[#allocation2 + $0x9b] sm:$0x7f] }
 0x194   : > { %2566 = vst.msk [vmem:[#allocation3 + $0x10] sm:$0xff] %vm18575_vm10, %v2477_v36  ;;  %vm18577_vm10 = vcmask 489920  }
 0x195   : > { %2848 = vrot.lane.b32.xlu0 %v14224_v34, %s13514_s26  ;;  %1473 = vst.msk [vmem:[#allocation3 + $0x18] sm:$0x7f] %vm18583_vm5, %v1385_v48  ;;  %v4665_v51 = vcombine.low %v3230_v42, %v3244_v43  ;;  %v12767_v29 = vcombine.high %v3230_v42, %v3244_v43  ;;  %v4673_v53 = vrot.slane %v4663_v44, %v14210_v32 }
 0x196   : > { %v4680_v37 = vrot.slane %v12766_v45, %v14210_v32  ;;  %2121 = vrot.lane.b32.xlu1 %v2054_v41, %s13510_s22  ;;  %v14305_v45 = vld [vmem:[#allocation2 + $0xa8] sm:$0xff] }
 0x197   : > { %v1205_v49 = vpop.permute.xlu0 %1204  ;;  %v4687_v50 = vrot.slane %v4665_v51, %v14210_v32  ;;  %v4694_v25 = vrot.slane %v12767_v29, %v14210_v32  ;;  %v2839_v39 = vpop.permute.xlu1 %2838 }
 0x198   : > { %1292 = vst.msk [vmem:[#allocation3 + $0x20] sm:$0xff] %vm18579_vm12, %v1205_v49  ;;  %v4695_v54 = vcombine.low %v4673_v53, %v4680_v37  ;;  %vm18621_vm12 = vcmask 325920   ;;  %v1874_v37 = vld [vmem:[#allocation2 + $0x99] sm:$0x7f] }
 0x199   : > { %2303 = vrot.lane.b32.xlu0 %v2236_v46, %s13511_s23  ;;  %2929 = vst.msk [vmem:[#allocation3 + $0x8] sm:$0x7f] %vm18577_vm10, %v2839_v39  ;;  %v4696_v59 = vcombine.low %v4687_v50, %v4694_v25  ;;  %vm18619_vm10 = vmmov 0  }
 0x19a   : > { %1576 = vrot.lane.b32.xlu1 %v13931_v23, %s13507_s19  ;;  %v4703_v19 = vrot.slane %v4695_v54, %v14210_v32  ;;  %v1691_v23 = vld [vmem:[#allocation2 + $0x90] sm:$0xff] }
 0x19b   : > { %v2659_v57 = vpop.permute.xlu0 %2658  ;;  %v4710_v47 = vrot.slane %v4696_v59, %v14210_v32  ;;  %v1567_v60 = vpop.permute.xlu1 %1566 }
 0x19c   : > { %2748 = vst.msk [vmem:[#allocation3 + $0x10] sm:$0xff] %vm18576_vm9, %v2659_v57  ;;  %vm18584_vm9 = vcmask 522720   ;;  %v965_v57 = vld [vmem:[#allocation2 + $0x98] sm:$0x7f] }
 0x19d   : > { %1032 = vrot.lane.b32.xlu0 %v963_v56, %s13504_s14  ;;  %1655 = vst.msk [vmem:[#allocation3 + $0x18] sm:$0x7f] %vm18582_vm6, %v1567_v60  ;;  %v4711_v62 = vcombine.low %v4703_v19, %v4710_v47  ;;  %v14326_v47 = vld [vmem:[#allocation2 + $0xa9] sm:$0xff] }
 0x19e   : > { %3030 = vrot.lane.b32.xlu1 %v13938_v31, %s13516_s9  ;;  %v1145_v31 = vld [vmem:[#allocation2 + $0x81] sm:$0x7f] }
 0x19f   : > { %v1387_v61 = vpop.permute.xlu0 %1386  ;;  %13108 = vmatmul.mubr.msk.f32.vlgmr.msra.gmra.mrb[0].mxu0 %vm6049_vm8, %v4711_v62  ;;  %v3021_v63 = vpop.permute.xlu1 %3020 }
 0x1a0   : > { %1474 = vst.msk [vmem:[#allocation3 + $0x20] sm:$0xff] %vm18578_vm14, %v1387_v61  ;;  %13110 = vmatprep.mubr.msk.f32.mxu0 %vm18619_vm10, %v18589_v0  ;;  %vm18620_vm14 = vcmask 293120  }
 0x1a1   : > { %2486 = vrot.lane.b32.xlu0 %v2419_v30, %s13512_s24  ;;  %3111 = vst.msk [vmem:[#allocation3 + $0x8] sm:$0x7f] %vm18584_vm9, %v3021_v63  ;;  %v2056_v30 = vld [vmem:[#allocation2 + $0x9a] sm:$0x7f] }
 0x1a2   : > { %1759 = vrot.lane.b32.xlu1 %v1691_v23, %s13508_s20 }
 0x1a3   : > { %v2841_v1 = vpop.permute.xlu0 %2840  ;;  %v1750_v26 = vpop.permute.xlu1 %1749 }
 0x1a4   : > { %2930 = vst.msk [vmem:[#allocation3 + $0x10] sm:$0xff] %vm18580_vm7, %v2841_v1  ;;  %vm18622_vm7 = vcmask 261344   ;;  %v14340_v1 = vld [vmem:[#allocation2 + $0xaa] sm:$0xff] }
 0x1a5   : > { %1941 = vrot.lane.b32.xlu0 %v14221_v22, %s13509_s21  ;;  %1838 = vst.msk [vmem:[#allocation3 + $0x18] sm:$0x7f] %vm18620_vm14, %v1750_v26  ;;  %vm18625_vm14 = vcmask 391520   ;;  %v2238_v26 = vld [vmem:[#allocation2 + $0x9b] sm:$0x7f] }
 0x1a6   : > { %1214 = vrot.lane.b32.xlu1 %v1145_v31, %s13506_s18 }
 0x1a7   : > { %v1932_v2 = vpop.permute.xlu0 %1931  ;;  %v1569_v33 = vpop.permute.xlu1 %1568 }
 0x1a8   : > { %2020 = vst.msk [vmem:[#allocation3 + $0x18] sm:$0x7f] %vm18621_vm12, %v1932_v2  ;;  %v3141_v3 = vld [vmem:[#allocation3 + $0x8] sm:$0x7f]  ;;  %vm18624_vm12 = vcmask 294144  }
 0x1a9   : > { %1034 = vrot.lane.b32.xlu0 %v1691_v23, %s13504_s14  ;;  %1656 = vst.msk [vmem:[#allocation3 + $0x20] sm:$0xff] %vm18622_vm7, %v1569_v33  ;;  %v3249_v5 = vcombine.high %v3141_v3, %v3141_v3  ;;  %v3256_v6 = vrot.slane %v3141_v3, %v14210_v32  ;;  %vm18623_vm7 = vcmask 358720   ;;  %v1147_v23 = vld [vmem:[#allocation2 + $0x99] sm:$0x7f] }
 0x1aa   : > { %2668 = vrot.lane.b32.xlu1 %v2601_v35, %s13513_s25 }
 0x1ab   : > { %v1025_v4 = vpop.permute.xlu0 %1024  ;;  %v3263_v8 = vrot.slane %v3249_v5, %v14210_v32  ;;  %v3264_v15 = vcombine.high %v3256_v6, %v3256_v6  ;;  %v3023_v9 = vpop.permute.xlu1 %3022  ;;  %v3272_v17 = vrot.slane %v3256_v6, %v14210_v32 }
 0x1ac   : > { %1111 = vst.msk [vmem:[#allocation3 + $0x28] sm:$0x7f] %vm18588_vm13, %v1025_v4  ;;  %v1329_v4 = vld [vmem:[#allocation2 + $0x9a] sm:$0x7f] }
 0x1ad   : > { %2123 = vrot.lane.b32.xlu0 %v14224_v34, %s13510_s22  ;;  %3112 = vst.msk [vmem:[#allocation3 + $0x10] sm:$0xff] %vm3108_vm15, %v3023_v9  ;;  %v3265_v12 = vcombine.high %v3263_v8, %v3263_v8  ;;  %v3286_v13 = vrot.slane %v3264_v15, %v14210_v32  ;;  %v3279_v18 = vrot.slane %v3263_v8, %v14210_v32  ;;  %v2421_v9 = vld [vmem:[#allocation2 + $0xb0] sm:$0x7f] }
 0x1ae   : > { %1396 = vrot.lane.b32.xlu1 %v1327_v7, %s13505_s17  ;;  %v14357_v7 = vld [vmem:[#allocation2 + $0xab] sm:$0xff] }
 0x1af   : > { %v2114_v10 = vpop.permute.xlu0 %2113  ;;  %v1752_v14 = vpop.permute.xlu1 %1751  ;;  %v3293_v58 = vrot.slane %v3265_v12, %v14210_v32  ;;  %v4712_v21 = vcombine.low %v3272_v17, %v3286_v13  ;;  %v3295_v38 = vcombine.high %v3279_v18, %v3279_v18 }
 0x1b0   : > { %2202 = vst.msk [vmem:[#allocation3 + $0x18] sm:$0x7f] %vm18623_vm7, %v2114_v10  ;;  %vm18626_vm7 = vcmask 359744  }
 0x1b1   : > { %1216 = vrot.lane.b32.xlu0 %v14221_v22, %s13506_s18  ;;  %1839 = vst.msk [vmem:[#allocation3 + $0x20] sm:$0xff] %vm18624_vm12, %v1752_v14  ;;  %v12768_v22 = vcombine.high %v3272_v17, %v3286_v13  ;;  %v4714_v41 = vcombine.low %v3279_v18, %v3293_v58  ;;  %v4722_v42 = vrot.slane %v4712_v21, %v14210_v32  ;;  %vm18627_vm12 = vcmask 425344   ;;  %v1511_v18 = vld [vmem:[#allocation2 + $0x9b] sm:$0x7f] }
 0x1b2   : > { %2850 = vrot.lane.b32.xlu1 %v2783_v11, %s13514_s26 }
 0x1b3   : > { %v1934_v55 = vpop.permute.xlu0 %1933  ;;  %v1207_v24 = vpop.permute.xlu1 %1206  ;;  %v4729_v43 = vrot.slane %v12768_v22, %v14210_v32  ;;  %v4736_v49 = vrot.slane %v4714_v41, %v14210_v32 }
 0x1b4   : > { %2021 = vst.msk [vmem:[#allocation3 + $0x20] sm:$0xff] %vm18585_vm3, %v1934_v55  ;;  %v14288_v27 = vld [vmem:[#allocation3 + $0x10] sm:$0xff] }
 0x1b5   : > { %2305 = vrot.lane.b32.xlu0 %v2237_v16, %s13511_s23  ;;  %1293 = vst.msk [vmem:[#allocation3 + $0x28] sm:$0x7f] %vm18605_vm1, %v1207_v24  ;;  %v14293_v36 = vrot.slane %v14288_v27, %v14210_v32  ;;  %v4744_v29 = vcombine.low %v4722_v42, %v4729_v43  ;;  %v3297_v35 = vcombine.high %v14288_v27, %v14288_v27 }
 0x1b6   : > { %1578 = vrot.lane.b32.xlu1 %v1509_v20, %s13507_s19 }
 0x1b7   : > { %v1389_v28 = vpop.permute.xlu0 %1388  ;;  %v14301_v40 = vrot.slane %v14293_v36, %v14210_v32  ;;  %v2296_v44 = vpop.permute.xlu1 %2295  ;;  %v4752_v54 = vrot.slane %v4744_v29, %v14210_v32  ;;  %v3312_v33 = vcombine.high %v14293_v36, %v14293_v36  ;;  %v3311_v6 = vrot.slane %v3297_v35, %v14210_v32  ;;  %v1694_v29 = vld [vmem:[#allocation2 + $0xb0] sm:$0x7f] }
 0x1b8   : > { %1475 = vst.msk [vmem:[#allocation3 + $0x28] sm:$0x7f] %vm18583_vm5, %v1389_v28 }
 0x1b9   : > { %1398 = vrot.lane.b32.xlu0 %v14224_v34, %s13505_s17  ;;  %2384 = vst.msk [vmem:[#allocation3 + $0x18] sm:$0x7f] %vm18625_vm14, %v2296_v44  ;;  %v4715_v46 = vcombine.low %v3295_v38, %v14301_v40  ;;  %v1692_v34 = vld [vmem:[#allocation2 + $0x98] sm:$0x7f]  ;;  %vm18628_vm14 = vcmask 293120   ;;  %v3334_v8 = vrot.slane %v3312_v33, %v14210_v32  ;;  %v3313_v11 = vcombine.high %v3311_v6, %v3311_v6 }
 0x1ba   : > { %3032 = vrot.lane.b32.xlu1 %v2965_v52, %s13516_s9  ;;  %v3327_v12 = vrot.slane %v3311_v6, %v14210_v32  ;;  %v3342_v55 = vcombine.high %v14301_v40, %v14301_v40  ;;  %v2603_v52 = vld [vmem:[#allocation2 + $0xb1] sm:$0x7f] }
 0x1bb   : > { %v2479_v48 = vpop.permute.xlu0 %2478  ;;  %v4743_v51 = vrot.slane %v4715_v46, %v14210_v32  ;;  %v2116_v53 = vpop.permute.xlu1 %2115  ;;  %v3344_v13 = vcombine.high %v3334_v8, %v3334_v8  ;;  %v3341_v17 = vrot.slane %v3313_v11, %v14210_v32 }
 0x1bc   : > { %2567 = vst.msk [vmem:[#allocation3 + $0x18] sm:$0x7f] %vm2564_vm2, %v2479_v48  ;;  %v3343_v20 = vcombine.high %v3327_v12, %v3327_v12  ;;  %v4761_v28 = vcombine.low %v3334_v8, %v3342_v55  ;;  %v14383_v48 = vld [vmem:[#allocation2 + $0xc0] sm:$0xff] }
 0x1bd   : > { %2488 = vrot.lane.b32.xlu0 %v14305_v45, %s13512_s24  ;;  %2203 = vst.msk [vmem:[#allocation3 + $0x20] sm:$0xff] %vm18626_vm7, %v2116_v53  ;;  %v4745_v25 = vcombine.low %v4736_v49, %v4743_v51  ;;  %vm18629_vm7 = vcmask 195744   ;;  %v4762_v58 = vcombine.low %v3344_v13, %v3327_v12  ;;  %v3345_v38 = vcombine.high %v3341_v17, %v3341_v17  ;;  %v2967_v12 = vld [vmem:[#allocation2 + $0xb3] sm:$0x7f]  ;;  %v14430_v55 = vld [vmem:[#allocation2 + $0xc2] sm:$0xff] }
 0x1be   : > { %1761 = vrot.lane.b32.xlu1 %v1692_v34, %s13508_s20  ;;  %v4763_v41 = vcombine.low %v3341_v17, %v3343_v20  ;;  %v4771_v51 = vrot.slane %v4761_v28, %v14210_v32 }
 0x1bf   : > { %v2298_v50 = vpop.permute.xlu0 %2297  ;;  %v4759_v39 = vrot.slane %v4745_v25, %v14210_v32  ;;  %v1571_v56 = vpop.permute.xlu1 %1570  ;;  %v4778_v42 = vrot.slane %v4762_v58, %v14210_v32 }
 0x1c0   : > { %2385 = vst.msk [vmem:[#allocation3 + $0x20] sm:$0xff] %vm18587_vm0, %v2298_v50  ;;  %v4785_v53 = vrot.slane %v4763_v41, %v14210_v32 }
 0x1c1   : > { %1943 = vrot.lane.b32.xlu0 %v1874_v37, %s13509_s21  ;;  %1657 = vst.msk [vmem:[#allocation3 + $0x28] sm:$0x7f] %vm18582_vm6, %v1571_v56  ;;  %v4760_v19 = vcombine.low %v4752_v54, %v4759_v39  ;;  %v4793_v50 = vcombine.low %v4771_v51, %v4778_v42  ;;  %v967_v42 = vld [vmem:[#allocation2 + $0xb0] sm:$0x7f] }
 0x1c2   : > { %1580 = vrot.lane.b32.xlu1 %v2237_v16, %s13507_s19 }
 0x1c3   : > { %v1027_v59 = vpop.permute.xlu0 %1026  ;;  %13111 = vmatmul.mubr.msk.f32.gmra.mrb[2].mxu0 %vm6049_vm8, %v4760_v19  ;;  %v2661_v60 = vpop.permute.xlu1 %2660  ;;  %v2785_v19 = vld [vmem:[#allocation2 + $0xb2] sm:$0x7f] }
 0x1c4   : > { %1112 = vst.msk [vmem:[#allocation3 + $0x30] sm:$0xff] %vm18581_vm11, %v1027_v59  ;;  %13113 = vmatprep.mubr.msk.f32.mxu0 %vm18619_vm10, %v18589_v0  ;;  %vm18631_vm11 = vcmask 458144  }
 0x1c5   : > { %1036 = vrot.lane.b32.xlu0 %v965_v57, %s13504_s14  ;;  %2749 = vst.msk [vmem:[#allocation3 + $0x18] sm:$0x7f] %vm18586_vm4, %v2661_v60  ;;  %v4801_v60 = vrot.slane %v4793_v50, %v14210_v32 }
 0x1c6   : > { %2670 = vrot.lane.b32.xlu1 %v14326_v47, %s13513_s25 }
 0x1c7   : > { %v2481_v61 = vpop.permute.xlu0 %2480  ;;  %v1754_v62 = vpop.permute.xlu1 %1753 }
 0x1c8   : > { %2568 = vst.msk [vmem:[#allocation3 + $0x20] sm:$0xff] %vm18627_vm12, %v2481_v61  ;;  %vm18630_vm12 = vcmask 489920  }
 0x1c9   : > { %2125 = vrot.lane.b32.xlu0 %v2056_v30, %s13510_s22  ;;  %1840 = vst.msk [vmem:[#allocation3 + $0x28] sm:$0x7f] %vm18628_vm14, %v1754_v62  ;;  %vm18632_vm14 = vcmask 325920  }
 0x1ca   : > { %1763 = vrot.lane.b32.xlu1 %v14305_v45, %s13508_s20 }
 0x1cb   : > { %v1209_v63 = vpop.permute.xlu0 %1208  ;;  %v2843_v31 = vpop.permute.xlu1 %2842 }
 0x1cc   : > { %1294 = vst.msk [vmem:[#allocation3 + $0x30] sm:$0xff] %vm18629_vm7, %v1209_v63  ;;  %vm18633_vm7 = vcmask 228544  }
 0x1cd   : > { %1218 = vrot.lane.b32.xlu0 %v1147_v23, %s13506_s18  ;;  %2931 = vst.msk [vmem:[#allocation3 + $0x18] sm:$0x7f] %vm18630_vm12, %v2843_v31  ;;  %vm18635_vm12 = vcmask 358720   ;;  %v14403_v23 = vld [vmem:[#allocation2 + $0xc1] sm:$0xff] }
 0x1ce   : > { %2852 = vrot.lane.b32.xlu1 %v14340_v1, %s13514_s26 }
 0x1cf   : > { %v2663_v2 = vpop.permute.xlu0 %2662  ;;  %v1936_v3 = vpop.permute.xlu1 %1935 }
 0x1d0   : > { %2750 = vst.msk [vmem:[#allocation3 + $0x20] sm:$0xff] %vm18631_vm11, %v2663_v2  ;;  %vm18634_vm11 = vcmask 490944  }
 0x1d1   : > { %2307 = vrot.lane.b32.xlu0 %v2238_v26, %s13511_s23  ;;  %2022 = vst.msk [vmem:[#allocation3 + $0x28] sm:$0x7f] %vm18632_vm14, %v1936_v3  ;;  %vm18636_vm14 = vcmask 391520   ;;  %v1876_v3 = vld [vmem:[#allocation2 + $0xb1] sm:$0x7f] }
 0x1d2   : > { %1945 = vrot.lane.b32.xlu1 %v14326_v47, %s13509_s21 }
 0x1d3   : > { %v1391_v5 = vpop.permute.xlu0 %1390  ;;  %v3025_v15 = vpop.permute.xlu1 %3024 }
 0x1d4   : > { %1476 = vst.msk [vmem:[#allocation3 + $0x30] sm:$0xff] %vm18633_vm7, %v1391_v5  ;;  %vm18637_vm7 = vcmask 261344  }
 0x1d5   : > { %1400 = vrot.lane.b32.xlu0 %v1329_v4, %s13505_s17  ;;  %3113 = vst.msk [vmem:[#allocation3 + $0x18] sm:$0x7f] %vm18584_vm9, %v3025_v15 }
 0x1d6   : > { %3034 = vrot.lane.b32.xlu1 %v14357_v7, %s13516_s9 }
 0x1d7   : > { %v2845_v10 = vpop.permute.xlu0 %2844  ;;  %v2118_v14 = vpop.permute.xlu1 %2117 }
 0x1d8   : > { %2932 = vst.msk [vmem:[#allocation3 + $0x20] sm:$0xff] %vm18634_vm11, %v2845_v10  ;;  %vm18638_vm11 = vcmask 294144  }
 0x1d9   : > { %2490 = vrot.lane.b32.xlu0 %v2421_v9, %s13512_s24  ;;  %2204 = vst.msk [vmem:[#allocation3 + $0x28] sm:$0x7f] %vm18635_vm12, %v2118_v14  ;;  %vm18639_vm12 = vcmask 489920  }
 0x1da   : > { %2127 = vrot.lane.b32.xlu1 %v14340_v1, %s13510_s22 }
 0x1db   : > { %v2300_v16 = vpop.permute.xlu0 %2299  ;;  %v1573_v21 = vpop.permute.xlu1 %1572 }
 0x1dc   : > { %2386 = vst.msk [vmem:[#allocation3 + $0x28] sm:$0x7f] %vm18636_vm14, %v2300_v16  ;;  %v3143_v22 = vld [vmem:[#allocation3 + $0x18] sm:$0x7f]  ;;  %vm18640_vm14 = vcmask 359744  }
 0x1dd   : > { %2309 = vrot.lane.b32.xlu0 %v14357_v7, %s13511_s23  ;;  %1658 = vst.msk [vmem:[#allocation3 + $0x30] sm:$0xff] %vm18637_vm7, %v1573_v21  ;;  %v3353_v27 = vrot.slane %v3143_v22, %v14210_v32  ;;  %v3346_v36 = vcombine.high %v3143_v22, %v3143_v22  ;;  %vm18641_vm7 = vcmask 162944  }
 0x1de   : > { %1582 = vrot.lane.b32.xlu1 %v1511_v18, %s13507_s19 }
 0x1df   : > { %v1029_v24 = vpop.permute.xlu0 %1028  ;;  %v3369_v40 = vrot.slane %v3353_v27, %v14210_v32  ;;  %v3361_v43 = vcombine.high %v3353_v27, %v3353_v27  ;;  %v3027_v44 = vpop.permute.xlu1 %3026  ;;  %v3360_v46 = vrot.slane %v3346_v36, %v14210_v32  ;;  %v2240_v27 = vld [vmem:[#allocation2 + $0xb3] sm:$0x7f] }
 0x1e0   : > { %1113 = vst.msk [vmem:[#allocation3 + $0x38] sm:$0x7f] %vm18588_vm13, %v1029_v24 }
 0x1e1   : > { %1038 = vrot.lane.b32.xlu0 %v14305_v45, %s13504_s14  ;;  %3114 = vst.msk [vmem:[#allocation3 + $0x20] sm:$0xff] %vm3108_vm15, %v3027_v44  ;;  %v4764_v49 = vcombine.low %v3345_v38, %v3369_v40  ;;  %v3383_v45 = vrot.slane %v3361_v43, %v14210_v32  ;;  %v3362_v54 = vcombine.high %v3360_v46, %v3360_v46 }
 0x1e2   : > { %2672 = vrot.lane.b32.xlu1 %v2603_v52, %s13513_s25  ;;  %v3376_v57 = vrot.slane %v3360_v46, %v14210_v32  ;;  %v3391_v61 = vcombine.high %v3369_v40, %v3369_v40  ;;  %v14454_v46 = vld [vmem:[#allocation2 + $0xc3] sm:$0xff] }
 0x1e3   : > { %v2483_v34 = vpop.permute.xlu0 %2482  ;;  %v4792_v37 = vrot.slane %v4764_v49, %v14210_v32  ;;  %v1756_v25 = vpop.permute.xlu1 %1755  ;;  %v3393_v59 = vcombine.high %v3383_v45, %v3383_v45  ;;  %v3390_v31 = vrot.slane %v3362_v54, %v14210_v32  ;;  %v2423_v49 = vld [vmem:[#allocation2 + $0xc8] sm:$0x7f] }
 0x1e4   : > { %2569 = vst.msk [vmem:[#allocation3 + $0x28] sm:$0x7f] %vm2564_vm2, %v2483_v34  ;;  %v3392_v35 = vcombine.high %v3376_v57, %v3376_v57  ;;  %v4810_v5 = vcombine.low %v3383_v45, %v3391_v61 }
 0x1e5   : > { %2492 = vrot.lane.b32.xlu0 %v14383_v48, %s13512_s24  ;;  %1841 = vst.msk [vmem:[#allocation3 + $0x30] sm:$0xff] %vm18638_vm11, %v1756_v25  ;;  %v4794_v56 = vcombine.low %v4785_v53, %v4792_v37  ;;  %vm18642_vm11 = vcmask 425344  }
 0x1e6   : > { %1765 = vrot.lane.b32.xlu1 %v1694_v29, %s13508_s20  ;;  %v4812_v10 = vcombine.low %v3390_v31, %v3392_v35  ;;  %v4820_v14 = vrot.slane %v4810_v5, %v14210_v32  ;;  %v2605_v31 = vld [vmem:[#allocation2 + $0xc9] sm:$0x7f] }
 0x1e7   : > { %v1938_v39 = vpop.permute.xlu0 %1937  ;;  %v4808_v30 = vrot.slane %v4794_v56, %v14210_v32  ;;  %v1211_v62 = vpop.permute.xlu1 %1210 }
 0x1e8   : > { %2023 = vst.msk [vmem:[#allocation3 + $0x30] sm:$0xff] %vm18585_vm3, %v1938_v39  ;;  %v3144_v63 = vld [vmem:[#allocation3 + $0x20] sm:$0xff]  ;;  %v4834_v18 = vrot.slane %v4812_v10, %v14210_v32 }
 0x1e9   : > { %1220 = vrot.lane.b32.xlu0 %v14326_v47, %s13506_s18  ;;  %1295 = vst.msk [vmem:[#allocation3 + $0x38] sm:$0x7f] %vm18605_vm1, %v1211_v62  ;;  %v4809_v2 = vcombine.low %v4801_v60, %v4808_v30  ;;  %v3401_v33 = vrot.slane %v3144_v63, %v14210_v32  ;;  %v4811_v47 = vcombine.low %v3393_v59, %v3376_v57  ;;  %v1149_v39 = vld [vmem:[#allocation2 + $0xb1] sm:$0x7f] }
 0x1ea   : > { %2854 = vrot.lane.b32.xlu1 %v2785_v19, %s13514_s26  ;;  %v3394_v21 = vcombine.high %v3144_v63, %v3144_v63  ;;  %v1331_v19 = vld [vmem:[#allocation2 + $0xb2] sm:$0x7f] }
 0x1eb   : > { %v1393_v26 = vpop.permute.xlu0 %1392  ;;  %13114 = vmatmul.mubr.msk.f32.gmra.mrb[4].mxu0 %vm6049_vm8, %v4809_v2  ;;  %v3409_v4 = vcombine.high %v3401_v33, %v3401_v33  ;;  %v2665_v6 = vpop.permute.xlu1 %2664  ;;  %v14417_v15 = vrot.slane %v3401_v33, %v14210_v32  ;;  %v4827_v11 = vrot.slane %v4811_v47, %v14210_v32  ;;  %v2787_v33 = vld [vmem:[#allocation2 + $0xca] sm:$0x7f] }
 0x1ec   : > { %1477 = vst.msk [vmem:[#allocation3 + $0x38] sm:$0x7f] %vm18583_vm5, %v1393_v26  ;;  %13116 = vmatprep.mubr.msk.f32.mxu0 %vm18619_vm10, %v18589_v0  ;;  %v3408_v52 = vrot.slane %v3394_v21, %v14210_v32  ;;  %v1696_v21 = vld [vmem:[#allocation2 + $0xc8] sm:$0x7f] }
 0x1ed   : > { %2674 = vrot.lane.b32.xlu0 %v14403_v23, %s13513_s25  ;;  %2751 = vst.msk [vmem:[#allocation3 + $0x28] sm:$0x7f] %vm18586_vm4, %v2665_v6  ;;  %v14420_v9 = vrot.slane %v3409_v4, %v14210_v32  ;;  %v4842_v58 = vcombine.low %v4820_v14, %v4827_v11 }
 0x1ee   : > { %1947 = vrot.lane.b32.xlu1 %v1876_v3, %s13509_s21  ;;  %v3410_v44 = vcombine.high %v3408_v52, %v3408_v52  ;;  %v3424_v29 = vrot.slane %v3408_v52, %v14210_v32  ;;  %v14522_v52 = vld [vmem:[#allocation2 + $0xd8] sm:$0xff] }
 0x1ef   : > { %v2847_v8 = vpop.permute.xlu0 %2846  ;;  %v4813_v13 = vcombine.low %v14417_v15, %v14420_v9  ;;  %v2120_v16 = vpop.permute.xlu1 %2119  ;;  %v4850_v36 = vrot.slane %v4842_v58, %v14210_v32  ;;  %v12769_v57 = vcombine.high %v14417_v15, %v14420_v9  ;;  %v1513_v9 = vld [vmem:[#allocation2 + $0xb3] sm:$0x7f] }
 0x1f0   : > { %2933 = vst.msk [vmem:[#allocation3 + $0x28] sm:$0x7f] %vm18639_vm12, %v2847_v8  ;;  %vm18643_vm12 = vcmask 293120   ;;  %v3438_v45 = vrot.slane %v3410_v44, %v14210_v32 }
 0x1f1   : > { %1402 = vrot.lane.b32.xlu0 %v14340_v1, %s13505_s17  ;;  %2205 = vst.msk [vmem:[#allocation3 + $0x30] sm:$0xff] %vm18640_vm14, %v2120_v16  ;;  %v4841_v20 = vrot.slane %v4813_v13, %v14210_v32  ;;  %v2058_v1 = vld [vmem:[#allocation2 + $0xb2] sm:$0x7f]  ;;  %vm18644_vm14 = vcmask 325920   ;;  %v4869_v2 = vrot.slane %v12769_v57, %v14210_v32 }
 0x1f2   : > { %3036 = vrot.lane.b32.xlu1 %v2967_v12, %s13516_s9  ;;  %v4860_v54 = vcombine.low %v3424_v29, %v3438_v45  ;;  %v12770_v62 = vcombine.high %v3424_v29, %v3438_v45  ;;  %v1878_v29 = vld [vmem:[#allocation2 + $0xc9] sm:$0x7f] }
 0x1f3   : > { %v2302_v17 = vpop.permute.xlu0 %2301  ;;  %v4843_v22 = vcombine.low %v4834_v18, %v4841_v20  ;;  %v1575_v24 = vpop.permute.xlu1 %1574 }
 0x1f4   : > { %2387 = vst.msk [vmem:[#allocation3 + $0x30] sm:$0xff] %vm18587_vm0, %v2302_v17  ;;  %v4876_v63 = vrot.slane %v4860_v54, %v14210_v32  ;;  %v4883_v3 = vrot.slane %v12770_v62, %v14210_v32  ;;  %v2969_v17 = vld [vmem:[#allocation2 + $0xcb] sm:$0x7f] }
 0x1f5   : > { %2856 = vrot.lane.b32.xlu0 %v14430_v55, %s13514_s26  ;;  %1659 = vst.msk [vmem:[#allocation3 + $0x38] sm:$0x7f] %vm18582_vm6, %v1575_v24  ;;  %v4857_v38 = vrot.slane %v4843_v22, %v14210_v32 }
 0x1f6   : > { %2129 = vrot.lane.b32.xlu1 %v2058_v1, %s13510_s22  ;;  %v4891_v5 = vcombine.low %v4869_v2, %v4876_v63 }
 0x1f7   : > { %v1031_v28 = vpop.permute.xlu0 %1030  ;;  %v4858_v40 = vcombine.low %v4850_v36, %v4857_v38  ;;  %v3029_v41 = vpop.permute.xlu1 %3028 }
 0x1f8   : > { %1114 = vst.msk [vmem:[#allocation3 + $0x40] sm:$0xff] %vm18641_vm7, %v1031_v28  ;;  %vm18645_vm7 = vcmask 195744   ;;  %v4899_v11 = vrot.slane %v4891_v5, %v14210_v32 }
 0x1f9   : > { %2311 = vrot.lane.b32.xlu0 %v2240_v27, %s13511_s23  ;;  %3115 = vst.msk [vmem:[#allocation3 + $0x28] sm:$0x7f] %vm18584_vm9, %v3029_v41  ;;  %13117 = vmatmul.mubr.msk.f32.gmra.mrb[6].mxu0 %vm6049_vm8, %v4858_v40 }
 0x1fa   : > { %1584 = vrot.lane.b32.xlu1 %v14357_v7, %s13507_s19  ;;  %13119 = vmatprep.mubr.msk.f32.mxu0 %vm18619_vm10, %v18589_v0 }
 0x1fb   : > { %v2485_v43 = vpop.permute.xlu0 %2484  ;;  %v1758_v34 = vpop.permute.xlu1 %1757 }
 0x1fc   : > { %2570 = vst.msk [vmem:[#allocation3 + $0x30] sm:$0xff] %vm18642_vm11, %v2485_v43  ;;  %vm18646_vm11 = vcmask 228544  }
 0x1fd   : > { %1040 = vrot.lane.b32.xlu0 %v967_v42, %s13504_s14  ;;  %1842 = vst.msk [vmem:[#allocation3 + $0x38] sm:$0x7f] %vm18643_vm12, %v1758_v34  ;;  %vm18647_vm12 = vcmask 458144   ;;  %v14527_v34 = vld [vmem:[#allocation2 + $0xd9] sm:$0xff] }
 0x1fe   : > { %3038 = vrot.lane.b32.xlu1 %v14454_v46, %s13516_s9 }
 0x1ff   : > { %v1940_v51 = vpop.permute.xlu0 %1939  ;;  %v1213_v53 = vpop.permute.xlu1 %1212 }
 0x200   : > { %2024 = vst.msk [vmem:[#allocation3 + $0x38] sm:$0x7f] %vm18644_vm14, %v1940_v51  ;;  %v3145_v37 = vld [vmem:[#allocation3 + $0x28] sm:$0x7f]  ;;  %vm18648_vm14 = vcmask 490944  }
 0x201   : > { %2494 = vrot.lane.b32.xlu0 %v2423_v49, %s13512_s24  ;;  %1296 = vst.msk [vmem:[#allocation3 + $0x40] sm:$0xff] %vm18645_vm7, %v1213_v53  ;;  %v3450_v25 = vrot.slane %v3145_v37, %v14210_v32  ;;  %vm18649_vm7 = vcmask 358720   ;;  %v3443_v6 = vcombine.high %v3145_v37, %v3145_v37 }
 0x202   : > { %1767 = vrot.lane.b32.xlu1 %v14383_v48, %s13508_s20 }
 0x203   : > { %v1395_v50 = vpop.permute.xlu0 %1394  ;;  %v3458_v56 = vcombine.high %v3450_v25, %v3450_v25  ;;  %v2667_v59 = vpop.permute.xlu1 %2666  ;;  %v14474_v30 = vrot.slane %v3450_v25, %v14210_v32  ;;  %v3457_v13 = vrot.slane %v3443_v6, %v14210_v32  ;;  %v2060_v25 = vld [vmem:[#allocation2 + $0xca] sm:$0x7f] }
 0x204   : > { %1478 = vst.msk [vmem:[#allocation3 + $0x40] sm:$0xff] %vm18646_vm11, %v1395_v50  ;;  %vm18650_vm11 = vcmask 391520  }
 0x205   : > { %1949 = vrot.lane.b32.xlu0 %v14403_v23, %s13509_s21  ;;  %2752 = vst.msk [vmem:[#allocation3 + $0x30] sm:$0xff] %vm18647_vm12, %v2667_v59  ;;  %v14477_v61 = vrot.slane %v3458_v56, %v14210_v32  ;;  %vm18651_vm12 = vcmask 261344   ;;  %v3459_v20 = vcombine.high %v3457_v13, %v3457_v13 }
 0x206   : > { %1222 = vrot.lane.b32.xlu1 %v1149_v39, %s13506_s18 }
 0x207   : > { %v2849_v60 = vpop.permute.xlu0 %2848  ;;  %v4862_v26 = vcombine.low %v14474_v30, %v14477_v61  ;;  %v3487_v22 = vrot.slane %v3459_v20, %v14210_v32  ;;  %v12771_v43 = vcombine.high %v14474_v30, %v14477_v61 }
 0x208   : > { %2934 = vst.msk [vmem:[#allocation3 + $0x30] sm:$0xff] %vm18648_vm14, %v2849_v60  ;;  %v2122_v35 = vpop.permute.xlu1 %2121  ;;  %vm18652_vm14 = vcmask 294144   ;;  %v787_v60 = vld [vmem:[#allocation2 + $0xb3] sm:$0x7f] }
 0x209   : > { %1404 = vrot.lane.b32.xlu0 %v1331_v19, %s13505_s17  ;;  %2206 = vst.msk [vmem:[#allocation3 + $0x38] sm:$0x7f] %vm18649_vm7, %v2122_v35  ;;  %v4890_v4 = vrot.slane %v4862_v26, %v14210_v32  ;;  %vm18653_vm7 = vcmask 162944   ;;  %v4918_v37 = vrot.slane %v12771_v43, %v14210_v32  ;;  %v14554_v26 = vld [vmem:[#allocation2 + $0xda] sm:$0xff]  ;;  %v2242_v35 = vld [vmem:[#allocation2 + $0xcb] sm:$0x7f] }
 0x20a   : > { %2676 = vrot.lane.b32.xlu1 %v2605_v31, %s13513_s25  ;;  %v2607_v43 = vld [vmem:[#allocation2 + $0xe1] sm:$0x7f] }
 0x20b   : > { %v2304_v47 = vpop.permute.xlu0 %2303  ;;  %v4892_v8 = vcombine.low %v4883_v3, %v4890_v4  ;;  %v969_v3 = vld [vmem:[#allocation2 + $0xc8] sm:$0x7f] }
 0x20c   : > { %2388 = vst.msk [vmem:[#allocation3 + $0x38] sm:$0x7f] %vm18650_vm11, %v2304_v47  ;;  %v1577_v15 = vpop.permute.xlu1 %1576  ;;  %vm18654_vm11 = vcmask 359744  }
 0x20d   : > { %2858 = vrot.lane.b32.xlu0 %v2787_v33, %s13514_s26  ;;  %1660 = vst.msk [vmem:[#allocation3 + $0x40] sm:$0xff] %vm18651_vm12, %v1577_v15  ;;  %v4906_v12 = vrot.slane %v4892_v8, %v14210_v32  ;;  %vm18655_vm12 = vcmask 195744   ;;  %v14571_v8 = vld [vmem:[#allocation2 + $0xdb] sm:$0xff] }
 0x20e   : > { %2131 = vrot.lane.b32.xlu1 %v14430_v55, %s13510_s22 }
 0x20f   : > { %v1033_v10 = vpop.permute.xlu0 %1032  ;;  %v4907_v14 = vcombine.low %v4899_v11, %v4906_v12 }
 0x210   : > { %1115 = vst.msk [vmem:[#allocation3 + $0x48] sm:$0x7f] %vm18588_vm13, %v1033_v10  ;;  %v3031_v16 = vpop.permute.xlu1 %3030 }
 0x211   : > { %1586 = vrot.lane.b32.xlu0 %v1513_v9, %s13507_s19  ;;  %3116 = vst.msk [vmem:[#allocation3 + $0x30] sm:$0xff] %vm3108_vm15, %v3031_v16  ;;  %13120 = vmatmul.mubr.msk.f32.gmra.mrb[8].mxu0 %vm6049_vm8, %v4907_v14  ;;  %v2425_v9 = vld [vmem:[#allocation2 + $0xe0] sm:$0x7f] }
 0x212   : > { %860 = vrot.lane.b32.xlu1 %v14357_v7, %s13503_s13  ;;  %13122 = vmatprep.mubr.msk.f32.mxu0 %vm18619_vm10, %v18589_v0  ;;  %v3473_v7 = vrot.slane %v3457_v13, %v14210_v32 }
 0x213   : > { %v2487_v18 = vpop.permute.xlu0 %2486 }
 0x214   : > { %2571 = vst.msk [vmem:[#allocation3 + $0x38] sm:$0x7f] %vm2564_vm2, %v2487_v18  ;;  %v1760_v58 = vpop.permute.xlu1 %1759  ;;  %v4909_v38 = vcombine.low %v3473_v7, %v3487_v22  ;;  %v3489_v40 = vcombine.high %v3473_v7, %v3473_v7 }
 0x215   : > { %3040 = vrot.lane.b32.xlu0 %v2969_v17, %s13516_s9  ;;  %1843 = vst.msk [vmem:[#allocation3 + $0x40] sm:$0xff] %vm18652_vm14, %v1760_v58  ;;  %vm18656_vm14 = vcmask 489920  }
 0x216   : > { %2313 = vrot.lane.b32.xlu1 %v14454_v46, %s13511_s23  ;;  %v4925_v45 = vrot.slane %v4909_v38, %v14210_v32 }
 0x217   : > { %v1942_v1 = vpop.permute.xlu0 %1941 }
 0x218   : > { %2025 = vst.msk [vmem:[#allocation3 + $0x40] sm:$0xff] %vm18585_vm3, %v1942_v1  ;;  %v1215_v24 = vpop.permute.xlu1 %1214  ;;  %v3146_v27 = vld [vmem:[#allocation3 + $0x30] sm:$0xff]  ;;  %v4940_v57 = vcombine.low %v4918_v37, %v4925_v45 }
 0x219   : > { %1769 = vrot.lane.b32.xlu0 %v1696_v21, %s13508_s20  ;;  %1297 = vst.msk [vmem:[#allocation3 + $0x48] sm:$0x7f] %vm18605_vm1, %v1215_v24  ;;  %v3498_v36 = vrot.slane %v3146_v27, %v14210_v32  ;;  %v3491_v63 = vcombine.high %v3146_v27, %v3146_v27  ;;  %v1151_v21 = vld [vmem:[#allocation2 + $0xc9] sm:$0x7f] }
 0x21a   : > { %1042 = vrot.lane.b32.xlu1 %v14383_v48, %s13504_s14  ;;  %v4948_v61 = vrot.slane %v4940_v57, %v14210_v32  ;;  %v1333_v27 = vld [vmem:[#allocation2 + $0xca] sm:$0x7f] }
 0x21b   : > { %v1035_v28 = vpop.permute.xlu0 %1034  ;;  %v3506_v41 = vcombine.high %v3498_v36, %v3498_v36  ;;  %v3514_v42 = vrot.slane %v3498_v36, %v14210_v32  ;;  %v3505_v47 = vrot.slane %v3491_v63, %v14210_v32 }
 0x21c   : > { %1116 = vst.msk [vmem:[#allocation3 + $0x50] sm:$0xff] %vm18653_vm7, %v1035_v28  ;;  %v2669_v44 = vpop.permute.xlu1 %2668  ;;  %vm18657_vm7 = vcmask 228544  }
 0x21d   : > { %1224 = vrot.lane.b32.xlu0 %v14403_v23, %s13506_s18  ;;  %2753 = vst.msk [vmem:[#allocation3 + $0x38] sm:$0x7f] %vm18586_vm4, %v2669_v44  ;;  %v14531_v48 = vrot.slane %v3506_v41, %v14210_v32  ;;  %v3536_v51 = vcombine.high %v3514_v42, %v3514_v42  ;;  %v4910_v23 = vcombine.low %v3489_v40, %v3514_v42 }
 0x21e   : > { %2496 = vrot.lane.b32.xlu1 %v14522_v52, %s13512_s24  ;;  %v3507_v5 = vcombine.high %v3505_v47, %v3505_v47  ;;  %v3521_v6 = vrot.slane %v3505_v47, %v14210_v32 }
 0x21f   : > { %v2124_v49 = vpop.permute.xlu0 %2123  ;;  %v4911_v53 = vcombine.low %v14531_v48, %v3536_v51  ;;  %v4932_v39 = vrot.slane %v4910_v23, %v14210_v32  ;;  %v3538_v10 = vcombine.high %v14531_v48, %v14531_v48  ;;  %v2789_v48 = vld [vmem:[#allocation2 + $0xe2] sm:$0x7f] }
 0x220   : > { %2207 = vst.msk [vmem:[#allocation3 + $0x40] sm:$0xff] %vm18654_vm11, %v2124_v49  ;;  %v1397_v50 = vpop.permute.xlu1 %1396  ;;  %vm18658_vm11 = vcmask 425344   ;;  %v3535_v12 = vrot.slane %v3507_v5, %v14210_v32  ;;  %v3537_v13 = vcombine.high %v3521_v6, %v3521_v6  ;;  %v14638_v5 = vld [vmem:[#allocation2 + $0xf1] sm:$0xff] }
 0x221   : > { %2678 = vrot.lane.b32.xlu0 %v14527_v34, %s13513_s25  ;;  %1479 = vst.msk [vmem:[#allocation3 + $0x48] sm:$0x7f] %vm18583_vm5, %v1397_v50  ;;  %v4939_v56 = vrot.slane %v4911_v53, %v14210_v32  ;;  %v4957_v17 = vcombine.low %v3538_v10, %v3521_v6  ;;  %v1515_v50 = vld [vmem:[#allocation2 + $0xcb] sm:$0x7f] }
 0x222   : > { %1951 = vrot.lane.b32.xlu1 %v1878_v29, %s13509_s21  ;;  %v4958_v58 = vcombine.low %v3535_v12, %v3537_v13  ;;  %v3539_v1 = vcombine.high %v3535_v12, %v3535_v12  ;;  %v2062_v13 = vld [vmem:[#allocation2 + $0xe2] sm:$0x7f] }
 0x223   : > { %v1217_v54 = vpop.permute.xlu0 %1216  ;;  %v4941_v59 = vcombine.low %v4932_v39, %v4939_v56  ;;  %v4967_v28 = vrot.slane %v4957_v17, %v14210_v32 }
 0x224   : > { %1298 = vst.msk [vmem:[#allocation3 + $0x50] sm:$0xff] %vm18655_vm12, %v1217_v54  ;;  %v2851_v19 = vpop.permute.xlu1 %2850  ;;  %vm18659_vm12 = vcmask 293120   ;;  %v4974_v42 = vrot.slane %v4958_v58, %v14210_v32 }
 0x225   : > { %2133 = vrot.lane.b32.xlu0 %v2060_v25, %s13510_s22  ;;  %2935 = vst.msk [vmem:[#allocation3 + $0x38] sm:$0x7f] %vm18656_vm14, %v2851_v19  ;;  %v4955_v62 = vrot.slane %v4941_v59, %v14210_v32  ;;  %vm18660_vm14 = vcmask 325920   ;;  %v2971_v19 = vld [vmem:[#allocation2 + $0xe3] sm:$0x7f] }
 0x226   : > { %1406 = vrot.lane.b32.xlu1 %v14430_v55, %s13505_s17  ;;  %v4989_v29 = vcombine.low %v4967_v28, %v4974_v42 }
 0x227   : > { %v2306_v30 = vpop.permute.xlu0 %2305  ;;  %v4956_v31 = vcombine.low %v4948_v61, %v4955_v62  ;;  %v1698_v62 = vld [vmem:[#allocation2 + $0xe0] sm:$0x7f] }
 0x228   : > { %2389 = vst.msk [vmem:[#allocation3 + $0x40] sm:$0xff] %vm18587_vm0, %v2306_v30  ;;  %v1579_v2 = vpop.permute.xlu1 %1578  ;;  %v4997_v54 = vrot.slane %v4989_v29, %v14210_v32  ;;  %v14680_v29 = vld [vmem:[#allocation2 + $0xf3] sm:$0xff] }
 0x229   : > { %862 = vrot.lane.b32.xlu0 %v787_v60, %s13503_s13  ;;  %1661 = vst.msk [vmem:[#allocation3 + $0x48] sm:$0x7f] %vm18582_vm6, %v1579_v2  ;;  %13123 = vmatmul.mubr.msk.f32.gmra.mrb[10].mxu0 %vm6049_vm8, %v4956_v31 }
 0x22a   : > { %2860 = vrot.lane.b32.xlu1 %v14554_v26, %s13514_s26  ;;  %13125 = vmatprep.mubr.msk.f32.mxu0 %vm18619_vm10, %v18589_v0 }
 0x22b   : > { %v1399_v33 = vpop.permute.xlu0 %1398 }
 0x22c   : > { %1480 = vst.msk [vmem:[#allocation3 + $0x50] sm:$0xff] %vm18657_vm7, %v1399_v33  ;;  %v3033_v55 = vpop.permute.xlu1 %3032  ;;  %vm18661_vm7 = vcmask 261344  }
 0x22d   : > { %2315 = vrot.lane.b32.xlu0 %v2242_v35, %s13511_s23  ;;  %3117 = vst.msk [vmem:[#allocation3 + $0x38] sm:$0x7f] %vm18584_vm9, %v3033_v55 }
 0x22e   : > { %1588 = vrot.lane.b32.xlu1 %v14454_v46, %s13507_s19 }
 0x22f   : > { %v2489_v4 = vpop.permute.xlu0 %2488 }
 0x230   : > { %2572 = vst.msk [vmem:[#allocation3 + $0x40] sm:$0xff] %vm18658_vm11, %v2489_v4  ;;  %v1762_v15 = vpop.permute.xlu1 %1761  ;;  %vm18662_vm11 = vcmask 458144  }
 0x231   : > { %1044 = vrot.lane.b32.xlu0 %v969_v3, %s13504_s14  ;;  %1844 = vst.msk [vmem:[#allocation3 + $0x48] sm:$0x7f] %vm18659_vm12, %v1762_v15  ;;  %vm18663_vm12 = vcmask 358720   ;;  %v14636_v3 = vld [vmem:[#allocation2 + $0xf0] sm:$0xff] }
 0x232   : > { %3042 = vrot.lane.b32.xlu1 %v14571_v8, %s13516_s9 }
 0x233   : > { %v1944_v11 = vpop.permute.xlu0 %1943 }
 0x234   : > { %2026 = vst.msk [vmem:[#allocation3 + $0x48] sm:$0x7f] %vm18660_vm14, %v1944_v11  ;;  %v1581_v14 = vpop.permute.xlu1 %1580  ;;  %v3147_v16 = vld [vmem:[#allocation3 + $0x38] sm:$0x7f]  ;;  %vm18664_vm14 = vcmask 294144  }
 0x235   : > { %2498 = vrot.lane.b32.xlu0 %v2425_v9, %s13512_s24  ;;  %1662 = vst.msk [vmem:[#allocation3 + $0x50] sm:$0xff] %vm18661_vm7, %v1581_v14  ;;  %v3547_v20 = vrot.slane %v3147_v16, %v14210_v32  ;;  %vm18665_vm7 = vcmask 490944   ;;  %v3540_v56 = vcombine.high %v3147_v16, %v3147_v16 }
 0x236   : > { %1771 = vrot.lane.b32.xlu1 %v14522_v52, %s13508_s20 }
 0x237   : > { %v1037_v18 = vpop.permute.xlu0 %1036  ;;  %v3555_v22 = vcombine.high %v3547_v20, %v3547_v20  ;;  %v3563_v7 = vrot.slane %v3547_v20, %v14210_v32  ;;  %v3554_v30 = vrot.slane %v3540_v56, %v14210_v32 }
 0x238   : > { %1117 = vst.msk [vmem:[#allocation3 + $0x58] sm:$0x7f] %vm18588_vm13, %v1037_v18  ;;  %v2671_v24 = vpop.permute.xlu1 %2670 }
 0x239   : > { %1953 = vrot.lane.b32.xlu0 %v14527_v34, %s13509_s21  ;;  %2754 = vst.msk [vmem:[#allocation3 + $0x40] sm:$0xff] %vm18662_vm11, %v2671_v24  ;;  %v14592_v38 = vrot.slane %v3555_v22, %v14210_v32  ;;  %v3585_v40 = vcombine.high %v3563_v7, %v3563_v7  ;;  %v4959_v41 = vcombine.low %v3539_v1, %v3563_v7  ;;  %vm18666_vm11 = vcmask 391520   ;;  %v789_v22 = vld [vmem:[#allocation2 + $0xcb] sm:$0x7f] }
 0x23a   : > { %1226 = vrot.lane.b32.xlu1 %v1151_v21, %s13506_s18  ;;  %v3556_v31 = vcombine.high %v3554_v30, %v3554_v30  ;;  %v3570_v2 = vrot.slane %v3554_v30, %v14210_v32 }
 0x23b   : > { %v2126_v36 = vpop.permute.xlu0 %2125  ;;  %v4960_v44 = vcombine.low %v14592_v38, %v3585_v40  ;;  %v4981_v23 = vrot.slane %v4959_v41, %v14210_v32  ;;  %v3587_v55 = vcombine.high %v14592_v38, %v14592_v38  ;;  %v2244_v41 = vld [vmem:[#allocation2 + $0xe3] sm:$0x7f] }
 0x23c   : > { %2208 = vst.msk [vmem:[#allocation3 + $0x48] sm:$0x7f] %vm18663_vm12, %v2126_v36  ;;  %v1764_v49 = vpop.permute.xlu1 %1763  ;;  %vm18667_vm12 = vcmask 359744   ;;  %v3584_v33 = vrot.slane %v3556_v31, %v14210_v32  ;;  %v3586_v47 = vcombine.high %v3570_v2, %v3570_v2  ;;  %v14662_v36 = vld [vmem:[#allocation2 + $0xf2] sm:$0xff] }
 0x23d   : > { %1408 = vrot.lane.b32.xlu0 %v1333_v27, %s13505_s17  ;;  %1845 = vst.msk [vmem:[#allocation3 + $0x50] sm:$0xff] %vm18664_vm14, %v1764_v49  ;;  %v4988_v45 = vrot.slane %v4960_v44, %v14210_v32  ;;  %v5006_v10 = vcombine.low %v3587_v55, %v3570_v2  ;;  %vm18668_vm14 = vcmask 162944  }
 0x23e   : > { %2680 = vrot.lane.b32.xlu1 %v2607_v43, %s13513_s25  ;;  %v5007_v11 = vcombine.low %v3584_v33, %v3586_v47 }
 0x23f   : > { %v1219_v51 = vpop.permute.xlu0 %1218  ;;  %v4990_v53 = vcombine.low %v4981_v23, %v4988_v45  ;;  %v5016_v18 = vrot.slane %v5006_v10, %v14210_v32 }
 0x240   : > { %1299 = vst.msk [vmem:[#allocation3 + $0x58] sm:$0x7f] %vm18605_vm1, %v1219_v51  ;;  %v2853_v37 = vpop.permute.xlu1 %2852  ;;  %v5023_v20 = vrot.slane %v5007_v11, %v14210_v32  ;;  %v971_v51 = vld [vmem:[#allocation2 + $0xe0] sm:$0x7f] }
 0x241   : > { %2862 = vrot.lane.b32.xlu0 %v2789_v48, %s13514_s26  ;;  %2936 = vst.msk [vmem:[#allocation3 + $0x40] sm:$0xff] %vm18665_vm7, %v2853_v37  ;;  %v5004_v39 = vrot.slane %v4990_v53, %v14210_v32  ;;  %vm18669_vm7 = vcmask 425344   ;;  %v2427_v37 = vld [vmem:[#allocation2 + $0xf8] sm:$0x7f] }
 0x242   : > { %2135 = vrot.lane.b32.xlu1 %v14554_v26, %s13510_s22  ;;  %v5038_v28 = vcombine.low %v5016_v18, %v5023_v20 }
 0x243   : > { %v2308_v25 = vpop.permute.xlu0 %2307  ;;  %v5005_v57 = vcombine.low %v4997_v54, %v5004_v39  ;;  %v1153_v39 = vld [vmem:[#allocation2 + $0xe1] sm:$0x7f] }
 0x244   : > { %2390 = vst.msk [vmem:[#allocation3 + $0x48] sm:$0x7f] %vm18666_vm11, %v2308_v25  ;;  %v1946_v59 = vpop.permute.xlu1 %1945  ;;  %vm18670_vm11 = vcmask 293120   ;;  %v5046_v43 = vrot.slane %v5038_v28, %v14210_v32 }
 0x245   : > { %1590 = vrot.lane.b32.xlu0 %v1515_v50, %s13507_s19  ;;  %2027 = vst.msk [vmem:[#allocation3 + $0x50] sm:$0xff] %vm18585_vm3, %v1946_v59  ;;  %13126 = vmatmul.mubr.msk.f32.gmra.mrb[12].mxu0 %vm6049_vm8, %v5005_v57 }
 0x246   : > { %864 = vrot.lane.b32.xlu1 %v14454_v46, %s13503_s13  ;;  %13128 = vmatprep.mubr.msk.f32.mxu0 %vm18619_vm10, %v18589_v0 }
 0x247   : > { %v1401_v60 = vpop.permute.xlu0 %1400 }
 0x248   : > { %1481 = vst.msk [vmem:[#allocation3 + $0x58] sm:$0x7f] %vm18583_vm5, %v1401_v60  ;;  %v3035_v61 = vpop.permute.xlu1 %3034 }
 0x249   : > { %3044 = vrot.lane.b32.xlu0 %v2971_v19, %s13516_s9  ;;  %3118 = vst.msk [vmem:[#allocation3 + $0x40] sm:$0xff] %vm3108_vm15, %v3035_v61  ;;  %v2609_v19 = vld [vmem:[#allocation2 + $0xf9] sm:$0x7f] }
 0x24a   : > { %2317 = vrot.lane.b32.xlu1 %v14571_v8, %s13511_s23 }
 0x24b   : > { %v2491_v63 = vpop.permute.xlu0 %2490 }
 0x24c   : > { %2573 = vst.msk [vmem:[#allocation3 + $0x48] sm:$0x7f] %vm2564_vm2, %v2491_v63  ;;  %v2128_v46 = vpop.permute.xlu1 %2127 }
 0x24d   : > { %1773 = vrot.lane.b32.xlu0 %v1698_v62, %s13508_s20  ;;  %2209 = vst.msk [vmem:[#allocation3 + $0x50] sm:$0xff] %vm18667_vm12, %v2128_v46  ;;  %vm18671_vm12 = vcmask 195744  }
 0x24e   : > { %1046 = vrot.lane.b32.xlu1 %v14522_v52, %s13504_s14  ;;  %v1880_v52 = vld [vmem:[#allocation2 + $0xe1] sm:$0x7f] }
 0x24f   : > { %v2310_v35 = vpop.permute.xlu0 %2309 }
 0x250   : > { %2391 = vst.msk [vmem:[#allocation3 + $0x50] sm:$0xff] %vm18587_vm0, %v2310_v35  ;;  %v1583_v4 = vpop.permute.xlu1 %1582  ;;  %v3148_v6 = vld [vmem:[#allocation3 + $0x40] sm:$0xff]  ;;  %v1335_v35 = vld [vmem:[#allocation2 + $0xe2] sm:$0x7f] }
 0x251   : > { %1228 = vrot.lane.b32.xlu0 %v14527_v34, %s13506_s18  ;;  %1663 = vst.msk [vmem:[#allocation3 + $0x58] sm:$0x7f] %vm18582_vm6, %v1583_v4  ;;  %v3595_v9 = vrot.slane %v3148_v6, %v14210_v32 }
 0x252   : > { %2500 = vrot.lane.b32.xlu1 %v14636_v3, %s13512_s24 }
 0x253   : > { %v1039_v15 = vpop.permute.xlu0 %1038  ;;  %v3603_v34 = vcombine.high %v3595_v9, %v3595_v9  ;;  %v3611_v16 = vrot.slane %v3595_v9, %v14210_v32 }
 0x254   : > { %1118 = vst.msk [vmem:[#allocation3 + $0x60] sm:$0xff] %vm18668_vm14, %v1039_v15  ;;  %v2673_v12 = vpop.permute.xlu1 %2672  ;;  %vm18672_vm14 = vcmask 489920  }
 0x255   : > { %2682 = vrot.lane.b32.xlu0 %v14638_v5, %s13513_s25  ;;  %2755 = vst.msk [vmem:[#allocation3 + $0x48] sm:$0x7f] %vm18586_vm4, %v2673_v12  ;;  %v3625_v17 = vrot.slane %v3603_v34, %v14210_v32 }
 0x256   : > { %1955 = vrot.lane.b32.xlu1 %v1880_v52, %s13509_s21 }
 0x257   : > { %v2493_v14 = vpop.permute.xlu0 %2492  ;;  %v5008_v58 = vcombine.low %v3611_v16, %v3625_v17  ;;  %v12772_v21 = vcombine.high %v3611_v16, %v3625_v17 }
 0x258   : > { %2574 = vst.msk [vmem:[#allocation3 + $0x50] sm:$0xff] %vm18669_vm7, %v2493_v14  ;;  %v1766_v1 = vpop.permute.xlu1 %1765  ;;  %vm18673_vm7 = vcmask 458144  }
 0x259   : > { %2137 = vrot.lane.b32.xlu0 %v2062_v13, %s13510_s22  ;;  %1846 = vst.msk [vmem:[#allocation3 + $0x58] sm:$0x7f] %vm18670_vm11, %v1766_v1  ;;  %v5030_v24 = vrot.slane %v5008_v58, %v14210_v32  ;;  %v5037_v27 = vrot.slane %v12772_v21, %v14210_v32  ;;  %vm18674_vm11 = vcmask 325920   ;;  %v2791_v13 = vld [vmem:[#allocation2 + $0xfa] sm:$0x7f] }
 0x25a   : > { %1410 = vrot.lane.b32.xlu1 %v14554_v26, %s13505_s17  ;;  %v3588_v26 = vcombine.high %v3148_v6, %v3148_v6 }
 0x25b   : > { %v1221_v7 = vpop.permute.xlu0 %1220  ;;  %v5039_v38 = vcombine.low %v5030_v24, %v5037_v27  ;;  %v1517_v27 = vld [vmem:[#allocation2 + $0xe3] sm:$0x7f] }
 0x25c   : > { %1300 = vst.msk [vmem:[#allocation3 + $0x60] sm:$0xff] %vm18671_vm12, %v1221_v7  ;;  %v2855_v40 = vpop.permute.xlu1 %2854  ;;  %vm18675_vm12 = vcmask 228544   ;;  %v3602_v45 = vrot.slane %v3588_v26, %v14210_v32 }
 0x25d   : > { %866 = vrot.lane.b32.xlu0 %v789_v22, %s13503_s13  ;;  %2937 = vst.msk [vmem:[#allocation3 + $0x48] sm:$0x7f] %vm18672_vm14, %v2855_v40  ;;  %v5053_v44 = vrot.slane %v5039_v38, %v14210_v32  ;;  %vm18676_vm14 = vcmask 490944  }
 0x25e   : > { %2864 = vrot.lane.b32.xlu1 %v14662_v36, %s13514_s26  ;;  %v3604_v25 = vcombine.high %v3602_v45, %v3602_v45  ;;  %v3618_v30 = vrot.slane %v3602_v45, %v14210_v32 }
 0x25f   : > { %v2675_v42 = vpop.permute.xlu0 %2674  ;;  %v5054_v49 = vcombine.low %v5046_v43, %v5053_v44 }
 0x260   : > { %2756 = vst.msk [vmem:[#allocation3 + $0x50] sm:$0xff] %vm18673_vm7, %v2675_v42  ;;  %v1948_v48 = vpop.permute.xlu1 %1947  ;;  %vm18677_vm7 = vcmask 358720   ;;  %v3632_v57 = vrot.slane %v3604_v25, %v14210_v32 }
 0x261   : > { %2319 = vrot.lane.b32.xlu0 %v2244_v41, %s13511_s23  ;;  %2028 = vst.msk [vmem:[#allocation3 + $0x58] sm:$0x7f] %vm18674_vm11, %v1948_v48  ;;  %13129 = vmatmul.mubr.msk.f32.gmra.mrb[14].mxu0 %vm6049_vm8, %v5054_v49  ;;  %vm18678_vm11 = vcmask 391520  }
 0x262   : > { %1592 = vrot.lane.b32.xlu1 %v14571_v8, %s13507_s19  ;;  %13131 = vmatprep.mubr.msk.f32.mxu0 %vm18619_vm10, %v18589_v0  ;;  %v5055_v63 = vcombine.low %v3618_v30, %v3632_v57  ;;  %v12773_v31 = vcombine.high %v3618_v30, %v3632_v57 }
 0x263   : > { %v1403_v23 = vpop.permute.xlu0 %1402 }
 0x264   : > { %1482 = vst.msk [vmem:[#allocation3 + $0x60] sm:$0xff] %vm18675_vm12, %v1403_v23  ;;  %v3037_v53 = vpop.permute.xlu1 %3036  ;;  %vm18679_vm12 = vcmask 261344   ;;  %v5065_v6 = vrot.slane %v5055_v63, %v14210_v32  ;;  %v5072_v15 = vrot.slane %v12773_v31, %v14210_v32 }
 0x265   : > { %1048 = vrot.lane.b32.xlu0 %v971_v51, %s13504_s14  ;;  %3119 = vst.msk [vmem:[#allocation3 + $0x48] sm:$0x7f] %vm18584_vm9, %v3037_v53 }
 0x266   : > { %3046 = vrot.lane.b32.xlu1 %v14680_v29, %s13516_s9  ;;  %v5087_v21 = vcombine.low %v5065_v6, %v5072_v15 }
 0x267   : > { %v2857_v50 = vpop.permute.xlu0 %2856 }
 0x268   : > { %2938 = vst.msk [vmem:[#allocation3 + $0x50] sm:$0xff] %vm18676_vm14, %v2857_v50  ;;  %v2130_v54 = vpop.permute.xlu1 %2129  ;;  %vm18680_vm14 = vcmask 294144   ;;  %v5095_v26 = vrot.slane %v5087_v21, %v14210_v32  ;;  %v2973_v50 = vld [vmem:[#allocation2 + $0xfb] sm:$0x7f] }
 0x269   : > { %2502 = vrot.lane.b32.xlu0 %v2427_v37, %s13512_s24  ;;  %2210 = vst.msk [vmem:[#allocation3 + $0x58] sm:$0x7f] %vm18677_vm7, %v2130_v54  ;;  %vm18681_vm7 = vcmask 489920  }
 0x26a   : > { %1775 = vrot.lane.b32.xlu1 %v14636_v3, %s13508_s20 }
 0x26b   : > { %v2312_v56 = vpop.permute.xlu0 %2311 }
 0x26c   : > { %2392 = vst.msk [vmem:[#allocation3 + $0x58] sm:$0x7f] %vm18678_vm11, %v2312_v56  ;;  %v1585_v59 = vpop.permute.xlu1 %1584  ;;  %v3149_v60 = vld [vmem:[#allocation3 + $0x48] sm:$0x7f]  ;;  %vm18682_vm11 = vcmask 359744  }
 0x26d   : > { %1230 = vrot.lane.b32.xlu0 %v1153_v39, %s13506_s18  ;;  %1664 = vst.msk [vmem:[#allocation3 + $0x60] sm:$0xff] %vm18679_vm12, %v1585_v59  ;;  %v3644_v62 = vrot.slane %v3149_v60, %v14210_v32  ;;  %v3637_v33 = vcombine.high %v3149_v60, %v3149_v60  ;;  %vm18683_vm12 = vcmask 130144  }
 0x26e   : > { %868 = vrot.lane.b32.xlu1 %v14571_v8, %s13503_s13 }
 0x26f   : > { %v1041_v61 = vpop.permute.xlu0 %1040  ;;  %v3652_v2 = vcombine.high %v3644_v62, %v3644_v62  ;;  %v3660_v55 = vrot.slane %v3644_v62, %v14210_v32  ;;  %v3651_v14 = vrot.slane %v3637_v33, %v14210_v32 }
 0x270   : > { %1119 = vst.msk [vmem:[#allocation3 + $0x68] sm:$0x7f] %vm18588_vm13, %v1041_v61  ;;  %v3039_v46 = vpop.permute.xlu1 %3038 }
 0x271   : > { %2684 = vrot.lane.b32.xlu0 %v2609_v19, %s13513_s25  ;;  %3120 = vst.msk [vmem:[#allocation3 + $0x50] sm:$0xff] %vm3108_vm15, %v3039_v46  ;;  %v3674_v4 = vrot.slane %v3652_v2, %v14210_v32  ;;  %v3653_v38 = vcombine.high %v3651_v14, %v3651_v14  ;;  %v3667_v23 = vrot.slane %v3651_v14, %v14210_v32  ;;  %v14791_v14 = vld [vmem:[#allocation2 + $0x108] sm:$0xff] }
 0x272   : > { %1957 = vrot.lane.b32.xlu1 %v14638_v5, %s13509_s21  ;;  %v6174_v8 = vpop.f32.mrb[0].mxu0 }
 0x273   : > { %v2495_v47 = vpop.permute.xlu0 %2494  ;;  %v6347_v9 = vcombine.high %v6174_v8, %v6174_v8  ;;  %v6354_v10 = vrot.slane %v6174_v8, %v14210_v32  ;;  %v13109_v11 = vpop.f32.mrb[1].mxu0  ;;  %v5057_v52 = vcombine.low %v3660_v55, %v3674_v4  ;;  %v12774_v34 = vcombine.high %v3660_v55, %v3674_v4 }
 0x274   : > { %2575 = vst.msk [vmem:[#allocation3 + $0x58] sm:$0x7f] %vm2564_vm2, %v2495_v47  ;;  %v1768_v12 = vpop.permute.xlu1 %1767  ;;  %v3681_v25 = vrot.slane %v3653_v38, %v14210_v32  ;;  %v3683_v62 = vcombine.high %v3667_v23, %v3667_v23 }
 0x275   : > { %1412 = vrot.lane.b32.xlu0 %v1335_v35, %s13505_s17  ;;  %v6361_v16 = vrot.slane %v6347_v9, %v14210_v32  ;;  %v6362_v17 = vcombine.high %v6354_v10, %v6354_v10  ;;  %1847 = vst.msk [vmem:[#allocation3 + $0x60] sm:$0xff] %vm18680_vm14, %v1768_v12  ;;  %v5079_v20 = vrot.slane %v5057_v52, %v14210_v32  ;;  %v1700_v35 = vld [vmem:[#allocation2 + $0xf8] sm:$0x7f]  ;;  %vm18684_vm14 = vcmask 293120  }
 0x276   : > { %1050 = vrot.lane.b32.xlu1 %v14636_v3, %s13504_s14  ;;  %v5086_v58 = vrot.slane %v12774_v34, %v14210_v32  ;;  %v14719_v22 = vrot.slane %v6354_v10, %v14210_v32  ;;  %v5104_v33 = vcombine.low %v3667_v23, %v3681_v25 }
 0x277   : > { %v1950_v18 = vpop.permute.xlu0 %1949  ;;  %v6363_v1 = vcombine.high %v6361_v16, %v6361_v16  ;;  %v14722_v7 = vrot.slane %v6362_v17, %v14210_v32  ;;  %v14726_v40 = vrot.slane %v6361_v16, %v14210_v32 }
 0x278   : > { %2029 = vst.msk [vmem:[#allocation3 + $0x60] sm:$0xff] %vm18585_vm3, %v1950_v18  ;;  %v1223_v24 = vpop.permute.xlu1 %1222  ;;  %v5088_v28 = vcombine.low %v5079_v20, %v5086_v58  ;;  %v3150_v43 = vld [vmem:[#allocation3 + $0x50] sm:$0xff]  ;;  %v14795_v58 = vld [vmem:[#allocation2 + $0x109] sm:$0xff] }
 0x279   : > { %2866 = vrot.lane.b32.xlu0 %v2791_v13, %s13514_s26  ;;  %v14729_v3 = vrot.slane %v6363_v1, %v14210_v32  ;;  %v7929_v41 = vcombine.low %v14719_v22, %v14722_v7  ;;  %1301 = vst.msk [vmem:[#allocation3 + $0x68] sm:$0x7f] %vm18605_vm1, %v1223_v24  ;;  %v12819_v44 = vcombine.high %v14719_v22, %v14722_v7 }
 0x27a   : > { %2139 = vrot.lane.b32.xlu1 %v14662_v36, %s13510_s22  ;;  %v5102_v37 = vrot.slane %v5088_v28, %v14210_v32  ;;  %v3685_v54 = vcombine.high %v3150_v43, %v3150_v43  ;;  %v3692_v59 = vrot.slane %v3150_v43, %v14210_v32  ;;  %v5114_v13 = vrot.slane %v5104_v33, %v14210_v32  ;;  %v1882_v28 = vld [vmem:[#allocation2 + $0xf9] sm:$0x7f] }
 0x27b   : > { %v1405_v42 = vpop.permute.xlu0 %1404  ;;  %v7931_v49 = vcombine.low %v14726_v40, %v14729_v3  ;;  %v12820_v48 = vcombine.high %v14726_v40, %v14729_v3  ;;  %v7939_v51 = vrot.slane %v7929_v41, %v14210_v32  ;;  %v7946_v45 = vrot.slane %v12819_v44, %v14210_v32  ;;  %v2064_v41 = vld [vmem:[#allocation2 + $0xfa] sm:$0x7f] }
 0x27c   : > { %1483 = vst.msk [vmem:[#allocation3 + $0x68] sm:$0x7f] %vm18583_vm5, %v1405_v42  ;;  %v2677_v53 = vpop.permute.xlu1 %2676  ;;  %v5103_v60 = vcombine.low %v5095_v26, %v5102_v37  ;;  %v3699_v30 = vrot.slane %v3685_v54, %v14210_v32  ;;  %v3700_v63 = vcombine.high %v3692_v59, %v3692_v59  ;;  %v3708_v31 = vrot.slane %v3692_v59, %v14210_v32 }
 0x27d   : > { %1594 = vrot.lane.b32.xlu0 %v1517_v27, %s13507_s19  ;;  %v7953_v39 = vrot.slane %v7931_v49, %v14210_v32  ;;  %v7960_v56 = vrot.slane %v12820_v48, %v14210_v32  ;;  %2757 = vst.msk [vmem:[#allocation3 + $0x58] sm:$0x7f] %vm18586_vm4, %v2677_v53  ;;  %v7961_v19 = vcombine.low %v7939_v51, %v7946_v45  ;;  %v791_v45 = vld [vmem:[#allocation2 + $0xe3] sm:$0x7f] }
 0x27e   : > { %1232 = vrot.lane.b32.xlu1 %v14638_v5, %s13506_s18  ;;  %13132 = vmatmul.mubr.msk.f32.gmra.mrb[16].mxu0 %vm6049_vm8, %v5103_v60  ;;  %v3722_v55 = vrot.slane %v3700_v63, %v14210_v32  ;;  %v3730_v4 = vcombine.high %v3708_v31, %v3708_v31  ;;  %v5105_v8 = vcombine.low %v3683_v62, %v3708_v31 }
 0x27f   : > { %v2859_v57 = vpop.permute.xlu0 %2858  ;;  %v7962_v61 = vcombine.low %v7953_v39, %v7960_v56  ;;  %v7969_v2 = vrot.slane %v7961_v19, %v14210_v32  ;;  %13134 = vmatprep.mubr.msk.f32.mxu0 %vm18619_vm10, %v18589_v0  ;;  %v14777_v6 = vrot.slane %v3699_v30, %v14210_v32  ;;  %v3701_v21 = vcombine.high %v3699_v30, %v3699_v30  ;;  %v14830_v19 = vld [vmem:[#allocation2 + $0x10a] sm:$0xff]  ;;  %v2246_v30 = vld [vmem:[#allocation2 + $0xfb] sm:$0x7f] }
 0x280   : > { %2939 = vst.msk [vmem:[#allocation3 + $0x58] sm:$0x7f] %vm18681_vm7, %v2859_v57  ;;  %v2132_v46 = vpop.permute.xlu1 %2131  ;;  %v3732_v9 = vcombine.high %v3722_v55, %v3722_v55  ;;  %v5106_v10 = vcombine.low %v3722_v55, %v3730_v4  ;;  %v5121_v11 = vrot.slane %v5105_v8, %v14210_v32  ;;  %vm18685_vm7 = vcmask 162944   ;;  %v973_v8 = vld [vmem:[#allocation2 + $0xf8] sm:$0x7f] }
 0x281   : > { %3048 = vrot.lane.b32.xlu0 %v2973_v50, %s13516_s9  ;;  %v7976_v47 = vrot.slane %v7962_v61, %v14210_v32  ;;  %2211 = vst.msk [vmem:[#allocation3 + $0x60] sm:$0xff] %vm18682_vm11, %v2132_v46  ;;  %v3729_v42 = vrot.slane %v3701_v21, %v14210_v32  ;;  %vm18686_vm11 = vcmask 195744   ;;  %v3731_v51 = vcombine.high %v14777_v6, %v14777_v6  ;;  %v2429_v21 = vld [vmem:[#allocation2 + $0x110] sm:$0x7f] }
 0x282   : > { %2321 = vrot.lane.b32.xlu1 %v14680_v29, %s13511_s23  ;;  %v5107_v12 = vcombine.low %v3732_v9, %v14777_v6  ;;  %v5128_v16 = vrot.slane %v5106_v10, %v14210_v32  ;;  %v5136_v18 = vcombine.low %v5114_v13, %v5121_v11 }
 0x283   : > { %v1587_v5 = vpop.permute.xlu0 %1586  ;;  %v7977_v15 = vcombine.low %v7969_v2, %v7976_v47  ;;  %v3733_v53 = vcombine.high %v3729_v42, %v3729_v42  ;;  %v5153_v62 = vcombine.low %v3729_v42, %v3731_v51  ;;  %v1155_v51 = vld [vmem:[#allocation2 + $0xf9] sm:$0x7f] }
 0x284   : > { %1665 = vst.msk [vmem:[#allocation3 + $0x68] sm:$0x7f] %vm18582_vm6, %v1587_v5  ;;  %v861_v52 = vpop.permute.xlu1 %860  ;;  %v5135_v17 = vrot.slane %v5107_v12, %v14210_v32 }
 0x285   : > { %1777 = vrot.lane.b32.xlu0 %v1700_v35, %s13508_s20  ;;  %9414 = vst.msk [vmem:[%s14771_s12] sm:$0xff] %vm6049_vm8, %v7977_v15  ;;  %v5163_v6 = vrot.slane %v5153_v62, %v14210_v32 }
 0x286   : > { %938 = vst.msk [vmem:[#allocation3 + $0x70] sm:$0xff] %vm18683_vm12, %v861_v52  ;;  %1414 = vrot.lane.b32.xlu1 %v14662_v36, %s13505_s17  ;;  %v5137_v24 = vcombine.low %v5128_v16, %v5135_v17  ;;  %v5144_v36 = vrot.slane %v5136_v18, %v14210_v32  ;;  %vm18687_vm12 = vcmask 425344   ;;  %v14858_v18 = vld [vmem:[#allocation2 + $0x10b] sm:$0xff] }
 0x287   : > { %v3041_v34 = vpop.permute.xlu0 %3040 }
 0x288   : > { %3121 = vst.msk [vmem:[#allocation3 + $0x58] sm:$0x7f] %vm18584_vm9, %v3041_v34  ;;  %v2314_v20 = vpop.permute.xlu1 %2313  ;;  %v5151_v27 = vrot.slane %v5137_v24, %v14210_v32 }
 0x289   : > { %1596 = vrot.lane.b32.xlu0 %v14680_v29, %s13507_s19  ;;  %2393 = vst.msk [vmem:[#allocation3 + $0x60] sm:$0xff] %vm18587_vm0, %v2314_v20 }
 0x28a   : > { %2504 = vrot.lane.b32.xlu1 %v14791_v14, %s13512_s24  ;;  %v5152_v43 = vcombine.low %v5144_v36, %v5151_v27 }
 0x28b   : > { %v1770_v1 = vpop.permute.xlu0 %1769 }
 0x28c   : > { %1848 = vst.msk [vmem:[#allocation3 + $0x68] sm:$0x7f] %vm18684_vm14, %v1770_v1  ;;  %v1043_v38 = vpop.permute.xlu1 %1042  ;;  %13135 = vmatmul.mubr.msk.f32.gmra.mrb[18].mxu0 %vm6049_vm8, %v5152_v43  ;;  %vm18688_vm14 = vcmask 458144  }
 0x28d   : > { %2686 = vrot.lane.b32.xlu0 %v14795_v58, %s13513_s25  ;;  %1120 = vst.msk [vmem:[#allocation3 + $0x70] sm:$0xff] %vm18685_vm7, %v1043_v38  ;;  %13137 = vmatprep.mubr.msk.f32.mxu0 %vm18619_vm10, %v18589_v0  ;;  %vm18689_vm7 = vcmask 325920  }
 0x28e   : > { %1959 = vrot.lane.b32.xlu1 %v1882_v28, %s13509_s21 }
 0x28f   : > { %v1225_v44 = vpop.permute.xlu0 %1224  ;;  %v3151_v26 = vld [vmem:[#allocation3 + $0x58] sm:$0x7f] }
 0x290   : > { %1302 = vst.msk [vmem:[#allocation3 + $0x70] sm:$0xff] %vm18686_vm11, %v1225_v44  ;;  %v3734_v49 = vcombine.high %v3151_v26, %v3151_v26  ;;  %v3741_v48 = vrot.slane %v3151_v26, %v14210_v32  ;;  %v2497_v23 = vpop.permute.xlu1 %2496  ;;  %vm18690_vm11 = vcmask 358720   ;;  %v9641_v26 = vmul.f32 0.2, %v14719_v22 }
 0x291   : > { %2141 = vrot.lane.b32.xlu0 %v2064_v41, %s13510_s22  ;;  %2576 = vst.msk [vmem:[#allocation3 + $0x60] sm:$0xff] %vm18687_vm12, %v2497_v23  ;;  %vm18691_vm12 = vcmask 228544  }
 0x292   : > { %v14817_v37 = vrot.slane %v3734_v49, %v14210_v32  ;;  %v3749_v50 = vcombine.high %v3741_v48, %v3741_v48  ;;  %v3757_v25 = vrot.slane %v3741_v48, %v14210_v32  ;;  %1779 = vrot.lane.b32.xlu1 %v14791_v14, %s13508_s20 }
 0x293   : > { %v2679_v54 = vpop.permute.xlu0 %2678 }
 0x294   : > { %2758 = vst.msk [vmem:[#allocation3 + $0x60] sm:$0xff] %vm18688_vm14, %v2679_v54  ;;  %v14826_v39 = vrot.slane %v14817_v37, %v14210_v32  ;;  %v3771_v56 = vrot.slane %v3749_v50, %v14210_v32  ;;  %v3779_v57 = vcombine.high %v3757_v25, %v3757_v25  ;;  %v5154_v59 = vcombine.low %v3733_v53, %v3757_v25  ;;  %v1952_v60 = vpop.permute.xlu1 %1951 }
 0x295   : > { %870 = vrot.lane.b32.xlu0 %v791_v45, %s13503_s13  ;;  %2030 = vst.msk [vmem:[#allocation3 + $0x68] sm:$0x7f] %vm18689_vm7, %v1952_v60  ;;  %vm18692_vm14 = vcmask 129120   ;;  %vm18693_vm7 = vcmask 490944   ;;  %v2611_v60 = vld [vmem:[#allocation2 + $0x111] sm:$0x7f] }
 0x296   : > { %v3781_v61 = vcombine.high %v3771_v56, %v3771_v56  ;;  %v5155_v63 = vcombine.low %v3771_v56, %v3779_v57  ;;  %2868 = vrot.lane.b32.xlu1 %v14830_v19, %s13514_s26  ;;  %v6179_v2 = vpop.f32.mrb[2].mxu0  ;;  %v5170_v35 = vrot.slane %v5154_v59, %v14210_v32 }
 0x297   : > { %v2134_v31 = vpop.permute.xlu0 %2133  ;;  %v6396_v47 = vcombine.high %v6179_v2, %v6179_v2  ;;  %v6403_v5 = vrot.slane %v6179_v2, %v14210_v32  ;;  %v13112_v55 = vpop.f32.mrb[3].mxu0 }
 0x298   : > { %2212 = vst.msk [vmem:[#allocation3 + $0x68] sm:$0x7f] %vm18690_vm11, %v2134_v31  ;;  %v5156_v46 = vcombine.low %v3781_v61, %v14826_v39  ;;  %v5177_v33 = vrot.slane %v5155_v63, %v14210_v32  ;;  %v1407_v4 = vpop.permute.xlu1 %1406  ;;  %v5185_v52 = vcombine.low %v5163_v6, %v5170_v35  ;;  %vm18694_vm11 = vcmask 391520   ;;  %v1337_v35 = vld [vmem:[#allocation2 + $0xfa] sm:$0x7f] }
 0x299   : > { %2323 = vrot.lane.b32.xlu0 %v2246_v30, %s13511_s23  ;;  %v6410_v9 = vrot.slane %v6396_v47, %v14210_v32  ;;  %v6411_v10 = vcombine.high %v6403_v5, %v6403_v5  ;;  %1484 = vst.msk [vmem:[#allocation3 + $0x70] sm:$0xff] %vm18691_vm12, %v1407_v4  ;;  %v14849_v13 = vrot.slane %v6403_v5, %v14210_v32  ;;  %vm9445_vm12 = vcmp.ge.f32.partialorder %v14719_v22, 0.0  ;;  %v2793_v5 = vld [vmem:[#allocation2 + $0x112] sm:$0x7f] }
 0x29a   : > { %v5184_v15 = vrot.slane %v5156_v46, %v14210_v32  ;;  %1961 = vrot.lane.b32.xlu1 %v14795_v58, %s13509_s21  ;;  %v5193_v44 = vrot.slane %v5185_v52, %v14210_v32  ;;  %v14899_v57 = vsel %vm9445_vm12, %v14719_v22, %v9641_v26  ;;  %vm18696_vm12 = vcmask 294144  }
 0x29b   : > { %v863_v11 = vpop.permute.xlu0 %862  ;;  %v6412_v12 = vcombine.high %v6410_v9, %v6410_v9  ;;  %v14852_v16 = vrot.slane %v6410_v9, %v14210_v32  ;;  %v14855_v17 = vrot.slane %v6411_v10, %v14210_v32  ;;  %v3750_v47 = vcombine.high %v14817_v37, %v14817_v37  ;;  %v14933_v9 = vld [vmem:[#allocation2 + $0x120] sm:$0xff] }
 0x29c   : > { %939 = vst.msk [vmem:[#allocation3 + $0x78] sm:$0x7f] %vm18692_vm14, %v863_v11  ;;  %v5186_v34 = vcombine.low %v5177_v33, %v5184_v15  ;;  %v2861_v20 = vpop.permute.xlu1 %2860  ;;  %vm18695_vm14 = vcmask 261344   ;;  %v3780_v6 = vcombine.high %v14826_v39, %v14826_v39 }
 0x29d   : > { %1052 = vrot.lane.b32.xlu0 %v973_v8, %s13504_s14  ;;  %v14861_v1 = vrot.slane %v6412_v12, %v14210_v32  ;;  %v7852_v24 = vcombine.high %v14852_v16, %v14852_v16  ;;  %v7978_v36 = vcombine.low %v14849_v13, %v14855_v17  ;;  %2940 = vst.msk [vmem:[#allocation3 + $0x60] sm:$0xff] %vm18693_vm7, %v2861_v20 }
 0x29e   : > { %v5200_v28 = vrot.slane %v5186_v34, %v14210_v32  ;;  %v12821_v38 = vcombine.high %v14849_v13, %v14855_v17  ;;  %3050 = vrot.lane.b32.xlu1 %v14858_v18, %s13516_s9  ;;  %v3778_v8 = vrot.slane %v3750_v47, %v14210_v32  ;;  %v1519_v34 = vld [vmem:[#allocation2 + $0xfb] sm:$0x7f] }
 0x29f   : > { %v2316_v27 = vpop.permute.xlu0 %2315  ;;  %v14876_v41 = vcombine.high %v14861_v1, %v14861_v1  ;;  %v7980_v42 = vcombine.low %v14852_v16, %v14861_v1  ;;  %v7987_v43 = vrot.slane %v7978_v36, %v14210_v32  ;;  %v8008_v45 = vrot.slane %v7852_v24, %v14210_v32 }
 0x2a0   : > { %2394 = vst.msk [vmem:[#allocation3 + $0x68] sm:$0x7f] %vm18694_vm11, %v2316_v27  ;;  %v7994_v49 = vrot.slane %v12821_v38, %v14210_v32  ;;  %v1589_v48 = vpop.permute.xlu1 %1588  ;;  %v5201_v50 = vcombine.low %v5193_v44, %v5200_v28  ;;  %vm9415_vm11 = vcmask 522240   ;;  %v5202_v24 = vcombine.low %v3778_v8, %v3780_v6 }
 0x2a1   : > { %2506 = vrot.lane.b32.xlu0 %v2429_v21, %s13512_s24  ;;  %v8001_v23 = vrot.slane %v7980_v42, %v14210_v32  ;;  %v9655_v53 = vmul.f32 0.2, %v14876_v41  ;;  %1666 = vst.msk [vmem:[#allocation3 + $0x70] sm:$0xff] %vm18695_vm14, %v1589_v48  ;;  %vm9459_vm7 = vcmp.ge.f32.partialorder %v14876_v41, 0.0  ;;  %vm18697_vm14 = vcmask 489920  }
 0x2a2   : > { %v8009_v54 = vcombine.low %v7987_v43, %v7994_v49  ;;  %2143 = vrot.lane.b32.xlu1 %v14830_v19, %s13510_s22  ;;  %13138 = vmatmul.mubr.msk.f32.gmra.mrb[20].mxu0 %vm6049_vm8, %v5201_v50  ;;  %v2975_v42 = vld [vmem:[#allocation2 + $0x113] sm:$0x7f]  ;;  %v5212_v26 = vrot.slane %v5202_v24, %v14210_v32  ;;  %v6392_v48 = vcombine.high %v14719_v22, %v14719_v22  ;;  %v9649_v6 = vmul.f32 0.2, %v14849_v13 }
 0x2a3   : > { %v1045_v25 = vpop.permute.xlu0 %1044  ;;  %v8010_v56 = vcombine.low %v8001_v23, %v8008_v45  ;;  %13140 = vmatprep.mubr.msk.f32.mxu0 %vm18619_vm10, %v18589_v0  ;;  %v14904_v30 = vsel %vm9459_vm7, %v14876_v41, %v9655_v53  ;;  %vm18698_vm7 = vcmask 359744   ;;  %v6393_v50 = vcombine.high %v14726_v40, %v14726_v40 }
 0x2a4   : > { %1121 = vst.msk [vmem:[#allocation3 + $0x78] sm:$0x7f] %vm18588_vm13, %v1045_v25  ;;  %v3043_v59 = vpop.permute.xlu1 %3042  ;;  %v8017_v61 = vrot.slane %v8009_v54, %v14210_v32  ;;  %v6394_v22 = vcombine.high %v14722_v7, %v14722_v7  ;;  %v6395_v25 = vcombine.high %v14729_v3, %v14729_v3 }
 0x2a5   : > { %1234 = vrot.lane.b32.xlu0 %v1155_v51, %s13506_s18  ;;  %v8024_v62 = vrot.slane %v8010_v56, %v14210_v32  ;;  %3122 = vst.msk [vmem:[#allocation3 + $0x60] sm:$0xff] %vm3108_vm15, %v3043_v59  ;;  %v14960_v51 = vld [vmem:[#allocation2 + $0x121] sm:$0xff]  ;;  %v9645_v56 = vmul.f32 0.2, %v14726_v40  ;;  %v9647_v47 = vmul.f32 0.2, %v6393_v50 }
 0x2a6   : > { %872 = vrot.lane.b32.xlu1 %v14680_v29, %s13503_s13 }
 0x2a7   : > { %v2499_v63 = vpop.permute.xlu0 %2498  ;;  %v8025_v2 = vcombine.low %v8017_v61, %v8024_v62  ;;  %v9642_v61 = vmul.f32 0.2, %v14722_v7  ;;  %v9643_v62 = vmul.f32 0.2, %v6392_v48 }
 0x2a8   : > { %2577 = vst.msk [vmem:[#allocation3 + $0x68] sm:$0x7f] %vm2564_vm2, %v2499_v63  ;;  %v1772_v46 = vpop.permute.xlu1 %1771  ;;  %v9646_v63 = vmul.f32 0.2, %v14729_v3 }
 0x2a9   : > { %2688 = vrot.lane.b32.xlu0 %v2611_v60, %s13513_s25  ;;  %9416 = vst.msk [vmem:[%s14771_s12 + $0x8] sm:$0x7f] %vm9415_vm11, %v8025_v2  ;;  %v793_v2 = vld [vmem:[#allocation2 + $0xfb] sm:$0x7f] }
 0x2aa   : > { %1849 = vst.msk [vmem:[#allocation3 + $0x70] sm:$0xff] %vm18696_vm12, %v1772_v46  ;;  %2325 = vrot.lane.b32.xlu1 %v14858_v18, %s13511_s23  ;;  %vm9449_vm12 = vcmp.ge.f32.partialorder %v14726_v40, 0.0 }
 0x2ab   : > { %v1954_v33 = vpop.permute.xlu0 %1953  ;;  %v14987_v8 = vsel %vm9449_vm12, %v14726_v40, %v9645_v56  ;;  %vm18705_vm12 = vcmask 458144  }
 0x2ac   : > { %2031 = vst.msk [vmem:[#allocation3 + $0x70] sm:$0xff] %vm18585_vm3, %v1954_v33  ;;  %v1227_v29 = vpop.permute.xlu1 %1226  ;;  %v3152_v55 = vld [vmem:[#allocation3 + $0x60] sm:$0xff]  ;;  %vm9452_vm3 = vcmp.ge.f32.partialorder %v6395_v25, 0.0 }
 0x2ad   : > { %1416 = vrot.lane.b32.xlu0 %v1337_v35, %s13505_s17  ;;  %1303 = vst.msk [vmem:[#allocation3 + $0x78] sm:$0x7f] %vm18605_vm1, %v1227_v29  ;;  %v3782_v15 = vcombine.high %v3152_v55, %v3152_v55  ;;  %v3789_v37 = vrot.slane %v3152_v55, %v14210_v32  ;;  %v9644_v29 = vmul.f32 0.2, %v6394_v22 }
 0x2ae   : > { %1054 = vrot.lane.b32.xlu1 %v14791_v14, %s13504_s14 }
 0x2af   : > { %v1409_v4 = vpop.permute.xlu0 %1408  ;;  %v3796_v10 = vrot.slane %v3782_v15, %v14210_v32  ;;  %v3797_v11 = vcombine.high %v3789_v37, %v3789_v37  ;;  %v3805_v20 = vrot.slane %v3789_v37, %v14210_v32 }
 0x2b0   : > { %1485 = vst.msk [vmem:[#allocation3 + $0x78] sm:$0x7f] %vm18583_vm5, %v1409_v4  ;;  %v2681_v52 = vpop.permute.xlu1 %2680  ;;  %vm9450_vm5 = vcmp.ge.f32.partialorder %v14729_v3, 0.0 }
 0x2b1   : > { %2870 = vrot.lane.b32.xlu0 %v2793_v5, %s13514_s26  ;;  %2759 = vst.msk [vmem:[#allocation3 + $0x68] sm:$0x7f] %vm18586_vm4, %v2681_v52  ;;  %v3798_v12 = vcombine.high %v3796_v10, %v3796_v10  ;;  %v3819_v21 = vrot.slane %v3797_v11, %v14210_v32  ;;  %v14944_v14 = vrot.slane %v3796_v10, %v14210_v32  ;;  %v9648_v5 = vmul.f32 0.2, %v6395_v25 }
 0x2b2   : > { %2508 = vrot.lane.b32.xlu1 %v14933_v9, %s13512_s24  ;;  %vm18700_vm4 = vcmask 293120   ;;  %v15006_v52 = vsel %vm9450_vm5, %v14729_v3, %v9646_v63  ;;  %vm18701_vm5 = vcmask 162944  }
 0x2b3   : > { %v2863_v39 = vpop.permute.xlu0 %2862  ;;  %v14947_v36 = vrot.slane %v3798_v12, %v14210_v32  ;;  %v5203_v27 = vcombine.low %v3805_v20, %v3819_v21  ;;  %v12775_v28 = vcombine.high %v3805_v20, %v3819_v21  ;;  %v1884_v20 = vld [vmem:[#allocation2 + $0x111] sm:$0x7f]  ;;  %v15022_v21 = vsel %vm9452_vm3, %v6395_v25, %v9648_v5 }
 0x2b4   : > { %2941 = vst.msk [vmem:[#allocation3 + $0x68] sm:$0x7f] %vm18697_vm14, %v2863_v39  ;;  %v2136_v38 = vpop.permute.xlu1 %2135  ;;  %vm18699_vm14 = vcmask 130144   ;;  %v975_v25 = vld [vmem:[#allocation2 + $0x110] sm:$0x7f]  ;;  %vm18704_vm3 = vcmask 425344  }
 0x2b5   : > { %1598 = vrot.lane.b32.xlu0 %v1519_v34, %s13507_s19  ;;  %2213 = vst.msk [vmem:[#allocation3 + $0x70] sm:$0xff] %vm18698_vm7, %v2136_v38  ;;  %v5205_v44 = vcombine.low %v14944_v14, %v14947_v36  ;;  %v5219_v49 = vrot.slane %v5203_v27, %v14210_v32  ;;  %v5226_v23 = vrot.slane %v12775_v28, %v14210_v32  ;;  %vm9446_vm7 = vcmp.ge.f32.partialorder %v14722_v7, 0.0 }
 0x2b6   : > { %1236 = vrot.lane.b32.xlu1 %v14795_v58, %s13506_s18  ;;  %v1702_v58 = vld [vmem:[#allocation2 + $0x110] sm:$0x7f]  ;;  %v14996_v37 = vsel %vm9446_vm7, %v14722_v7, %v9642_v61  ;;  %v15010_v7 = vld [vmem:[#allocation2 + $0x122] sm:$0xff]  ;;  %v9654_v34 = vmul.f32 0.2, %v14861_v1 }
 0x2b7   : > { %v1591_v43 = vpop.permute.xlu0 %1590  ;;  %v5233_v45 = vrot.slane %v5205_v44, %v14210_v32  ;;  %v5234_v53 = vcombine.low %v5212_v26, %v5219_v49  ;;  %v15037_v44 = vmul.f32 0.2, %v14852_v16 }
 0x2b8   : > { %1667 = vst.msk [vmem:[#allocation3 + $0x78] sm:$0x7f] %vm18582_vm6, %v1591_v43  ;;  %v865_v54 = vpop.permute.xlu1 %864  ;;  %vm9447_vm6 = vcmp.ge.f32.partialorder %v6392_v48, 0.0  ;;  %v15034_v43 = vcombine.high %v14855_v17, %v14855_v17 }
 0x2b9   : > { %3052 = vrot.lane.b32.xlu0 %v2975_v42, %s13516_s9  ;;  %940 = vst.msk [vmem:[#allocation3 + $0x80] sm:$0xff] %vm18699_vm14, %v865_v54  ;;  %v5235_v60 = vcombine.low %v5226_v23, %v5233_v45  ;;  %v5242_v46 = vrot.slane %v5234_v53, %v14210_v32  ;;  %vm9451_vm14 = vcmp.ge.f32.partialorder %v6393_v50, 0.0  ;;  %v14999_v10 = vsel %vm9447_vm6, %v6392_v48, %v9643_v62 }
 0x2ba   : > { %2690 = vrot.lane.b32.xlu1 %v14960_v51, %s13513_s25  ;;  %v15014_v39 = vsel %vm9451_vm14, %v6393_v50, %v9647_v47  ;;  %v15030_v42 = vcombine.high %v14849_v13, %v14849_v13  ;;  %v9650_v54 = vmul.f32 0.2, %v14855_v17 }
 0x2bb   : > { %v3045_v59 = vpop.permute.xlu0 %3044  ;;  %v5249_v35 = vrot.slane %v5235_v60, %v14210_v32 }
 0x2bc   : > { %3123 = vst.msk [vmem:[#allocation3 + $0x68] sm:$0x7f] %vm18584_vm9, %v3045_v59  ;;  %v2318_v33 = vpop.permute.xlu1 %2317  ;;  %vm9448_vm9 = vcmp.ge.f32.partialorder %v6394_v22, 0.0  ;;  %vm9455_vm7 = vcmp.ge.f32.partialorder %v15030_v42, 0.0  ;;  %v9651_v5 = vmul.f32 0.2, %v15030_v42 }
 0x2bd   : > { %1781 = vrot.lane.b32.xlu0 %v1702_v58, %s13508_s20  ;;  %2395 = vst.msk [vmem:[#allocation3 + $0x70] sm:$0xff] %vm18587_vm0, %v2318_v33  ;;  %v5250_v4 = vcombine.low %v5242_v46, %v5249_v35  ;;  %vm9453_vm0 = vcmp.ge.f32.partialorder %v14849_v13, 0.0  ;;  %v15019_v3 = vsel %vm9448_vm9, %v6394_v22, %v9644_v29  ;;  %vm18702_vm9 = vcmask 195744   ;;  %v15076_v35 = vld [vmem:[#allocation2 + $0x123] sm:$0xff]  ;;  %v2066_v33 = vld [vmem:[#allocation2 + $0x112] sm:$0x7f] }
 0x2be   : > { %1418 = vrot.lane.b32.xlu1 %v14830_v19, %s13505_s17  ;;  %v6184_v15 = vpop.f32.mrb[4].mxu0  ;;  %v15042_v26 = vsel %vm9453_vm0, %v14849_v13, %v9649_v6  ;;  %vm9454_vm0 = vcmp.ge.f32.partialorder %v14855_v17, 0.0 }
 0x2bf   : > { %v1774_v55 = vpop.permute.xlu0 %1773  ;;  %v6444_v40 = vcombine.high %v6184_v15, %v6184_v15  ;;  %v6451_v11 = vrot.slane %v6184_v15, %v14210_v32  ;;  %v13115_v19 = vpop.f32.mrb[5].mxu0  ;;  %13141 = vmatmul.mubr.msk.f32.gmra.mrb[22].mxu0 %vm6049_vm8, %v5250_v4 }
 0x2c0   : > { %1850 = vst.msk [vmem:[#allocation3 + $0x78] sm:$0x7f] %vm18700_vm4, %v1774_v55  ;;  %v1047_v12 = vpop.permute.xlu1 %1046  ;;  %13143 = vmatprep.mubr.msk.f32.mxu0 %vm18619_vm10, %v18589_v0  ;;  %vm9458_vm4 = vcmp.ge.f32.partialorder %v14861_v1, 0.0  ;;  %v15082_v55 = vsel %vm9454_vm0, %v14855_v17, %v9650_v54  ;;  %v12776_v17 = vcombine.high %v14944_v14, %v14947_v36  ;;  %vm18708_vm0 = vcmask 228544  }
 0x2c1   : > { %874 = vrot.lane.b32.xlu0 %v793_v2, %s13503_s13  ;;  %v6458_v24 = vrot.slane %v6444_v40, %v14210_v32  ;;  %v6459_v27 = vcombine.high %v6451_v11, %v6451_v11  ;;  %v6467_v28 = vrot.slane %v6451_v11, %v14210_v32  ;;  %1122 = vst.msk [vmem:[#allocation3 + $0x80] sm:$0xff] %vm18701_vm5, %v1047_v12  ;;  %vm18706_vm5 = vcmask 325920  }
 0x2c2   : > { %2872 = vrot.lane.b32.xlu1 %v15010_v7, %s13514_s26  ;;  %v15055_v13 = vsel %vm9458_vm4, %v14861_v1, %v9654_v34 }
 0x2c3   : > { %v1229_v38 = vpop.permute.xlu0 %1228  ;;  %v6460_v49 = vcombine.high %v6458_v24, %v6458_v24  ;;  %v6474_v48 = vrot.slane %v6458_v24, %v14210_v32  ;;  %v6481_v23 = vrot.slane %v6459_v27, %v14210_v32  ;;  %v15049_v45 = vcombine.high %v6467_v28, %v6467_v28  ;;  %v3153_v53 = vld [vmem:[#allocation3 + $0x68] sm:$0x7f]  ;;  %18703 = vst [vmem:[#allocation9_spill] sm:$0xff] %v15055_v13 }
 0x2c4   : > { %1304 = vst.msk [vmem:[#allocation3 + $0x80] sm:$0xff] %vm18702_vm9, %v1229_v38  ;;  %v8026_v50 = vcombine.low %v14876_v41, %v6467_v28  ;;  %v2501_v22 = vpop.permute.xlu1 %2500  ;;  %vm9460_vm6 = vcmp.ge.f32.partialorder %v6467_v28, 0.0  ;;  %v9656_v61 = vmul.f32 0.2, %v6467_v28  ;;  %v3831_v41 = vcombine.high %v3153_v53, %v3153_v53 }
 0x2c5   : > { %1963 = vrot.lane.b32.xlu0 %v1884_v20, %s13509_s21  ;;  %v6488_v58 = vrot.slane %v6460_v49, %v14210_v32  ;;  %v15061_v56 = vcombine.high %v6474_v48, %v6474_v48  ;;  %v15063_v59 = vcombine.high %v6481_v23, %v6481_v23  ;;  %v8027_v60 = vcombine.low %v6481_v23, %v15049_v45 }
 0x2c6   : > { %2578 = vst.msk [vmem:[#allocation3 + $0x70] sm:$0xff] %vm18704_vm3, %v2501_v22  ;;  %1600 = vrot.lane.b32.xlu1 %v14858_v18, %s13507_s19  ;;  %v8036_v2 = vrot.slane %v8026_v50, %v14210_v32  ;;  %vm9461_vm14 = vcmp.ge.f32.partialorder %v6481_v23, 0.0  ;;  %v9657_v47 = vmul.f32 0.2, %v6481_v23  ;;  %vm9464_vm4 = vcmp.ge.f32.partialorder %v6474_v48, 0.0 }
 0x2c7   : > { %v2683_v1 = vpop.permute.xlu0 %2682  ;;  %v8028_v62 = vcombine.low %v15063_v59, %v6474_v48  ;;  %v8029_v63 = vcombine.low %v6488_v58, %v15061_v56  ;;  %v8043_v46 = vrot.slane %v8027_v60, %v14210_v32  ;;  %vm9465_vm9 = vcmp.ge.f32.partialorder %v6488_v58, 0.0 }
 0x2c8   : > { %2760 = vst.msk [vmem:[#allocation3 + $0x70] sm:$0xff] %vm18705_vm12, %v2683_v1  ;;  %v1956_v29 = vpop.permute.xlu1 %1955  ;;  %v9660_v11 = vmul.f32 0.2, %v6474_v48  ;;  %v15088_v19 = vsel %vm9460_vm6, %v6467_v28, %v9656_v61  ;;  %vm18707_vm3 = vcmask 358720   ;;  %v9661_v12 = vmul.f32 0.2, %v6488_v58 }
 0x2c9   : > { %1056 = vrot.lane.b32.xlu0 %v975_v25, %s13504_s14  ;;  %v8050_v4 = vrot.slane %v8028_v62, %v14210_v32  ;;  %v8057_v6 = vrot.slane %v8029_v63, %v14210_v32  ;;  %v8058_v15 = vcombine.low %v8036_v2, %v8043_v46  ;;  %2032 = vst.msk [vmem:[#allocation3 + $0x78] sm:$0x7f] %vm18706_vm5, %v1956_v29  ;;  %vm18709_vm6 = vcmask 129120   ;;  %v1157_v2 = vld [vmem:[#allocation2 + $0x111] sm:$0x7f] }
 0x2ca   : > { %3054 = vrot.lane.b32.xlu1 %v15076_v35, %s13516_s9  ;;  %v3838_v20 = vrot.slane %v3153_v53, %v14210_v32  ;;  %v15098_v24 = vrot.slane %v3831_v41, %v14210_v32  ;;  %v15102_v28 = vsel %vm9461_vm14, %v6481_v23, %v9657_v47  ;;  %v15105_v38 = vsel %vm9464_vm4, %v6474_v48, %v9660_v11 }
 0x2cb   : > { %v2138_v40 = vpop.permute.xlu0 %2137  ;;  %v8059_v34 = vcombine.low %v8050_v4, %v8057_v6  ;;  %v8066_v27 = vrot.slane %v8058_v15, %v14210_v32  ;;  %v15111_v53 = vsel %vm9465_vm9, %v6488_v58, %v9661_v12  ;;  %v15125_v61 = vmul.f32 0.2, %v15034_v43  ;;  %v1339_v6 = vld [vmem:[#allocation2 + $0x112] sm:$0x7f] }
 0x2cc   : > { %2214 = vst.msk [vmem:[#allocation3 + $0x78] sm:$0x7f] %vm18707_vm3, %v2138_v40  ;;  %v1411_v36 = vpop.permute.xlu1 %1410  ;;  %v6189_v49 = vpop.f32.mrb[6].mxu0  ;;  %v15127_v41 = vcombine.high %v6488_v58, %v6488_v58  ;;  %v15132_v63 = vsel %vm9455_vm7, %v15030_v42, %v9651_v5  ;;  %v3846_v46 = vcombine.high %v3838_v20, %v3838_v20  ;;  %v15139_v58 = vrot.slane %v12776_v17, %v14210_v32 }
 0x2cd   : > { %2145 = vrot.lane.b32.xlu0 %v2066_v33, %s13510_s22  ;;  %v8073_v50 = vrot.slane %v8059_v34, %v14210_v32  ;;  %1486 = vst.msk [vmem:[#allocation3 + $0x80] sm:$0xff] %vm18708_vm0, %v1411_v36  ;;  %v13118_v25 = vpop.f32.mrb[7].mxu0  ;;  %v6493_v60 = vcombine.high %v6189_v49, %v6189_v49  ;;  %v6500_v1 = vrot.slane %v6189_v49, %v14210_v32  ;;  %18710 = vst [vmem:[#allocation10_spill] sm:$0xff] %v15132_v63  ;;  %vm18711_vm14 = vcmask 490944  }
 0x2ce   : > { %1783 = vrot.lane.b32.xlu1 %v14933_v9, %s13508_s20  ;;  %vm9462_vm12 = vcmp.ge.f32.partialorder %v15049_v45, 0.0  ;;  %vm9463_vm7 = vcmp.ge.f32.partialorder %v15063_v59, 0.0  ;;  %v9658_v42 = vmul.f32 0.2, %v15049_v45  ;;  %v3847_v15 = vcombine.high %v15098_v24, %v15098_v24 }
 0x2cf   : > { %v867_v48 = vpop.permute.xlu0 %866  ;;  %v8074_v62 = vcombine.low %v8066_v27, %v8073_v50  ;;  %v6507_v33 = vrot.slane %v6493_v60, %v14210_v32  ;;  %v6508_v47 = vcombine.high %v6500_v1, %v6500_v1  ;;  %v6516_v29 = vrot.slane %v6500_v1, %v14210_v32  ;;  %v2248_v50 = vld [vmem:[#allocation2 + $0x113] sm:$0x7f] }
 0x2d0   : > { %941 = vst.msk [vmem:[#allocation3 + $0x88] sm:$0x7f] %vm18709_vm6, %v867_v48  ;;  %v2865_v4 = vpop.permute.xlu1 %2864  ;;  %vm9466_vm4 = vcmp.ge.f32.partialorder %v15061_v56, 0.0  ;;  %v9659_v40 = vmul.f32 0.2, %v15063_v59  ;;  %vm18712_vm5 = vcmask 391520   ;;  %v3854_v36 = vrot.slane %v3838_v20, %v14210_v32 }
 0x2d1   : > { %1965 = vrot.lane.b32.xlu0 %v14960_v51, %s13509_s21  ;;  %9417 = vst.msk [vmem:[%s14771_s12 + $0x10] sm:$0xff] %vm6049_vm8, %v8074_v62  ;;  %v6509_v11 = vcombine.high %v6507_v33, %v6507_v33  ;;  %v6530_v17 = vrot.slane %v6508_v47, %v14210_v32  ;;  %v15152_v34 = vcombine.high %v6516_v29, %v6516_v29  ;;  %vm9467_vm9 = vcmp.ge.f32.partialorder %v15127_v41, 0.0 }
 0x2d2   : > { %2942 = vst.msk [vmem:[#allocation3 + $0x70] sm:$0xff] %vm18711_vm14, %v2865_v4  ;;  %1238 = vrot.lane.b32.xlu1 %v1157_v2, %s13506_s18  ;;  %v15158_v12 = vmul.f32 0.2, %v15061_v56  ;;  %v8075_v27 = vcombine.low %v15127_v41, %v6516_v29  ;;  %v3868_v49 = vrot.slane %v3846_v46, %v14210_v32  ;;  %vm9457_vm3 = vcmp.ge.f32.partialorder %v14852_v16, 0.0  ;;  %v2431_v2 = vld [vmem:[#allocation2 + $0x128] sm:$0x7f] }
 0x2d3   : > { %v2320_v5 = vpop.permute.xlu0 %2319  ;;  %v15166_v48 = vrot.slane %v6507_v33, %v14210_v32  ;;  %v15169_v25 = vrot.slane %v6509_v11, %v14210_v32  ;;  %v15171_v60 = vcombine.high %v6530_v17, %v6530_v17  ;;  %v8076_v1 = vcombine.low %v6530_v17, %v15152_v34 }
 0x2d4   : > { %2396 = vst.msk [vmem:[#allocation3 + $0x78] sm:$0x7f] %vm18712_vm5, %v2320_v5  ;;  %v1593_v62 = vpop.permute.xlu1 %1592  ;;  %v9663_v47 = vmul.f32 0.2, %v15127_v41  ;;  %v9664_v20 = vmul.f32 0.2, %v6516_v29  ;;  %v15178_v46 = vrot.slane %v15098_v24, %v14210_v32  ;;  %v3875_v33 = vrot.slane %v3847_v15, %v14210_v32 }
 0x2d5   : > { %1420 = vrot.lane.b32.xlu0 %v1339_v6, %s13505_s17  ;;  %vm18713_vm0 = vcmask 261344   ;;  %vm9456_vm6 = vcmp.ge.f32.partialorder %v15034_v43, 0.0  ;;  %v8077_v6 = vcombine.low %v15171_v60, %v15166_v48  ;;  %v8084_v5 = vrot.slane %v8075_v27, %v14210_v32 }
 0x2d6   : > { %1668 = vst.msk [vmem:[#allocation3 + $0x80] sm:$0xff] %vm18713_vm0, %v1593_v62  ;;  %v8091_v11 = vrot.slane %v8076_v1, %v14210_v32  ;;  %vm9468_vm14 = vcmp.ge.f32.partialorder %v6516_v29, 0.0  ;;  %2327 = vrot.lane.b32.xlu1 %v2248_v50, %s13511_s23  ;;  %vm9469_vm5 = vcmp.ge.f32.partialorder %v6530_v17, 0.0  ;;  %v9665_v24 = vmul.f32 0.2, %v6530_v17 }
 0x2d7   : > { %v1049_v4 = vpop.permute.xlu0 %1048  ;;  %v5252_v62 = vcombine.low %v3854_v36, %v3868_v49  ;;  %v15192_v15 = vsel %vm9462_vm12, %v15049_v45, %v9658_v42  ;;  %v8098_v23 = vrot.slane %v8077_v6, %v14210_v32  ;;  %v8105_v27 = vrot.slane %v15169_v25, %v14210_v32  ;;  %v1521_v50 = vld [vmem:[#allocation2 + $0x113] sm:$0x7f] }
 0x2d8   : > { %1123 = vst.msk [vmem:[#allocation3 + $0x88] sm:$0x7f] %vm18588_vm13, %v1049_v4  ;;  %v8106_v1 = vcombine.low %v8084_v5, %v8091_v11  ;;  %vm9472_vm0 = vcmp.ge.f32.partialorder %v15166_v48, 0.0  ;;  %v3047_v4 = vpop.permute.xlu1 %3046  ;;  %vm9470_vm13 = vcmp.ge.f32.partialorder %v15152_v34, 0.0  ;;  %v9668_v54 = vmul.f32 0.2, %v15166_v48 }
 0x2d9   : > { %2510 = vrot.lane.b32.xlu0 %v2431_v2, %s13512_s24  ;;  %v15201_v2 = vsel %vm9468_vm14, %v6516_v29, %v9664_v20  ;;  %3124 = vst.msk [vmem:[#allocation3 + $0x70] sm:$0xff] %vm3108_vm15, %v3047_v4  ;;  %v15207_v42 = vsel %vm9463_vm7, %v15063_v59, %v9659_v40  ;;  %v8107_v6 = vcombine.low %v8098_v23, %v8105_v27  ;;  %v9666_v5 = vmul.f32 0.2, %v15152_v34  ;;  %v2613_v4 = vld [vmem:[#allocation2 + $0x129] sm:$0x7f] }
 0x2da   : > { %v15211_v11 = vsel %vm9469_vm5, %v6530_v17, %v9665_v24  ;;  %2147 = vrot.lane.b32.xlu1 %v15010_v7, %s13510_s22  ;;  %v8114_v29 = vrot.slane %v8106_v1, %v14210_v32  ;;  %v15222_v59 = vsel %vm9472_vm0, %v15166_v48, %v9668_v54  ;;  %v12777_v40 = vcombine.high %v3854_v36, %v3868_v49 }
 0x2db   : > { %v2503_v45 = vpop.permute.xlu0 %2502  ;;  %18714 = vst [vmem:[#allocation11_spill] sm:$0xff] %v15211_v11  ;;  %18715 = vst [vmem:[#allocation12_spill] sm:$0xff] %v15222_v59  ;;  %v8121_v17 = vrot.slane %v8107_v6, %v14210_v32  ;;  %v5254_v24 = vcombine.low %v15178_v46, %v3875_v33  ;;  %v5268_v27 = vrot.slane %v5252_v62, %v14210_v32  ;;  %vm9471_vm12 = vcmp.ge.f32.partialorder %v15171_v60, 0.0 }
 0x2dc   : > { %2579 = vst.msk [vmem:[#allocation3 + $0x78] sm:$0x7f] %vm2564_vm2, %v2503_v45  ;;  %v1776_v1 = vpop.permute.xlu1 %1775  ;;  %v9667_v54 = vmul.f32 0.2, %v15171_v60  ;;  %v5275_v36 = vrot.slane %v12777_v40, %v14210_v32  ;;  %vm18716_vm7 = vcmask 294144   ;;  %v15250_v6 = vsel %vm9467_vm9, %v15127_v41, %v9663_v47 }
 0x2dd   : > { %1602 = vrot.lane.b32.xlu0 %v1521_v50, %s13507_s19  ;;  %1851 = vst.msk [vmem:[#allocation3 + $0x80] sm:$0xff] %vm18716_vm7, %v1776_v1  ;;  %v15240_v50 = vsel %vm9466_vm4, %v15061_v56, %v15158_v12  ;;  %v8122_v33 = vcombine.low %v8114_v29, %v8121_v17  ;;  %v5282_v62 = vrot.slane %v5254_v24, %v14210_v32  ;;  %v1704_v29 = vld [vmem:[#allocation2 + $0x128] sm:$0x7f]  ;;  %vm18720_vm4 = vcmask 130144  }
 0x2de   : > { %v5283_v45 = vcombine.low %v15139_v58, %v5268_v27  ;;  %876 = vrot.lane.b32.xlu1 %v14858_v18, %s13503_s13  ;;  %v15256_v56 = vsel %vm9457_vm3, %v14852_v16, %v15037_v44  ;;  %v15273_v44 = vsel %vm9456_vm6, %v15034_v43, %v15125_v61  ;;  %v15278_v17 = vsel %vm9470_vm13, %v15152_v34, %v9666_v5  ;;  %v2977_v16 = vld [vmem:[#allocation2 + $0x12b] sm:$0x7f] }
 0x2df   : > { %v1231_v49 = vpop.permute.xlu0 %1230  ;;  %18717 = vst [vmem:[#allocation13_spill] sm:$0xff] %v15256_v56  ;;  %9418 = vst.msk [vmem:[%s14771_s12 + $0x18] sm:$0x7f] %vm9415_vm11, %v8122_v33  ;;  %v5284_v41 = vcombine.low %v5275_v36, %v5282_v62  ;;  %vm18722_vm13 = vcmask 457120   ;;  %vm18723_vm9 = vcmask 326944   ;;  %vm18724_vm3 = vcmask 227520  }
 0x2e0   : > { %1305 = vst.msk [vmem:[#allocation3 + $0x88] sm:$0x7f] %vm18605_vm1, %v1231_v49  ;;  %v869_v47 = vpop.permute.xlu1 %868  ;;  %v3154_v40 = vld [vmem:[#allocation3 + $0x70] sm:$0xff]  ;;  %18718 = vst [vmem:[#allocation14_spill] sm:$0xff] %v15273_v44  ;;  %v5291_v61 = vrot.slane %v5283_v45, %v14210_v32  ;;  %v2795_v45 = vld [vmem:[#allocation2 + $0x12a] sm:$0x7f] }
 0x2e1   : > { %2692 = vrot.lane.b32.xlu0 %v2613_v4, %s13513_s25  ;;  %18719 = vst [vmem:[#allocation15_spill] sm:$0xff] %v15278_v17  ;;  %942 = vst.msk [vmem:[#allocation3 + $0x90] sm:$0xff] %vm18720_vm4, %v869_v47  ;;  %v3879_v27 = vcombine.high %v3154_v40, %v3154_v40  ;;  %v3886_v1 = vrot.slane %v3154_v40, %v14210_v32  ;;  %v15285_v4 = vsel %vm9471_vm12, %v15171_v60, %v9667_v54  ;;  %vm18725_vm6 = vcmask 31744  }
 0x2e2   : > { %18721 = vst [vmem:[#allocation16_spill] sm:$0xff] %v15285_v4  ;;  %v5298_v36 = vrot.slane %v5284_v41, %v14210_v32  ;;  %2329 = vrot.lane.b32.xlu1 %v15076_v35, %s13511_s23  ;;  %vm18726_vm14 = vcmask 162944   ;;  %vm18727_vm5 = vcmask 489920   ;;  %vm18728_vm0 = vcmask 359744  }
 0x2e3   : > { %v2685_v24 = vpop.permute.xlu0 %2684  ;;  %v3893_v60 = vrot.slane %v3879_v27, %v14210_v32  ;;  %v3894_v5 = vcombine.high %v3886_v1, %v3886_v1  ;;  %v3902_v54 = vrot.slane %v3886_v1, %v14210_v32  ;;  %vm18729_vm12 = vcmask 260320  }
 0x2e4   : > { %2761 = vst.msk [vmem:[#allocation3 + $0x78] sm:$0x7f] %vm18722_vm13, %v2685_v24  ;;  %v5299_v49 = vcombine.low %v5291_v61, %v5298_v36  ;;  %v1958_v33 = vpop.permute.xlu1 %1957  ;;  %v6194_v62 = vpop.f32.mrb[8].mxu0  ;;  %vm18730_vm7 = vcmask 195744   ;;  %vm18731_vm4 = vcmask 522720   ;;  %vm18732_vm13 = vcmask 392544  }
 0x2e5   : > { %1785 = vrot.lane.b32.xlu0 %v1704_v29, %s13508_s20  ;;  %2033 = vst.msk [vmem:[#allocation3 + $0x80] sm:$0xff] %vm18723_vm9, %v1958_v33  ;;  %v6542_v41 = vcombine.high %v6194_v62, %v6194_v62  ;;  %v6549_v47 = vrot.slane %v6194_v62, %v14210_v32  ;;  %v13121_v24 = vpop.f32.mrb[9].mxu0  ;;  %v3895_v20 = vcombine.high %v3893_v60, %v3893_v60  ;;  %v310_v29 = vld [vmem:[%s13708_s10 + $0xe0] sm:$0xff]  ;;  %v15311_v33 = vld [vmem:[#allocation2 + $0x138] sm:$0xff]  ;;  %vm18733_vm9 = vcmask 293120  }
 0x2e6   : > { %v3909_v34 = vrot.slane %v3893_v60, %v14210_v32  ;;  %13144 = vmatmul.mubr.msk.f32.gmra.mrb[24].mxu0 %vm6049_vm8, %v5299_v49  ;;  %1058 = vrot.lane.b32.xlu1 %v14933_v9, %s13504_s14  ;;  %v3916_v27 = vrot.slane %v3894_v5, %v14210_v32  ;;  %v3924_v1 = vcombine.high %v3902_v54, %v3902_v54  ;;  %v1886_v49 = vld [vmem:[#allocation2 + $0x129] sm:$0x7f] }
 0x2e7   : > { %v1413_v40 = vpop.permute.xlu0 %1412  ;;  %343 = vst.msk [vmem:[#allocation2 + $0x169] sm:$0xff] %vm18725_vm6, %v310_v29  ;;  %v6556_v61 = vrot.slane %v6542_v41, %v14210_v32  ;;  %v6557_v36 = vcombine.high %v6549_v47, %v6549_v47  ;;  %13146 = vmatprep.mubr.msk.f32.mxu0 %vm18619_vm10, %v18589_v0  ;;  %v3877_v9 = vcombine.high %v15178_v46, %v15178_v46 }
 0x2e8   : > { %1487 = vst.msk [vmem:[#allocation3 + $0x88] sm:$0x7f] %vm18724_vm3, %v1413_v40  ;;  %v1051_v60 = vpop.permute.xlu1 %1050  ;;  %v15318_v5 = vrot.slane %v3895_v20, %v14210_v32  ;;  %v3925_v62 = vcombine.high %v3909_v34, %v3909_v34  ;;  %v3926_v40 = vcombine.high %v3916_v27, %v3916_v27  ;;  %v12822_v41 = vcombine.high %v15166_v48, %v15169_v25 }
 0x2e9   : > { %2874 = vrot.lane.b32.xlu0 %v2795_v45, %s13514_s26  ;;  %v6558_v24 = vcombine.high %v6556_v61, %v6556_v61  ;;  %v15323_v45 = vrot.slane %v6549_v47, %v14210_v32  ;;  %v15326_v29 = vrot.slane %v6557_v36, %v14210_v32  ;;  %1124 = vst.msk [vmem:[#allocation3 + $0x90] sm:$0xff] %vm18726_vm14, %v1051_v60  ;;  %vm18734_vm3 = vcmask 228544  }
 0x2ea   : > { %2512 = vrot.lane.b32.xlu1 %v15311_v33, %s13512_s24  ;;  %v5300_v46 = vcombine.low %v3877_v9, %v3902_v54  ;;  %v5301_v20 = vcombine.low %v3916_v27, %v3924_v1  ;;  %v5302_v23 = vcombine.low %v3926_v40, %v3909_v34  ;;  %v15333_v22 = vrot.slane %v6556_v61, %v14210_v32 }
 0x2eb   : > { %v2867_v43 = vpop.permute.xlu0 %2866  ;;  %v15336_v47 = vrot.slane %v6558_v24, %v14210_v32  ;;  %v8124_v36 = vcombine.low %v15323_v45, %v15326_v29  ;;  %v5303_v54 = vcombine.low %v15318_v5, %v3925_v62  ;;  %v8133_v34 = vrot.slane %v12822_v41, %v14210_v32 }
 0x2ec   : > { %2943 = vst.msk [vmem:[#allocation3 + $0x78] sm:$0x7f] %vm18727_vm5, %v2867_v43  ;;  %v12823_v43 = vcombine.high %v15323_v45, %v15326_v29  ;;  %v2140_v60 = vpop.permute.xlu1 %2139  ;;  %v5317_v9 = vrot.slane %v5301_v20, %v14210_v32  ;;  %v5324_v62 = vrot.slane %v5302_v23, %v14210_v32  ;;  %vm18735_vm14 = vcmask 261344  }
 0x2ed   : > { %1967 = vrot.lane.b32.xlu0 %v1886_v49, %s13509_s21  ;;  %v8126_v27 = vcombine.low %v15333_v22, %v15336_v47  ;;  %v8140_v1 = vrot.slane %v8124_v36, %v14210_v32  ;;  %2215 = vst.msk [vmem:[#allocation3 + $0x80] sm:$0xff] %vm18728_vm0, %v2140_v60  ;;  %v5310_v49 = vrot.slane %v5300_v46, %v14210_v32  ;;  %v15358_v36 = vld [vmem:[#allocation2 + $0x139] sm:$0xff]  ;;  %vm18736_vm0 = vcmask 425344  }
 0x2ee   : > { %1240 = vrot.lane.b32.xlu1 %v14960_v51, %s13506_s18  ;;  %v8147_v40 = vrot.slane %v12823_v43, %v14210_v32  ;;  %v5331_v18 = vrot.slane %v5303_v54, %v14210_v32 }
 0x2ef   : > { %v1595_v61 = vpop.permute.xlu0 %1594  ;;  %v8154_v41 = vrot.slane %v8126_v27, %v14210_v32  ;;  %v8155_v24 = vcombine.low %v8133_v34, %v8140_v1  ;;  %v5332_v51 = vcombine.low %v5310_v49, %v5317_v9  ;;  %v795_v27 = vld [vmem:[#allocation2 + $0x113] sm:$0x7f] }
 0x2f0   : > { %1669 = vst.msk [vmem:[#allocation3 + $0x88] sm:$0x7f] %vm18729_vm12, %v1595_v61  ;;  %v1233_v60 = vpop.permute.xlu1 %1232  ;;  %v2068_v61 = vld [vmem:[#allocation2 + $0x12a] sm:$0x7f]  ;;  %v5333_v23 = vcombine.low %v5324_v62, %v5331_v18  ;;  %v6541_v18 = vcombine.high %v15169_v25, %v15169_v25 }
 0x2f1   : > { %3056 = vrot.lane.b32.xlu0 %v2977_v16, %s13516_s9  ;;  %v8156_v12 = vcombine.low %v8147_v40, %v8154_v41  ;;  %1306 = vst.msk [vmem:[#allocation3 + $0x90] sm:$0xff] %vm18730_vm7, %v1233_v60  ;;  %v8163_v16 = vrot.slane %v8155_v24, %v14210_v32  ;;  %v5340_v43 = vrot.slane %v5332_v51, %v14210_v32  ;;  %v2250_v40 = vld [vmem:[#allocation2 + $0x12b] sm:$0x7f]  ;;  %vm18737_vm7 = vcmask 458144  }
 0x2f2   : > { %2694 = vrot.lane.b32.xlu1 %v15358_v36, %s13513_s25  ;;  %v5347_v54 = vrot.slane %v5333_v23, %v14210_v32  ;;  %v311_v41 = vld [vmem:[%s13708_s10 + $0xe8] sm:$0xff]  ;;  %v6539_v24 = vcombine.high %v15166_v48, %v15166_v48  ;;  %vm9474_vm5 = vcmp.ge.f32.partialorder %v6541_v18, 0.0 }
 0x2f3   : > { %v3049_v46 = vpop.permute.xlu0 %3048  ;;  %v8170_v20 = vrot.slane %v8156_v12, %v14210_v32  ;;  %v15377_v12 = vld [vmem:[#allocation2 + $0x13a] sm:$0xff]  ;;  %344 = vst.msk [vmem:[#allocation2 + $0x171] sm:$0xff] %vm18725_vm6, %v311_v41 }
 0x2f4   : > { %3125 = vst.msk [vmem:[#allocation3 + $0x78] sm:$0x7f] %vm18731_vm4, %v3049_v46  ;;  %v2322_v34 = vpop.permute.xlu1 %2321  ;;  %v5348_v9 = vcombine.low %v5340_v43, %v5347_v54  ;;  %v977_v46 = vld [vmem:[#allocation2 + $0x128] sm:$0x7f]  ;;  %v9670_v43 = vmul.f32 0.2, %v6541_v18 }
 0x2f5   : > { %2149 = vrot.lane.b32.xlu0 %v2068_v61, %s13510_s22  ;;  %v8171_v1 = vcombine.low %v8163_v16, %v8170_v20  ;;  %2397 = vst.msk [vmem:[#allocation3 + $0x80] sm:$0xff] %vm18732_vm13, %v2322_v34  ;;  %vm9473_vm12 = vcmp.ge.f32.partialorder %v6539_v24, 0.0  ;;  %vm18738_vm4 = vcmask 325920   ;;  %vm18739_vm13 = vcmask 358720  }
 0x2f6   : > { %1422 = vrot.lane.b32.xlu1 %v15010_v7, %s13505_s17  ;;  %13147 = vmatmul.mubr.msk.f32.gmra.mrb[26].mxu0 %vm6049_vm8, %v5348_v9 }
 0x2f7   : > { %v1778_v49 = vpop.permute.xlu0 %1777  ;;  %9419 = vst.msk [vmem:[%s14771_s12 + $0x20] sm:$0xff] %vm6049_vm8, %v8171_v1  ;;  %13149 = vmatprep.mubr.msk.f32.mxu0 %vm18619_vm10, %v18589_v0 }
 0x2f8   : > { %1852 = vst.msk [vmem:[#allocation3 + $0x88] sm:$0x7f] %vm18733_vm9, %v1778_v49  ;;  %v1415_v62 = vpop.permute.xlu1 %1414  ;;  %v9669_v49 = vmul.f32 0.2, %v6539_v24  ;;  %vm9475_vm9 = vcmp.ge.f32.partialorder %v15323_v45, 0.0 }
 0x2f9   : > { %878 = vrot.lane.b32.xlu0 %v795_v27, %s13503_s13  ;;  %1488 = vst.msk [vmem:[#allocation3 + $0x90] sm:$0xff] %vm18734_vm3, %v1415_v62  ;;  %vm18740_vm3 = vcmask 294144  }
 0x2fa   : > { %2876 = vrot.lane.b32.xlu1 %v15377_v12, %s13514_s26 }
 0x2fb   : > { %v1597_v7 = vpop.permute.xlu0 %1596  ;;  %v3155_v60 = vld [vmem:[#allocation3 + $0x78] sm:$0x7f] }
 0x2fc   : > { %1670 = vst.msk [vmem:[#allocation3 + $0x90] sm:$0xff] %vm18735_vm14, %v1597_v7  ;;  %v3928_v25 = vcombine.high %v3155_v60, %v3155_v60  ;;  %v3935_v61 = vrot.slane %v3155_v60, %v14210_v32  ;;  %v2505_v48 = vpop.permute.xlu1 %2504  ;;  %v6199_v51 = vpop.f32.mrb[10].mxu0  ;;  %v12824_v60 = vcombine.high %v15333_v22, %v15336_v47  ;;  %vm18741_vm14 = vcmask 129120  }
 0x2fd   : > { %2331 = vrot.lane.b32.xlu0 %v2250_v40, %s13511_s23  ;;  %2580 = vst.msk [vmem:[#allocation3 + $0x80] sm:$0xff] %vm18736_vm0, %v2505_v48  ;;  %v6591_v54 = vcombine.high %v6199_v51, %v6199_v51  ;;  %v6598_v34 = vrot.slane %v6199_v51, %v14210_v32  ;;  %v13124_v1 = vpop.f32.mrb[11].mxu0 }
 0x2fe   : > { %v3942_v23 = vrot.slane %v3928_v25, %v14210_v32  ;;  %v3943_v16 = vcombine.high %v3935_v61, %v3935_v61  ;;  %v3951_v20 = vrot.slane %v3935_v61, %v14210_v32  ;;  %1604 = vrot.lane.b32.xlu1 %v15076_v35, %s13507_s19  ;;  %v15407_v25 = vld [vmem:[#allocation2 + $0x13b] sm:$0xff]  ;;  %v3927_v61 = vcombine.high %v15318_v5, %v15318_v5 }
 0x2ff   : > { %v2687_v27 = vpop.permute.xlu0 %2686  ;;  %v6605_v41 = vrot.slane %v6591_v54, %v14210_v32  ;;  %v6606_v7 = vcombine.high %v6598_v34, %v6598_v34  ;;  %v15412_v48 = vrot.slane %v6598_v34, %v14210_v32  ;;  %v9866_v5 = vsel %vm9474_vm5, %v6541_v18, %v9670_v43 }
 0x300   : > { %2762 = vst.msk [vmem:[#allocation3 + $0x80] sm:$0xff] %vm18737_vm7, %v2687_v27  ;;  %v3944_v9 = vcombine.high %v3942_v23, %v3942_v23  ;;  %v3958_v62 = vrot.slane %v3942_v23, %v14210_v32  ;;  %v3965_v40 = vrot.slane %v3943_v16, %v14210_v32  ;;  %v1960_v51 = vpop.permute.xlu1 %1959  ;;  %v2433_v23 = vld [vmem:[#allocation2 + $0x140] sm:$0x7f]  ;;  %v3973_v27 = vcombine.high %v3951_v20, %v3951_v20 }
 0x301   : > { %1060 = vrot.lane.b32.xlu0 %v977_v46, %s13504_s14  ;;  %v6607_v1 = vcombine.high %v6605_v41, %v6605_v41  ;;  %v6621_v58 = vrot.slane %v6605_v41, %v14210_v32  ;;  %v15417_v0 = vrot.slane %v6606_v7, %v14210_v32  ;;  %2034 = vst.msk [vmem:[#allocation3 + $0x88] sm:$0x7f] %vm18738_vm4, %v1960_v51  ;;  %v9671_v18 = vmul.f32 0.2, %v15323_v45 }
 0x302   : > { %v3972_v16 = vrot.slane %v3944_v9, %v14210_v32  ;;  %v3974_v54 = vcombine.high %v3958_v62, %v3958_v62  ;;  %v3975_v14 = vcombine.high %v3965_v40, %v3965_v40  ;;  %v9865_v34 = vsel %vm9473_vm12, %v6539_v24, %v9669_v49  ;;  %3058 = vrot.lane.b32.xlu1 %v15407_v25, %s13516_s9 }
 0x303   : > { %v2142_v46 = vpop.permute.xlu0 %2141  ;;  %v5349_v9 = vcombine.low %v3927_v61, %v3951_v20  ;;  %v15427_v41 = vrot.slane %v6607_v1, %v14210_v32  ;;  %v15429_v7 = vcombine.high %v6621_v58, %v6621_v58  ;;  %v8173_v51 = vcombine.low %v15412_v48, %v15417_v0 }
 0x304   : > { %2216 = vst.msk [vmem:[#allocation3 + $0x88] sm:$0x7f] %vm18739_vm13, %v2142_v46  ;;  %v12825_v24 = vcombine.high %v15412_v48, %v15417_v0  ;;  %v8181_v43 = vrot.slane %v12824_v60, %v14210_v32  ;;  %v1780_v20 = vpop.permute.xlu1 %1779  ;;  %v5350_v49 = vcombine.low %v3965_v40, %v3973_v27  ;;  %v5351_v31 = vcombine.low %v3975_v14, %v3958_v62 }
 0x305   : > { %2514 = vrot.lane.b32.xlu0 %v2433_v23, %s13512_s24  ;;  %v15440_v61 = vcombine.high %v15427_v41, %v15427_v41  ;;  %v8188_v1 = vrot.slane %v8173_v51, %v14210_v32  ;;  %1853 = vst.msk [vmem:[#allocation3 + $0x90] sm:$0xff] %vm18740_vm3, %v1780_v20  ;;  %v5352_v23 = vcombine.low %v3972_v16, %v3974_v54  ;;  %vm9487_vm6 = vcmp.ge.f32.partialorder %v15427_v41, 0.0  ;;  %v1341_v51 = vld [vmem:[#allocation2 + $0x12a] sm:$0x7f] }
 0x306   : > { %v8195_v59 = vrot.slane %v12825_v24, %v14210_v32  ;;  %v8202_v13 = vrot.slane %v6621_v58, %v14210_v32  ;;  %1787 = vrot.lane.b32.xlu1 %v15311_v33, %s13508_s20  ;;  %v5359_v40 = vrot.slane %v5349_v9, %v14210_v32  ;;  %vm9488_vm5 = vcmp.ge.f32.partialorder %v15429_v7, 0.0  ;;  %v1159_v58 = vld [vmem:[#allocation2 + $0x129] sm:$0x7f] }
 0x307   : > { %v871_v46 = vpop.permute.xlu0 %870  ;;  %v8203_v60 = vcombine.low %v8181_v43, %v8188_v1  ;;  %vm9489_vm0 = vcmp.ge.f32.partialorder %v15440_v61, 0.0  ;;  %v9683_v14 = vmul.f32 0.2, %v15427_v41  ;;  %v9684_v16 = vmul.f32 0.2, %v15429_v7 }
 0x308   : > { %943 = vst.msk [vmem:[#allocation3 + $0x98] sm:$0x7f] %vm18741_vm14, %v871_v46  ;;  %v8204_v62 = vcombine.low %v8195_v59, %v8202_v13  ;;  %v9685_v27 = vmul.f32 0.2, %v15440_v61  ;;  %v2869_v54 = vpop.permute.xlu1 %2868  ;;  %v5366_v9 = vrot.slane %v5350_v49, %v14210_v32  ;;  %vm18742_vm12 = vcmask 490944  }
 0x309   : > { %1969 = vrot.lane.b32.xlu0 %v15358_v36, %s13509_s21  ;;  %v8211_v24 = vrot.slane %v8203_v60, %v14210_v32  ;;  %v9879_v43 = vsel %vm9487_vm6, %v15427_v41, %v9683_v14  ;;  %2944 = vst.msk [vmem:[#allocation3 + $0x80] sm:$0xff] %vm18742_vm12, %v2869_v54  ;;  %v5373_v1 = vrot.slane %v5351_v31, %v14210_v32  ;;  %vm18744_vm7 = vcmask 391520  }
 0x30a   : > { %v5380_v13 = vrot.slane %v5352_v23, %v14210_v32  ;;  %v8218_v59 = vrot.slane %v8204_v62, %v14210_v32  ;;  %v9880_v46 = vsel %vm9488_vm5, %v15429_v7, %v9684_v16  ;;  %v15470_v49 = vmax.f32 %v9865_v34, %v9879_v43  ;;  %1242 = vrot.lane.b32.xlu1 %v1159_v58, %s13506_s18  ;;  %v2615_v62 = vld [vmem:[#allocation2 + $0x141] sm:$0x7f] }
 0x30b   : > { %v2324_v20 = vpop.permute.xlu0 %2323  ;;  %v5381_v60 = vcombine.low %v5359_v40, %v5366_v9  ;;  %v9867_v14 = vsel %vm9475_vm9, %v15323_v45, %v9671_v18  ;;  %v15477_v31 = vmax.f32 %v9866_v5, %v9880_v46  ;;  %v9881_v34 = vsel %vm9489_vm0, %v15440_v61, %v9685_v27  ;;  %v2797_v18 = vld [vmem:[#allocation2 + $0x142] sm:$0x7f] }
 0x30c   : > { %18743 = vst [vmem:[#allocation17_spill] sm:$0xff] %v15470_v49  ;;  %2398 = vst.msk [vmem:[#allocation3 + $0x88] sm:$0x7f] %vm18744_vm7, %v2324_v20  ;;  %v5382_v23 = vcombine.low %v5373_v1, %v5380_v13  ;;  %v8219_v16 = vcombine.low %v8211_v24, %v8218_v59  ;;  %v18746_v40 = vmax.f32 %v14899_v57, %v14904_v30  ;;  %v1962_v54 = vpop.permute.xlu1 %1961  ;;  %vm18749_vm4 = vcmask 326944   ;;  %v1523_v20 = vld [vmem:[#allocation2 + $0x12b] sm:$0x7f] }
 0x30d   : > { %18745 = vst [vmem:[#allocation18_spill] sm:$0xff] %v15477_v31  ;;  %1424 = vrot.lane.b32.xlu0 %v1341_v51, %s13505_s17  ;;  %v15489_v5 = vmax.f32 %v9867_v14, %v9881_v34  ;;  %v18748_v51 = vmax.f32 %v14996_v37, %v15088_v19  ;;  %2035 = vst.msk [vmem:[#allocation3 + $0x90] sm:$0xff] %vm18749_vm4, %v1962_v54  ;;  %v5389_v27 = vrot.slane %v5381_v60, %v14210_v32  ;;  %vm18750_vm13 = vcmask 161920   ;;  %v312_v1 = vld [vmem:[%s13708_s10 + $0xf0] sm:$0xff]  ;;  %v2979_v34 = vld [vmem:[#allocation2 + $0x143] sm:$0x7f] }
 0x30e   : > { %v15487_v58 = vmax.f32 %v18746_v40, %v15470_v49  ;;  %v5396_v24 = vrot.slane %v5382_v23, %v14210_v32  ;;  %9420 = vst.msk [vmem:[%s14771_s12 + $0x28] sm:$0x7f] %vm9415_vm11, %v8219_v16  ;;  %2696 = vrot.lane.b32.xlu1 %v2615_v62, %s13513_s25  ;;  %v6590_v30 = vcombine.high %v15336_v47, %v15336_v47  ;;  %vm18751_vm9 = vcmask 31744  }
 0x30f   : > { %18747 = vst [vmem:[#allocation19_spill] sm:$0xff] %v15489_v5  ;;  %v15495_v9 = vmax.f32 %v18748_v51, %v15477_v31  ;;  %v1053_v57 = vpop.permute.xlu0 %1052  ;;  %v6587_v13 = vcombine.high %v15323_v45, %v15323_v45  ;;  %345 = vst.msk [vmem:[#allocation2 + $0x181] sm:$0xff] %vm18751_vm9, %v312_v1  ;;  %v6588_v46 = vcombine.high %v15333_v22, %v15333_v22  ;;  %v9675_v60 = vmul.f32 0.2, %v15333_v22 }
 0x310   : > { %1125 = vst.msk [vmem:[#allocation3 + $0x98] sm:$0x7f] %vm18750_vm13, %v1053_v57  ;;  %v5397_v19 = vcombine.low %v5389_v27, %v5396_v24  ;;  %v3051_v43 = vpop.permute.xlu1 %3050  ;;  %v18752_v14 = vmov 0.0   ;;  %v6589_v45 = vcombine.high %v15326_v29, %v15326_v29  ;;  %vm9479_vm3 = vcmp.ge.f32.partialorder %v15333_v22, 0.0  ;;  %v1706_v57 = vld [vmem:[#allocation2 + $0x140] sm:$0x7f] }
 0x311   : > { %2878 = vrot.lane.b32.xlu0 %v2797_v18, %s13514_s26  ;;  %3126 = vst.msk [vmem:[#allocation3 + $0x80] sm:$0xff] %vm3108_vm15, %v3051_v43  ;;  %v9678_v23 = vmul.f32 0.2, %v6590_v30  ;;  %vm9482_vm6 = vcmp.ge.f32.partialorder %v6590_v30, 0.0  ;;  %v9672_v16 = vmul.f32 0.2, %v15326_v29  ;;  %v15531_v54 = vsel %vm9479_vm3, %v15333_v22, %v9675_v60 }
 0x312   : > { %13150 = vmatmul.mubr.msk.f32.gmra.mrb[28].mxu0 %vm6049_vm8, %v5397_v19  ;;  %2151 = vrot.lane.b32.xlu1 %v15377_v12, %s13510_s22  ;;  %vm18753_vm14 = vcmask 359744   ;;  %vm9476_vm5 = vcmp.ge.f32.partialorder %v15326_v29, 0.0  ;;  %vm9477_vm0 = vcmp.ge.f32.partialorder %v6587_v13, 0.0  ;;  %v9673_v18 = vmul.f32 0.2, %v6587_v13 }
 0x313   : > { %v2507_v59 = vpop.permute.xlu0 %2506  ;;  %13152 = vmatprep.mubr.msk.f32.mxu0 %vm18619_vm10, %v18752_v14  ;;  %v9676_v51 = vmul.f32 0.2, %v15336_v47  ;;  %v9677_v27 = vmul.f32 0.2, %v6588_v46  ;;  %vm9480_vm12 = vcmp.ge.f32.partialorder %v15336_v47, 0.0  ;;  %vm9481_vm7 = vcmp.ge.f32.partialorder %v6588_v46, 0.0 }
 0x314   : > { %2581 = vst.msk [vmem:[#allocation3 + $0x88] sm:$0x7f] %vm2564_vm2, %v2507_v59  ;;  %v2144_v62 = vpop.permute.xlu1 %2143  ;;  %v15540_v24 = vsel %vm9482_vm6, %v6590_v30, %v9678_v23  ;;  %v9674_v22 = vmul.f32 0.2, %v6589_v45  ;;  %v8220_v19 = vcombine.low %v15427_v41, %v15429_v7  ;;  %v9679_v43 = vmul.f32 0.2, %v15412_v48 }
 0x315   : > { %1606 = vrot.lane.b32.xlu0 %v1523_v20, %s13507_s19  ;;  %2217 = vst.msk [vmem:[#allocation3 + $0x90] sm:$0xff] %vm18753_vm14, %v2144_v62  ;;  %v15548_v1 = vsel %vm9476_vm5, %v15326_v29, %v9672_v16  ;;  %vm9478_vm4 = vcmp.ge.f32.partialorder %v6589_v45, 0.0  ;;  %vm9483_vm13 = vcmp.ge.f32.partialorder %v15412_v48, 0.0  ;;  %vm18754_vm9 = vcmask 130144  }
 0x316   : > { %880 = vrot.lane.b32.xlu1 %v15076_v35, %s13503_s13  ;;  %v15554_v62 = vsel %vm9477_vm0, %v6587_v13, %v9673_v18  ;;  %v15559_v29 = vsel %vm9480_vm12, %v15336_v47, %v9676_v51  ;;  %vm18755_vm3 = vcmask 457120   ;;  %v15575_v47 = vsel %vm9478_vm4, %v6589_v45, %v9674_v22 }
 0x317   : > { %v1235_v40 = vpop.permute.xlu0 %1234  ;;  %vm18756_vm6 = vcmask 31744   ;;  %v15582_v51 = vsel %vm9483_vm13, %v15412_v48, %v9679_v43  ;;  %vm18758_vm14 = vcmask 392544   ;;  %vm18759_vm0 = vcmask 227520  }
 0x318   : > { %1307 = vst.msk [vmem:[#allocation3 + $0x98] sm:$0x7f] %vm18605_vm1, %v1235_v40  ;;  %v873_v35 = vpop.permute.xlu1 %872  ;;  %v6204_v20 = vpop.f32.mrb[12].mxu0  ;;  %v3156_v59 = vld [vmem:[#allocation3 + $0x80] sm:$0xff]  ;;  %v313_v40 = vld [vmem:[%s13708_s10 + $0xf8] sm:$0xff]  ;;  %vm18761_vm13 = vcmask 162944  }
 0x319   : > { %3060 = vrot.lane.b32.xlu0 %v2979_v34, %s13516_s9  ;;  %944 = vst.msk [vmem:[#allocation3 + $0xa0] sm:$0xff] %vm18754_vm9, %v873_v35  ;;  %v6640_v30 = vcombine.high %v6204_v20, %v6204_v20  ;;  %v6647_v60 = vrot.slane %v6204_v20, %v14210_v32  ;;  %v13127_v7 = vpop.f32.mrb[13].mxu0  ;;  %v3976_v23 = vcombine.high %v3156_v59, %v3156_v59  ;;  %s13519_s10 = smov 64  }
 0x31a   : > { %v15562_v34 = vsel %vm9481_vm7, %v6588_v46, %v9677_v27  ;;  %2333 = vrot.lane.b32.xlu1 %v15407_v25, %s13511_s23  ;;  %v15568_v16 = vrot.slane %v3156_v59, %v14210_v32  ;;  %346 = vst.msk [vmem:[#allocation2 + $0x189] sm:$0xff] %vm18756_vm6, %v313_v40  ;;  %v8230_v46 = vrot.slane %v8220_v19, %v14210_v32  ;;  %v15616_v40 = vld [vmem:[#allocation2 + $0x150] sm:$0xff]  ;;  %vm18762_vm6 = vcmask 489920  }
 0x31b   : > { %v2689_v41 = vpop.permute.xlu0 %2688  ;;  %v6654_v13 = vrot.slane %v6640_v30, %v14210_v32  ;;  %v6655_v18 = vcombine.high %v6647_v60, %v6647_v60  ;;  %v6663_v35 = vrot.slane %v6647_v60, %v14210_v32  ;;  %v18757_v27 = vmax.f32 %v14999_v10, %v15102_v28  ;;  %v2070_v10 = vld [vmem:[#allocation2 + $0x142] sm:$0x7f] }
 0x31c   : > { %2763 = vst.msk [vmem:[#allocation3 + $0x88] sm:$0x7f] %vm18755_vm3, %v2689_v41  ;;  %v2326_v59 = vpop.permute.xlu1 %2325  ;;  %v15606_v28 = vrot.slane %v15568_v16, %v14210_v32 }
 0x31d   : > { %1789 = vrot.lane.b32.xlu0 %v1706_v57, %s13508_s20  ;;  %v15588_v20 = vmax.f32 %v18757_v27, %v15489_v5  ;;  %v15591_v57 = vrot.slane %v3976_v23, %v14210_v32  ;;  %v6656_v45 = vcombine.high %v6654_v13, %v6654_v13  ;;  %v6670_v22 = vrot.slane %v6654_v13, %v14210_v32  ;;  %v15619_v27 = vld [vmem:[#allocation2 + $0x151] sm:$0xff] }
 0x31e   : > { %v6677_v19 = vrot.slane %v6655_v18, %v14210_v32  ;;  %v15595_v30 = vcombine.high %v6663_v35, %v6663_v35  ;;  %2399 = vst.msk [vmem:[#allocation3 + $0x90] sm:$0xff] %vm18758_vm14, %v2326_v59  ;;  %v8221_v60 = vcombine.low %v15440_v61, %v6663_v35  ;;  %vm9490_vm5 = vcmp.ge.f32.partialorder %v6663_v35, 0.0  ;;  %1062 = vrot.lane.b32.xlu1 %v15311_v33, %s13504_s14  ;;  %v1888_v59 = vld [vmem:[#allocation2 + $0x141] sm:$0x7f] }
 0x31f   : > { %v1417_v43 = vpop.permute.xlu0 %1416  ;;  %v15609_v41 = vrot.slane %v6656_v45, %v14210_v32  ;;  %v15611_v7 = vcombine.high %v6670_v22, %v6670_v22  ;;  %v9686_v13 = vmul.f32 0.2, %v6663_v35  ;;  %18760 = vst [vmem:[#allocation20_spill] sm:$0xff] %v15619_v27  ;;  %vm9494_vm4 = vcmp.ge.f32.partialorder %v6670_v22, 0.0 }
 0x320   : > { %1489 = vst.msk [vmem:[#allocation3 + $0x98] sm:$0x7f] %vm18759_vm0, %v1417_v43  ;;  %v6687_v23 = vcombine.high %v6677_v19, %v6677_v19  ;;  %v8222_v61 = vcombine.low %v6677_v19, %v15595_v30  ;;  %v8237_v33 = vrot.slane %v8221_v60, %v14210_v32  ;;  %vm9491_vm12 = vcmp.ge.f32.partialorder %v6677_v19, 0.0  ;;  %v1055_v18 = vpop.permute.xlu1 %1054 }
 0x321   : > { %1244 = vrot.lane.b32.xlu0 %v15358_v36, %s13506_s18  ;;  %v15625_v45 = vcombine.high %v15609_v41, %v15609_v41  ;;  %vm9492_vm7 = vcmp.ge.f32.partialorder %v15595_v30, 0.0  ;;  %1126 = vst.msk [vmem:[#allocation3 + $0xa0] sm:$0xff] %vm18761_vm13, %v1055_v18  ;;  %vm9495_vm3 = vcmp.ge.f32.partialorder %v15609_v41, 0.0  ;;  %vm9496_vm14 = vcmp.ge.f32.partialorder %v15611_v7, 0.0 }
 0x322   : > { %v8223_v43 = vcombine.low %v6687_v23, %v6670_v22  ;;  %v8244_v60 = vrot.slane %v8222_v61, %v14210_v32  ;;  %v8252_v37 = vcombine.low %v8230_v46, %v8237_v33  ;;  %vm9493_vm9 = vcmp.ge.f32.partialorder %v6687_v23, 0.0  ;;  %2516 = vrot.lane.b32.xlu1 %v15616_v40, %s13512_s24 }
 0x323   : > { %v2871_v36 = vpop.permute.xlu0 %2870  ;;  %v9687_v31 = vmul.f32 0.2, %v6677_v19  ;;  %v9688_v18 = vmul.f32 0.2, %v15595_v30  ;;  %v9689_v61 = vmul.f32 0.2, %v6687_v23  ;;  %v9882_v17 = vsel %vm9490_vm5, %v6663_v35, %v9686_v13 }
 0x324   : > { %2945 = vst.msk [vmem:[#allocation3 + $0x88] sm:$0x7f] %vm18762_vm6, %v2871_v36  ;;  %v8251_v5 = vrot.slane %v8223_v43, %v14210_v32  ;;  %v8260_v46 = vrot.slane %v8252_v37, %v14210_v32  ;;  %v9690_v33 = vmul.f32 0.2, %v6670_v22  ;;  %v9691_v36 = vmul.f32 0.2, %v15609_v41  ;;  %v2509_v49 = vpop.permute.xlu1 %2508 }
 0x325   : > { %2698 = vrot.lane.b32.xlu0 %v15619_v27, %s13513_s25  ;;  %vm10302_vm0 = vcmask 516096   ;;  %v9692_v56 = vmul.f32 0.2, %v15611_v7  ;;  %v9693_v43 = vmul.f32 0.2, %v15625_v45  ;;  %vm18763_vm13 = vcmask 425344  }
 0x326   : > { %v8253_v4 = vcombine.low %v8244_v60, %v8251_v5  ;;  %2582 = vst.msk [vmem:[#allocation3 + $0x90] sm:$0xff] %vm18763_vm13, %v2509_v49  ;;  %v9883_v11 = vsel %vm9491_vm12, %v6677_v19, %v9687_v31  ;;  %v9885_v37 = vsel %vm9493_vm9, %v6687_v23, %v9689_v61  ;;  %v9886_v63 = vsel %vm9494_vm4, %v6670_v22, %v9690_v33  ;;  %v2252_v13 = vld [vmem:[#allocation2 + $0x143] sm:$0x7f] }
 0x327   : > { %v1599_v44 = vpop.permute.xlu0 %1598  ;;  %v9887_v27 = vsel %vm9495_vm3, %v15609_v41, %v9691_v36  ;;  %vm18764_vm6 = vcmask 260320   ;;  %1971 = vrot.lane.b32.xlu1 %v1888_v59, %s13509_s21  ;;  %v9888_v49 = vsel %vm9496_vm14, %v15611_v7, %v9692_v56  ;;  %v15658_v31 = vmax.f32 %v15548_v1, %v9882_v17  ;;  %v797_v1 = vld [vmem:[#allocation2 + $0x12b] sm:$0x7f] }
 0x328   : > { %1671 = vst.msk [vmem:[#allocation3 + $0x98] sm:$0x7f] %vm18764_vm6, %v1599_v44  ;;  %v8267_v5 = vrot.slane %v8253_v4, %v14210_v32  ;;  %v15661_v35 = vmax.f32 %v15554_v62, %v9883_v11  ;;  %v15665_v22 = vmax.f32 %v15531_v54, %v9885_v37  ;;  %v15668_v44 = vmax.f32 %v15559_v29, %v9886_v63  ;;  %v1237_v17 = vpop.permute.xlu1 %1236 }
 0x329   : > { %2153 = vrot.lane.b32.xlu0 %v2070_v10, %s13510_s22  ;;  %v15671_v4 = vmax.f32 %v15562_v34, %v9887_v27  ;;  %v15674_v56 = vmax.f32 %v15540_v24, %v9888_v49  ;;  %vm9497_vm5 = vcmp.ge.f32.partialorder %v15625_v45, 0.0  ;;  %v18765_v11 = vmax.f32 %v15019_v3, %v15192_v15 }
 0x32a   : > { %v8268_v19 = vcombine.low %v8260_v46, %v8267_v5  ;;  %v18766_v63 = vmax.f32 %v14987_v8, %v15207_v42  ;;  %vm18767_vm12 = vcmask 195744   ;;  %v18768_v24 = vmax.f32 %v15014_v39, %v15111_v53 }
 0x32b   : > { %v10134_v54 = vmax.f32 %v18765_v11, %v15658_v31  ;;  %1308 = vst.msk [vmem:[#allocation3 + $0xa0] sm:$0xff] %vm18767_vm12, %v1237_v17  ;;  %v3053_v29 = vpop.permute.xlu0 %3052  ;;  %v18769_v10 = vmax.f32 %v15022_v21, %v15240_v50  ;;  %v18770_v3 = vmax.f32 %v15042_v26, %v15250_v6  ;;  %v18771_v8 = vmax.f32 %v15082_v55, %v15201_v2  ;;  %v15721_v50 = vld [vmem:[#allocation2 + $0x152] sm:$0xff] }
 0x32c   : > { %v10135_v62 = vmax.f32 %v18766_v63, %v15661_v35  ;;  %v10137_v34 = vmax.f32 %v18768_v24, %v15665_v22  ;;  %vm18772_vm4 = vcmask 522720   ;;  %1426 = vrot.lane.b32.xlu1 %v15377_v12, %s13505_s17  ;;  %9421 = vst.msk [vmem:[%s14771_s12 + $0x30] sm:$0xff] %vm6049_vm8, %v8268_v19  ;;  %v4006_v21 = vrot.slane %v15591_v57, %v14210_v32 }
 0x32d   : > { %v10138_v23 = vmax.f32 %v18769_v10, %v15668_v44  ;;  %v10139_v15 = vmax.f32 %v18770_v3, %v15671_v4  ;;  %v10140_v42 = vmax.f32 %v18771_v8, %v15674_v56  ;;  %3127 = vst.msk [vmem:[#allocation3 + $0x88] sm:$0x7f] %vm18772_vm4, %v3053_v29  ;;  %v15708_v39 = vmax.f32 %v15588_v20, %v10134_v54  ;;  %v2691_v20 = vpop.permute.xlu1 %2690  ;;  %v15764_v54 = vld [vmem:[#allocation2 + $0x153] sm:$0xff] }
 0x32e   : > { %882 = vrot.lane.b32.xlu0 %v797_v1, %s13503_s13  ;;  %v18773_v26 = vcombine.high %v15568_v16, %v15568_v16  ;;  %v18774_v53 = vcombine.high %v15591_v57, %v15591_v57  ;;  %v9889_v27 = vsel %vm9497_vm5, %v15625_v45, %v9693_v43  ;;  %v9884_v16 = vsel %vm9492_vm7, %v15595_v30, %v9688_v18 }
 0x32f   : > { %v10218_v6 = vmax.f32 %v10137_v34, %v10138_v23  ;;  %v15723_v12 = vmax.f32 %v10139_v15, %v10140_v42  ;;  %v18775_v57 = vmax.f32 %v15487_v58, %v15495_v9  ;;  %vm18776_vm9 = vcmask 458144   ;;  %v1782_v33 = vpop.permute.xlu0 %1781  ;;  %v2435_v34 = vld [vmem:[#allocation2 + $0x158] sm:$0x7f] }
 0x330   : > { %v4013_v55 = vrot.slane %v18773_v26, %v14210_v32  ;;  %v4020_v2 = vrot.slane %v18774_v53, %v14210_v32  ;;  %2764 = vst.msk [vmem:[#allocation3 + $0x90] sm:$0xff] %vm18776_vm9, %v2691_v20  ;;  %vm18777_vm3 = vcmask 293120   ;;  %2880 = vrot.lane.b32.xlu1 %v15721_v50, %s13514_s26  ;;  %v15743_v30 = vmax.f32 %v15582_v51, %v9889_v27  ;;  %v979_v51 = vld [vmem:[#allocation2 + $0x140] sm:$0x7f] }
 0x331   : > { %v10257_v59 = vmax.f32 %v18775_v57, %v15708_v39  ;;  %v10260_v36 = vmax.f32 %v10218_v6, %v15723_v12  ;;  %1854 = vst.msk [vmem:[#allocation3 + $0x98] sm:$0x7f] %vm18777_vm3, %v1782_v33  ;;  %v15746_v58 = vmax.f32 %v15575_v47, %v9884_v16  ;;  %v1419_v5 = vpop.permute.xlu1 %1418  ;;  %v18778_v47 = vmax.f32 %v15006_v52, %v15105_v38 }
 0x332   : > { %v5398_v60 = vcombine.low %v15606_v28, %v4013_v55  ;;  %v12778_v46 = vcombine.high %v15606_v28, %v4013_v55  ;;  %v5400_v61 = vcombine.low %v4006_v21, %v4020_v2  ;;  %v12779_v43 = vcombine.high %v4006_v21, %v4020_v2  ;;  %2335 = vrot.lane.b32.xlu0 %v2252_v13, %s13511_s23 }
 0x333   : > { %10303 = vst.msk [vmem:[#allocation4 + $0x9] sm:$0x1] %vm10302_vm0, %v10257_v59  ;;  %10321 = vst.msk [vmem:[#allocation4 + $0xc] sm:$0x1] %vm10302_vm0, %v10260_v36  ;;  %v10136_v49 = vmax.f32 %v18778_v47, %v15746_v58  ;;  %vm18779_vm7 = vcmask 228544   ;;  %v875_v1 = vpop.permute.xlu0 %874  ;;  %vm18780_vm14 = vcmask 129120   ;;  %v15768_v63 = vcombine.high %v15417_v0, %v15417_v0 }
 0x334   : > { %v5408_v9 = vrot.slane %v5398_v60, %v14210_v32  ;;  %v5415_v28 = vrot.slane %v12778_v46, %v14210_v32  ;;  %v5422_v18 = vrot.slane %v5400_v61, %v14210_v32  ;;  %v5429_v37 = vrot.slane %v12779_v43, %v14210_v32  ;;  %1490 = vst.msk [vmem:[#allocation3 + $0xa0] sm:$0xff] %vm18779_vm7, %v1419_v5  ;;  %v15772_v24 = vpop.f32.mrb[14].mxu0  ;;  %v3157_v10 = vld [vmem:[#allocation3 + $0x88] sm:$0x7f] }
 0x335   : > { %945 = vst.msk [vmem:[#allocation3 + $0xa8] sm:$0x7f] %vm18780_vm14, %v875_v1  ;;  %1608 = vrot.lane.b32.xlu1 %v15407_v25, %s13507_s19  ;;  %v10217_v11 = vmax.f32 %v10135_v62, %v10136_v49  ;;  %v2873_v29 = vpop.permute.xlu1 %2872  ;;  %vm18781_vm13 = vcmask 490944   ;;  %v6696_v62 = vrot.slane %v15772_v24, %v14210_v32  ;;  %v13130_v3 = vpop.f32.mrb[15].mxu0  ;;  %v15780_v42 = vcombine.high %v15412_v48, %v15412_v48 }
 0x336   : > { %v5430_v17 = vcombine.low %v5408_v9, %v5415_v28  ;;  %v5431_v19 = vcombine.low %v5422_v18, %v5429_v37  ;;  %1064 = vrot.lane.b32.xlu0 %v979_v51, %s13504_s14  ;;  %2946 = vst.msk [vmem:[#allocation3 + $0x90] sm:$0xff] %vm18781_vm13, %v2873_v29  ;;  %vm18782_vm6 = vcmask 325920   ;;  %v4025_v53 = vcombine.high %v3157_v10, %v3157_v10  ;;  %v2617_v9 = vld [vmem:[#allocation2 + $0x159] sm:$0x7f] }
 0x337   : > { %v1964_v23 = vpop.permute.xlu0 %1963  ;;  %v10258_v15 = vmax.f32 %v15708_v39, %v10217_v11  ;;  %v10259_v8 = vmax.f32 %v10217_v11, %v10218_v6  ;;  %v6704_v26 = vcombine.high %v6696_v62, %v6696_v62  ;;  %v6712_v55 = vrot.slane %v6696_v62, %v14210_v32  ;;  %v1161_v6 = vld [vmem:[#allocation2 + $0x141] sm:$0x7f] }
 0x338   : > { %v5438_v52 = vrot.slane %v5430_v17, %v14210_v32  ;;  %v5445_v38 = vrot.slane %v5431_v19, %v14210_v32  ;;  %2036 = vst.msk [vmem:[#allocation3 + $0x98] sm:$0x7f] %vm18782_vm6, %v1964_v23  ;;  %v4032_v2 = vrot.slane %v3157_v10, %v14210_v32  ;;  %vm9486_vm5 = vcmp.ge.f32.partialorder %v15768_v63, 0.0  ;;  %v1343_v62 = vld [vmem:[#allocation2 + $0x142] sm:$0x7f] }
 0x339   : > { %3062 = vrot.lane.b32.xlu1 %v15764_v54, %s13516_s9  ;;  %10309 = vst.msk [vmem:[#allocation4 + $0xa] sm:$0x1] %vm10302_vm0, %v10258_v15  ;;  %10315 = vst.msk [vmem:[#allocation4 + $0xb] sm:$0x1] %vm10302_vm0, %v10259_v8  ;;  %v8269_v48 = vcombine.low %v15609_v41, %v15611_v7  ;;  %v1601_v39 = vpop.permute.xlu1 %1600  ;;  %vm18604_vm12 = vcmask 520192   ;;  %v6726_v13 = vrot.slane %v6704_v26, %v14210_v32  ;;  %v6734_v27 = vcombine.high %v6712_v55, %v6712_v55  ;;  %v18788_v26 = vld [vmem:[#allocation20_spill] sm:$0xff] }
 0x33a   : > { %v5446_v21 = vcombine.low %v5438_v52, %v5445_v38  ;;  %2518 = vrot.lane.b32.xlu0 %v2435_v34, %s13512_s24  ;;  %v9682_v20 = vmul.f32 0.2, %v15768_v63  ;;  %vm9484_vm4 = vcmp.ge.f32.partialorder %v15417_v0, 0.0  ;;  %vm18783_vm9 = vcmask 261344  }
 0x33b   : > { %1672 = vst.msk [vmem:[#allocation3 + $0xa0] sm:$0xff] %vm18783_vm9, %v1601_v39  ;;  %v1057_v16 = vpop.permute.xlu0 %1056  ;;  %v8270_v41 = vcombine.low %v15625_v45, %v6712_v55  ;;  %vm9485_vm3 = vcmp.ge.f32.partialorder %v15780_v42, 0.0  ;;  %v9680_v7 = vmul.f32 0.2, %v15417_v0  ;;  %v9681_v57 = vmul.f32 0.2, %v15780_v42 }
 0x33c   : > { %13153 = vmatmul.mubr.msk.f32.gmra.mrb[30].mxu0 %vm6049_vm8, %v5446_v21  ;;  %vm18784_vm7 = vcmask 161920   ;;  %v7853_v59 = vcombine.high %v6726_v13, %v6726_v13  ;;  %v8271_v60 = vcombine.low %v6726_v13, %v6734_v27  ;;  %v4039_v46 = vrot.slane %v4025_v53, %v14210_v32 }
 0x33d   : > { %13155 = vmatprep.mubr.msk.f32.mxu0 %vm18619_vm10, %v18752_v14  ;;  %1127 = vst.msk [vmem:[#allocation3 + $0xa8] sm:$0x7f] %vm18784_vm7, %v1057_v16  ;;  %1791 = vrot.lane.b32.xlu1 %v15616_v40, %s13508_s20  ;;  %v4040_v61 = vcombine.high %v4032_v2, %v4032_v2  ;;  %v8278_v45 = vrot.slane %v8269_v48, %v14210_v32  ;;  %vm9498_vm14 = vcmp.ge.f32.partialorder %v6712_v55, 0.0  ;;  %v9694_v36 = vmul.f32 0.2, %v6712_v55  ;;  %v3055_v43 = vpop.permute.xlu1 %3054  ;;  %v18792_v16 = vld [vmem:[#allocation14_spill] sm:$0xff] }
 0x33e   : > { %1246 = vrot.lane.b32.xlu0 %v1161_v6, %s13506_s18  ;;  %v8285_v33 = vrot.slane %v8270_v41, %v14210_v32  ;;  %v8292_v28 = vrot.slane %v8271_v60, %v14210_v32  ;;  %v8299_v18 = vrot.slane %v7853_v59, %v14210_v32  ;;  %vm9499_vm13 = vcmp.ge.f32.partialorder %v6726_v13, 0.0  ;;  %3128 = vst.msk [vmem:[#allocation3 + $0x90] sm:$0xff] %vm3108_vm15, %v3055_v43  ;;  %v18789_v6 = vld [vmem:[#allocation10_spill] sm:$0xff]  ;;  %v18793_v41 = vld [vmem:[#allocation15_spill] sm:$0xff]  ;;  %v18795_v59 = vld [vmem:[#allocation13_spill] sm:$0xff] }
 0x33f   : > { %vm9500_vm6 = vcmp.ge.f32.partialorder %v6734_v27, 0.0  ;;  %v2146_v37 = vpop.permute.xlu0 %2145  ;;  %v9695_v51 = vmul.f32 0.2, %v6726_v13  ;;  %v9696_v47 = vmul.f32 0.2, %v6734_v27  ;;  %v9878_v49 = vsel %vm9486_vm5, %v15768_v63, %v9682_v20  ;;  %v18790_v20 = vld [vmem:[#allocation11_spill] sm:$0xff] }
 0x340   : > { %v8300_v5 = vcombine.low %v8278_v45, %v8285_v33  ;;  %vm18785_vm9 = vcmask 358720   ;;  %v10340_v17 = vld [vmem:[#allocation4 + $0x8] sm:$0x1f]  ;;  %v8301_v1 = vcombine.low %v8292_v28, %v8299_v18  ;;  %v4041_v19 = vcombine.high %v4039_v46, %v4039_v46  ;;  %v18796_v60 = vld [vmem:[#allocation16_spill] sm:$0xff]  ;;  %v18798_v45 = vld [vmem:[#allocation9_spill] sm:$0xff] }
 0x341   : > { %2218 = vst.msk [vmem:[#allocation3 + $0x98] sm:$0x7f] %vm18785_vm9, %v2146_v37  ;;  %884 = vrot.lane.b32.xlu1 %v15407_v25, %s13503_s13  ;;  %v4048_v11 = vrot.slane %v4032_v2, %v14210_v32  ;;  %v4062_v52 = vrot.slane %v4040_v61, %v14210_v32  ;;  %v10421_v38 = vld [vmem:[#allocation4 + $0x8] sm:$0x1f]  ;;  %v6689_v63 = vcombine.high %v15772_v24, %v15772_v24  ;;  %v1784_v10 = vpop.permute.xlu1 %1783  ;;  %vm18786_vm5 = vcmask 294144   ;;  %v18799_v33 = vld [vmem:[#allocation12_spill] sm:$0xff] }
 0x342   : > { %2700 = vrot.lane.b32.xlu0 %v2617_v9, %s13513_s25  ;;  %10346 = vst.msk [vmem:[#allocation5 + $0x40] sm:$0x1f] %vm18604_vm12, %v10340_v17  ;;  %v9876_v29 = vsel %vm9484_vm4, %v15417_v0, %v9680_v7  ;;  %v9877_v25 = vsel %vm9485_vm3, %v15780_v42, %v9681_v57  ;;  %v9890_v34 = vsel %vm9498_vm14, %v6712_v55, %v9694_v36  ;;  %10426 = vst.msk [vmem:[#allocation5 + $0x10] sm:$0x1f] %vm18604_vm12, %v10421_v38  ;;  %vm18787_vm4 = vcmask 326944  }
 0x343   : > { %v8308_v23 = vrot.slane %v8300_v5, %v14210_v32  ;;  %v8315_v3 = vrot.slane %v8301_v1, %v14210_v32  ;;  %v9891_v24 = vsel %vm9499_vm13, %v6726_v13, %v9695_v51  ;;  %v9892_v15 = vsel %vm9500_vm6, %v6734_v27, %v9696_v47  ;;  %1855 = vst.msk [vmem:[#allocation3 + $0xa0] sm:$0xff] %vm18786_vm5, %v1784_v10  ;;  %v1966_v0 = vpop.permute.xlu0 %1965  ;;  %v2799_v28 = vld [vmem:[#allocation2 + $0x15a] sm:$0x7f] }
 0x344   : > { %v15839_v8 = vmax.f32 %v9876_v29, %v9890_v34  ;;  %v15841_v42 = vmax.f32 %v9877_v25, %v9891_v24  ;;  %v15843_v21 = vmax.f32 %v9878_v49, %v9892_v15  ;;  %2037 = vst.msk [vmem:[#allocation3 + $0xa0] sm:$0xff] %vm18787_vm4, %v1966_v0  ;;  %v4055_v55 = vrot.slane %v4039_v46, %v14210_v32  ;;  %v1525_v25 = vld [vmem:[#allocation2 + $0x143] sm:$0x7f]  ;;  %v2981_v0 = vld [vmem:[#allocation2 + $0x15b] sm:$0x7f] }
 0x345   : > { %1973 = vrot.lane.b32.xlu1 %v18788_v26, %s13509_s21  ;;  %v8316_v53 = vcombine.low %v8308_v23, %v8315_v3  ;;  %v4069_v2 = vrot.slane %v4041_v19, %v14210_v32  ;;  %v5447_v48 = vcombine.low %v4048_v11, %v4062_v52  ;;  %v12780_v39 = vcombine.high %v4048_v11, %v4062_v52  ;;  %v1239_v9 = vpop.permute.xlu1 %1238  ;;  %v3158_v18 = vld [vmem:[#allocation3 + $0x90] sm:$0xff] }
 0x346   : > { %1428 = vrot.lane.b32.xlu0 %v1343_v62, %s13505_s17  ;;  %v18791_v13 = vmax.f32 %v18789_v6, %v18790_v20  ;;  %v18794_v7 = vmax.f32 %v18792_v16, %v18793_v41  ;;  %v18797_v46 = vmax.f32 %v18795_v59, %v18796_v60  ;;  %v18800_v36 = vmax.f32 %v18798_v45, %v18799_v33  ;;  %v1708_v16 = vld [vmem:[#allocation2 + $0x158] sm:$0x7f] }
 0x347   : > { %v6703_v37 = vrot.slane %v6689_v63, %v14210_v32  ;;  %9422 = vst.msk [vmem:[%s14771_s12 + $0x38] sm:$0x7f] %vm9415_vm11, %v8316_v53  ;;  %v1421_v5 = vpop.permute.xlu0 %1420  ;;  %v4080_v51 = vrot.slane %v3158_v18, %v14210_v32  ;;  %vm18801_vm3 = vcmask 227520   ;;  %v4071_v17 = vcombine.high %v4055_v55, %v4055_v55 }
 0x348   : > { %v10141_v27 = vmax.f32 %v18791_v13, %v15743_v30  ;;  %v10142_v57 = vmax.f32 %v18794_v7, %v15839_v8  ;;  %v10143_v61 = vmax.f32 %v18797_v46, %v15841_v42  ;;  %v10144_v43 = vmax.f32 %v18800_v36, %v15843_v21  ;;  %1309 = vst.msk [vmem:[#allocation3 + $0xa8] sm:$0x7f] %vm18605_vm1, %v1239_v9 }
 0x349   : > { %1491 = vst.msk [vmem:[#allocation3 + $0xa8] sm:$0x7f] %vm18801_vm3, %v1421_v5  ;;  %1066 = vrot.lane.b32.xlu1 %v15616_v40, %s13504_s14  ;;  %v15877_v1 = vrot.slane %v4080_v51, %v14210_v32  ;;  %v5449_v19 = vcombine.low %v4055_v55, %v4069_v2  ;;  %v5457_v11 = vrot.slane %v5447_v48, %v14210_v32  ;;  %v2328_v29 = vpop.permute.xlu1 %2327  ;;  %vm18802_vm7 = vcmask 391520  }
 0x34a   : > { %v10220_v47 = vmax.f32 %v10141_v27, %v10142_v57  ;;  %v10251_v49 = vmax.f32 %v10143_v61, %v10144_v43  ;;  %2882 = vrot.lane.b32.xlu0 %v2799_v28, %s13514_s26  ;;  %v5464_v52 = vrot.slane %v12780_v39, %v14210_v32  ;;  %v6705_v34 = vcombine.high %v6703_v37, %v6703_v37 }
 0x34b   : > { %2400 = vst.msk [vmem:[#allocation3 + $0x98] sm:$0x7f] %vm18802_vm7, %v2328_v29  ;;  %v2511_v40 = vpop.permute.xlu0 %2510  ;;  %v5450_v10 = vcombine.low %v4071_v17, %v15877_v1  ;;  %v4088_v62 = vcombine.high %v4080_v51, %v4080_v51  ;;  %v4073_v24 = vcombine.high %v3158_v18, %v3158_v18  ;;  %vm18803_vm14 = vcmask 359744  }
 0x34c   : > { %v10261_v38 = vmax.f32 %v15723_v12, %v10220_v47  ;;  %v10262_v63 = vmax.f32 %v10220_v47, %v10251_v49  ;;  %2583 = vst.msk [vmem:[#allocation3 + $0x98] sm:$0x7f] %vm2564_vm2, %v2511_v40  ;;  %v5471_v12 = vrot.slane %v5449_v19, %v14210_v32  ;;  %v5479_v3 = vcombine.low %v5457_v11, %v5464_v52  ;;  %v15941_v52 = vld [vmem:[#allocation2 + $0x168] sm:$0xff]  ;;  %v1890_v40 = vld [vmem:[#allocation2 + $0x159] sm:$0x7f] }
 0x34d   : > { %2155 = vrot.lane.b32.xlu1 %v15721_v50, %s13510_s22  ;;  %v5478_v23 = vrot.slane %v5450_v10, %v14210_v32  ;;  %v2148_v15 = vpop.permute.xlu1 %2147  ;;  %v15893_v55 = vrot.slane %v6705_v34, %v14210_v32  ;;  %v4110_v48 = vrot.slane %v4088_v62, %v14210_v32  ;;  %vm18804_vm13 = vcmask 260320  }
 0x34e   : > { %10327 = vst.msk [vmem:[#allocation4 + $0xd] sm:$0x1] %vm10302_vm0, %v10261_v38  ;;  %10333 = vst.msk [vmem:[#allocation4 + $0xe] sm:$0x1] %vm10302_vm0, %v10262_v63  ;;  %1610 = vrot.lane.b32.xlu0 %v1525_v25, %s13507_s19  ;;  %v15901_v39 = vrot.slane %v6703_v37, %v14210_v32  ;;  %v5487_v6 = vrot.slane %v5479_v3, %v14210_v32  ;;  %v4087_v13 = vrot.slane %v4073_v24, %v14210_v32  ;;  %vm18805_vm6 = vcmask 130144  }
 0x34f   : > { %2219 = vst.msk [vmem:[#allocation3 + $0xa0] sm:$0xff] %vm18803_vm14, %v2148_v15  ;;  %v1603_v53 = vpop.permute.xlu0 %1602  ;;  %v5480_v2 = vcombine.low %v5471_v12, %v5478_v23  ;;  %v4120_v59 = vcombine.high %v4110_v48, %v4110_v48  ;;  %vm18806_vm9 = vcmask 457120   ;;  %v15918_v61 = vcombine.high %v15893_v55, %v15893_v55  ;;  %v799_v37 = vld [vmem:[#allocation2 + $0x143] sm:$0x7f] }
 0x350   : > { %1673 = vst.msk [vmem:[#allocation3 + $0xa8] sm:$0x7f] %vm18804_vm13, %v1603_v53  ;;  %v8317_v41 = vcombine.low %v15901_v39, %v15893_v55  ;;  %v12826_v7 = vcombine.high %v15901_v39, %v15893_v55  ;;  %v4103_v33 = vrot.slane %v4087_v13, %v14210_v32  ;;  %v4118_v36 = vcombine.high %v15877_v1, %v15877_v1 }
 0x351   : > { %1248 = vrot.lane.b32.xlu1 %v18788_v26, %s13506_s18  ;;  %v5494_v20 = vrot.slane %v5480_v2, %v14210_v32  ;;  %v877_v27 = vpop.permute.xlu1 %876  ;;  %v6214_v45 = vpop.f32.mrb[16].mxu0  ;;  %vm18807_vm5 = vcmask 392544   ;;  %v4089_v49 = vcombine.high %v4087_v13, %v4087_v13  ;;  %vm18808_vm4 = vcmask 293120  }
 0x352   : > { %3064 = vrot.lane.b32.xlu0 %v2981_v0, %s13516_s9  ;;  %946 = vst.msk [vmem:[#allocation3 + $0xb0] sm:$0xff] %vm18805_vm6, %v877_v27  ;;  %v6737_v43 = vcombine.high %v6214_v45, %v6214_v45  ;;  %v6744_v9 = vrot.slane %v6214_v45, %v14210_v32  ;;  %v13133_v28 = vpop.f32.mrb[17].mxu0  ;;  %v8327_v5 = vrot.slane %v8317_v41, %v14210_v32  ;;  %vm9501_vm3 = vcmp.ge.f32.partialorder %v15901_v39, 0.0  ;;  %v981_v41 = vld [vmem:[#allocation2 + $0x158] sm:$0x7f] }
 0x353   : > { %v2693_v26 = vpop.permute.xlu0 %2692  ;;  %v5495_v57 = vcombine.low %v5487_v6, %v5494_v20  ;;  %v8334_v51 = vrot.slane %v12826_v7, %v14210_v32  ;;  %v5497_v17 = vcombine.low %v4120_v59, %v4103_v33  ;;  %v6735_v11 = vcombine.high %v15901_v39, %v15901_v39  ;;  %v16005_v28 = vld [vmem:[#allocation2 + $0x169] sm:$0xff] }
 0x354   : > { %2765 = vst.msk [vmem:[#allocation3 + $0x98] sm:$0x7f] %vm18806_vm9, %v2693_v26  ;;  %v6751_v1 = vrot.slane %v6737_v43, %v14210_v32  ;;  %v6752_v19 = vcombine.high %v6744_v9, %v6744_v9  ;;  %vm9504_vm7 = vcmp.ge.f32.partialorder %v15918_v61, 0.0  ;;  %v5496_v38 = vcombine.low %v4110_v48, %v4118_v36 }
 0x355   : > { %v10382_v60 = vld [vmem:[#allocation4 + $0xa] sm:$0x1f]  ;;  %2337 = vrot.lane.b32.xlu1 %v15764_v54, %s13511_s23  ;;  %13156 = vmatmul.mubr.msk.f32.gmra.mrb[32].mxu0 %vm6049_vm8, %v5495_v57  ;;  %v2330_v18 = vpop.permute.xlu1 %2329  ;;  %v9697_v63 = vmul.f32 0.2, %v15901_v39  ;;  %v15945_v25 = vrot.slane %v6744_v9, %v14210_v32  ;;  %v8349_v10 = vcombine.low %v8327_v5, %v8334_v51  ;;  %vm18809_vm14 = vcmask 162944  }
 0x356   : > { %10387 = vst.msk [vmem:[#allocation5 + $0x48] sm:$0x1f] %vm18604_vm12, %v10382_v60  ;;  %v10461_v46 = vld [vmem:[#allocation4 + $0xa] sm:$0x1f]  ;;  %1793 = vrot.lane.b32.xlu0 %v1708_v16, %s13508_s20  ;;  %13158 = vmatprep.mubr.msk.f32.mxu0 %vm18619_vm10, %v18752_v14  ;;  %v6753_v29 = vcombine.high %v6751_v1, %v6751_v1  ;;  %v15952_v12 = vrot.slane %v4089_v49, %v14210_v32  ;;  %v9700_v24 = vmul.f32 0.2, %v15918_v61 }
 0x357   : > { %10466 = vst.msk [vmem:[#allocation5 + $0x18] sm:$0x1f] %vm18604_vm12, %v10461_v46  ;;  %v1786_v47 = vpop.permute.xlu0 %1785  ;;  %v4119_v23 = vcombine.high %v4103_v33, %v4103_v33  ;;  %v5513_v3 = vrot.slane %v5497_v17, %v14210_v32  ;;  %vm18810_vm13 = vcmask 489920   ;;  %v9698_v53 = vmul.f32 0.2, %v15893_v55 }
 0x358   : > { %2401 = vst.msk [vmem:[#allocation3 + $0xa0] sm:$0xff] %vm18807_vm5, %v2330_v18  ;;  %v15957_v15 = vrot.slane %v6753_v29, %v14210_v32  ;;  %vm9502_vm6 = vcmp.ge.f32.partialorder %v15893_v55, 0.0  ;;  %v9699_v48 = vmul.f32 0.2, %v6735_v11  ;;  %v5506_v6 = vrot.slane %v5496_v38, %v14210_v32  ;;  %v2072_v51 = vld [vmem:[#allocation2 + $0x15a] sm:$0x7f] }
 0x359   : > { %1856 = vst.msk [vmem:[#allocation3 + $0xa8] sm:$0x7f] %vm18808_vm4, %v1786_v47  ;;  %1430 = vrot.lane.b32.xlu1 %v15721_v50, %s13505_s17  ;;  %v15948_v50 = vrot.slane %v6752_v19, %v14210_v32  ;;  %v1059_v34 = vpop.permute.xlu1 %1058  ;;  %v15973_v20 = vsel %vm9501_vm3, %v15901_v39, %v9697_v63  ;;  %v6767_v13 = vrot.slane %v6751_v1, %v14210_v32  ;;  %vm9503_vm9 = vcmp.ge.f32.partialorder %v6735_v11, 0.0 }
 0x35a   : > { %886 = vrot.lane.b32.xlu0 %v799_v37, %s13503_s13  ;;  %1128 = vst.msk [vmem:[#allocation3 + $0xb0] sm:$0xff] %vm18809_vm14, %v1059_v34  ;;  %v8357_v7 = vrot.slane %v8349_v10, %v14210_v32  ;;  %vm18811_vm5 = vcmask 425344   ;;  %v15981_v59 = vcombine.low %v15952_v12, %v4119_v23  ;;  %v15983_v60 = vcombine.low %v5506_v6, %v5513_v3  ;;  %v1163_v3 = vld [vmem:[#allocation2 + $0x159] sm:$0x7f] }
 0x35b   : > { %v2875_v62 = vpop.permute.xlu0 %2874  ;;  %v8319_v0 = vcombine.low %v15945_v25, %v15948_v50  ;;  %v12827_v2 = vcombine.high %v15945_v25, %v15948_v50  ;;  %v8366_v39 = vcombine.low %v6767_v13, %v15957_v15  ;;  %v12828_v46 = vcombine.high %v6767_v13, %v15957_v15 }
 0x35c   : > { %2947 = vst.msk [vmem:[#allocation3 + $0x98] sm:$0x7f] %vm18810_vm13, %v2875_v62  ;;  %vm18812_vm4 = vcmask 325920   ;;  %v15993_v45 = vsel %vm9502_vm6, %v15893_v55, %v9698_v53  ;;  %v15998_v33 = vsel %vm9504_vm7, %v15918_v61, %v9700_v24  ;;  %v9701_v43 = vmul.f32 0.2, %v15945_v25 }
 0x35d   : > { %2520 = vrot.lane.b32.xlu1 %v15941_v52, %s13512_s24  ;;  %v8341_v27 = vrot.slane %v8319_v0, %v14210_v32  ;;  %v2513_v16 = vpop.permute.xlu1 %2512  ;;  %v8348_v26 = vrot.slane %v12827_v2, %v14210_v32  ;;  %v16002_v9 = vsel %vm9503_vm9, %v6735_v11, %v9699_v48  ;;  %v4121_v18 = vcombine.high %v15952_v12, %v15952_v12 }
 0x35e   : > { %1975 = vrot.lane.b32.xlu0 %v1890_v40, %s13509_s21  ;;  %2584 = vst.msk [vmem:[#allocation3 + $0xa0] sm:$0xff] %vm18811_vm5, %v2513_v16  ;;  %v16011_v55 = vcombine.high %v15948_v50, %v15948_v50  ;;  %v16015_v61 = vcombine.high %v15957_v15, %v15957_v15  ;;  %vm9505_vm3 = vcmp.ge.f32.partialorder %v15945_v25, 0.0  ;;  %v9705_v37 = vmul.f32 0.2, %v6767_v13 }
 0x35f   : > { %v1968_v57 = vpop.permute.xlu0 %1967  ;;  %v8350_v36 = vcombine.low %v8341_v27, %v8348_v26  ;;  %vm9509_vm7 = vcmp.ge.f32.partialorder %v6767_v13, 0.0  ;;  %vm18813_vm14 = vcmask 195744   ;;  %v5520_v17 = vrot.slane %v15981_v59, %v14210_v32  ;;  %v6219_v29 = vpop.f32.mrb[18].mxu0 }
 0x360   : > { %2038 = vst.msk [vmem:[#allocation3 + $0xa8] sm:$0x7f] %vm18812_vm4, %v1968_v57  ;;  %v6782_v19 = vcombine.high %v15945_v25, %v15945_v25  ;;  %v16026_v11 = vcombine.high %v6767_v13, %v6767_v13  ;;  %v8375_v38 = vrot.slane %v8366_v39, %v14210_v32  ;;  %v8382_v63 = vrot.slane %v12828_v46, %v14210_v32  ;;  %v13136_v23 = vpop.f32.mrb[19].mxu0  ;;  %v16065_v46 = vld [vmem:[#allocation2 + $0x16a] sm:$0xff] }
 0x361   : > { %1612 = vrot.lane.b32.xlu1 %v15764_v54, %s13507_s19  ;;  %v1241_v5 = vpop.permute.xlu1 %1240  ;;  %v8364_v47 = vrot.slane %v8350_v36, %v14210_v32  ;;  %vm18814_vm13 = vcmask 522720   ;;  %v16036_v40 = vsel %vm9505_vm3, %v15945_v25, %v9701_v43  ;;  %v6786_v10 = vcombine.high %v6219_v29, %v6219_v29  ;;  %v2254_v36 = vld [vmem:[#allocation2 + $0x15b] sm:$0x7f] }
 0x362   : > { %1068 = vrot.lane.b32.xlu0 %v981_v41, %s13504_s14  ;;  %1310 = vst.msk [vmem:[#allocation3 + $0xb0] sm:$0xff] %vm18813_vm14, %v1241_v5  ;;  %v6793_v62 = vrot.slane %v6219_v29, %v14210_v32  ;;  %vm9508_vm6 = vcmp.ge.f32.partialorder %v16011_v55, 0.0  ;;  %v9704_v24 = vmul.f32 0.2, %v16011_v55  ;;  %v9708_v0 = vmul.f32 0.2, %v16015_v61 }
 0x363   : > { %v3057_v49 = vpop.permute.xlu0 %3056  ;;  %v8365_v34 = vcombine.low %v8357_v7, %v8364_v47  ;;  %v16044_v53 = vsel %vm9509_vm7, %v6767_v13, %v9705_v37  ;;  %v6800_v25 = vrot.slane %v6786_v10, %v14210_v32  ;;  %vm18815_vm9 = vcmask 458144  }
 0x364   : > { %3129 = vst.msk [vmem:[#allocation3 + $0x98] sm:$0x7f] %vm18814_vm13, %v3057_v49  ;;  %v6801_v48 = vcombine.high %v6793_v62, %v6793_v62  ;;  %v16050_v6 = vrot.slane %v6793_v62, %v14210_v32  ;;  %vm9506_vm5 = vcmp.ge.f32.partialorder %v15948_v50, 0.0  ;;  %v8397_v16 = vcombine.low %v8375_v38, %v8382_v63 }
 0x365   : > { %2702 = vrot.lane.b32.xlu1 %v16005_v28, %s13513_s25  ;;  %v2695_v2 = vpop.permute.xlu1 %2694  ;;  %9423 = vst.msk [vmem:[%s14771_s12 + $0x40] sm:$0xff] %vm6049_vm8, %v8365_v34  ;;  %vm18816_vm4 = vcmask 358720   ;;  %vm9507_vm3 = vcmp.ge.f32.partialorder %v6782_v19, 0.0  ;;  %v9702_v13 = vmul.f32 0.2, %v15948_v50  ;;  %v6802_v7 = vcombine.high %v6800_v25, %v6800_v25 }
 0x366   : > { %2157 = vrot.lane.b32.xlu0 %v2072_v51, %s13510_s22  ;;  %2766 = vst.msk [vmem:[#allocation3 + $0xa0] sm:$0xff] %vm18815_vm9, %v2695_v2  ;;  %v9703_v41 = vmul.f32 0.2, %v6782_v19  ;;  %v6816_v26 = vrot.slane %v6800_v25, %v14210_v32  ;;  %v16060_v57 = vrot.slane %v6801_v48, %v14210_v32  ;;  %v7854_v39 = vcombine.high %v16050_v6, %v16050_v6 }
 0x367   : > { %v2150_v27 = vpop.permute.xlu0 %2149  ;;  %vm9512_vm7 = vcmp.ge.f32.partialorder %v16015_v61, 0.0  ;;  %vm9510_vm14 = vcmp.ge.f32.partialorder %v15957_v15, 0.0  ;;  %v9706_v37 = vmul.f32 0.2, %v15957_v15  ;;  %v16071_v5 = vmul.f32 0.2, %v16026_v11 }
 0x368   : > { %2220 = vst.msk [vmem:[#allocation3 + $0xa8] sm:$0x7f] %vm18816_vm4, %v2150_v27  ;;  %v6830_v51 = vrot.slane %v6802_v7, %v14210_v32  ;;  %v6831_v47 = vcombine.high %v6816_v26, %v6816_v26  ;;  %v6832_v49 = vcombine.high %v16060_v57, %v16060_v57  ;;  %v8368_v38 = vcombine.low %v16050_v6, %v16060_v57 }
 0x369   : > { %1795 = vrot.lane.b32.xlu1 %v15941_v52, %s13508_s20  ;;  %v1423_v43 = vpop.permute.xlu1 %1422  ;;  %vm18817_vm13 = vcmask 228544   ;;  %v8405_v29 = vrot.slane %v8397_v16, %v14210_v32  ;;  %vm18818_vm9 = vcmask 129120   ;;  %v16086_v34 = vsel %vm9506_vm5, %v15948_v50, %v9702_v13 }
 0x36a   : > { %1250 = vrot.lane.b32.xlu0 %v1163_v3, %s13506_s18  ;;  %1492 = vst.msk [vmem:[#allocation3 + $0xb0] sm:$0xff] %vm18817_vm13, %v1423_v43  ;;  %v16089_v10 = vsel %vm9507_vm3, %v6782_v19, %v9703_v41  ;;  %v16094_v62 = vsel %vm9508_vm6, %v16011_v55, %v9704_v24  ;;  %v16096_v23 = vcombine.high %v6830_v51, %v6830_v51  ;;  %vm9516_vm5 = vcmp.ge.f32.partialorder %v6816_v26, 0.0  ;;  %v1345_v19 = vld [vmem:[#allocation2 + $0x15a] sm:$0x7f]  ;;  %v16123_v43 = vld [vmem:[#allocation2 + $0x16b] sm:$0xff] }
 0x36b   : > { %v879_v63 = vpop.permute.xlu0 %878  ;;  %v8389_v3 = vrot.slane %v8368_v38, %v14210_v32  ;;  %v8396_v2 = vrot.slane %v7854_v39, %v14210_v32  ;;  %v8414_v25 = vcombine.low %v6832_v49, %v6816_v26  ;;  %v8415_v48 = vcombine.low %v6830_v51, %v6831_v47  ;;  %v3159_v38 = vld [vmem:[#allocation3 + $0x98] sm:$0x7f] }
 0x36c   : > { %947 = vst.msk [vmem:[#allocation3 + $0xb8] sm:$0x7f] %vm18818_vm9, %v879_v63  ;;  %v9711_v50 = vmul.f32 0.2, %v6832_v49  ;;  %vm9511_vm4 = vcmp.ge.f32.partialorder %v16026_v11, 0.0  ;;  %v16105_v55 = vsel %vm9512_vm7, %v16015_v61, %v9708_v0  ;;  %vm9515_vm6 = vcmp.ge.f32.partialorder %v6832_v49, 0.0 }
 0x36d   : > { %2884 = vrot.lane.b32.xlu1 %v16065_v46, %s13514_s26  ;;  %v2877_v27 = vpop.permute.xlu1 %2876  ;;  %v8398_v24 = vcombine.low %v8389_v3, %v8396_v2  ;;  %vm9517_vm3 = vcmp.ge.f32.partialorder %v6830_v51, 0.0  ;;  %vm9518_vm13 = vcmp.ge.f32.partialorder %v6831_v47, 0.0  ;;  %vm18819_vm9 = vcmask 490944  }
 0x36e   : > { %2339 = vrot.lane.b32.xlu0 %v2254_v36, %s13511_s23  ;;  %2948 = vst.msk [vmem:[#allocation3 + $0xa0] sm:$0xff] %vm18819_vm9, %v2877_v27  ;;  %v9712_v13 = vmul.f32 0.2, %v6816_v26  ;;  %v9713_v41 = vmul.f32 0.2, %v6830_v51  ;;  %vm18820_vm12 = vcmask 391520   ;;  %v16114_v61 = vsel %vm9510_vm14, %v15957_v15, %v9706_v37 }
 0x36f   : > { %v2332_v16 = vpop.permute.xlu0 %2331  ;;  %v9714_v7 = vmul.f32 0.2, %v6831_v47  ;;  %v8412_v0 = vrot.slane %v8398_v24, %v14210_v32  ;;  %v16118_v39 = vrot.slane %v8414_v25, %v14210_v32  ;;  %vm9519_vm7 = vcmp.ge.f32.partialorder %v16096_v23, 0.0  ;;  %v2437_v25 = vld [vmem:[#allocation2 + $0x170] sm:$0x7f] }
 0x370   : > { %2402 = vst.msk [vmem:[#allocation3 + $0xa8] sm:$0x7f] %vm18820_vm12, %v2332_v16  ;;  %v9715_v36 = vmul.f32 0.2, %v16096_v23  ;;  %v9907_v63 = vsel %vm9515_vm6, %v6832_v49, %v9711_v50  ;;  %v9908_v3 = vsel %vm9516_vm5, %v6816_v26, %v9712_v13  ;;  %v9909_v15 = vsel %vm9517_vm3, %v6830_v51, %v9713_v41  ;;  %v18825_v13 = vld [vmem:[#allocation19_spill] sm:$0xff] }
 0x371   : > { %1977 = vrot.lane.b32.xlu1 %v16005_v28, %s13509_s21  ;;  %v9910_v37 = vsel %vm9518_vm13, %v6831_v47, %v9714_v7  ;;  %v1605_v2 = vpop.permute.xlu1 %1604  ;;  %v8413_v27 = vcombine.low %v8405_v29, %v8412_v0  ;;  %v8431_v24 = vrot.slane %v8415_v48, %v14210_v32  ;;  %v16131_v16 = vmax.f32 %v15973_v20, %v9907_v63  ;;  %v18823_v47 = vld [vmem:[#allocation17_spill] sm:$0xff]  ;;  %v18824_v29 = vld [vmem:[#allocation18_spill] sm:$0xff] }
 0x372   : > { %1432 = vrot.lane.b32.xlu0 %v1345_v19, %s13505_s17  ;;  %v16134_v19 = vmax.f32 %v15993_v45, %v9908_v3  ;;  %vm18821_vm12 = vcmask 261344   ;;  %v16138_v26 = vmax.f32 %v16002_v9, %v9909_v15  ;;  %v16141_v51 = vmax.f32 %v15998_v33, %v9910_v37 }
 0x373   : > { %1674 = vst.msk [vmem:[#allocation3 + $0xb0] sm:$0xff] %vm18821_vm12, %v1605_v2  ;;  %v1061_v49 = vpop.permute.xlu0 %1060  ;;  %vm18822_vm14 = vcmask 161920   ;;  %v9911_v20 = vsel %vm9519_vm7, %v16096_v23, %v9715_v36  ;;  %v4129_v45 = vrot.slane %v3159_v38, %v14210_v32  ;;  %v10145_v9 = vmax.f32 %v18823_v47, %v16131_v16 }
 0x374   : > { %1129 = vst.msk [vmem:[#allocation3 + $0xb8] sm:$0x7f] %vm18822_vm14, %v1061_v49  ;;  %v10146_v33 = vmax.f32 %v18824_v29, %v16134_v19  ;;  %v16158_v48 = vmax.f32 %v16036_v40, %v9911_v20  ;;  %v4122_v50 = vcombine.high %v3159_v38, %v3159_v38  ;;  %v10147_v41 = vmax.f32 %v18825_v13, %v16138_v26  ;;  %v1710_v29 = vld [vmem:[#allocation2 + $0x170] sm:$0x7f] }
 0x375   : > { %3066 = vrot.lane.b32.xlu1 %v16123_v43, %s13516_s9  ;;  %9424 = vst.msk [vmem:[%s14771_s12 + $0x48] sm:$0x7f] %vm9415_vm11, %v8413_v27  ;;  %v10148_v7 = vmax.f32 %v15658_v31, %v16141_v51  ;;  %v3059_v0 = vpop.permute.xlu1 %3058  ;;  %v4145_v36 = vrot.slane %v4129_v45, %v14210_v32  ;;  %v4137_v63 = vcombine.high %v4129_v45, %v4129_v45  ;;  %vm9513_vm5 = vcmp.ge.f32.partialorder %v16050_v6, 0.0  ;;  %v1527_v45 = vld [vmem:[#allocation2 + $0x15b] sm:$0x7f] }
 0x376   : > { %2522 = vrot.lane.b32.xlu0 %v2437_v25, %s13512_s24  ;;  %v9709_v3 = vmul.f32 0.2, %v16050_v6  ;;  %v10221_v15 = vmax.f32 %v10145_v9, %v10146_v33  ;;  %3130 = vst.msk [vmem:[#allocation3 + $0xa0] sm:$0xff] %vm3108_vm15, %v3059_v0  ;;  %v4136_v38 = vrot.slane %v4122_v50, %v14210_v32  ;;  %v8446_v37 = vcombine.low %v16118_v39, %v8431_v24  ;;  %v6224_v25 = vpop.f32.mrb[20].mxu0 }
 0x377   : > { %v2515_v40 = vpop.permute.xlu0 %2514  ;;  %v16170_v2 = vmax.f32 %v10147_v41, %v10148_v7  ;;  %v5499_v31 = vcombine.low %v4121_v18, %v4145_v36  ;;  %v16179_v27 = vrot.slane %v4137_v63, %v14210_v32  ;;  %v6834_v49 = vcombine.high %v6224_v25, %v6224_v25  ;;  %v13139_v24 = vpop.f32.mrb[21].mxu0 }
 0x378   : > { %2585 = vst.msk [vmem:[#allocation3 + $0xa8] sm:$0x7f] %vm2564_vm2, %v2515_v40  ;;  %v6841_v20 = vrot.slane %v6224_v25, %v14210_v32  ;;  %v16186_v39 = vsel %vm9511_vm4, %v16026_v11, %v16071_v5  ;;  %v4167_v47 = vcombine.high %v4145_v36, %v4145_v36  ;;  %v4138_v33 = vcombine.high %v4136_v38, %v4136_v38  ;;  %v2801_v25 = vld [vmem:[#allocation2 + $0x172] sm:$0x7f] }
 0x379   : > { %2159 = vrot.lane.b32.xlu1 %v16065_v46, %s13510_s22  ;;  %v10263_v12 = vmax.f32 %v10221_v15, %v16170_v2  ;;  %v1788_v18 = vpop.permute.xlu1 %1787  ;;  %v5527_v9 = vrot.slane %v5499_v31, %v14210_v32  ;;  %v16193_v50 = vrot.slane %v4136_v38, %v14210_v32  ;;  %v16198_v11 = vsel %vm9513_vm5, %v16050_v6, %v9709_v3  ;;  %v2983_v36 = vld [vmem:[#allocation2 + $0x173] sm:$0x7f] }
 0x37a   : > { %2341 = vrot.lane.b32.xlu0 %v16123_v43, %s13511_s23  ;;  %v6848_v5 = vrot.slane %v6834_v49, %v14210_v32  ;;  %v6849_v13 = vcombine.high %v6841_v20, %v6841_v20  ;;  %v6857_v41 = vrot.slane %v6841_v20, %v14210_v32  ;;  %vm18826_vm4 = vcmask 294144  }
 0x37b   : > { %1857 = vst.msk [vmem:[#allocation3 + $0xb0] sm:$0xff] %vm18826_vm4, %v1788_v18  ;;  %v1970_v7 = vpop.permute.xlu0 %1969  ;;  %v16204_v0 = vrot.slane %v8446_v37, %v14210_v32  ;;  %v16212_v6 = vcombine.low %v5520_v17, %v5527_v9  ;;  %vm18827_vm6 = vcmask 326944   ;;  %v2619_v37 = vld [vmem:[#allocation2 + $0x171] sm:$0x7f]  ;;  %v16225_v31 = vrot.slane %v4138_v33, %v14210_v32 }
 0x37c   : > { %10304 = vst.msk [vmem:[#allocation4 + $0x11] sm:$0x1] %vm10302_vm0, %v10263_v12  ;;  %v6850_v3 = vcombine.high %v6848_v5, %v6848_v5  ;;  %v16219_v15 = vrot.slane %v6848_v5, %v14210_v32  ;;  %v6871_v40 = vrot.slane %v6849_v13, %v14210_v32  ;;  %v6879_v38 = vcombine.high %v6857_v41, %v6857_v41  ;;  %v16253_v13 = vld [vmem:[#allocation2 + $0x180] sm:$0xff] }
 0x37d   : > { %2039 = vst.msk [vmem:[#allocation3 + $0xb0] sm:$0xff] %vm18827_vm6, %v1970_v7  ;;  %1614 = vrot.lane.b32.xlu1 %v1527_v45, %s13507_s19  ;;  %v8416_v59 = vcombine.low %v16096_v23, %v6857_v41  ;;  %v1243_v17 = vpop.permute.xlu1 %1242  ;;  %v16230_v20 = vcombine.low %v16179_v27, %v4167_v47  ;;  %vm9520_vm3 = vcmp.ge.f32.partialorder %v6857_v41, 0.0  ;;  %vm18828_vm13 = vcmask 227520   ;;  %v1892_v7 = vld [vmem:[#allocation2 + $0x171] sm:$0x7f] }
 0x37e   : > { %1797 = vrot.lane.b32.xlu0 %v1710_v29, %s13508_s20  ;;  %v16233_v24 = vrot.slane %v6850_v3, %v14210_v32  ;;  %v16237_v45 = vcombine.high %v16219_v15, %v16219_v15  ;;  %v16239_v12 = vcombine.high %v6871_v40, %v6871_v40  ;;  %v8417_v23 = vcombine.low %v6871_v40, %v6879_v38 }
 0x37f   : > { %1311 = vst.msk [vmem:[#allocation3 + $0xb8] sm:$0x7f] %vm18605_vm1, %v1243_v17  ;;  %v1425_v18 = vpop.permute.xlu0 %1424  ;;  %v8438_v9 = vrot.slane %v8416_v59, %v14210_v32  ;;  %v9716_v29 = vmul.f32 0.2, %v6857_v41  ;;  %vm9521_vm9 = vcmp.ge.f32.partialorder %v6871_v40, 0.0  ;;  %vm9522_vm7 = vcmp.ge.f32.partialorder %v6879_v38, 0.0 }
 0x380   : > { %1493 = vst.msk [vmem:[#allocation3 + $0xb8] sm:$0x7f] %vm18828_vm13, %v1425_v18  ;;  %v16249_v33 = vcombine.high %v16233_v24, %v16233_v24  ;;  %v8445_v5 = vrot.slane %v8417_v23, %v14210_v32  ;;  %vm9523_vm12 = vcmp.ge.f32.partialorder %v16239_v12, 0.0  ;;  %vm9524_vm14 = vcmp.ge.f32.partialorder %v16219_v15, 0.0 }
 0x381   : > { %2704 = vrot.lane.b32.xlu1 %v2619_v37, %s13513_s25  ;;  %vm9525_vm5 = vcmp.ge.f32.partialorder %v16233_v24, 0.0  ;;  %v9717_v3 = vmul.f32 0.2, %v6871_v40  ;;  %v2697_v37 = vpop.permute.xlu1 %2696  ;;  %vm9526_vm4 = vcmp.ge.f32.partialorder %v16237_v45, 0.0  ;;  %v9718_v17 = vmul.f32 0.2, %v6879_v38 }
 0x382   : > { %2886 = vrot.lane.b32.xlu0 %v2801_v25, %s13514_s26  ;;  %v8447_v59 = vcombine.low %v8438_v9, %v8445_v5  ;;  %vm9527_vm6 = vcmp.ge.f32.partialorder %v16249_v33, 0.0  ;;  %vm18829_vm13 = vcmask 457120   ;;  %v9719_v23 = vmul.f32 0.2, %v16239_v12 }
 0x383   : > { %2767 = vst.msk [vmem:[#allocation3 + $0xa8] sm:$0x7f] %vm18829_vm13, %v2697_v37  ;;  %v2879_v25 = vpop.permute.xlu0 %2878  ;;  %v9720_v18 = vmul.f32 0.2, %v16219_v15  ;;  %v9721_v49 = vmul.f32 0.2, %v16233_v24  ;;  %v9912_v63 = vsel %vm9520_vm3, %v6857_v41, %v9716_v29  ;;  %v9913_v1 = vsel %vm9521_vm9, %v6871_v40, %v9717_v3 }
 0x384   : > { %vm18830_vm1 = vcmask 489920   ;;  %v8461_v9 = vrot.slane %v8447_v59, %v14210_v32  ;;  %v9722_v5 = vmul.f32 0.2, %v16237_v45  ;;  %v9723_v37 = vmul.f32 0.2, %v16249_v33 }
 0x385   : > { %2949 = vst.msk [vmem:[#allocation3 + $0xa8] sm:$0x7f] %vm18830_vm1, %v2879_v25  ;;  %2524 = vrot.lane.b32.xlu1 %v16253_v13, %s13512_s24  ;;  %v9914_v47 = vsel %vm9522_vm7, %v6879_v38, %v9718_v17  ;;  %v9915_v41 = vsel %vm9523_vm12, %v16239_v12, %v9719_v23  ;;  %v9916_v29 = vsel %vm9524_vm14, %v16219_v15, %v9720_v18  ;;  %v2152_v25 = vpop.permute.xlu1 %2151  ;;  %vm18831_vm1 = vcmask 359744  }
 0x386   : > { %1979 = vrot.lane.b32.xlu0 %v1892_v7, %s13509_s21  ;;  %v9917_v59 = vsel %vm9525_vm5, %v16233_v24, %v9721_v49  ;;  %v8462_v40 = vcombine.low %v16204_v0, %v8461_v9  ;;  %v9918_v38 = vsel %vm9526_vm4, %v16237_v45, %v9722_v5  ;;  %v9919_v7 = vsel %vm9527_vm6, %v16249_v33, %v9723_v37 }
 0x387   : > { %v16291_v3 = vmax.f32 %v16086_v34, %v9912_v63  ;;  %2221 = vst.msk [vmem:[#allocation3 + $0xb0] sm:$0xff] %vm18831_vm1, %v2152_v25  ;;  %v1607_v17 = vpop.permute.xlu0 %1606  ;;  %v16295_v49 = vmax.f32 %v16089_v10, %v9913_v1  ;;  %v16298_v23 = vmax.f32 %v16094_v62, %v9914_v47  ;;  %v16301_v0 = vmax.f32 %v16044_v53, %v9915_v41  ;;  %v16323_v62 = vld [vmem:[#allocation2 + $0x181] sm:$0xff]  ;;  %v2074_v47 = vld [vmem:[#allocation2 + $0x172] sm:$0x7f] }
 0x388   : > { %v16304_v18 = vmax.f32 %v16114_v61, %v9916_v29  ;;  %vm18832_vm3 = vcmask 260320   ;;  %9425 = vst.msk [vmem:[%s14771_s12 + $0x50] sm:$0xff] %vm6049_vm8, %v8462_v40  ;;  %v16312_v34 = vmax.f32 %v16186_v39, %v9917_v59  ;;  %v16315_v1 = vmax.f32 %v16105_v55, %v9918_v38  ;;  %v3160_v61 = vld [vmem:[#allocation3 + $0xa0] sm:$0xff] }
 0x389   : > { %1675 = vst.msk [vmem:[#allocation3 + $0xb8] sm:$0x7f] %vm18832_vm3, %v1607_v17  ;;  %888 = vrot.lane.b32.xlu1 %v15764_v54, %s13503_s13  ;;  %v16318_v10 = vmax.f32 %v16198_v11, %v9919_v7  ;;  %v10150_v53 = vmax.f32 %v15746_v58, %v16291_v3  ;;  %v10151_v54 = vmax.f32 %v15665_v22, %v16295_v49  ;;  %v881_v63 = vpop.permute.xlu1 %880  ;;  %vm18836_vm9 = vcmask 130144  }
 0x38a   : > { %3068 = vrot.lane.b32.xlu0 %v2983_v36, %s13516_s9  ;;  %v10152_v39 = vmax.f32 %v15668_v44, %v16298_v23  ;;  %v10153_v55 = vmax.f32 %v15671_v4, %v16301_v0  ;;  %v10154_v11 = vmax.f32 %v15674_v56, %v16304_v18  ;;  %v10155_v58 = vmax.f32 %v15743_v30, %v16312_v34 }
 0x38b   : > { %v10156_v36 = vmax.f32 %v15839_v8, %v16315_v1  ;;  %v18833_v22 = vmax.f32 %v15661_v35, %v16158_v48  ;;  %v18834_v44 = vrot.slane %v16212_v6, %v14210_v32  ;;  %v18835_v4 = vrot.slane %v15983_v60, %v14210_v32  ;;  %948 = vst.msk [vmem:[#allocation3 + $0xc0] sm:$0xff] %vm18836_vm9, %v881_v63  ;;  %v3061_v56 = vpop.permute.xlu0 %3060 }
 0x38c   : > { %v10224_v37 = vmax.f32 %v10151_v54, %v10152_v39  ;;  %v10225_v41 = vmax.f32 %v10153_v55, %v10154_v11  ;;  %vm18837_vm7 = vcmask 522720   ;;  %v4177_v35 = vrot.slane %v3160_v61, %v14210_v32  ;;  %v16390_v11 = vld [vmem:[#allocation2 + $0x183] sm:$0xff] }
 0x38d   : > { %v10223_v9 = vmax.f32 %v18833_v22, %v10150_v53  ;;  %v5544_v5 = vcombine.low %v18835_v4, %v18834_v44  ;;  %3131 = vst.msk [vmem:[#allocation3 + $0xa8] sm:$0x7f] %vm18837_vm7, %v3061_v56  ;;  %2706 = vrot.lane.b32.xlu1 %v16323_v62, %s13513_s25  ;;  %v18838_v30 = vcombine.high %v16179_v27, %v16179_v27  ;;  %v2334_v25 = vpop.permute.xlu1 %2333  ;;  %vm18839_vm12 = vcmask 392544   ;;  %v2439_v56 = vld [vmem:[#allocation2 + $0x188] sm:$0x7f] }
 0x38e   : > { %v16355_v6 = vmax.f32 %v10155_v58, %v10156_v36  ;;  %2161 = vrot.lane.b32.xlu0 %v2074_v47, %s13510_s22  ;;  %v10266_v59 = vmax.f32 %v10224_v37, %v10225_v41  ;;  %v4185_v40 = vcombine.high %v4177_v35, %v4177_v35  ;;  %2403 = vst.msk [vmem:[#allocation3 + $0xb0] sm:$0xff] %vm18839_vm12, %v2334_v25  ;;  %vm18841_vm14 = vcmask 293120  }
 0x38f   : > { %v5546_v8 = vcombine.low %v18838_v30, %v16193_v50  ;;  %v10264_v60 = vmax.f32 %v16170_v2, %v10223_v9  ;;  %13159 = vmatmul.mubr.msk.f32.gmra.mrb[34].mxu0 %vm6049_vm8, %v5544_v5  ;;  %v10265_v29 = vmax.f32 %v10223_v9, %v10224_v37  ;;  %v1790_v27 = vpop.permute.xlu0 %1789  ;;  %v18840_v2 = vcombine.high %v16193_v50, %v16193_v50 }
 0x390   : > { %13161 = vmatprep.mubr.msk.f32.mxu0 %vm18619_vm10, %v18752_v14  ;;  %v10267_v38 = vmax.f32 %v10225_v41, %v16355_v6  ;;  %v5555_v17 = vrot.slane %v16230_v20, %v14210_v32  ;;  %10322 = vst.msk [vmem:[#allocation4 + $0x14] sm:$0x1] %vm10302_vm0, %v10266_v59  ;;  %v16375_v53 = vrot.slane %v4177_v35, %v14210_v32  ;;  %vm18842_vm5 = vcmask 162944  }
 0x391   : > { %10310 = vst.msk [vmem:[#allocation4 + $0x12] sm:$0x1] %vm10302_vm0, %v10264_v60  ;;  %v5547_v7 = vcombine.low %v16225_v31, %v18840_v2  ;;  %10316 = vst.msk [vmem:[#allocation4 + $0x13] sm:$0x1] %vm10302_vm0, %v10265_v29  ;;  %v16378_v54 = vrot.slane %v4185_v40, %v14210_v32  ;;  %v5562_v39 = vrot.slane %v5546_v8, %v14210_v32  ;;  %1070 = vrot.lane.b32.xlu1 %v15941_v52, %s13504_s14  ;;  %v16386_v31 = vld [vmem:[#allocation2 + $0x182] sm:$0xff]  ;;  %v1063_v55 = vpop.permute.xlu1 %1062  ;;  %vm18843_vm4 = vcmask 195744  }
 0x392   : > { %1858 = vst.msk [vmem:[#allocation3 + $0xb8] sm:$0x7f] %vm18841_vm14, %v1790_v27  ;;  %v4170_v50 = vcombine.high %v3160_v61, %v3160_v61  ;;  %1252 = vrot.lane.b32.xlu0 %v16005_v28, %s13506_s18  ;;  %v8463_v47 = vcombine.low %v16239_v12, %v16219_v15  ;;  %v8464_v28 = vcombine.low %v16233_v24, %v16237_v45  ;;  %v16405_v9 = vpop.f32.mrb[22].mxu0  ;;  %v2256_v24 = vld [vmem:[#allocation2 + $0x173] sm:$0x7f]  ;;  %vm18844_vm6 = vcmask 425344  }
 0x393   : > { %10328 = vst.msk [vmem:[#allocation4 + $0x15] sm:$0x1] %vm10302_vm0, %v10267_v38  ;;  %v5548_v20 = vcombine.low %v16375_v53, %v16378_v54  ;;  %v1245_v52 = vpop.permute.xlu0 %1244  ;;  %v5569_v58 = vrot.slane %v5547_v7, %v14210_v32  ;;  %v5577_v22 = vcombine.low %v5555_v17, %v5562_v39  ;;  %v6890_v15 = vrot.slane %v16405_v9, %v14210_v32  ;;  %v13142_v12 = vpop.f32.mrb[23].mxu0 }
 0x394   : > { %v4184_v63 = vrot.slane %v4170_v50, %v14210_v32  ;;  %1130 = vst.msk [vmem:[#allocation3 + $0xc0] sm:$0xff] %vm18842_vm5, %v1063_v55  ;;  %v16396_v61 = vld [vmem:[#allocation3 + $0xa8] sm:$0x7f]  ;;  %v8472_v29 = vrot.slane %v8463_v47, %v14210_v32  ;;  %v8479_v40 = vrot.slane %v8464_v28, %v14210_v32  ;;  %vm18845_vm13 = vcmask 458144  }
 0x395   : > { %v5576_v36 = vrot.slane %v5548_v20, %v14210_v32  ;;  %1312 = vst.msk [vmem:[#allocation3 + $0xc0] sm:$0xff] %vm18843_vm4, %v1245_v52  ;;  %2888 = vrot.lane.b32.xlu1 %v16386_v31, %s13514_s26  ;;  %v4226_v44 = vrot.slane %v16396_v61, %v14210_v32  ;;  %v2517_v5 = vpop.permute.xlu1 %2516  ;;  %v6898_v37 = vcombine.high %v6890_v15, %v6890_v15  ;;  %vm18846_vm1 = vcmask 520192   ;;  %v2621_v20 = vld [vmem:[#allocation2 + $0x189] sm:$0x7f] }
 0x396   : > { %3070 = vrot.lane.b32.xlu0 %v16390_v11, %s13516_s9  ;;  %v4186_v45 = vcombine.high %v4184_v63, %v4184_v63  ;;  %v16414_v41 = vrot.slane %v6890_v15, %v14210_v32  ;;  %2586 = vst.msk [vmem:[#allocation3 + $0xb0] sm:$0xff] %vm18844_vm6, %v2517_v5  ;;  %v5585_v59 = vrot.slane %v5577_v22, %v14210_v32  ;;  %vm18847_vm3 = vmmov %vm18846_vm1  ;;  %v9710_v55 = vmul.f32 0.2, %v16060_v57 }
 0x397   : > { %v5578_v4 = vcombine.low %v5569_v58, %v5576_v36  ;;  %v2699_v35 = vpop.permute.xlu0 %2698  ;;  %vm18848_vm9 = vmmov %vm18846_vm1  ;;  %v16427_v38 = vrot.slane %v6898_v37, %v14210_v32  ;;  %v4234_v2 = vcombine.high %v4226_v44, %v4226_v44  ;;  %vm18849_vm12 = vcmask 325920  }
 0x398   : > { %v10422_v30 = vld [vmem:[#allocation4 + $0x10] sm:$0x1f]  ;;  %2768 = vst.msk [vmem:[#allocation3 + $0xb0] sm:$0xff] %vm18845_vm13, %v2699_v35  ;;  %v4214_v27 = vrot.slane %v4186_v45, %v14210_v32  ;;  %v8465_v17 = vcombine.low %v16249_v33, %v16414_v41  ;;  %v9724_v39 = vmul.f32 0.2, %v16414_v41  ;;  %vm9528_vm7 = vcmp.ge.f32.partialorder %v16414_v41, 0.0 }
 0x399   : > { %v10341_v8 = vld [vmem:[#allocation4 + $0x10] sm:$0x1f]  ;;  %v5592_v25 = vrot.slane %v5578_v4, %v14210_v32  ;;  %2343 = vrot.lane.b32.xlu1 %v2256_v24, %s13511_s23  ;;  %10427 = vst.msk [vmem:[#allocation5 + $0x50] sm:$0x1f] %vm18846_vm1, %v10422_v30  ;;  %v1972_v50 = vpop.permute.xlu1 %1971  ;;  %v8493_v47 = vrot.slane %v16427_v38, %v14210_v32  ;;  %v4200_v28 = vrot.slane %v4184_v63, %v14210_v32  ;;  %vm9514_vm14 = vcmp.ge.f32.partialorder %v16060_v57, 0.0 }
 0x39a   : > { %v10502_v60 = vld [vmem:[#allocation4 + $0x10] sm:$0x1f]  ;;  %10347 = vst.msk [vmem:[#allocation5 + $0x80] sm:$0x1f] %vm18847_vm3, %v10341_v8  ;;  %2526 = vrot.lane.b32.xlu0 %v2439_v56, %s13512_s24  ;;  %v8486_v33 = vrot.slane %v8465_v17, %v14210_v32  ;;  %v8494_v58 = vcombine.low %v8472_v29, %v8479_v40  ;;  %vm18850_vm5 = vcmask 358720   ;;  %v12781_v36 = vcombine.high %v16375_v53, %v16378_v54 }
 0x39b   : > { %10507 = vst.msk [vmem:[#allocation5 + $0x20] sm:$0x1f] %vm18848_vm9, %v10502_v60  ;;  %v5593_v7 = vcombine.low %v5585_v59, %v5592_v25  ;;  %v2154_v52 = vpop.permute.xlu0 %2153  ;;  %v16452_v63 = vrot.slane %v4226_v44, %v14210_v32  ;;  %v16455_v22 = vrot.slane %v4234_v2, %v14210_v32  ;;  %v5595_v15 = vcombine.low %v4200_v28, %v4214_v27  ;;  %v2803_v45 = vld [vmem:[#allocation2 + $0x18a] sm:$0x7f] }
 0x39c   : > { %2040 = vst.msk [vmem:[#allocation3 + $0xb8] sm:$0x7f] %vm18849_vm12, %v1972_v50  ;;  %v8495_v12 = vcombine.low %v8486_v33, %v8493_v47  ;;  %v9906_v53 = vsel %vm9514_vm14, %v16060_v57, %v9710_v55  ;;  %vm18851_vm4 = vcmask 228544   ;;  %v12782_v44 = vcombine.high %v4200_v28, %v4214_v27  ;;  %v2985_v59 = vld [vmem:[#allocation2 + $0x18b] sm:$0x7f]  ;;  %v2622_v55 = vld [vmem:[#allocation2 + $0x199] sm:$0xff] }
 0x39d   : > { %13162 = vmatmul.mubr.msk.f32.gmra.mrb[36].mxu0 %vm6049_vm8, %v5593_v7  ;;  %2222 = vst.msk [vmem:[#allocation3 + $0xb8] sm:$0x7f] %vm18850_vm5, %v2154_v52  ;;  %1434 = vrot.lane.b32.xlu1 %v16065_v46, %s13505_s17  ;;  %v9920_v46 = vsel %vm9528_vm7, %v16414_v41, %v9724_v39  ;;  %v8502_v4 = vrot.slane %v8494_v58, %v14210_v32  ;;  %vm18852_vm6 = vcmask 129120   ;;  %vm18853_vm13 = vcmask 490944   ;;  %v2986_v33 = vld [vmem:[#allocation2 + $0x19b] sm:$0xff] }
 0x39e   : > { %2708 = vrot.lane.b32.xlu0 %v2621_v20, %s13513_s25  ;;  %13164 = vmatprep.mubr.msk.f32.mxu0 %vm18619_vm10, %v18752_v14  ;;  %v1427_v24 = vpop.permute.xlu1 %1426  ;;  %v8509_v5 = vrot.slane %v8495_v12, %v14210_v32  ;;  %v16466_v56 = vmax.f32 %v9906_v53, %v9920_v46  ;;  %v5597_v57 = vcombine.low %v16452_v63, %v16455_v22  ;;  %vm18854_vm1 = vcmask 391520  }
 0x39f   : > { %1494 = vst.msk [vmem:[#allocation3 + $0xc0] sm:$0xff] %vm18851_vm4, %v1427_v24  ;;  %v5604_v37 = vrot.slane %v12781_v36, %v14210_v32  ;;  %v5611_v35 = vrot.slane %v5595_v15, %v14210_v32  ;;  %v10157_v8 = vmax.f32 %v15841_v42, %v16318_v10  ;;  %v5618_v25 = vrot.slane %v12782_v44, %v14210_v32  ;;  %v2804_v24 = vld [vmem:[#allocation2 + $0x19a] sm:$0xff] }
 0x3a0   : > { %v883_v54 = vpop.permute.xlu0 %882  ;;  %v8510_v30 = vcombine.low %v8502_v4, %v8509_v5  ;;  %v10158_v60 = vmax.f32 %v15843_v21, %v16466_v56  ;;  %v5625_v40 = vrot.slane %v5597_v57, %v14210_v32  ;;  %v4219_v2 = vcombine.high %v16396_v61, %v16396_v61 }
 0x3a1   : > { %949 = vst.msk [vmem:[#allocation3 + $0xc8] sm:$0x7f] %vm18852_vm6, %v883_v54  ;;  %1616 = vrot.lane.b32.xlu1 %v16123_v43, %s13507_s19  ;;  %v5626_v27 = vcombine.low %v5604_v37, %v5611_v35  ;;  %vm18855_vm3 = vcmask 261344   ;;  %vm18856_vm9 = vcmask 161920   ;;  %v6883_v28 = vcombine.high %v16405_v9, %v16405_v9  ;;  %v10392_v37 = vld [vmem:[#allocation4 + $0xb] sm:$0x1f] }
 0x3a2   : > { %2890 = vrot.lane.b32.xlu0 %v2803_v45, %s13514_s26  ;;  %v2881_v29 = vpop.permute.xlu1 %2880  ;;  %9426 = vst.msk [vmem:[%s14771_s12 + $0x58] sm:$0x7f] %vm9415_vm11, %v8510_v30  ;;  %v10252_v7 = vmax.f32 %v10157_v8, %v10158_v60  ;;  %v5627_v42 = vcombine.low %v5618_v25, %v5625_v40  ;;  %v4233_v20 = vrot.slane %v4219_v2, %v14210_v32  ;;  %vm18857_vm7 = vcmask 294144  }
 0x3a3   : > { %2950 = vst.msk [vmem:[#allocation3 + $0xb0] sm:$0xff] %vm18853_vm13, %v2881_v29  ;;  %v5634_v39 = vrot.slane %v5626_v27, %v14210_v32  ;;  %v6897_v12 = vrot.slane %v6883_v28, %v14210_v32  ;;  %vm18858_vm12 = vcmask 194720   ;;  %vm18859_vm14 = vcmask 520192  }
 0x3a4   : > { %v2336_v43 = vpop.permute.xlu0 %2335  ;;  %v10268_v21 = vmax.f32 %v16355_v6, %v10252_v7  ;;  %v5641_v50 = vrot.slane %v5627_v42, %v14210_v32  ;;  %v4235_v52 = vcombine.high %v4233_v20, %v4233_v20  ;;  %v4249_v36 = vrot.slane %v4233_v20, %v14210_v32  ;;  %vm18860_vm5 = vmmov %vm18859_vm14  ;;  %v10432_v20 = vld [vmem:[#allocation4 + $0x11] sm:$0x1f] }
 0x3a5   : > { %2404 = vst.msk [vmem:[#allocation3 + $0xb8] sm:$0x7f] %vm18854_vm1, %v2336_v43  ;;  %1799 = vrot.lane.b32.xlu1 %v16253_v13, %s13508_s20  ;;  %vm18861_vm4 = vmmov %vm18860_vm5  ;;  %v12783_v54 = vcombine.high %v16452_v63, %v16455_v22  ;;  %vm18862_vm6 = vcmask 130144   ;;  %v6899_v57 = vcombine.high %v6897_v12, %v6897_v12  ;;  %vm18863_vm13 = vcmask 457120  }
 0x3a6   : > { %3072 = vrot.lane.b32.xlu0 %v2985_v59, %s13516_s9  ;;  %10334 = vst.msk [vmem:[#allocation4 + $0x16] sm:$0x1] %vm10302_vm0, %v10268_v21  ;;  %v5642_v13 = vcombine.low %v5634_v39, %v5641_v50  ;;  %v4263_v9 = vrot.slane %v4235_v52, %v14210_v32  ;;  %v4265_v30 = vcombine.high %v4249_v36, %v4249_v36  ;;  %vm18864_vm1 = vcmask 326944   ;;  %v10351_v59 = vld [vmem:[#allocation4 + $0x9] sm:$0x1f] }
 0x3a7   : > { %v1609_v17 = vpop.permute.xlu1 %1608  ;;  %v5653_v60 = vrot.slane %v12783_v54, %v14210_v32  ;;  %v16537_v2 = vrot.slane %v6899_v57, %v14210_v32 }
 0x3a8   : > { %1676 = vst.msk [vmem:[#allocation3 + $0xc0] sm:$0xff] %vm18855_vm3, %v1609_v17  ;;  %v1065_v61 = vpop.permute.xlu0 %1064  ;;  %13165 = vmatmul.mubr.msk.f32.gmra.mrb[38].mxu0 %vm6049_vm8, %v5642_v13  ;;  %v5644_v5 = vcombine.low %v4249_v36, %v4263_v9  ;;  %vm18865_vm3 = vcmask 227520   ;;  %v16545_v17 = vrot.slane %v6897_v12, %v14210_v32  ;;  %v12829_v36 = vcombine.high %v16414_v41, %v16427_v38 }
 0x3a9   : > { %1131 = vst.msk [vmem:[#allocation3 + $0xc8] sm:$0x7f] %vm18856_vm9, %v1065_v61  ;;  %1981 = vrot.lane.b32.xlu1 %v16323_v62, %s13509_s21  ;;  %13167 = vmatprep.mubr.msk.f32.mxu0 %vm18619_vm10, %v18752_v14  ;;  %v2440_v62 = vld [vmem:[#allocation2 + $0x198] sm:$0xff]  ;;  %vm18866_vm9 = vcmask 162944  }
 0x3aa   : > { %2345 = vrot.lane.b32.xlu0 %v16390_v11, %s13511_s23  ;;  %v5660_v27 = vrot.slane %v5644_v5, %v14210_v32 }
 0x3ab   : > { %v3063_v6 = vpop.permute.xlu1 %3062 }
 0x3ac   : > { %3132 = vst.msk [vmem:[#allocation3 + $0xb0] sm:$0xff] %vm3108_vm15, %v3063_v6  ;;  %v2519_v47 = vpop.permute.xlu0 %2518 }
 0x3ad   : > { %2587 = vst.msk [vmem:[#allocation3 + $0xb8] sm:$0x7f] %vm2564_vm2, %v2519_v47  ;;  %2163 = vrot.lane.b32.xlu1 %v16386_v31, %s13510_s22  ;;  %v10462_v15 = vld [vmem:[#allocation4 + $0x12] sm:$0x1f]  ;;  %v8512_v47 = vcombine.low %v16545_v17, %v16537_v2 }
 0x3ae   : > { %2710 = vrot.lane.b32.xlu0 %v2622_v55, %s13513_s25  ;;  %10467 = vst.msk [vmem:[#allocation5 + $0x58] sm:$0x1f] %vm18859_vm14, %v10462_v15  ;;  %v10383_v31 = vld [vmem:[#allocation4 + $0x12] sm:$0x1f]  ;;  %v5675_v55 = vcombine.low %v5653_v60, %v5660_v27  ;;  %vm18869_vm14 = vcmask 260320  }
 0x3af   : > { %v1792_v11 = vpop.permute.xlu1 %1791  ;;  %v10542_v46 = vld [vmem:[#allocation4 + $0x12] sm:$0x1f]  ;;  %10388 = vst.msk [vmem:[#allocation5 + $0x88] sm:$0x1f] %vm18860_vm5, %v10383_v31  ;;  %v6930_v31 = vcombine.high %v16427_v38, %v16427_v38  ;;  %v8528_v54 = vrot.slane %v8512_v47, %v14210_v32  ;;  %vm9531_vm5 = vcmp.ge.f32.partialorder %v16545_v17, 0.0 }
 0x3b0   : > { %1859 = vst.msk [vmem:[#allocation3 + $0xc0] sm:$0xff] %vm18857_vm7, %v1792_v11  ;;  %v1247_v58 = vpop.permute.xlu0 %1246  ;;  %v10472_v7 = vld [vmem:[#allocation4 + $0x13] sm:$0x1f]  ;;  %vm18867_vm7 = vcmask 489920  }
 0x3b1   : > { %1313 = vst.msk [vmem:[#allocation3 + $0xc8] sm:$0x7f] %vm18858_vm12, %v1247_v58  ;;  %2528 = vrot.lane.b32.xlu1 %v2440_v62, %s13512_s24  ;;  %vm18868_vm12 = vcmask 359744   ;;  %v9726_v27 = vmul.f32 0.2, %v6930_v31 }
 0x3b2   : > { %3074 = vrot.lane.b32.xlu0 %v2986_v33, %s13516_s9  ;;  %10547 = vst.msk [vmem:[#allocation5 + $0x28] sm:$0x1f] %vm18861_vm4, %v10542_v46  ;;  %v12830_v46 = vcombine.high %v16545_v17, %v16537_v2  ;;  %vm18870_vm4 = vcmask 195744  }
 0x3b3   : > { %v885_v45 = vpop.permute.xlu1 %884  ;;  %v3162_v53 = vld [vmem:[#allocation3 + $0xb0] sm:$0xff] }
 0x3b4   : > { %950 = vst.msk [vmem:[#allocation3 + $0xd0] sm:$0xff] %vm18862_vm6, %v885_v45  ;;  %v2701_v44 = vpop.permute.xlu0 %2700  ;;  %v4274_v4 = vrot.slane %v3162_v53, %v14210_v32  ;;  %v4267_v35 = vcombine.high %v3162_v53, %v3162_v53  ;;  %v5683_v45 = vrot.slane %v5675_v55, %v14210_v32  ;;  %vm9530_vm6 = vcmp.ge.f32.partialorder %v6930_v31, 0.0 }
 0x3b5   : > { %2769 = vst.msk [vmem:[#allocation3 + $0xb8] sm:$0x7f] %vm18863_vm13, %v2701_v44  ;;  %2892 = vrot.lane.b32.xlu1 %v2804_v24, %s13514_s26  ;;  %vm18871_vm13 = vcmask 522720   ;;  %v9728_v55 = vmul.f32 0.2, %v16537_v2 }
 0x3b6   : > { %10403 = vrot.lane.b32.xlu0 %v10392_v37, %s13519_s10  ;;  %v4282_v8 = vcombine.high %v4274_v4, %v4274_v4  ;;  %v4290_v63 = vrot.slane %v4274_v4, %v14210_v32  ;;  %v4281_v42 = vrot.slane %v4267_v35, %v14210_v32 }
 0x3b7   : > { %v1974_v22 = vpop.permute.xlu1 %1973 }
 0x3b8   : > { %2041 = vst.msk [vmem:[#allocation3 + $0xc0] sm:$0xff] %vm18864_vm1, %v1974_v22  ;;  %v1429_v29 = vpop.permute.xlu0 %1428  ;;  %v16533_v43 = vrot.slane %v4282_v8, %v14210_v32  ;;  %v4312_v25 = vcombine.high %v4290_v63, %v4290_v63  ;;  %v5645_v40 = vcombine.low %v4265_v30, %v4290_v63  ;;  %v4283_v11 = vcombine.high %v4281_v42, %v4281_v42 }
 0x3b9   : > { %1495 = vst.msk [vmem:[#allocation3 + $0xc8] sm:$0x7f] %vm18865_vm3, %v1429_v29  ;;  %10362 = vrot.lane.b32.xlu1 %v10351_v59, %s13519_s10  ;;  %v6234_v50 = vpop.f32.mrb[24].mxu0  ;;  %v4297_v58 = vrot.slane %v4281_v42, %v14210_v32  ;;  %v6928_v30 = vcombine.high %v16414_v41, %v16414_v41  ;;  %v6931_v8 = vcombine.high %v16537_v2, %v16537_v2  ;;  %v9727_v59 = vmul.f32 0.2, %v16545_v17 }
 0x3ba   : > { %10483 = vrot.lane.b32.xlu0 %v10472_v7, %s13519_s10  ;;  %v5646_v21 = vcombine.low %v16533_v43, %v4312_v25  ;;  %v5667_v13 = vrot.slane %v5645_v40, %v14210_v32  ;;  %v6932_v52 = vcombine.high %v6234_v50, %v6234_v50  ;;  %v6939_v28 = vrot.slane %v6234_v50, %v14210_v32  ;;  %v13145_v62 = vpop.f32.mrb[25].mxu0 }
 0x3bb   : > { %v1067_v39 = vpop.permute.xlu1 %1066  ;;  %v16575_v38 = vrot.slane %v4283_v11, %v14210_v32  ;;  %v4313_v37 = vcombine.high %v4297_v58, %v4297_v58  ;;  %v4314_v35 = vcombine.high %v16533_v43, %v16533_v43  ;;  %v8521_v63 = vrot.slane %v12829_v36, %v14210_v32 }
 0x3bc   : > { %1132 = vst.msk [vmem:[#allocation3 + $0xd0] sm:$0xff] %vm18866_vm9, %v1067_v39  ;;  %v2883_v61 = vpop.permute.xlu0 %2882  ;;  %v5674_v6 = vrot.slane %v5646_v21, %v14210_v32  ;;  %v6946_v9 = vrot.slane %v6932_v52, %v14210_v32  ;;  %v6947_v15 = vcombine.high %v6939_v28, %v6939_v28  ;;  %v16568_v44 = vrot.slane %v6939_v28, %v14210_v32 }
 0x3bd   : > { %2951 = vst.msk [vmem:[#allocation3 + $0xb8] sm:$0x7f] %vm18867_vm7, %v2883_v61  ;;  %10443 = vrot.lane.b32.xlu1 %v10432_v20, %s13519_s10  ;;  %v6929_v29 = vcombine.high %v16545_v17, %v16545_v17  ;;  %v8535_v41 = vrot.slane %v12830_v46, %v14210_v32  ;;  %v8543_v25 = vcombine.low %v8521_v63, %v8528_v54  ;;  %vm9534_vm1 = vcmp.ge.f32.partialorder %v6931_v8, 0.0 }
 0x3be   : > { %v5676_v33 = vcombine.low %v5667_v13, %v5674_v6  ;;  %v16571_v4 = vrot.slane %v6947_v15, %v14210_v32  ;;  %v6948_v5 = vcombine.high %v6946_v9, %v6946_v9  ;;  %v5692_v42 = vcombine.low %v4314_v35, %v4297_v58 }
 0x3bf   : > { %v2156_v12 = vpop.permute.xlu1 %2155  ;;  %v5693_v21 = vcombine.low %v16575_v38, %v4313_v37  ;;  %v9730_v39 = vmul.f32 0.2, %v6931_v8  ;;  %v9725_v20 = vmul.f32 0.2, %v6928_v30  ;;  %v16602_v13 = vrot.slane %v6946_v9, %v14210_v32 }
 0x3c0   : > { %2223 = vst.msk [vmem:[#allocation3 + $0xc0] sm:$0xff] %vm18868_vm12, %v2156_v12  ;;  %v1611_v24 = vpop.permute.xlu0 %1610  ;;  %v5690_v53 = vrot.slane %v5676_v33, %v14210_v32  ;;  %v8514_v22 = vcombine.low %v16568_v44, %v16571_v4  ;;  %v16598_v7 = vrot.slane %v6948_v5, %v14210_v32  ;;  %vm18872_vm3 = vcmask 392544  }
 0x3c1   : > { %1677 = vst.msk [vmem:[#allocation3 + $0xc8] sm:$0x7f] %vm18869_vm14, %v1611_v24  ;;  %vm9529_vm9 = vcmp.ge.f32.partialorder %v6928_v30, 0.0  ;;  %v9729_v47 = vmul.f32 0.2, %v6929_v29  ;;  %v8551_v52 = vrot.slane %v8543_v25, %v14210_v32  ;;  %vm18873_vm7 = vcmask 293120  }
 0x3c2   : > { %v5691_v57 = vcombine.low %v5683_v45, %v5690_v53  ;;  %v8542_v40 = vrot.slane %v8514_v22, %v14210_v32  ;;  %vm9532_vm12 = vcmp.ge.f32.partialorder %v16537_v2, 0.0  ;;  %vm9533_vm14 = vcmp.ge.f32.partialorder %v6929_v29, 0.0 }
 0x3c3   : > { %v1249_v60 = vpop.permute.xlu1 %1248  ;;  %v16611_v62 = vsel %vm9530_vm6, %v6930_v31, %v9726_v27  ;;  %v8561_v11 = vcombine.low %v16602_v13, %v16598_v7  ;;  %v5702_v33 = vrot.slane %v5692_v42, %v14210_v32  ;;  %v5709_v58 = vrot.slane %v5693_v21, %v14210_v32 }
 0x3c4   : > { %1314 = vst.msk [vmem:[#allocation3 + $0xd0] sm:$0xff] %vm18870_vm4, %v1249_v60  ;;  %v3065_v43 = vpop.permute.xlu0 %3064  ;;  %13168 = vmatmul.mubr.msk.f32.gmra.mrb[40].mxu0 %vm6049_vm8, %v5691_v57  ;;  %v8544_v50 = vcombine.low %v8535_v41, %v8542_v40  ;;  %v16620_v36 = vsel %vm9531_vm5, %v16545_v17, %v9727_v59  ;;  %v16622_v15 = vsel %vm9529_vm9, %v6928_v30, %v9725_v20  ;;  %vm18874_vm4 = vcmask 228544  }
 0x3c5   : > { %3133 = vst.msk [vmem:[#allocation3 + $0xb8] sm:$0x7f] %vm18871_vm13, %v3065_v43  ;;  %13170 = vmatprep.mubr.msk.f32.mxu0 %vm18619_vm10, %v18752_v14  ;;  %v16625_v12 = vsel %vm9534_vm1, %v6931_v8, %v9730_v39  ;;  %v12831_v46 = vcombine.high %v16568_v44, %v16571_v4  ;;  %v16630_v24 = vsel %vm9532_vm12, %v16537_v2, %v9728_v55  ;;  %vm9535_vm5 = vcmp.ge.f32.partialorder %v16568_v44, 0.0 }
 0x3c6   : > { %v8558_v28 = vrot.slane %v8544_v50, %v14210_v32  ;;  %v16632_v45 = vsel %vm9533_vm14, %v6929_v29, %v9729_v47  ;;  %v4315_v54 = vcombine.high %v16575_v38, %v16575_v38  ;;  %v16639_v5 = vcombine.high %v16568_v44, %v16568_v44 }
 0x3c7   : > { %v2338_v61 = vpop.permute.xlu1 %2337  ;;  %v9731_v2 = vmul.f32 0.2, %v16568_v44  ;;  %vm18875_vm6 = vcmask 129120   ;;  %v16649_v37 = vcombine.high %v16602_v13, %v16602_v13  ;;  %v16653_v38 = vcombine.high %v16571_v4, %v16571_v4 }
 0x3c8   : > { %2405 = vst.msk [vmem:[#allocation3 + $0xc0] sm:$0xff] %vm18872_vm3, %v2338_v61  ;;  %v1794_v6 = vpop.permute.xlu0 %1793  ;;  %v8559_v9 = vcombine.low %v8551_v52, %v8558_v28  ;;  %v8576_v30 = vrot.slane %v8561_v11, %v14210_v32  ;;  %v16656_v8 = vcombine.low %v5702_v33, %v5709_v58  ;;  %vm9539_vm13 = vcmp.ge.f32.partialorder %v16602_v13, 0.0 }
 0x3c9   : > { %1860 = vst.msk [vmem:[#allocation3 + $0xc8] sm:$0x7f] %vm18873_vm7, %v1794_v6  ;;  %v6239_v35 = vpop.f32.mrb[26].mxu0  ;;  %v9735_v41 = vmul.f32 0.2, %v16602_v13  ;;  %v12832_v25 = vcombine.high %v16602_v13, %v16598_v7  ;;  %v8569_v40 = vrot.slane %v12831_v46, %v14210_v32  ;;  %vm18876_vm1 = vcmask 425344  }
 0x3ca   : > { %9427 = vst.msk [vmem:[%s14771_s12 + $0x60] sm:$0xff] %vm6049_vm8, %v8559_v9  ;;  %v6981_v63 = vcombine.high %v6239_v35, %v6239_v35  ;;  %v6988_v22 = vrot.slane %v6239_v35, %v14210_v32  ;;  %v13148_v60 = vpop.f32.mrb[27].mxu0  ;;  %v16669_v42 = vsel %vm9535_vm5, %v16568_v44, %v9731_v2  ;;  %vm18877_vm3 = vcmask 325920  }
 0x3cb   : > { %v1431_v31 = vpop.permute.xlu1 %1430  ;;  %v16676_v61 = vcombine.high %v16598_v7, %v16598_v7  ;;  %v8591_v20 = vcombine.low %v8569_v40, %v8576_v30  ;;  %v16688_v33 = vmul.f32 0.2, %v16653_v38  ;;  %v8583_v9 = vrot.slane %v12832_v25, %v14210_v32 }
 0x3cc   : > { %1496 = vst.msk [vmem:[#allocation3 + $0xd0] sm:$0xff] %vm18874_vm4, %v1431_v31  ;;  %v887_v53 = vpop.permute.xlu0 %886  ;;  %v3163_v17 = vld [vmem:[#allocation3 + $0xb8] sm:$0x7f]  ;;  %v6995_v21 = vrot.slane %v6981_v63, %v14210_v32  ;;  %v6996_v39 = vcombine.high %v6988_v22, %v6988_v22  ;;  %v7004_v50 = vrot.slane %v6988_v22, %v14210_v32  ;;  %vm18878_vm9 = vcmask 261344  }
 0x3cd   : > { %951 = vst.msk [vmem:[#allocation3 + $0xd8] sm:$0x7f] %vm18875_vm6, %v887_v53  ;;  %v4323_v57 = vrot.slane %v3163_v17, %v14210_v32  ;;  %v4316_v55 = vcombine.high %v3163_v17, %v3163_v17  ;;  %v16698_v53 = vsel %vm9539_vm13, %v16602_v13, %v9735_v41  ;;  %vm18879_vm7 = vcmask 161920  }
 0x3ce   : > { %v6997_v47 = vcombine.high %v6995_v21, %v6995_v21  ;;  %v16682_v44 = vrot.slane %v6995_v21, %v14210_v32  ;;  %v16685_v52 = vrot.slane %v6996_v39, %v14210_v32  ;;  %v16690_v58 = vcombine.high %v7004_v50, %v7004_v50 }
 0x3cf   : > { %v2521_v29 = vpop.permute.xlu1 %2520  ;;  %v4331_v59 = vcombine.high %v4323_v57, %v4323_v57  ;;  %v4339_v43 = vrot.slane %v4323_v57, %v14210_v32  ;;  %v8590_v31 = vrot.slane %v7004_v50, %v14210_v32  ;;  %v16713_v35 = vmul.f32 0.2, %v16676_v61 }
 0x3d0   : > { %2588 = vst.msk [vmem:[#allocation3 + $0xc0] sm:$0xff] %vm18876_vm1, %v2521_v29  ;;  %v1976_v27 = vpop.permute.xlu0 %1975  ;;  %v16701_v17 = vrot.slane %v6997_v47, %v14210_v32  ;;  %v16705_v2 = vcombine.high %v16682_v44, %v16682_v44  ;;  %v16709_v57 = vcombine.high %v16685_v52, %v16685_v52  ;;  %v8599_v13 = vrot.slane %v8591_v20, %v14210_v32 }
 0x3d1   : > { %2042 = vst.msk [vmem:[#allocation3 + $0xc8] sm:$0x7f] %vm18877_vm3, %v1976_v27  ;;  %v16679_v6 = vrot.slane %v4331_v59, %v14210_v32  ;;  %v4361_v11 = vcombine.high %v4339_v43, %v4339_v43  ;;  %v8592_v30 = vcombine.low %v8583_v9, %v8590_v31  ;;  %v16717_v63 = vrot.slane %v4316_v55, %v14210_v32 }
 0x3d2   : > { %v16721_v22 = vcombine.high %v16701_v17, %v16701_v17  ;;  %vm9543_vm12 = vcmp.ge.f32.partialorder %v16685_v52, 0.0  ;;  %v5694_v29 = vcombine.low %v4315_v54, %v4339_v43  ;;  %vm9544_vm14 = vcmp.ge.f32.partialorder %v16690_v58, 0.0 }
 0x3d3   : > { %v1613_v28 = vpop.permute.xlu1 %1612  ;;  %v5695_v59 = vcombine.low %v16679_v6, %v4361_v11  ;;  %v8606_v41 = vrot.slane %v8592_v30, %v14210_v32  ;;  %vm9545_vm4 = vcmp.ge.f32.partialorder %v16709_v57, 0.0  ;;  %vm9546_vm5 = vcmp.ge.f32.partialorder %v16682_v44, 0.0 }
 0x3d4   : > { %1678 = vst.msk [vmem:[#allocation3 + $0xd0] sm:$0xff] %vm18878_vm9, %v1613_v28  ;;  %v1069_v46 = vpop.permute.xlu0 %1068  ;;  %vm18880_vm6 = vcmask 458144   ;;  %vm9547_vm13 = vcmp.ge.f32.partialorder %v16701_v17, 0.0  ;;  %vm9548_vm1 = vcmp.ge.f32.partialorder %v16705_v2, 0.0  ;;  %v9739_v54 = vmul.f32 0.2, %v16685_v52 }
 0x3d5   : > { %1133 = vst.msk [vmem:[#allocation3 + $0xd8] sm:$0x7f] %vm18879_vm7, %v1069_v46  ;;  %v9740_v43 = vmul.f32 0.2, %v16690_v58  ;;  %vm18881_vm3 = vcmask 358720   ;;  %v8607_v40 = vcombine.low %v8599_v13, %v8606_v41  ;;  %vm9549_vm9 = vcmp.ge.f32.partialorder %v16721_v22, 0.0 }
 0x3d6   : > { %v9741_v27 = vmul.f32 0.2, %v16709_v57  ;;  %v9742_v21 = vmul.f32 0.2, %v16682_v44  ;;  %v9743_v39 = vmul.f32 0.2, %v16701_v17  ;;  %v9935_v20 = vsel %vm9543_vm12, %v16685_v52, %v9739_v54 }
 0x3d7   : > { %v2703_v60 = vpop.permute.xlu1 %2702  ;;  %v9744_v50 = vmul.f32 0.2, %v16705_v2  ;;  %v5716_v47 = vrot.slane %v5694_v29, %v14210_v32  ;;  %9428 = vst.msk [vmem:[%s14771_s12 + $0x68] sm:$0x7f] %vm9415_vm11, %v8607_v40  ;;  %v9936_v28 = vsel %vm9544_vm14, %v16690_v58, %v9740_v43  ;;  %vm18882_vm7 = vcmask 294144  }
 0x3d8   : > { %2770 = vst.msk [vmem:[#allocation3 + $0xc0] sm:$0xff] %vm18880_vm6, %v2703_v60  ;;  %v2158_v25 = vpop.permute.xlu0 %2157  ;;  %v9937_v11 = vsel %vm9545_vm4, %v16709_v57, %v9741_v27  ;;  %v9938_v9 = vsel %vm9546_vm5, %v16682_v44, %v9742_v21  ;;  %v9939_v31 = vsel %vm9547_vm13, %v16701_v17, %v9743_v39  ;;  %vm9538_vm12 = vcmp.ge.f32.partialorder %v16653_v38, 0.0 }
 0x3d9   : > { %2224 = vst.msk [vmem:[#allocation3 + $0xc8] sm:$0x7f] %vm18881_vm3, %v2158_v25  ;;  %v9745_v30 = vmul.f32 0.2, %v16721_v22  ;;  %v9940_v13 = vsel %vm9548_vm1, %v16705_v2, %v9744_v50  ;;  %v16765_v60 = vmax.f32 %v16622_v15, %v9935_v20  ;;  %v16768_v29 = vmax.f32 %v16611_v62, %v9936_v28 }
 0x3da   : > { %vm18883_vm14 = vcmask 194720   ;;  %vm9542_vm4 = vcmp.ge.f32.partialorder %v16676_v61, 0.0  ;;  %v16773_v41 = vmax.f32 %v16620_v36, %v9937_v11  ;;  %v16776_v25 = vmax.f32 %v16630_v24, %v9938_v9 }
 0x3db   : > { %v1796_v55 = vpop.permute.xlu1 %1795  ;;  %v16779_v54 = vmax.f32 %v16632_v45, %v9939_v31  ;;  %v16782_v43 = vmax.f32 %v16625_v12, %v9940_v13  ;;  %v8609_v62 = vcombine.low %v16709_v57, %v16682_v44  ;;  %v10159_v15 = vmax.f32 %v16131_v16, %v16765_v60 }
 0x3dc   : > { %1861 = vst.msk [vmem:[#allocation3 + $0xd0] sm:$0xff] %vm18882_vm7, %v1796_v55  ;;  %v1251_v46 = vpop.permute.xlu0 %1250  ;;  %v10160_v40 = vmax.f32 %v16134_v19, %v16768_v29  ;;  %v5723_v36 = vrot.slane %v5695_v59, %v14210_v32  ;;  %v10161_v24 = vmax.f32 %v16138_v26, %v16773_v41  ;;  %v10162_v45 = vmax.f32 %v16141_v51, %v16776_v25 }
 0x3dd   : > { %1315 = vst.msk [vmem:[#allocation3 + $0xd8] sm:$0x7f] %vm18883_vm14, %v1251_v46  ;;  %v10163_v12 = vmax.f32 %v16158_v48, %v16779_v54  ;;  %v10164_v44 = vmax.f32 %v16291_v3, %v16782_v43  ;;  %vm18884_vm5 = vcmask 490944   ;;  %v8608_v19 = vcombine.low %v16685_v52, %v16690_v58 }
 0x3de   : > { %v5725_v57 = vcombine.low %v5716_v47, %v5723_v36  ;;  %v5732_v59 = vrot.slane %v16656_v8, %v14210_v32  ;;  %vm18885_vm6 = vcmask 391520   ;;  %v9941_v26 = vsel %vm9549_vm9, %v16721_v22, %v9745_v30 }
 0x3df   : > { %v2885_v27 = vpop.permute.xlu1 %2884  ;;  %v10227_v51 = vmax.f32 %v10159_v15, %v10160_v40  ;;  %v10228_v48 = vmax.f32 %v10161_v24, %v10162_v45  ;;  %v16808_v21 = vmax.f32 %v10163_v12, %v10164_v44  ;;  %v16811_v3 = vmax.f32 %v16669_v42, %v9941_v26 }
 0x3e0   : > { %2952 = vst.msk [vmem:[#allocation3 + $0xc0] sm:$0xff] %vm18884_vm5, %v2885_v27  ;;  %v2340_v16 = vpop.permute.xlu0 %2339  ;;  %v8625_v39 = vrot.slane %v8609_v62, %v14210_v32  ;;  %v5739_v52 = vrot.slane %v5725_v57, %v14210_v32  ;;  %v4332_v8 = vcombine.high %v16717_v63, %v16717_v63  ;;  %v4346_v50 = vrot.slane %v16717_v63, %v14210_v32 }
 0x3e1   : > { %2406 = vst.msk [vmem:[#allocation3 + $0xc8] sm:$0x7f] %vm18885_vm6, %v2340_v16  ;;  %v10269_v20 = vmax.f32 %v10227_v51, %v10228_v48  ;;  %v10270_v55 = vmax.f32 %v10228_v48, %v16808_v21  ;;  %vm9536_vm13 = vcmp.ge.f32.partialorder %v16571_v4, 0.0  ;;  %v9732_v47 = vmul.f32 0.2, %v16571_v4 }
 0x3e2   : > { %vm18886_vm1 = vcmask 326944   ;;  %v8618_v28 = vrot.slane %v8608_v19, %v14210_v32  ;;  %v5740_v11 = vcombine.low %v5732_v59, %v5739_v52  ;;  %v9733_v9 = vmul.f32 0.2, %v16639_v5 }
 0x3e3   : > { %v1978_v58 = vpop.permute.xlu1 %1977  ;;  %v9736_v31 = vmul.f32 0.2, %v16598_v7  ;;  %vm18887_vm3 = vcmask 227520   ;;  %10305 = vst.msk [vmem:[#allocation4 + $0x19] sm:$0x1] %vm10302_vm0, %v10269_v20  ;;  %vm9537_vm9 = vcmp.ge.f32.partialorder %v16639_v5, 0.0  ;;  %v8610_v46 = vcombine.low %v16701_v17, %v16705_v2 }
 0x3e4   : > { %2043 = vst.msk [vmem:[#allocation3 + $0xd0] sm:$0xff] %vm18886_vm1, %v1978_v58  ;;  %v1433_v42 = vpop.permute.xlu0 %1432  ;;  %vm9540_vm7 = vcmp.ge.f32.partialorder %v16598_v7, 0.0  ;;  %vm9541_vm14 = vcmp.ge.f32.partialorder %v16649_v37, 0.0  ;;  %v9737_v63 = vmul.f32 0.2, %v16649_v37  ;;  %v8640_v30 = vcombine.low %v8618_v28, %v8625_v39  ;;  %13171 = vmatmul.mubr.msk.f32.gmra.mrb[42].mxu0 %vm6049_vm8, %v5740_v11 }
 0x3e5   : > { %1497 = vst.msk [vmem:[#allocation3 + $0xd8] sm:$0x7f] %vm18887_vm3, %v1433_v42  ;;  %v6244_v13 = vpop.f32.mrb[28].mxu0  ;;  %v4360_v15 = vrot.slane %v4332_v8, %v14210_v32  ;;  %v4362_v40 = vcombine.high %v4346_v50, %v4346_v50  ;;  %v16841_v24 = vsel %vm9536_vm13, %v16571_v4, %v9732_v47  ;;  %v16847_v17 = vsel %vm9538_vm12, %v16653_v38, %v16688_v33 }
 0x3e6   : > { %10311 = vst.msk [vmem:[#allocation4 + $0x1a] sm:$0x1] %vm10302_vm0, %v10270_v55  ;;  %v7030_v36 = vcombine.high %v6244_v13, %v6244_v13  ;;  %v7037_v27 = vrot.slane %v6244_v13, %v14210_v32  ;;  %v13151_v2 = vpop.f32.mrb[29].mxu0  ;;  %13173 = vmatprep.mubr.msk.f32.mxu0 %vm18619_vm10, %v18752_v14  ;;  %v16855_v12 = vsel %vm9537_vm9, %v16639_v5, %v9733_v9  ;;  %vm18888_vm12 = vcmask 359744  }
 0x3e7   : > { %v3067_v62 = vpop.permute.xlu1 %3066  ;;  %v16860_v4 = vsel %vm9540_vm7, %v16598_v7, %v9736_v31  ;;  %v16866_v38 = vsel %vm9542_vm4, %v16676_v61, %v16713_v35  ;;  %v4363_v33 = vcombine.high %v16679_v6, %v16679_v6  ;;  %v16876_v7 = vsel %vm9541_vm14, %v16649_v37, %v9737_v63 }
 0x3e8   : > { %3134 = vst.msk [vmem:[#allocation3 + $0xc0] sm:$0xff] %vm3108_vm15, %v3067_v62  ;;  %v2523_v45 = vpop.permute.xlu0 %2522  ;;  %v7044_v44 = vrot.slane %v7030_v36, %v14210_v32  ;;  %v7045_v5 = vcombine.high %v7037_v27, %v7037_v27  ;;  %v7053_v16 = vrot.slane %v7037_v27, %v14210_v32  ;;  %v8648_v19 = vrot.slane %v8640_v30, %v14210_v32 }
 0x3e9   : > { %2589 = vst.msk [vmem:[#allocation3 + $0xc8] sm:$0x7f] %vm2564_vm2, %v2523_v45  ;;  %v8632_v61 = vrot.slane %v8610_v46, %v14210_v32  ;;  %v10165_v35 = vmax.f32 %v16295_v49, %v16811_v3  ;;  %v16882_v59 = vcombine.low %v4360_v15, %v4362_v40  ;;  %vm18889_vm5 = vcmask 392544  }
 0x3ea   : > { %v7046_v6 = vcombine.high %v7044_v44, %v7044_v44  ;;  %v7060_v26 = vrot.slane %v7044_v44, %v14210_v32  ;;  %v7067_v51 = vrot.slane %v7045_v5, %v14210_v32  ;;  %v7075_v48 = vcombine.high %v7053_v16, %v7053_v16 }
 0x3eb   : > { %v2160_v57 = vpop.permute.xlu1 %2159  ;;  %v8611_v39 = vcombine.low %v16721_v22, %v7053_v16  ;;  %vm9550_vm4 = vcmp.ge.f32.partialorder %v7053_v16, 0.0  ;;  %v9746_v52 = vmul.f32 0.2, %v7053_v16  ;;  %v16889_v58 = vcombine.low %v4363_v33, %v4346_v50 }
 0x3ec   : > { %2225 = vst.msk [vmem:[#allocation3 + $0xd0] sm:$0xff] %vm18888_vm12, %v2160_v57  ;;  %v2342_v37 = vpop.permute.xlu0 %2341  ;;  %v7074_v8 = vrot.slane %v7046_v6, %v14210_v32  ;;  %v7076_v20 = vcombine.high %v7060_v26, %v7060_v26  ;;  %v7077_v55 = vcombine.high %v7067_v51, %v7067_v51  ;;  %v8657_v47 = vcombine.low %v7067_v51, %v7075_v48 }
 0x3ed   : > { %2407 = vst.msk [vmem:[#allocation3 + $0xd0] sm:$0xff] %vm18889_vm5, %v2342_v37  ;;  %v8639_v42 = vrot.slane %v8611_v39, %v14210_v32  ;;  %vm9551_vm6 = vcmp.ge.f32.partialorder %v7067_v51, 0.0  ;;  %vm9552_vm13 = vcmp.ge.f32.partialorder %v7075_v48, 0.0  ;;  %vm9554_vm1 = vcmp.ge.f32.partialorder %v7060_v26, 0.0 }
 0x3ee   : > { %v7855_v11 = vcombine.high %v7074_v8, %v7074_v8  ;;  %v8658_v9 = vcombine.low %v7077_v55, %v7060_v26  ;;  %v8659_v22 = vcombine.low %v7074_v8, %v7076_v20  ;;  %v8666_v31 = vrot.slane %v8657_v47, %v14210_v32 }
 0x3ef   : > { %v1615_v28 = vpop.permute.xlu1 %1614  ;;  %vm18890_vm3 = vcmask 260320   ;;  %v8641_v63 = vcombine.low %v8632_v61, %v8639_v42  ;;  %vm9553_vm9 = vcmp.ge.f32.partialorder %v7077_v55, 0.0  ;;  %vm9555_vm7 = vcmp.ge.f32.partialorder %v7074_v8, 0.0 }
 0x3f0   : > { %1679 = vst.msk [vmem:[#allocation3 + $0xd8] sm:$0x7f] %vm18890_vm3, %v1615_v28  ;;  %v1798_v50 = vpop.permute.xlu0 %1797  ;;  %vm9556_vm14 = vcmp.ge.f32.partialorder %v7076_v20, 0.0  ;;  %vm18891_vm12 = vcmask 293120   ;;  %v8673_v46 = vrot.slane %v8658_v9, %v14210_v32  ;;  %v8680_v30 = vrot.slane %v8659_v22, %v14210_v32  ;;  %v3164_v9 = vld [vmem:[#allocation3 + $0xc0] sm:$0xff] }
 0x3f1   : > { %1862 = vst.msk [vmem:[#allocation3 + $0xd8] sm:$0x7f] %vm18891_vm12, %v1798_v50  ;;  %v8687_v13 = vrot.slane %v7855_v11, %v14210_v32  ;;  %v9747_v62 = vmul.f32 0.2, %v7067_v51  ;;  %v8655_v15 = vrot.slane %v8641_v63, %v14210_v32  ;;  %v9748_v40 = vmul.f32 0.2, %v7075_v48 }
 0x3f2   : > { %v9749_v36 = vmul.f32 0.2, %v7077_v55  ;;  %v9750_v27 = vmul.f32 0.2, %v7060_v26  ;;  %v8688_v45 = vcombine.low %v8666_v31, %v8673_v46  ;;  %v9751_v44 = vmul.f32 0.2, %v7074_v8 }
 0x3f3   : > { %v2705_v2 = vpop.permute.xlu1 %2704  ;;  %v8689_v33 = vcombine.low %v8680_v30, %v8687_v13  ;;  %v9752_v5 = vmul.f32 0.2, %v7076_v20  ;;  %vm18892_vm5 = vcmask 457120   ;;  %v8656_v57 = vcombine.low %v8648_v19, %v8655_v15 }
 0x3f4   : > { %2771 = vst.msk [vmem:[#allocation3 + $0xc8] sm:$0x7f] %vm18892_vm5, %v2705_v2  ;;  %v2887_v61 = vpop.permute.xlu0 %2886  ;;  %v9942_v6 = vsel %vm9550_vm4, %v7053_v16, %v9746_v52  ;;  %v9943_v37 = vsel %vm9551_vm6, %v7067_v51, %v9747_v62  ;;  %v9944_v39 = vsel %vm9552_vm13, %v7075_v48, %v9748_v40  ;;  %vm18893_vm3 = vcmask 489920  }
 0x3f5   : > { %2953 = vst.msk [vmem:[#allocation3 + $0xc8] sm:$0x7f] %vm18893_vm3, %v2887_v61  ;;  %v8696_v47 = vrot.slane %v8688_v45, %v14210_v32  ;;  %v8703_v42 = vrot.slane %v8689_v33, %v14210_v32  ;;  %v9945_v28 = vsel %vm9553_vm9, %v7077_v55, %v9749_v36  ;;  %v9946_v11 = vsel %vm9554_vm1, %v7060_v26, %v9750_v27 }
 0x3f6   : > { %9429 = vst.msk [vmem:[%s14771_s12 + $0x70] sm:$0xff] %vm6049_vm8, %v8656_v57  ;;  %v9947_v19 = vsel %vm9555_vm7, %v7074_v8, %v9751_v44  ;;  %v9948_v16 = vsel %vm9556_vm14, %v7076_v20, %v9752_v5  ;;  %v16914_v51 = vmax.f32 %v16841_v24, %v9942_v6  ;;  %v16917_v48 = vmax.f32 %v16855_v12, %v9943_v37 }
 0x3f7   : > { %v2525_v52 = vpop.permute.xlu1 %2524  ;;  %v8704_v22 = vcombine.low %v8696_v47, %v8703_v42  ;;  %v16920_v55 = vmax.f32 %v16847_v17, %v9944_v39  ;;  %v16923_v26 = vmax.f32 %v16698_v53, %v9945_v28  ;;  %v16926_v8 = vmax.f32 %v16860_v4, %v9946_v11 }
 0x3f8   : > { %vm18894_vm4 = vcmask 425344   ;;  %v1980_v20 = vpop.permute.xlu0 %1979  ;;  %v16930_v24 = vmax.f32 %v16876_v7, %v9947_v19  ;;  %v16933_v12 = vmax.f32 %v16866_v38, %v9948_v16  ;;  %v10166_v31 = vmax.f32 %v16298_v23, %v16914_v51 }
 0x3f9   : > { %2590 = vst.msk [vmem:[#allocation3 + $0xd0] sm:$0xff] %vm18894_vm4, %v2525_v52  ;;  %v10167_v17 = vmax.f32 %v16301_v0, %v16917_v48  ;;  %vm18895_vm6 = vcmask 325920   ;;  %v10168_v53 = vmax.f32 %v16304_v18, %v16920_v55  ;;  %v10169_v4 = vmax.f32 %v16312_v34, %v16923_v26 }
 0x3fa   : > { %2044 = vst.msk [vmem:[#allocation3 + $0xd8] sm:$0x7f] %vm18895_vm6, %v1980_v20  ;;  %v10170_v38 = vmax.f32 %v16315_v1, %v16926_v8  ;;  %v4371_v7 = vrot.slane %v3164_v9, %v14210_v32  ;;  %v10171_v23 = vmax.f32 %v16318_v10, %v16930_v24  ;;  %v10172_v0 = vmax.f32 %v16466_v56, %v16933_v12 }
 0x3fb   : > { %9430 = vst.msk [vmem:[%s14771_s12 + $0x78] sm:$0x7f] %vm9415_vm11, %v8704_v22  ;;  %v10230_v50 = vmax.f32 %v10165_v35, %v10166_v31  ;;  %v889_v63 = vpop.permute.xlu1 %888  ;;  %v4364_v18 = vcombine.high %v3164_v9, %v3164_v9  ;;  %v10231_v46 = vmax.f32 %v10167_v17, %v10168_v53  ;;  %vm18896_vm13 = vcmask 130144  }
 0x3fc   : > { %v10232_v30 = vmax.f32 %v10169_v4, %v10170_v38  ;;  %952 = vst.msk [vmem:[#allocation3 + $0xe0] sm:$0xff] %vm18896_vm13, %v889_v63  ;;  %v3069_v34 = vpop.permute.xlu0 %3068  ;;  %v4379_v1 = vcombine.high %v4371_v7, %v4371_v7  ;;  %v5758_v13 = vrot.slane %v16882_v59, %v14210_v32  ;;  %v10253_v62 = vmax.f32 %v10171_v23, %v10172_v0 }
 0x3fd   : > { %v10271_v10 = vmax.f32 %v16808_v21, %v10230_v50  ;;  %vm18897_vm1 = vcmask 522720   ;;  %v5751_v49 = vrot.slane %v16889_v58, %v14210_v32  ;;  %v4378_v56 = vrot.slane %v4364_v18, %v14210_v32 }
 0x3fe   : > { %3135 = vst.msk [vmem:[#allocation3 + $0xc8] sm:$0x7f] %vm18897_vm1, %v3069_v34  ;;  %v10272_v35 = vmax.f32 %v10230_v50, %v10231_v46  ;;  %v10273_v15 = vmax.f32 %v10231_v46, %v10232_v30  ;;  %v4387_v40 = vrot.slane %v4371_v7, %v14210_v32  ;;  %v4401_v36 = vrot.slane %v4379_v1, %v14210_v32 }
 0x3ff   : > { %v10274_v27 = vmax.f32 %v10232_v30, %v10253_v62  ;;  %10317 = vst.msk [vmem:[#allocation4 + $0x1b] sm:$0x1] %vm10302_vm0, %v10271_v10  ;;  %v2707_v59 = vpop.permute.xlu1 %2706  ;;  %v4380_v2 = vcombine.high %v4378_v56, %v4378_v56  ;;  %vm18898_vm9 = vcmask 458144   ;;  %vm18899_vm7 = vcmask 358720  }
 0x400   : > { %10323 = vst.msk [vmem:[#allocation4 + $0x1c] sm:$0x1] %vm10302_vm0, %v10272_v35  ;;  %10329 = vst.msk [vmem:[#allocation4 + $0x1d] sm:$0x1] %vm10302_vm0, %v10273_v15  ;;  %v2162_v21 = vpop.permute.xlu0 %2161  ;;  %v5743_v58 = vcombine.low %v4387_v40, %v4401_v36  ;;  %v12784_v45 = vcombine.high %v4387_v40, %v4401_v36  ;;  %v5773_v5 = vcombine.low %v5751_v49, %v5758_v13  ;;  %vm18900_vm14 = vcmask 162944  }
 0x401   : > { %2772 = vst.msk [vmem:[#allocation3 + $0xd0] sm:$0xff] %vm18898_vm9, %v2707_v59  ;;  %v4408_v61 = vrot.slane %v4380_v2, %v14210_v32  ;;  %v4394_v47 = vrot.slane %v4378_v56, %v14210_v32  ;;  %vm18901_vm12 = vcmask 195744   ;;  %vm18902_vm5 = vcmask 490944  }
 0x402   : > { %10335 = vst.msk [vmem:[#allocation4 + $0x1e] sm:$0x1] %vm10302_vm0, %v10274_v27  ;;  %v5765_v33 = vrot.slane %v5743_v58, %v14210_v32  ;;  %v5772_v44 = vrot.slane %v12784_v45, %v14210_v32  ;;  %v5781_v28 = vrot.slane %v5773_v5, %v14210_v32  ;;  %vm18903_vm3 = vcmask 520192  }
 0x403   : > { %2226 = vst.msk [vmem:[#allocation3 + $0xd8] sm:$0x7f] %vm18899_vm7, %v2162_v21  ;;  %v1071_v57 = vpop.permute.xlu1 %1070  ;;  %v5790_v19 = vcombine.low %v4394_v47, %v4408_v61  ;;  %v12785_v16 = vcombine.high %v4394_v47, %v4408_v61  ;;  %vm18904_vm4 = vmmov %vm18903_vm3  ;;  %vm18909_vm7 = vcmask 391520  }
 0x404   : > { %v5774_v6 = vcombine.low %v5765_v33, %v5772_v44  ;;  %1134 = vst.msk [vmem:[#allocation3 + $0xe0] sm:$0xff] %vm18900_vm14, %v1071_v57  ;;  %v1253_v37 = vpop.permute.xlu0 %1252  ;;  %vm18905_vm6 = vmmov %vm18903_vm3 }
 0x405   : > { %v3165_v39 = vld [vmem:[#allocation3 + $0xc8] sm:$0x7f]  ;;  %1316 = vst.msk [vmem:[#allocation3 + $0xe0] sm:$0xff] %vm18901_vm12, %v1253_v37  ;;  %v5800_v0 = vrot.slane %v5790_v19, %v14210_v32  ;;  %v5807_v50 = vrot.slane %v12785_v16, %v14210_v32  ;;  %vm18906_vm13 = vmmov %vm18903_vm3 }
 0x406   : > { %v4420_v42 = vrot.slane %v3165_v39, %v14210_v32  ;;  %v5788_v11 = vrot.slane %v5774_v6, %v14210_v32  ;;  %v4413_v13 = vcombine.high %v3165_v39, %v3165_v39  ;;  %vm18907_vm1 = vmmov %vm18903_vm3 }
 0x407   : > { %v10513_v52 = vld [vmem:[#allocation4 + $0x19] sm:$0x1f]  ;;  %v2889_v9 = vpop.permute.xlu1 %2888  ;;  %vm18908_vm9 = vmmov %vm18907_vm1  ;;  %v5822_v40 = vcombine.low %v5800_v0, %v5807_v50 }
 0x408   : > { %v4428_v22 = vcombine.high %v4420_v42, %v4420_v42  ;;  %v4436_v20 = vrot.slane %v4420_v42, %v14210_v32  ;;  %v10503_v31 = vld [vmem:[#allocation4 + $0x18] sm:$0x1f]  ;;  %10524 = vrot.lane.b32.xlu1 %v10513_v52, %s13519_s10  ;;  %v5789_v53 = vcombine.low %v5781_v28, %v5788_v11  ;;  %2954 = vst.msk [vmem:[#allocation3 + $0xd0] sm:$0xff] %vm18902_vm5, %v2889_v9  ;;  %v3071_v4 = vpop.permute.xlu0 %3070  ;;  %vm18910_vm14 = vmmov %vm18907_vm1  ;;  %vm18912_vm5 = vcmask 228544  }
 0x409   : > { %v10553_v17 = vld [vmem:[#allocation4 + $0x1b] sm:$0x1f]  ;;  %10508 = vst.msk [vmem:[#allocation5 + $0x60] sm:$0x1f] %vm18903_vm3, %v10503_v31  ;;  %vm18911_vm12 = vmmov %vm18907_vm1  ;;  %v4427_v58 = vrot.slane %v4413_v13, %v14210_v32  ;;  %vm18913_vm3 = vcmask 457120   ;;  %v5830_v61 = vrot.slane %v5822_v40, %v14210_v32 }
 0x40a   : > { %v10543_v38 = vld [vmem:[#allocation4 + $0x1a] sm:$0x1f]  ;;  %10564 = vrot.lane.b32.xlu0 %v10553_v17, %s13519_s10  ;;  %3136 = vst.msk [vmem:[#allocation3 + $0xd0] sm:$0xff] %vm3108_vm15, %v3071_v4  ;;  %v4450_v7 = vrot.slane %v4428_v22, %v14210_v32  ;;  %13174 = vmatmul.mubr.msk.f32.gmra.mrb[44].mxu0 %vm6049_vm8, %v5789_v53 }
 0x40b   : > { %10548 = vst.msk [vmem:[#allocation5 + $0x68] sm:$0x1f] %vm18904_vm4, %v10543_v38  ;;  %v10342_v23 = vld [vmem:[#allocation4 + $0x18] sm:$0x1f]  ;;  %v2344_v30 = vpop.permute.xlu1 %2343  ;;  %13176 = vmatprep.mubr.msk.f32.mxu0 %vm18619_vm10, %v18752_v14  ;;  %v4429_v42 = vcombine.high %v4427_v58, %v4427_v58  ;;  %vm18914_vm4 = vcmask 261344  }
 0x40c   : > { %10348 = vst.msk [vmem:[#allocation5 + $0xc0] sm:$0x1f] %vm18905_vm6, %v10342_v23  ;;  %v10384_v63 = vld [vmem:[#allocation4 + $0x1a] sm:$0x1f]  ;;  %v5792_v34 = vcombine.low %v4436_v20, %v4450_v7  ;;  %v12786_v1 = vcombine.high %v4436_v20, %v4450_v7  ;;  %v2527_v10 = vpop.permute.xlu0 %2526  ;;  %vm18915_vm6 = vcmask 489920   ;;  %v4443_v20 = vrot.slane %v4427_v58, %v14210_v32 }
 0x40d   : > { %v10423_v18 = vld [vmem:[#allocation4 + $0x18] sm:$0x1f]  ;;  %10389 = vst.msk [vmem:[#allocation5 + $0xc8] sm:$0x1f] %vm18906_vm13, %v10384_v63  ;;  %v4457_v7 = vrot.slane %v4429_v42, %v14210_v32  ;;  %vm18916_vm13 = vcmask 294144  }
 0x40e   : > { %v10463_v46 = vld [vmem:[#allocation4 + $0x1a] sm:$0x1f]  ;;  %10428 = vst.msk [vmem:[#allocation5 + $0x90] sm:$0x1f] %vm18907_vm1, %v10423_v18  ;;  %v5814_v56 = vrot.slane %v5792_v34, %v14210_v32  ;;  %v5821_v35 = vrot.slane %v12786_v1, %v14210_v32  ;;  %vm18917_vm1 = vcmask 522720  }
 0x40f   : > { %10468 = vst.msk [vmem:[#allocation5 + $0x98] sm:$0x1f] %vm18908_vm9, %v10463_v46  ;;  %v10583_v62 = vld [vmem:[#allocation4 + $0x18] sm:$0x1f]  ;;  %v6249_v15 = vpop.f32.mrb[30].mxu0  ;;  %v1435_v2 = vpop.permute.xlu1 %1434  ;;  %vm18918_vm9 = vcmask 326944  }
 0x410   : > { %2408 = vst.msk [vmem:[#allocation3 + $0xd8] sm:$0x7f] %vm18909_vm7, %v2344_v30  ;;  %v10623_v49 = vld [vmem:[#allocation4 + $0x1a] sm:$0x1f]  ;;  %v7078_v36 = vcombine.high %v6249_v15, %v6249_v15  ;;  %v7085_v27 = vrot.slane %v6249_v15, %v14210_v32  ;;  %v13154_v59 = vpop.f32.mrb[31].mxu0  ;;  %v5823_v21 = vcombine.low %v5814_v56, %v5821_v35  ;;  %v2709_v45 = vpop.permute.xlu0 %2708  ;;  %v4459_v30 = vcombine.high %v4443_v20, %v4443_v20 }
 0x411   : > { %10588 = vst.msk [vmem:[#allocation5 + $0x30] sm:$0x1f] %vm18910_vm14, %v10583_v62  ;;  %v3166_v47 = vld [vmem:[#allocation3 + $0xd0] sm:$0xff]  ;;  %vm18919_vm7 = vcmask 359744   ;;  %vm18920_vm14 = vcmask 392544  }
 0x412   : > { %2591 = vst.msk [vmem:[#allocation3 + $0xd8] sm:$0x7f] %vm2564_vm2, %v2527_v10  ;;  %v7092_v33 = vrot.slane %v7078_v36, %v14210_v32  ;;  %v7093_v44 = vcombine.high %v7085_v27, %v7085_v27  ;;  %v5837_v5 = vrot.slane %v5823_v21, %v14210_v32  ;;  %v17012_v6 = vrot.slane %v7085_v27, %v14210_v32 }
 0x413   : > { %10628 = vst.msk [vmem:[#allocation5 + $0x38] sm:$0x1f] %vm18911_vm12, %v10623_v49  ;;  %v1617_v39 = vpop.permute.xlu1 %1616  ;;  %v4461_v19 = vcombine.high %v3166_v47, %v3166_v47  ;;  %v4468_v31 = vrot.slane %v3166_v47, %v14210_v32  ;;  %v5839_v10 = vcombine.low %v4443_v20, %v4457_v7  ;;  %vm18921_vm12 = vcmask 425344  }
 0x414   : > { %1498 = vst.msk [vmem:[#allocation3 + $0xe0] sm:$0xff] %vm18912_vm5, %v1435_v2  ;;  %v7094_v57 = vcombine.high %v7092_v33, %v7092_v33  ;;  %v17015_v37 = vrot.slane %v7093_v44, %v14210_v32  ;;  %v2891_v28 = vpop.permute.xlu0 %2890  ;;  %v5838_v11 = vcombine.low %v5830_v61, %v5837_v5  ;;  %v17019_v16 = vrot.slane %v7092_v33, %v14210_v32 }
 0x415   : > { %2773 = vst.msk [vmem:[#allocation3 + $0xd8] sm:$0x7f] %vm18913_vm3, %v2709_v45  ;;  %v4475_v50 = vrot.slane %v4461_v19, %v14210_v32  ;;  %v4476_v34 = vcombine.high %v4468_v31, %v4468_v31  ;;  %v4484_v1 = vrot.slane %v4468_v31, %v14210_v32  ;;  %v5849_v61 = vrot.slane %v5839_v10, %v14210_v32 }
 0x416   : > { %1680 = vst.msk [vmem:[#allocation3 + $0xe0] sm:$0xff] %vm18914_vm4, %v1617_v39  ;;  %v17022_v52 = vrot.slane %v7094_v57, %v14210_v32  ;;  %v8705_v9 = vcombine.low %v17012_v6, %v17015_v37  ;;  %v12833_v22 = vcombine.high %v17012_v6, %v17015_v37  ;;  %13177 = vmatmul.mubr.msk.f32.gmra.mrb[46].mxu0 %vm6049_vm8, %v5838_v11  ;;  %vm18922_vm5 = vcmask 458144  }
 0x417   : > { %2955 = vst.msk [vmem:[#allocation3 + $0xd8] sm:$0x7f] %vm18915_vm6, %v2891_v28  ;;  %v1800_v38 = vpop.permute.xlu1 %1799  ;;  %13179 = vmatprep.mubr.msk.f32.mxu0 %vm18619_vm10, %v18752_v14  ;;  %v4491_v56 = vrot.slane %v4475_v50, %v14210_v32  ;;  %v4498_v35 = vrot.slane %v4476_v34, %v14210_v32  ;;  %v4506_v15 = vcombine.high %v4484_v1, %v4484_v1  ;;  %vm10375_vm3 = vcmask 1044992  }
 0x418   : > { %v8707_v17 = vcombine.low %v17019_v16, %v17022_v52  ;;  %v12834_v53 = vcombine.high %v17019_v16, %v17022_v52  ;;  %v8715_v4 = vrot.slane %v8705_v9, %v14210_v32  ;;  %v8722_v23 = vrot.slane %v12833_v22, %v14210_v32  ;;  %1863 = vst.msk [vmem:[#allocation3 + $0xe0] sm:$0xff] %vm18916_vm13, %v1800_v38  ;;  %v3073_v0 = vpop.permute.xlu0 %3072 }
 0x419   : > { %3137 = vst.msk [vmem:[#allocation3 + $0xd8] sm:$0x7f] %vm18917_vm1, %v3073_v0  ;;  %v5840_v40 = vcombine.low %v4459_v30, %v4484_v1  ;;  %v4477_v59 = vcombine.high %v4475_v50, %v4475_v50  ;;  %v4508_v2 = vcombine.high %v4498_v35, %v4498_v35  ;;  %v5841_v21 = vcombine.low %v4498_v35, %v4506_v15 }
 0x41a   : > { %v8729_v63 = vrot.slane %v8707_v17, %v14210_v32  ;;  %v8736_v18 = vrot.slane %v12834_v53, %v14210_v32  ;;  %v8737_v46 = vcombine.low %v8715_v4, %v8722_v23  ;;  %v4507_v4 = vcombine.high %v4491_v56, %v4491_v56 }
 0x41b   : > { %v1982_v62 = vpop.permute.xlu1 %1981  ;;  %v5856_v58 = vrot.slane %v5840_v40, %v14210_v32  ;;  %v5842_v5 = vcombine.low %v4508_v2, %v4491_v56  ;;  %v5863_v57 = vrot.slane %v5841_v21, %v14210_v32  ;;  %v4505_v47 = vrot.slane %v4477_v59, %v14210_v32 }
 0x41c   : > { %v8738_v13 = vcombine.low %v8729_v63, %v8736_v18  ;;  %2045 = vst.msk [vmem:[#allocation3 + $0xe0] sm:$0xff] %vm18918_vm9, %v1982_v62  ;;  %v2346_v49 = vpop.permute.xlu0 %2345  ;;  %v8745_v36 = vrot.slane %v8737_v46, %v14210_v32  ;;  %vm18923_vm4 = vcmask 490944   ;;  %vm9561_vm13 = vcmp.ge.f32.partialorder %v17019_v16, 0.0 }
 0x41d   : > { %v5870_v11 = vrot.slane %v5842_v5, %v14210_v32  ;;  %v5871_v19 = vcombine.low %v5849_v61, %v5856_v58  ;;  %v4509_v38 = vcombine.high %v4505_v47, %v4505_v47  ;;  %v5888_v10 = vcombine.low %v4505_v47, %v4507_v4 }
 0x41e   : > { %v8752_v27 = vrot.slane %v8738_v13, %v14210_v32  ;;  %vm9558_vm1 = vcmp.ge.f32.partialorder %v17015_v37, 0.0 }
 0x41f   : > { %v2164_v33 = vpop.permute.xlu1 %2163  ;;  %v5872_v17 = vcombine.low %v5863_v57, %v5870_v11  ;;  %v5879_v50 = vrot.slane %v5871_v19, %v14210_v32 }
 0x420   : > { %v8753_v45 = vcombine.low %v8745_v36, %v8752_v27  ;;  %2227 = vst.msk [vmem:[#allocation3 + $0xe0] sm:$0xff] %vm18919_vm7, %v2164_v33  ;;  %v2711_v44 = vpop.permute.xlu0 %2710  ;;  %v3167_v39 = vld [vmem:[#allocation3 + $0xd8] sm:$0x7f] }
 0x421   : > { %2409 = vst.msk [vmem:[#allocation3 + $0xe0] sm:$0xff] %vm18920_vm14, %v2346_v49  ;;  %v4510_v42 = vcombine.high %v3167_v39, %v3167_v39  ;;  %v4517_v28 = vrot.slane %v3167_v39, %v14210_v32  ;;  %v5886_v63 = vrot.slane %v5872_v17, %v14210_v32  ;;  %v9753_v39 = vmul.f32 0.2, %v17012_v6 }
 0x422   : > { %9431 = vst.msk [vmem:[%s14771_s12 + $0x80] sm:$0xff] %vm6049_vm8, %v8753_v45  ;;  %v5898_v45 = vrot.slane %v5888_v10, %v14210_v32 }
 0x423   : > { %v2529_v9 = vpop.permute.xlu1 %2528  ;;  %v17063_v22 = vrot.slane %v4510_v42, %v14210_v32  ;;  %v4525_v20 = vcombine.high %v4517_v28, %v4517_v28  ;;  %v4533_v31 = vrot.slane %v4517_v28, %v14210_v32  ;;  %v5887_v1 = vcombine.low %v5879_v50, %v5886_v63 }
 0x424   : > { %2592 = vst.msk [vmem:[#allocation3 + $0xe0] sm:$0xff] %vm18921_vm12, %v2529_v9  ;;  %v3075_v53 = vpop.permute.xlu0 %3074  ;;  %vm9562_vm12 = vcmp.ge.f32.partialorder %v17022_v52, 0.0 }
 0x425   : > { %2774 = vst.msk [vmem:[#allocation3 + $0xe0] sm:$0xff] %vm18922_vm5, %v2711_v44  ;;  %v17070_v7 = vrot.slane %v17063_v22, %v14210_v32  ;;  %v4547_v23 = vrot.slane %v4525_v20, %v14210_v32  ;;  %v4555_v0 = vcombine.high %v4533_v31, %v4533_v31  ;;  %v5889_v30 = vcombine.low %v4509_v38, %v4533_v31 }
 0x426   : > { %13180 = vmatmul.mubr.msk.f32.gmra.mrb[48].mxu0 %vm6049_vm8, %v5887_v1  ;;  %v4526_v38 = vcombine.high %v17063_v22, %v17063_v22 }
 0x427   : > { %v2893_v18 = vpop.permute.xlu1 %2892  ;;  %v4557_v46 = vcombine.high %v4547_v23, %v4547_v23  ;;  %v5890_v34 = vcombine.low %v4547_v23, %v4555_v0  ;;  %13182 = vmatprep.mubr.msk.f32.mxu0 %vm18619_vm10, %v18752_v14  ;;  %v5905_v27 = vrot.slane %v5889_v30, %v14210_v32  ;;  %v4556_v1 = vcombine.high %v17070_v7, %v17070_v7 }
 0x428   : > { %2956 = vst.msk [vmem:[#allocation3 + $0xe0] sm:$0xff] %vm18923_vm4, %v2893_v18  ;;  %v10404_v13 = vpop.permute.xlu0 %10403  ;;  %v6254_v62 = vpop.f32.mrb[32].mxu0 }
 0x429   : > { %3138 = vst.msk [vmem:[#allocation3 + $0xe0] sm:$0xff] %vm3108_vm15, %v3075_v53  ;;  %v5891_v49 = vcombine.low %v4557_v46, %v17070_v7  ;;  %v5912_v56 = vrot.slane %v5890_v34, %v14210_v32  ;;  %v7127_v35 = vcombine.high %v6254_v62, %v6254_v62  ;;  %v7134_v15 = vrot.slane %v6254_v62, %v14210_v32  ;;  %v13157_v40 = vpop.f32.mrb[33].mxu0 }
 0x42a   : > { %10417 = vst.msk [vmem:[#allocation5 + $0x48] sm:$0x1f] %vm10375_vm3, %v10404_v13  ;;  %v5920_v42 = vcombine.low %v5898_v45, %v5905_v27  ;;  %vm9557_vm15 = vcmp.ge.f32.partialorder %v17012_v6, 0.0  ;;  %v4554_v62 = vrot.slane %v4526_v38, %v14210_v32 }
 0x42b   : > { %v10363_v36 = vpop.permute.xlu1 %10362  ;;  %v5919_v59 = vrot.slane %v5891_v49, %v14210_v32  ;;  %v7141_v2 = vrot.slane %v7127_v35, %v14210_v32  ;;  %v7142_v21 = vcombine.high %v7134_v15, %v7134_v15  ;;  %v17091_v5 = vrot.slane %v7134_v15, %v14210_v32 }
 0x42c   : > { %10377 = vst.msk [vmem:[#allocation5 + $0x40] sm:$0x1f] %vm10375_vm3, %v10363_v36  ;;  %v10484_v58 = vpop.permute.xlu0 %10483  ;;  %v9949_v23 = vsel %vm9557_vm15, %v17012_v6, %v9753_v39  ;;  %v5928_v50 = vrot.slane %v5920_v42, %v14210_v32 }
 0x42d   : > { %10497 = vst.msk [vmem:[#allocation5 + $0x58] sm:$0x1f] %vm10375_vm3, %v10484_v58  ;;  %v5921_v33 = vcombine.low %v5912_v56, %v5919_v59  ;;  %v7143_v44 = vcombine.high %v7141_v2, %v7141_v2  ;;  %v17094_v61 = vrot.slane %v7141_v2, %v14210_v32  ;;  %v17097_v57 = vrot.slane %v7142_v21, %v14210_v32 }
 0x42e   : > { %v5937_v21 = vcombine.low %v4554_v62, %v4556_v1  ;;  %vm9565_vm4 = vcmp.ge.f32.partialorder %v17091_v5, 0.0 }
 0x42f   : > { %v10444_v47 = vpop.permute.xlu1 %10443  ;;  %v17102_v28 = vrot.slane %v7143_v44, %v14210_v32  ;;  %v7856_v11 = vcombine.high %v17094_v61, %v17094_v61  ;;  %v8754_v19 = vcombine.low %v17091_v5, %v17097_v57  ;;  %v12835_v9 = vcombine.high %v17091_v5, %v17097_v57 }
 0x430   : > { %10457 = vst.msk [vmem:[#allocation5 + $0x50] sm:$0x1f] %vm10375_vm3, %v10444_v47  ;;  %v5935_v20 = vrot.slane %v5921_v33, %v14210_v32  ;;  %v3168_v4 = vld [vmem:[#allocation3 + $0xe0] sm:$0xff]  ;;  %v5947_v47 = vrot.slane %v5937_v21, %v14210_v32  ;;  %vm9569_vm15 = vcmp.ge.f32.partialorder %v17094_v61, 0.0  ;;  %v17206_v21 = vcombine.high %v17091_v5, %v17091_v5 }
 0x431   : > { %v17114_v31 = vcombine.high %v17102_v28, %v17102_v28  ;;  %v8756_v17 = vcombine.low %v17094_v61, %v17102_v28  ;;  %v8763_v53 = vrot.slane %v8754_v19, %v14210_v32  ;;  %v8770_v0 = vrot.slane %v12835_v9, %v14210_v32 }
 0x432   : > { %v8784_v18 = vrot.slane %v7856_v11, %v14210_v32  ;;  %v5936_v34 = vcombine.low %v5928_v50, %v5935_v20  ;;  %v4558_v22 = vcombine.high %v3168_v4, %v3168_v4  ;;  %v4565_v10 = vrot.slane %v3168_v4, %v14210_v32 }
 0x433   : > { %v8777_v63 = vrot.slane %v8756_v17, %v14210_v32  ;;  %vm9571_vm6 = vcmp.ge.f32.partialorder %v17114_v31, 0.0  ;;  %v9767_v46 = vmul.f32 0.2, %v17114_v31  ;;  %v8785_v30 = vcombine.low %v8763_v53, %v8770_v0 }
 0x434   : > { %13183 = vmatmul.mubr.msk.f32.gmra.mrb[50].mxu0 %vm6049_vm8, %v5936_v34  ;;  %v4572_v56 = vrot.slane %v4558_v22, %v14210_v32  ;;  %v4573_v7 = vcombine.high %v4565_v10, %v4565_v10  ;;  %v4581_v59 = vrot.slane %v4565_v10, %v14210_v32  ;;  %v7125_v0 = vcombine.high %v17015_v37, %v17015_v37 }
 0x435   : > { %v8786_v13 = vcombine.low %v8777_v63, %v8784_v18  ;;  %v9963_v49 = vsel %vm9571_vm6, %v17114_v31, %v9767_v46  ;;  %v8793_v15 = vrot.slane %v8785_v30, %v14210_v32  ;;  %13185 = vmatprep.mubr.msk.f32.mxu0 %vm18619_vm10, %v18752_v14  ;;  %v7124_v50 = vcombine.high %v17019_v16, %v17019_v16 }
 0x436   : > { %v17135_v35 = vmax.f32 %v9949_v23, %v9963_v49  ;;  %v4574_v36 = vcombine.high %v4572_v56, %v4572_v56  ;;  %v4595_v2 = vrot.slane %v4573_v7, %v14210_v32  ;;  %v17144_v58 = vrot.slane %v4572_v56, %v14210_v32 }
 0x437   : > { %v8800_v40 = vrot.slane %v8786_v13, %v14210_v32  ;;  %v7123_v23 = vcombine.high %v17012_v6, %v17012_v6  ;;  %v7126_v63 = vcombine.high %v17022_v52, %v17022_v52  ;;  %v9757_v18 = vmul.f32 0.2, %v17019_v16 }
 0x438   : > { %v17147_v45 = vrot.slane %v4574_v36, %v14210_v32  ;;  %v5938_v33 = vcombine.low %v4581_v59, %v4595_v2  ;;  %v12787_v44 = vcombine.high %v4581_v59, %v4595_v2  ;;  %v9754_v46 = vmul.f32 0.2, %v17015_v37 }
 0x439   : > { %v8801_v27 = vcombine.low %v8793_v15, %v8800_v40  ;;  %v9755_v30 = vmul.f32 0.2, %v7123_v23  ;;  %vm9560_vm9 = vcmp.ge.f32.partialorder %v7125_v0, 0.0  ;;  %v9756_v6 = vmul.f32 0.2, %v7125_v0 }
 0x43a   : > { %v5940_v39 = vcombine.low %v17144_v58, %v17147_v45  ;;  %v5954_v42 = vrot.slane %v5938_v33, %v14210_v32  ;;  %v5961_v19 = vrot.slane %v12787_v44, %v14210_v32  ;;  %vm9559_vm7 = vcmp.ge.f32.partialorder %v7123_v23, 0.0 }
 0x43b   : > { %9432 = vst.msk [vmem:[%s14771_s12 + $0x88] sm:$0x7f] %vm9415_vm11, %v8801_v27  ;;  %v9760_v34 = vmul.f32 0.2, %v7126_v63  ;;  %v17177_v1 = vsel %vm9561_vm13, %v17019_v16, %v9757_v18  ;;  %v9758_v22 = vmul.f32 0.2, %v17022_v52  ;;  %v17182_v62 = vsel %vm9558_vm1, %v17015_v37, %v9754_v46 }
 0x43c   : > { %v5968_v9 = vrot.slane %v5940_v39, %v14210_v32  ;;  %v5969_v20 = vcombine.low %v5947_v47, %v5954_v42  ;;  %v9759_v13 = vmul.f32 0.2, %v7124_v50  ;;  %vm9564_vm14 = vcmp.ge.f32.partialorder %v7126_v63, 0.0 }
 0x43d   : > { %vm9563_vm5 = vcmp.ge.f32.partialorder %v7124_v50, 0.0  ;;  %v17186_v10 = vcombine.high %v17097_v57, %v17097_v57  ;;  %v9761_v49 = vmul.f32 0.2, %v17091_v5  ;;  %v9765_v56 = vmul.f32 0.2, %v17094_v61 }
 0x43e   : > { %v5970_v17 = vcombine.low %v5961_v19, %v5968_v9  ;;  %v5977_v53 = vrot.slane %v5969_v20, %v14210_v32  ;;  %v17190_v15 = vsel %vm9559_vm7, %v7123_v23, %v9755_v30  ;;  %v9952_v36 = vsel %vm9560_vm9, %v7125_v0, %v9756_v6 }
 0x43f   : > { %v17197_v27 = vsel %vm9562_vm12, %v17022_v52, %v9758_v22  ;;  %v17199_v59 = vsel %vm9563_vm5, %v7124_v50, %v9759_v13  ;;  %v17202_v2 = vsel %vm9564_vm14, %v7126_v63, %v9760_v34  ;;  %v17211_v47 = vmul.f32 0.2, %v17186_v10 }
 0x440   : > { %v5984_v4 = vrot.slane %v5970_v17, %v14210_v32  ;;  %v17214_v52 = vmul.f32 0.2, %v17102_v28  ;;  %v17217_v42 = vsel %vm9565_vm4, %v17091_v5, %v9761_v49  ;;  %v17220_v19 = vsel %vm9569_vm15, %v17094_v61, %v9765_v56 }
 0x441   : > { %v10173_v23 = vmax.f32 %v16765_v60, %v17135_v35  ;;  %vm9570_vm5 = vcmp.ge.f32.partialorder %v17102_v28, 0.0  ;;  %vm9568_vm15 = vcmp.ge.f32.partialorder %v17186_v10, 0.0 }
 0x442   : > { %v5985_v38 = vcombine.low %v5977_v53, %v5984_v4 }
 0x444   : > { %13186 = vmatmul.mubr.msk.f32.gmra.mrb[52].mxu0 %vm6049_vm8, %v5985_v38 }
 0x445   : > { %13188 = vmatprep.mubr.msk.f32.mxu0 %vm18619_vm10, %v18752_v14 }
 0x462   : > { %v6259_v16 = vpop.f32.mrb[34].mxu0 }
 0x463   : > { %v7175_v40 = vcombine.high %v6259_v16, %v6259_v16  ;;  %v7182_v7 = vrot.slane %v6259_v16, %v14210_v32  ;;  %v13160_v37 = vpop.f32.mrb[35].mxu0 }
 0x465   : > { %v7189_v33 = vrot.slane %v7175_v40, %v14210_v32  ;;  %v7190_v44 = vcombine.high %v7182_v7, %v7182_v7  ;;  %v7198_v39 = vrot.slane %v7182_v7, %v14210_v32 }
 0x467   : > { %v7191_v9 = vcombine.high %v7189_v33, %v7189_v33  ;;  %v7205_v20 = vrot.slane %v7189_v33, %v14210_v32  ;;  %v7212_v17 = vrot.slane %v7190_v44, %v14210_v32  ;;  %v7220_v53 = vcombine.high %v7198_v39, %v7198_v39 }
 0x468   : > { %v8802_v4 = vcombine.low %v17114_v31, %v7198_v39  ;;  %vm9572_vm6 = vcmp.ge.f32.partialorder %v7198_v39, 0.0  ;;  %v9768_v38 = vmul.f32 0.2, %v7198_v39 }
 0x469   : > { %v7219_v0 = vrot.slane %v7191_v9, %v14210_v32  ;;  %v7221_v5 = vcombine.high %v7205_v20, %v7205_v20  ;;  %v7222_v50 = vcombine.high %v7212_v17, %v7212_v17  ;;  %v8803_v63 = vcombine.low %v7212_v17, %v7220_v53 }
 0x46a   : > { %v8812_v61 = vrot.slane %v8802_v4, %v14210_v32  ;;  %vm9573_vm13 = vcmp.ge.f32.partialorder %v7212_v17, 0.0  ;;  %vm9574_vm1 = vcmp.ge.f32.partialorder %v7220_v53, 0.0  ;;  %vm9576_vm9 = vcmp.ge.f32.partialorder %v7205_v20, 0.0 }
 0x46b   : > { %v17229_v18 = vcombine.high %v7219_v0, %v7219_v0  ;;  %v8804_v46 = vcombine.low %v7222_v50, %v7205_v20  ;;  %v8805_v30 = vcombine.low %v7219_v0, %v7221_v5  ;;  %v8819_v31 = vrot.slane %v8803_v63, %v14210_v32 }
 0x46c   : > { %vm9575_vm7 = vcmp.ge.f32.partialorder %v7222_v50, 0.0  ;;  %vm9577_vm14 = vcmp.ge.f32.partialorder %v7219_v0, 0.0  ;;  %vm9578_vm12 = vcmp.ge.f32.partialorder %v7221_v5, 0.0  ;;  %v9769_v60 = vmul.f32 0.2, %v7212_v17 }
 0x46d   : > { %v8826_v6 = vrot.slane %v8804_v46, %v14210_v32  ;;  %v8833_v34 = vrot.slane %v8805_v30, %v14210_v32  ;;  %v8834_v22 = vcombine.low %v8812_v61, %v8819_v31  ;;  %vm9579_vm4 = vcmp.ge.f32.partialorder %v17229_v18, 0.0 }
 0x46e   : > { %v9770_v13 = vmul.f32 0.2, %v7220_v53  ;;  %v9771_v49 = vmul.f32 0.2, %v7222_v50  ;;  %v9772_v56 = vmul.f32 0.2, %v7205_v20  ;;  %v9964_v16 = vsel %vm9572_vm6, %v7198_v39, %v9768_v38 }
 0x46f   : > { %v8835_v40 = vcombine.low %v8826_v6, %v8833_v34  ;;  %v8842_v7 = vrot.slane %v8834_v22, %v14210_v32  ;;  %v9773_v37 = vmul.f32 0.2, %v7219_v0  ;;  %v9774_v33 = vmul.f32 0.2, %v7221_v5 }
 0x470   : > { %v9775_v44 = vmul.f32 0.2, %v17229_v18  ;;  %v9965_v9 = vsel %vm9573_vm13, %v7212_v17, %v9769_v60  ;;  %v9966_v4 = vsel %vm9574_vm1, %v7220_v53, %v9770_v13  ;;  %v9967_v63 = vsel %vm9575_vm7, %v7222_v50, %v9771_v49  ;;  %v6264_v30 = vpop.f32.mrb[36].mxu0 }
 0x471   : > { %v8849_v61 = vrot.slane %v8835_v40, %v14210_v32  ;;  %v9968_v46 = vsel %vm9576_vm9, %v7205_v20, %v9772_v56  ;;  %v9969_v39 = vsel %vm9577_vm14, %v7219_v0, %v9773_v37  ;;  %v9970_v38 = vsel %vm9578_vm12, %v7221_v5, %v9774_v33  ;;  %v13163_v50 = vpop.f32.mrb[37].mxu0 }
 0x472   : > { %v17248_v31 = vmax.f32 %v17182_v62, %v9964_v16  ;;  %v17251_v6 = vmax.f32 %v17190_v15, %v9965_v9  ;;  %v17253_v17 = vmax.f32 %v9952_v36, %v9966_v4  ;;  %v17256_v53 = vmax.f32 %v17177_v1, %v9967_v63 }
 0x473   : > { %v8850_v60 = vcombine.low %v8842_v7, %v8849_v61  ;;  %v17259_v20 = vmax.f32 %v17197_v27, %v9968_v46  ;;  %v17262_v0 = vmax.f32 %v17199_v59, %v9969_v39  ;;  %v17265_v5 = vmax.f32 %v17202_v2, %v9970_v38 }
 0x474   : > { %v10174_v62 = vmax.f32 %v16768_v29, %v17248_v31  ;;  %v10175_v15 = vmax.f32 %v16773_v41, %v17251_v6  ;;  %v10176_v1 = vmax.f32 %v16776_v25, %v17253_v17  ;;  %v10177_v36 = vmax.f32 %v16779_v54, %v17256_v53 }
 0x475   : > { %9433 = vst.msk [vmem:[%s14771_s12 + $0x90] sm:$0xff] %vm6049_vm8, %v8850_v60  ;;  %v10178_v27 = vmax.f32 %v16782_v43, %v17259_v20  ;;  %v10179_v59 = vmax.f32 %v16811_v3, %v17262_v0  ;;  %v10180_v29 = vmax.f32 %v16914_v51, %v17265_v5  ;;  %v7224_v2 = vcombine.high %v6264_v30, %v6264_v30 }
 0x476   : > { %v10233_v34 = vmax.f32 %v10173_v23, %v10174_v62  ;;  %v10234_v41 = vmax.f32 %v10175_v15, %v10176_v1  ;;  %v7231_v22 = vrot.slane %v6264_v30, %v14210_v32  ;;  %v9971_v25 = vsel %vm9579_vm4, %v17229_v18, %v9775_v44 }
 0x477   : > { %v10235_v54 = vmax.f32 %v10177_v36, %v10178_v27  ;;  %v17287_v13 = vmax.f32 %v10179_v59, %v10180_v29  ;;  %v7238_v43 = vrot.slane %v7224_v2, %v14210_v32  ;;  %v17291_v49 = vmax.f32 %v17217_v42, %v9971_v25 }
 0x478   : > { %v9962_v3 = vsel %vm9570_vm5, %v17102_v28, %v17214_v52  ;;  %v10275_v51 = vmax.f32 %v10233_v34, %v10234_v41  ;;  %v7239_v23 = vcombine.high %v7231_v22, %v7231_v22  ;;  %v7247_v56 = vrot.slane %v7231_v22, %v14210_v32 }
 0x479   : > { %v10276_v16 = vmax.f32 %v10234_v41, %v10235_v54  ;;  %v10277_v40 = vmax.f32 %v10235_v54, %v17287_v13  ;;  %v7240_v7 = vcombine.high %v7238_v43, %v7238_v43  ;;  %vm9566_vm6 = vcmp.ge.f32.partialorder %v17097_v57, 0.0 }
 0x47a   : > { %10306 = vst.msk [vmem:[#allocation4 + $0x21] sm:$0x1] %vm10302_vm0, %v10275_v51  ;;  %v7261_v42 = vrot.slane %v7239_v23, %v14210_v32  ;;  %v7269_v37 = vcombine.high %v7247_v56, %v7247_v56  ;;  %v8851_v33 = vcombine.low %v17229_v18, %v7247_v56  ;;  %vm9567_vm13 = vcmp.ge.f32.partialorder %v17206_v21, 0.0  ;;  %v10525_v4 = vpop.permute.xlu1 %10524 }
 0x47b   : > { %10312 = vst.msk [vmem:[#allocation4 + $0x22] sm:$0x1] %vm10302_vm0, %v10276_v16  ;;  %10318 = vst.msk [vmem:[#allocation4 + $0x23] sm:$0x1] %vm10302_vm0, %v10277_v40  ;;  %v17307_v28 = vrot.slane %v7238_v43, %v14210_v32  ;;  %v9762_v52 = vmul.f32 0.2, %v17097_v57  ;;  %v9960_v9 = vsel %vm9568_vm15, %v17186_v10, %v17211_v47  ;;  %v17316_v18 = vrot.slane %v7240_v7, %v14210_v32 }
 0x47c   : > { %v9763_v44 = vmul.f32 0.2, %v17206_v21  ;;  %v7271_v63 = vcombine.high %v7261_v42, %v7261_v42  ;;  %v8852_v61 = vcombine.low %v7261_v42, %v7269_v37  ;;  %vm9580_vm1 = vcmp.ge.f32.partialorder %v7247_v56, 0.0  ;;  %10538 = vst.msk [vmem:[#allocation5 + $0x60] sm:$0x1f] %vm10375_vm3, %v10525_v4  ;;  %v10565_v46 = vpop.permute.xlu0 %10564  ;;  %v6269_v59 = vpop.f32.mrb[38].mxu0 }
 0x47d   : > { %v8860_v39 = vrot.slane %v8851_v33, %v14210_v32  ;;  %vm9581_vm9 = vcmp.ge.f32.partialorder %v7261_v42, 0.0  ;;  %vm9582_vm7 = vcmp.ge.f32.partialorder %v7269_v37, 0.0  ;;  %v9776_v38 = vmul.f32 0.2, %v7247_v56  ;;  %10578 = vst.msk [vmem:[#allocation5 + $0x68] sm:$0x1f] %vm10375_vm3, %v10565_v46 }
 0x47e   : > { %v8853_v30 = vcombine.low %v7271_v63, %v17307_v28  ;;  %v8867_v10 = vrot.slane %v8852_v61, %v14210_v32  ;;  %vm9583_vm14 = vcmp.ge.f32.partialorder %v7271_v63, 0.0  ;;  %v9777_v47 = vmul.f32 0.2, %v7261_v42  ;;  %v13166_v22 = vpop.f32.mrb[39].mxu0 }
 0x47f   : > { %vm9584_vm12 = vcmp.ge.f32.partialorder %v17307_v28, 0.0  ;;  %v9778_v50 = vmul.f32 0.2, %v7269_v37  ;;  %v9779_v60 = vmul.f32 0.2, %v7271_v63  ;;  %v9958_v62 = vsel %vm9566_vm6, %v17097_v57, %v9762_v52 }
 0x480   : > { %v8874_v15 = vrot.slane %v8853_v30, %v14210_v32  ;;  %v8881_v1 = vrot.slane %v17316_v18, %v14210_v32  ;;  %v8882_v36 = vcombine.low %v8860_v39, %v8867_v10  ;;  %v9780_v27 = vmul.f32 0.2, %v17307_v28 }
 0x481   : > { %v9972_v29 = vsel %vm9580_vm1, %v7247_v56, %v9776_v38  ;;  %v9973_v2 = vsel %vm9581_vm9, %v7261_v42, %v9777_v47  ;;  %v9974_v34 = vsel %vm9582_vm7, %v7269_v37, %v9778_v50  ;;  %v9975_v41 = vsel %vm9583_vm14, %v7271_v63, %v9779_v60  ;;  %v10381_v47 = vld [vmem:[#allocation4 + $0x2] sm:$0x1f] }
 0x482   : > { %v8883_v25 = vcombine.low %v8874_v15, %v8881_v1  ;;  %v8890_v57 = vrot.slane %v8882_v36, %v14210_v32  ;;  %v9959_v54 = vsel %vm9567_vm13, %v17206_v21, %v9763_v44  ;;  %v9976_v43 = vsel %vm9584_vm12, %v17307_v28, %v9780_v27 }
 0x483   : > { %v17341_v51 = vmax.f32 %v9958_v62, %v9972_v29  ;;  %v17343_v23 = vmax.f32 %v9959_v54, %v9973_v2  ;;  %v17345_v56 = vmax.f32 %v9960_v9, %v9974_v34  ;;  %v17348_v16 = vmax.f32 %v17220_v19, %v9975_v41  ;;  %v11344_v29 = vld [vmem:[#allocation6 + $0x80] sm:$0xff]  ;;  %v11345_v2 = vld [vmem:[#allocation6 + $0x88] sm:$0xff] }
 0x484   : > { %v8897_v40 = vrot.slane %v8883_v25, %v14210_v32  ;;  %v17351_v7 = vmax.f32 %v9962_v3, %v9976_v43  ;;  %v10181_v21 = vmax.f32 %v16917_v48, %v17291_v49  ;;  %v7273_v42 = vcombine.high %v6269_v59, %v6269_v59  ;;  %v10350_v43 = vld [vmem:[#allocation4 + $0x1] sm:$0x1f] }
 0x485   : > { %v10182_v37 = vmax.f32 %v16920_v55, %v17341_v51  ;;  %v10183_v33 = vmax.f32 %v16923_v26, %v17343_v23  ;;  %v10184_v52 = vmax.f32 %v16926_v8, %v17345_v56  ;;  %v10185_v19 = vmax.f32 %v16930_v24, %v17348_v16  ;;  %v10339_v55 = vld [vmem:[#allocation4] sm:$0x1f] }
 0x486   : > { %v8898_v44 = vcombine.low %v8890_v57, %v8897_v40  ;;  %v10186_v3 = vmax.f32 %v16933_v12, %v17351_v7  ;;  %v7280_v9 = vrot.slane %v6269_v59, %v14210_v32  ;;  %v7287_v48 = vrot.slane %v7273_v42, %v14210_v32 }
 0x487   : > { %v10237_v4 = vmax.f32 %v10181_v21, %v10182_v37  ;;  %v10238_v63 = vmax.f32 %v10183_v33, %v10184_v52  ;;  %vm18924_vm5 = vcmask 520192   ;;  %v12836_v8 = vcombine.high %v17307_v28, %v17316_v18  ;;  %v10391_v37 = vld [vmem:[#allocation4 + $0x3] sm:$0x1f] }
 0x488   : > { %9434 = vst.msk [vmem:[%s14771_s12 + $0x98] sm:$0x7f] %vm9415_vm11, %v8898_v44  ;;  %v10254_v26 = vmax.f32 %v10185_v19, %v10186_v3  ;;  %v7288_v61 = vcombine.high %v7280_v9, %v7280_v9  ;;  %v7289_v46 = vcombine.high %v7287_v48, %v7287_v48  ;;  %v17374_v38 = vrot.slane %v7280_v9, %v14210_v32  ;;  %vm18925_vm4 = vmmov %vm18924_vm5  ;;  %v11328_v19 = vld [vmem:[#allocation6] sm:$0xff]  ;;  %v11329_v44 = vld [vmem:[#allocation6 + $0x8] sm:$0xff] }
 0x489   : > { %10345 = vst.msk [vmem:[#allocation5] sm:$0x1f] %vm18924_vm5, %v10339_v55  ;;  %v10278_v24 = vmax.f32 %v17287_v13, %v10237_v4  ;;  %v10279_v12 = vmax.f32 %v10237_v4, %v10238_v63  ;;  %v17385_v50 = vrot.slane %v7287_v48, %v14210_v32  ;;  %v8909_v15 = vrot.slane %v12836_v8, %v14210_v32  ;;  %vm18926_vm15 = vmmov %vm18925_vm4  ;;  %v11346_v3 = vld [vmem:[#allocation6 + $0x90] sm:$0xff]  ;;  %v11347_v48 = vld [vmem:[#allocation6 + $0x98] sm:$0xff] }
 0x48a   : > { %v10280_v39 = vmax.f32 %v10238_v63, %v10254_v26  ;;  %v17377_v30 = vrot.slane %v7288_v61, %v14210_v32  ;;  %v17380_v10 = vrot.slane %v7289_v46, %v14210_v32  ;;  %10386 = vst.msk [vmem:[#allocation5 + $0x8] sm:$0x1f] %vm18925_vm4, %v10381_v47  ;;  %v13206_v54 = vpack.c.bf16 %v11345_v2, %v11344_v29  ;;  %vm18927_vm6 = vmmov %vm18925_vm4  ;;  %v11330_v4 = vld [vmem:[#allocation6 + $0x10] sm:$0xff]  ;;  %v11331_v63 = vld [vmem:[#allocation6 + $0x18] sm:$0xff] }
 0x48b   : > { %10324 = vst.msk [vmem:[#allocation4 + $0x24] sm:$0x1] %vm10302_vm0, %v10278_v24  ;;  %10330 = vst.msk [vmem:[#allocation4 + $0x25] sm:$0x1] %vm10302_vm0, %v10279_v12  ;;  %v13208_v9 = vpack.c.bf16 %v11329_v44, %v11328_v19  ;;  %v13210_v26 = vpack.c.bf16 %v11347_v48, %v11346_v3  ;;  %v11348_v61 = vld [vmem:[#allocation6 + $0xa0] sm:$0xff]  ;;  %v11349_v46 = vld [vmem:[#allocation6 + $0xa8] sm:$0xff] }
 0x48c   : > { %10336 = vst.msk [vmem:[#allocation4 + $0x26] sm:$0x1] %vm10302_vm0, %v10280_v39  ;;  %v8900_v13 = vcombine.low %v17374_v38, %v17377_v30  ;;  %v12837_v60 = vcombine.high %v17374_v38, %v17377_v30  ;;  %v8902_v62 = vcombine.low %v17385_v50, %v17380_v10  ;;  %13207 = vmatprep.subr.bf16.mxu1 %v13206_v54  ;;  %vm18928_vm13 = vmmov %vm18925_vm4  ;;  %v11332_v47 = vld [vmem:[#allocation6 + $0x20] sm:$0xff]  ;;  %v11350_v29 = vld [vmem:[#allocation6 + $0xb0] sm:$0xff] }
 0x48d   : > { %vm18929_vm1 = vmmov %vm18925_vm4  ;;  %13209 = vmatpush3.bf16.msra.mxu1 %v13208_v9  ;;  %v13212_v39 = vpack.c.bf16 %v11331_v63, %v11330_v4  ;;  %v11351_v2 = vld [vmem:[#allocation6 + $0xb8] sm:$0xff]  ;;  %v11352_v48 = vld [vmem:[#allocation6 + $0xc0] sm:$0xff]  ;;  %v9783_v63 = vmul.f32 0.2, %v17374_v38 }
 0x48e   : > { %v8916_v1 = vrot.slane %v8900_v13, %v14210_v32  ;;  %v8923_v36 = vrot.slane %v12837_v60, %v14210_v32  ;;  %v8930_v27 = vrot.slane %v8902_v62, %v14210_v32  ;;  %v11333_v13 = vld [vmem:[#allocation6 + $0x28] sm:$0xff]  ;;  %v17414_v60 = vcombine.high %v17316_v18, %v17316_v18  ;;  %13211 = vmatprep.subr.bf16.mxu1 %v13210_v26  ;;  %vm18930_vm9 = vmmov %vm18929_vm1  ;;  %v10353_v19 = vld [vmem:[#allocation4 + $0x19] sm:$0x1f] }
 0x48f   : > { %v10431_v62 = vld [vmem:[#allocation4 + $0x9] sm:$0x1f]  ;;  %v12838_v18 = vcombine.high %v17385_v50, %v17380_v10  ;;  %vm18931_vm7 = vmmov %vm18929_vm1 }
 0x490   : > { %v8931_v59 = vcombine.low %v8909_v15, %v8916_v1  ;;  %v8932_v34 = vcombine.low %v8923_v36, %v8930_v27  ;;  %v13214_v15 = vpack.c.bf16 %v11349_v46, %v11348_v61  ;;  %v17418_v1 = vcombine.high %v17307_v28, %v17307_v28  ;;  %v10471_v36 = vld [vmem:[#allocation4 + $0xb] sm:$0x1f]  ;;  %vm18932_vm12 = vmmov %vm18929_vm1 }
 0x491   : > { %13213 = vmatpush3.bf16.msra.mxu1 %v13212_v39  ;;  %vm9586_vm14 = vcmp.ge.f32.partialorder %v17414_v60, 0.0  ;;  %vm18933_vm5 = vmmov %vm18929_vm1  ;;  %v11353_v4 = vld [vmem:[#allocation6 + $0xc8] sm:$0xff]  ;;  %v8957_v46 = vrot.slane %v12838_v18, %v14210_v32 }
 0x492   : > { %v10594_v41 = vld [vmem:[#allocation4 + $0x21] sm:$0x1f]  ;;  %v8939_v22 = vrot.slane %v8931_v59, %v14210_v32  ;;  %v8946_v25 = vrot.slane %v8932_v34, %v14210_v32  ;;  %v13216_v34 = vpack.c.bf16 %v11333_v13, %v11332_v47  ;;  %13215 = vmatprep.subr.bf16.mxu1 %v13214_v15  ;;  %vm9585_vm4 = vcmp.ge.f32.partialorder %v17418_v1, 0.0 }
 0x493   : > { %10605 = vrot.lane.b32.xlu1 %v10594_v41, %s13519_s10  ;;  %v10634_v57 = vld [vmem:[#allocation4 + $0x23] sm:$0x1f]  ;;  %v9781_v26 = vmul.f32 0.2, %v17418_v1  ;;  %v13222_v13 = vpack.c.bf16 %v11353_v4, %v11352_v48  ;;  %v11339_v48 = vld [vmem:[#allocation6 + $0x58] sm:$0xff] }
 0x494   : > { %10645 = vrot.lane.b32.xlu0 %v10634_v57, %s13519_s10  ;;  %v10584_v40 = vld [vmem:[#allocation4 + $0x20] sm:$0x1f]  ;;  %v8947_v42 = vcombine.low %v8939_v22, %v8946_v25  ;;  %v10352_v25 = vld [vmem:[#allocation4 + $0x11] sm:$0x1f] }
 0x495   : > { %v10624_v21 = vld [vmem:[#allocation4 + $0x22] sm:$0x1f]  ;;  %10589 = vst.msk [vmem:[#allocation5 + $0x70] sm:$0x1f] %vm18926_vm15, %v10584_v40  ;;  %vm9587_vm15 = vcmp.ge.f32.partialorder %v17374_v38, 0.0  ;;  %13217 = vmatpush3.bf16.msra.mxu1 %v13216_v34 }
 0x496   : > { %10629 = vst.msk [vmem:[#allocation5 + $0x78] sm:$0x1f] %vm18927_vm6, %v10624_v21  ;;  %v10424_v33 = vld [vmem:[#allocation4 + $0x20] sm:$0x1f]  ;;  %v9979_v18 = vsel %vm9587_vm15, %v17374_v38, %v9783_v63  ;;  %v10433_v34 = vld [vmem:[#allocation4 + $0x19] sm:$0x1f] }
 0x497   : > { %v10464_v52 = vld [vmem:[#allocation4 + $0x22] sm:$0x1f]  ;;  %10429 = vst.msk [vmem:[#allocation5 + $0xd0] sm:$0x1f] %vm18928_vm13, %v10424_v33  ;;  %10360 = vrot.lane.b32.xlu1 %v10350_v43, %s13519_s10  ;;  %v6274_v55 = vpop.f32.mrb[40].mxu0  ;;  %v11334_v33 = vld [vmem:[#allocation6 + $0x30] sm:$0xff] }
 0x498   : > { %10469 = vst.msk [vmem:[#allocation5 + $0xd8] sm:$0x1f] %vm18929_vm1, %v10464_v52  ;;  %10401 = vrot.lane.b32.xlu0 %v10391_v37, %s13519_s10  ;;  %v7322_v8 = vcombine.high %v6274_v55, %v6274_v55  ;;  %v7329_v24 = vrot.slane %v6274_v55, %v14210_v32  ;;  %v13169_v12 = vpop.f32.mrb[41].mxu0  ;;  %v10343_v41 = vld [vmem:[#allocation4 + $0x20] sm:$0x1f]  ;;  %v13218_v37 = vpack.c.bf16 %v11351_v2, %v11350_v29  ;;  %v11335_v52 = vld [vmem:[#allocation6 + $0x38] sm:$0xff] }
 0x499   : > { %9435 = vst.msk [vmem:[%s14771_s12 + $0xa0] sm:$0xff] %vm6049_vm8, %v8947_v42  ;;  %v10385_v22 = vld [vmem:[#allocation4 + $0x22] sm:$0x1f]  ;;  %v9782_v42 = vmul.f32 0.2, %v17414_v60 }
 0x49a   : > { %v7336_v27 = vrot.slane %v7322_v8, %v14210_v32  ;;  %v7337_v59 = vcombine.high %v7329_v24, %v7329_v24  ;;  %v17426_v28 = vrot.slane %v7329_v24, %v14210_v32  ;;  %10349 = vst.msk [vmem:[#allocation5 + $0x100] sm:$0x1f] %vm18930_vm9, %v10343_v41  ;;  %v10504_v40 = vld [vmem:[#allocation4 + $0x20] sm:$0x1f]  ;;  %v13220_v24 = vpack.c.bf16 %v11335_v52, %v11334_v33  ;;  %v10393_v12 = vld [vmem:[#allocation4 + $0x13] sm:$0x1f] }
 0x49b   : > { %10441 = vrot.lane.b32.xlu1 %v10431_v62, %s13519_s10  ;;  %10390 = vst.msk [vmem:[#allocation5 + $0x108] sm:$0x1f] %vm18931_vm7, %v10385_v22  ;;  %v10544_v21 = vld [vmem:[#allocation4 + $0x22] sm:$0x1f]  ;;  %13219 = vmatprep.subr.bf16.mxu1 %v13218_v37  ;;  %v10394_v62 = vld [vmem:[#allocation4 + $0x1b] sm:$0x1f] }
 0x49c   : > { %10481 = vrot.lane.b32.xlu0 %v10471_v36, %s13519_s10  ;;  %v7338_v57 = vcombine.high %v7336_v27, %v7336_v27  ;;  %v7352_v54 = vrot.slane %v7336_v27, %v14210_v32  ;;  %v17430_v43 = vrot.slane %v7337_v59, %v14210_v32  ;;  %10509 = vst.msk [vmem:[#allocation5 + $0xa0] sm:$0x1f] %vm18932_vm12, %v10504_v40  ;;  %v10434_v41 = vld [vmem:[#allocation4 + $0x21] sm:$0x1f]  ;;  %v11354_v37 = vld [vmem:[#allocation6 + $0xd0] sm:$0xff]  ;;  %vm9591_vm7 = vcmp.ge.f32.partialorder %v17385_v50, 0.0 }
 0x49d   : > { %10549 = vst.msk [vmem:[#allocation5 + $0xa8] sm:$0x1f] %vm18933_vm5, %v10544_v21  ;;  %v9978_v27 = vsel %vm9586_vm14, %v17414_v60, %v9782_v42  ;;  %13221 = vmatpush3.bf16.msra.mxu1 %v13220_v24  ;;  %v11336_v42 = vld [vmem:[#allocation6 + $0x40] sm:$0xff]  ;;  %vm9588_vm12 = vcmp.ge.f32.partialorder %v17377_v30, 0.0 }
 0x49e   : > { %v17440_v44 = vrot.slane %v7338_v57, %v14210_v32  ;;  %v17442_v3 = vcombine.high %v7352_v54, %v7352_v54  ;;  %v8949_v9 = vcombine.low %v17426_v28, %v17430_v43  ;;  %v12839_v55 = vcombine.high %v17426_v28, %v17430_v43  ;;  %13223 = vmatprep.subr.bf16.mxu1 %v13222_v13  ;;  %v11341_v13 = vld [vmem:[#allocation6 + $0x68] sm:$0xff] }
 0x49f   : > { %10364 = vrot.lane.b32.xlu1 %v10352_v25, %s13519_s10  ;;  %v8978_v47 = vrot.slane %v7352_v54, %v14210_v32  ;;  %v9977_v25 = vsel %vm9585_vm4, %v17418_v1, %v9781_v26  ;;  %v11337_v1 = vld [vmem:[#allocation6 + $0x48] sm:$0xff]  ;;  %vm9592_vm4 = vcmp.ge.f32.partialorder %v17380_v10, 0.0 }
 0x4a0   : > { %10366 = vrot.lane.b32.xlu0 %v10353_v19, %s13519_s10  ;;  %v17455_v61 = vcombine.high %v17440_v44, %v17440_v44  ;;  %v8964_v8 = vrot.slane %v8949_v9, %v14210_v32  ;;  %v8971_v39 = vrot.slane %v12839_v55, %v14210_v32  ;;  %vm9599_vm6 = vcmp.ge.f32.partialorder %v17440_v44, 0.0  ;;  %v11355_v19 = vld [vmem:[#allocation6 + $0xd8] sm:$0xff]  ;;  %v11338_v9 = vld [vmem:[#allocation6 + $0x50] sm:$0xff]  ;;  %v11356_v55 = vld [vmem:[#allocation6 + $0xe0] sm:$0xff] }
 0x4a1   : > { %vm9600_vm13 = vcmp.ge.f32.partialorder %v17442_v3, 0.0  ;;  %v9795_v36 = vmul.f32 0.2, %v17440_v44  ;;  %v9796_v29 = vmul.f32 0.2, %v17442_v3  ;;  %v13224_v63 = vpack.c.bf16 %v11337_v1, %v11336_v42  ;;  %v11357_v26 = vld [vmem:[#allocation6 + $0xe8] sm:$0xff] }
 0x4a2   : > { %v8979_v15 = vcombine.low %v8957_v46, %v8964_v8  ;;  %vm9601_vm1 = vcmp.ge.f32.partialorder %v17455_v61, 0.0  ;;  %v8980_v59 = vcombine.low %v8971_v39, %v8978_v47  ;;  %v9797_v2 = vmul.f32 0.2, %v17455_v61  ;;  %v10473_v8 = vld [vmem:[#allocation4 + $0x1b] sm:$0x1f]  ;;  %v11340_v47 = vld [vmem:[#allocation6 + $0x60] sm:$0xff] }
 0x4a3   : > { %10405 = vrot.lane.b32.xlu1 %v10393_v12, %s13519_s10  ;;  %v9991_v60 = vsel %vm9599_vm6, %v17440_v44, %v9795_v36  ;;  %v9992_v54 = vsel %vm9600_vm13, %v17442_v3, %v9796_v29  ;;  %v13226_v46 = vpack.c.bf16 %v11355_v19, %v11354_v37  ;;  %13225 = vmatpush3.bf16.msra.mxu1 %v13224_v63  ;;  %v10474_v12 = vld [vmem:[#allocation4 + $0x23] sm:$0x1f]  ;;  %v11343_v29 = vld [vmem:[#allocation6 + $0x78] sm:$0xff] }
 0x4a4   : > { %10407 = vrot.lane.b32.xlu0 %v10394_v62, %s13519_s10  ;;  %v8987_v22 = vrot.slane %v8979_v15, %v14210_v32  ;;  %v8994_v57 = vrot.slane %v8980_v59, %v14210_v32  ;;  %v17486_v40 = vmax.f32 %v9977_v25, %v9991_v60  ;;  %v9993_v21 = vsel %vm9601_vm1, %v17455_v61, %v9797_v2  ;;  %v11358_v62 = vld [vmem:[#allocation6 + $0xf0] sm:$0xff]  ;;  %v11359_v15 = vld [vmem:[#allocation6 + $0xf8] sm:$0xff] }
 0x4a5   : > { %v17492_v33 = vmax.f32 %v9978_v27, %v9992_v54  ;;  %v17494_v52 = vmax.f32 %v9979_v18, %v9993_v21  ;;  %v13228_v24 = vpack.c.bf16 %v11339_v48, %v11338_v9  ;;  %13227 = vmatprep.subr.bf16.mxu1 %v13226_v46  ;;  %v13230_v39 = vpack.c.bf16 %v11357_v26, %v11356_v55  ;;  %v11342_v59 = vld [vmem:[#allocation6 + $0x70] sm:$0xff] }
 0x4a6   : > { %v8995_v4 = vcombine.low %v8987_v22, %v8994_v57  ;;  %v13232_v36 = vpack.c.bf16 %v11341_v13, %v11340_v47  ;;  %v13234_v27 = vpack.c.bf16 %v11359_v15, %v11358_v62  ;;  %v13236_v2 = vpack.c.bf16 %v11343_v29, %v11342_v59 }
 0x4a7   : > { %10445 = vrot.lane.b32.xlu1 %v10433_v34, %s13519_s10  ;;  %13229 = vmatpush3.bf16.msra.mxu1 %v13228_v24  ;;  %v7320_v18 = vcombine.high %v17377_v30, %v17377_v30  ;;  %v7318_v34 = vcombine.high %v17374_v38, %v17374_v38  ;;  %v7319_v22 = vcombine.high %v17385_v50, %v17385_v50  ;;  %v9787_v60 = vmul.f32 0.2, %v17385_v50 }
 0x4a8   : > { %10447 = vrot.lane.b32.xlu0 %v10434_v41, %s13519_s10  ;;  %9436 = vst.msk [vmem:[%s14771_s12 + $0xa8] sm:$0x7f] %vm9415_vm11, %v8995_v4  ;;  %13231 = vmatprep.subr.bf16.mxu1 %v13230_v39  ;;  %v7321_v41 = vcombine.high %v17380_v10, %v17380_v10  ;;  %v9784_v54 = vmul.f32 0.2, %v17377_v30  ;;  %v9788_v38 = vmul.f32 0.2, %v17380_v10  ;;  %v8996_v42 = vcombine.low %v17440_v44, %v17442_v3 }
 0x4a9   : > { %vm9590_vm9 = vcmp.ge.f32.partialorder %v7320_v18, 0.0  ;;  %v9786_v25 = vmul.f32 0.2, %v7320_v18  ;;  %v9785_v21 = vmul.f32 0.2, %v7318_v34  ;;  %vm9589_vm5 = vcmp.ge.f32.partialorder %v7318_v34, 0.0 }
 0x4aa   : > { %v9790_v57 = vmul.f32 0.2, %v7321_v41  ;;  %vm9594_vm14 = vcmp.ge.f32.partialorder %v7321_v41, 0.0  ;;  %v9789_v37 = vmul.f32 0.2, %v7319_v22  ;;  %v17518_v19 = vsel %vm9591_vm7, %v17385_v50, %v9787_v60 }
 0x4ab   : > { %10485 = vrot.lane.b32.xlu1 %v10473_v8, %s13519_s10  ;;  %13233 = vmatpush3.bf16.msra.mxu1 %v13232_v36  ;;  %vm9593_vm15 = vcmp.ge.f32.partialorder %v7319_v22, 0.0  ;;  %v9980_v63 = vsel %vm9588_vm12, %v17377_v30, %v9784_v54  ;;  %v9981_v55 = vsel %vm9589_vm5, %v7318_v34, %v9785_v21  ;;  %v9982_v26 = vsel %vm9590_vm9, %v7320_v18, %v9786_v25 }
 0x4ac   : > { %10487 = vrot.lane.b32.xlu0 %v10474_v12, %s13519_s10  ;;  %13235 = vmatprep.subr.bf16.mxu1 %v13234_v27  ;;  %v9986_v46 = vsel %vm9594_vm14, %v7321_v41, %v9790_v57  ;;  %v9984_v50 = vsel %vm9592_vm4, %v17380_v10, %v9788_v38  ;;  %v9006_v24 = vrot.slane %v8996_v42, %v14210_v32  ;;  %v17529_v12 = vmul.f32 0.2, %v17426_v28 }
 0x4ad   : > { %v10187_v30 = vmax.f32 %v17135_v35, %v17486_v40  ;;  %v9985_v39 = vsel %vm9593_vm15, %v7319_v22, %v9789_v37  ;;  %v10188_v36 = vmax.f32 %v17248_v31, %v17492_v33  ;;  %v10189_v27 = vmax.f32 %v17251_v6, %v17494_v52 }
 0x4ae   : > { %vm9595_vm9 = vcmp.ge.f32.partialorder %v17426_v28, 0.0  ;;  %vm18934_vm15 = vcmask 520192  }
 0x4af   : > { %13237 = vmatpush3.bf16.msra.mxu1 %v13236_v2 }
 0x4b7   : > { %v6279_v1 = vpop.f32.mrb[42].mxu0 }
 0x4b8   : > { %v7371_v9 = vcombine.high %v6279_v1, %v6279_v1  ;;  %v7378_v48 = vrot.slane %v6279_v1, %v14210_v32  ;;  %v13172_v4 = vpop.f32.mrb[43].mxu0 }
 0x4ba   : > { %v7385_v44 = vrot.slane %v7371_v9, %v14210_v32  ;;  %v7386_v3 = vcombine.high %v7378_v48, %v7378_v48  ;;  %v7394_v8 = vrot.slane %v7378_v48, %v14210_v32 }
 0x4bc   : > { %v7387_v47 = vcombine.high %v7385_v44, %v7385_v44  ;;  %v7401_v13 = vrot.slane %v7385_v44, %v14210_v32  ;;  %v7408_v62 = vrot.slane %v7386_v3, %v14210_v32  ;;  %v7416_v15 = vcombine.high %v7394_v8, %v7394_v8 }
 0x4bd   : > { %v8997_v10 = vcombine.low %v17455_v61, %v7394_v8  ;;  %vm9602_vm6 = vcmp.ge.f32.partialorder %v7394_v8, 0.0  ;;  %v9798_v34 = vmul.f32 0.2, %v7394_v8 }
 0x4be   : > { %v17541_v59 = vrot.slane %v7387_v47, %v14210_v32  ;;  %v17543_v35 = vcombine.high %v7401_v13, %v7401_v13  ;;  %v7418_v29 = vcombine.high %v7408_v62, %v7408_v62  ;;  %v8998_v2 = vcombine.low %v7408_v62, %v7416_v15 }
 0x4bf   : > { %v9013_v18 = vrot.slane %v8997_v10, %v14210_v32  ;;  %vm9603_vm13 = vcmp.ge.f32.partialorder %v7408_v62, 0.0  ;;  %vm9604_vm1 = vcmp.ge.f32.partialorder %v7416_v15, 0.0  ;;  %vm9606_vm7 = vcmp.ge.f32.partialorder %v7401_v13, 0.0 }
 0x4c0   : > { %v17549_v31 = vcombine.high %v17541_v59, %v17541_v59  ;;  %v8999_v61 = vcombine.low %v7418_v29, %v7401_v13  ;;  %v9020_v6 = vrot.slane %v8998_v2, %v14210_v32  ;;  %vm9605_vm14 = vcmp.ge.f32.partialorder %v7418_v29, 0.0 }
 0x4c1   : > { %v9028_v41 = vcombine.low %v9006_v24, %v9013_v18  ;;  %vm9607_vm12 = vcmp.ge.f32.partialorder %v17541_v59, 0.0  ;;  %vm9608_vm5 = vcmp.ge.f32.partialorder %v17543_v35, 0.0  ;;  %v9799_v25 = vmul.f32 0.2, %v7408_v62 }
 0x4c2   : > { %v9027_v22 = vrot.slane %v8999_v61, %v14210_v32  ;;  %vm9609_vm4 = vcmp.ge.f32.partialorder %v17549_v31, 0.0  ;;  %v9800_v60 = vmul.f32 0.2, %v7416_v15  ;;  %v9801_v54 = vmul.f32 0.2, %v7418_v29 }
 0x4c3   : > { %v9036_v57 = vrot.slane %v9028_v41, %v14210_v32  ;;  %v9802_v21 = vmul.f32 0.2, %v7401_v13  ;;  %v9803_v38 = vmul.f32 0.2, %v17541_v59  ;;  %v9804_v1 = vmul.f32 0.2, %v17543_v35 }
 0x4c4   : > { %v9029_v42 = vcombine.low %v9020_v6, %v9027_v22  ;;  %v9805_v37 = vmul.f32 0.2, %v17549_v31  ;;  %v9994_v9 = vsel %vm9602_vm6, %v7394_v8, %v9798_v34  ;;  %v9995_v48 = vsel %vm9603_vm13, %v7408_v62, %v9799_v25  ;;  %vm18935_vm6 = vmmov %vm18934_vm15 }
 0x4c5   : > { %v9996_v4 = vsel %vm9604_vm1, %v7416_v15, %v9800_v60  ;;  %v9997_v44 = vsel %vm9605_vm14, %v7418_v29, %v9801_v54  ;;  %v9998_v3 = vsel %vm9606_vm7, %v7401_v13, %v9802_v21  ;;  %v9999_v47 = vsel %vm9607_vm12, %v17541_v59, %v9803_v38  ;;  %vm18936_vm13 = vmmov %vm18935_vm6 }
 0x4c6   : > { %v9043_v24 = vrot.slane %v9029_v42, %v14210_v32  ;;  %v10000_v10 = vsel %vm9608_vm5, %v17543_v35, %v9804_v1  ;;  %v17572_v8 = vmax.f32 %v9980_v63, %v9994_v9  ;;  %v17574_v62 = vmax.f32 %v9981_v55, %v9995_v48 }
 0x4c7   : > { %v17576_v15 = vmax.f32 %v9982_v26, %v9996_v4  ;;  %v17579_v29 = vmax.f32 %v17518_v19, %v9997_v44  ;;  %v17581_v13 = vmax.f32 %v9984_v50, %v9998_v3  ;;  %v17583_v18 = vmax.f32 %v9985_v39, %v9999_v47 }
 0x4c8   : > { %v9044_v2 = vcombine.low %v9036_v57, %v9043_v24  ;;  %v17585_v34 = vmax.f32 %v9986_v46, %v10000_v10  ;;  %v10190_v61 = vmax.f32 %v17253_v17, %v17572_v8  ;;  %v10191_v63 = vmax.f32 %v17256_v53, %v17574_v62 }
 0x4c9   : > { %v10192_v55 = vmax.f32 %v17259_v20, %v17576_v15  ;;  %v10193_v19 = vmax.f32 %v17262_v0, %v17579_v29  ;;  %v10194_v26 = vmax.f32 %v17265_v5, %v17581_v13  ;;  %v10239_v50 = vmax.f32 %v10187_v30, %v10188_v36 }
 0x4ca   : > { %9437 = vst.msk [vmem:[%s14771_s12 + $0xb0] sm:$0xff] %vm6049_vm8, %v9044_v2  ;;  %v10195_v46 = vmax.f32 %v17291_v49, %v17583_v18  ;;  %v10196_v17 = vmax.f32 %v17341_v51, %v17585_v34  ;;  %v10240_v39 = vmax.f32 %v10189_v27, %v10190_v61  ;;  %v9987_v53 = vsel %vm9595_vm9, %v17426_v28, %v17529_v12  ;;  %v13415_v2 = vld [vmem:[#allocation5 + $0x50] ss:$8 sps:$4 sm:$0xff]  }
 0x4cb   : > { %v10241_v20 = vmax.f32 %v10191_v63, %v10192_v55  ;;  %v10242_v0 = vmax.f32 %v10193_v19, %v10194_v26  ;;  %v10001_v5 = vsel %vm9609_vm4, %v17549_v31, %v9805_v37  ;;  %v7369_v60 = vcombine.high %v17430_v43, %v17430_v43 }
 0x4cc   : > { %v17610_v30 = vmax.f32 %v10195_v46, %v10196_v17  ;;  %v10281_v36 = vmax.f32 %v10239_v50, %v10240_v39  ;;  %v17612_v6 = vmax.f32 %v9987_v53, %v10001_v5  ;;  %v7367_v38 = vcombine.high %v17426_v28, %v17426_v28 }
 0x4cd   : > { %v10282_v49 = vmax.f32 %v10240_v39, %v10241_v20  ;;  %v10283_v41 = vmax.f32 %v10241_v20, %v10242_v0  ;;  %v9045_v42 = vcombine.low %v17541_v59, %v17543_v35  ;;  %vm9596_vm1 = vcmp.ge.f32.partialorder %v17430_v43, 0.0  ;;  %v13412_v20 = vld [vmem:[#allocation5 + $0x40] ss:$8 sps:$4 sm:$0xff]  }
 0x4ce   : > { %v10284_v51 = vmax.f32 %v10242_v0, %v17610_v30  ;;  %10307 = vst.msk [vmem:[#allocation4 + $0x29] sm:$0x1] %vm10302_vm0, %v10281_v36  ;;  %vm9598_vm9 = vcmp.ge.f32.partialorder %v7369_v60, 0.0  ;;  %v9794_v3 = vmul.f32 0.2, %v7369_v60  ;;  %vm9597_vm7 = vcmp.ge.f32.partialorder %v7367_v38, 0.0 }
 0x4cf   : > { %10313 = vst.msk [vmem:[#allocation4 + $0x2a] sm:$0x1] %vm10302_vm0, %v10282_v49  ;;  %10319 = vst.msk [vmem:[#allocation4 + $0x2b] sm:$0x1] %vm10302_vm0, %v10283_v41  ;;  %v9792_v28 = vmul.f32 0.2, %v17430_v43  ;;  %v9054_v35 = vrot.slane %v9045_v42, %v14210_v32  ;;  %v10888_v0 = vrot.slane %v13415_v2, %v14210_v32 }
 0x4d0   : > { %10325 = vst.msk [vmem:[#allocation4 + $0x2c] sm:$0x1] %vm10302_vm0, %v10284_v51  ;;  %v9793_v10 = vmul.f32 0.2, %v7367_v38  ;;  %v9990_v49 = vsel %vm9598_vm9, %v7369_v60, %v9794_v3 }
 0x4d1   : > { %v9988_v53 = vsel %vm9596_vm1, %v17430_v43, %v9792_v28 }
 0x4d2   : > { %v9989_v36 = vsel %vm9597_vm7, %v7367_v38, %v9793_v10 }
 0x4d7   : > { %v10505_v12 = vld [vmem:[#allocation4 + $0x28] sm:$0x1f] }
 0x4d8   : > { %v10425_v27 = vld [vmem:[#allocation4 + $0x28] sm:$0x1f]  ;;  %10510 = vst.msk [vmem:[#allocation5 + $0xe0] sm:$0x1f] %vm18934_vm15, %v10505_v12 }
 0x4d9   : > { %v10585_v22 = vld [vmem:[#allocation4 + $0x28] sm:$0x1f]  ;;  %10430 = vst.msk [vmem:[#allocation5 + $0x110] sm:$0x1f] %vm18935_vm6, %v10425_v27 }
 0x4da   : > { %10590 = vst.msk [vmem:[#allocation5 + $0xb0] sm:$0x1f] %vm18936_vm13, %v10585_v22 }
 0x4dd   : > { %v6284_v25 = vpop.f32.mrb[44].mxu0 }
 0x4de   : > { %v7420_v57 = vcombine.high %v6284_v25, %v6284_v25  ;;  %v7427_v54 = vrot.slane %v6284_v25, %v14210_v32  ;;  %v13175_v21 = vpop.f32.mrb[45].mxu0 }
 0x4e0   : > { %v7434_v1 = vrot.slane %v7420_v57, %v14210_v32  ;;  %v7435_v37 = vcombine.high %v7427_v54, %v7427_v54  ;;  %v7443_v9 = vrot.slane %v7427_v54, %v14210_v32 }
 0x4e2   : > { %v7436_v48 = vcombine.high %v7434_v1, %v7434_v1  ;;  %v7457_v4 = vrot.slane %v7435_v37, %v14210_v32  ;;  %v7465_v44 = vcombine.high %v7443_v9, %v7443_v9  ;;  %v9046_v24 = vcombine.low %v17549_v31, %v7443_v9  ;;  %v13417_v37 = vld [vmem:[#allocation5 + $0x54] ss:$8 sps:$4 sm:$0x11]  }
 0x4e3   : > { %v17637_v61 = vrot.slane %v7434_v1, %v14210_v32  ;;  %v9806_v19 = vmul.f32 0.2, %v7443_v9  ;;  %vm9610_vm14 = vcmp.ge.f32.partialorder %v7443_v9, 0.0 }
 0x4e4   : > { %v7857_v47 = vcombine.high %v7457_v4, %v7457_v4  ;;  %v9047_v59 = vcombine.low %v7457_v4, %v7465_v44  ;;  %v17640_v63 = vrot.slane %v7436_v48, %v14210_v32  ;;  %v9061_v55 = vrot.slane %v9046_v24, %v14210_v32 }
 0x4e5   : > { %vm9611_vm12 = vcmp.ge.f32.partialorder %v7457_v4, 0.0  ;;  %vm9612_vm5 = vcmp.ge.f32.partialorder %v7465_v44, 0.0  ;;  %v9807_v46 = vmul.f32 0.2, %v7457_v4  ;;  %v9808_v17 = vmul.f32 0.2, %v7465_v44 }
 0x4e6   : > { %v9068_v31 = vrot.slane %v9047_v59, %v14210_v32  ;;  %v9075_v26 = vrot.slane %v7857_v47, %v14210_v32  ;;  %v9076_v50 = vcombine.low %v9054_v35, %v9061_v55  ;;  %v9093_v5 = vcombine.low %v17637_v61, %v17640_v63  ;;  %v13414_v47 = vld [vmem:[#allocation5 + $0x44] ss:$8 sps:$4 sm:$0x11]  }
 0x4e7   : > { %v10002_v41 = vsel %vm9610_vm14, %v7443_v9, %v9806_v19  ;;  %v10003_v22 = vsel %vm9611_vm12, %v7457_v4, %v9807_v46  ;;  %v10004_v43 = vsel %vm9612_vm5, %v7465_v44, %v9808_v17  ;;  %v12840_v57 = vcombine.high %v17637_v61, %v17640_v63 }
 0x4e8   : > { %v9077_v39 = vcombine.low %v9068_v31, %v9075_v26  ;;  %v9084_v12 = vrot.slane %v9076_v50, %v14210_v32  ;;  %v17658_v54 = vmax.f32 %v9988_v53, %v10002_v41  ;;  %v17660_v21 = vmax.f32 %v9989_v36, %v10003_v22  ;;  %v13418_v22 = vld [vmem:[#allocation5 + $0x60] ss:$8 sps:$4 sm:$0xff]  }
 0x4e9   : > { %v6289_v51 = vpop.f32.mrb[46].mxu0  ;;  %v17662_v38 = vmax.f32 %v9990_v49, %v10004_v43  ;;  %v10874_v9 = vrot.slane %v13412_v20, %v14210_v32  ;;  %v10197_v48 = vmax.f32 %v17343_v23, %v17612_v6  ;;  %v9103_v10 = vrot.slane %v9093_v5, %v14210_v32 }
 0x4ea   : > { %v9091_v27 = vrot.slane %v9077_v39, %v14210_v32  ;;  %v13178_v25 = vpop.f32.mrb[47].mxu0  ;;  %v7468_v42 = vcombine.high %v6289_v51, %v6289_v51  ;;  %v7475_v1 = vrot.slane %v6289_v51, %v14210_v32  ;;  %v10198_v4 = vmax.f32 %v17345_v56, %v17658_v54 }
 0x4eb   : > { %v10199_v44 = vmax.f32 %v17348_v16, %v17660_v21  ;;  %v10200_v3 = vmax.f32 %v17351_v7, %v17662_v38  ;;  %v10924_v59 = vcombine.low %v10874_v9, %v10888_v0  ;;  %v10925_v35 = vcombine.high %v10874_v9, %v10888_v0 }
 0x4ec   : > { %v9092_v60 = vcombine.low %v9084_v12, %v9091_v27  ;;  %v7482_v24 = vrot.slane %v7468_v42, %v14210_v32  ;;  %v7483_v28 = vcombine.high %v7475_v1, %v7475_v1  ;;  %v9110_v23 = vrot.slane %v12840_v57, %v14210_v32 }
 0x4ed   : > { %v10244_v2 = vmax.f32 %v10197_v48, %v10198_v4  ;;  %v10255_v56 = vmax.f32 %v10199_v44, %v10200_v3  ;;  %v7491_v16 = vrot.slane %v7475_v1, %v14210_v32  ;;  %v10895_v7 = vrot.slane %v13417_v37, %v14210_v32 }
 0x4ee   : > { %9438 = vst.msk [vmem:[%s14771_s12 + $0xb8] sm:$0x7f] %vm9415_vm11, %v9092_v60  ;;  %v7484_v55 = vcombine.high %v7482_v24, %v7482_v24  ;;  %v17681_v19 = vrot.slane %v7483_v28, %v14210_v32  ;;  %v17687_v50 = vcombine.high %v17640_v63, %v17640_v63  ;;  %v10881_v39 = vrot.slane %v13414_v47, %v14210_v32 }
 0x4ef   : > { %v10285_v31 = vmax.f32 %v17610_v30, %v10244_v2  ;;  %v10286_v26 = vmax.f32 %v10244_v2, %v10255_v56  ;;  %v9125_v53 = vcombine.low %v9103_v10, %v9110_v23  ;;  %v7498_v20 = vrot.slane %v7482_v24, %v14210_v32 }
 0x4f0   : > { %v17690_v46 = vrot.slane %v7484_v55, %v14210_v32  ;;  %v9095_v17 = vcombine.low %v7491_v16, %v17681_v19  ;;  %v12841_v30 = vcombine.high %v7491_v16, %v17681_v19  ;;  %v17699_v0 = vrot.slane %v10924_v59, %v14210_v32 }
 0x4f1   : > { %10331 = vst.msk [vmem:[#allocation4 + $0x2d] sm:$0x1] %vm10302_vm0, %v10285_v31  ;;  %10337 = vst.msk [vmem:[#allocation4 + $0x2e] sm:$0x1] %vm10302_vm0, %v10286_v26  ;;  %v7466_v5 = vcombine.high %v17637_v61, %v17637_v61  ;;  %v17705_v49 = vrot.slane %v10925_v35, %v14210_v32  ;;  %v10926_v41 = vcombine.low %v10881_v39, %v10895_v7  ;;  %vm9613_vm4 = vcmp.ge.f32.partialorder %v17637_v61, 0.0 }
 0x4f2   : > { %v9117_v36 = vrot.slane %v9095_v17, %v14210_v32  ;;  %v9124_v51 = vrot.slane %v12841_v30, %v14210_v32  ;;  %v9142_v12 = vcombine.low %v7498_v20, %v17690_v46  ;;  %v12842_v27 = vcombine.high %v7498_v20, %v17690_v46 }
 0x4f3   : > { %vm9616_vm15 = vcmp.ge.f32.partialorder %v17687_v50, 0.0  ;;  %v9809_v43 = vmul.f32 0.2, %v17637_v61  ;;  %v9812_v25 = vmul.f32 0.2, %v17687_v50  ;;  %vm9614_vm6 = vcmp.ge.f32.partialorder %v17640_v63, 0.0 }
 0x4f4   : > { %v9133_v57 = vrot.slane %v9125_v53, %v14210_v32  ;;  %v9126_v60 = vcombine.low %v9117_v36, %v9124_v51  ;;  %vm9617_vm13 = vcmp.ge.f32.partialorder %v7491_v16, 0.0  ;;  %v9810_v42 = vmul.f32 0.2, %v17640_v63 }
 0x4f5   : > { %v7515_v1 = vcombine.high %v17681_v19, %v17681_v19  ;;  %vm9621_vm1 = vcmp.ge.f32.partialorder %v7498_v20, 0.0  ;;  %v9813_v37 = vmul.f32 0.2, %v7491_v16  ;;  %v9817_v9 = vmul.f32 0.2, %v7498_v20 }
 0x4f6   : > { %v7516_v48 = vcombine.high %v17690_v46, %v17690_v46  ;;  %v9140_v4 = vrot.slane %v9126_v60, %v14210_v32  ;;  %v9151_v44 = vrot.slane %v9142_v12, %v14210_v32  ;;  %v9158_v3 = vrot.slane %v12842_v27, %v14210_v32 }
 0x4f7   : > { %v17727_v24 = vsel %vm9613_vm4, %v17637_v61, %v9809_v43  ;;  %v9811_v59 = vmul.f32 0.2, %v7466_v5  ;;  %v17730_v35 = vrot.slane %v13418_v22, %v14210_v32  ;;  %v17733_v10 = vrot.slane %v10926_v41, %v14210_v32 }
 0x4f8   : > { %v10515_v28 = vld [vmem:[#allocation4 + $0x29] sm:$0x1f]  ;;  %v7513_v23 = vcombine.high %v7491_v16, %v7491_v16  ;;  %v17735_v2 = vcombine.high %v7498_v20, %v7498_v20  ;;  %v9141_v56 = vcombine.low %v9133_v57, %v9140_v4  ;;  %vm9615_vm9 = vcmp.ge.f32.partialorder %v7466_v5, 0.0 }
 0x4f9   : > { %v10555_v47 = vld [vmem:[#allocation4 + $0x2b] sm:$0x1f]  ;;  %10528 = vrot.lane.b32.xlu1 %v10515_v28, %s13519_s10  ;;  %vm9620_vm7 = vcmp.ge.f32.partialorder %v7515_v1, 0.0  ;;  %v9816_v61 = vmul.f32 0.2, %v7515_v1  ;;  %v17740_v55 = vsel %vm9617_vm13, %v7491_v16, %v9813_v37  ;;  %v17743_v7 = vsel %vm9621_vm1, %v7498_v20, %v9817_v9  ;;  %v6294_v39 = vpop.f32.mrb[48].mxu0 }
 0x4fa   : > { %10568 = vrot.lane.b32.xlu0 %v10555_v47, %s13519_s10  ;;  %v10545_v31 = vld [vmem:[#allocation4 + $0x2a] sm:$0x1f]  ;;  %v9173_v26 = vcombine.low %v9151_v44, %v9158_v3  ;;  %9439 = vst.msk [vmem:[%s14771_s12 + $0xc0] sm:$0xff] %vm6049_vm8, %v9141_v56  ;;  %vm9624_vm14 = vcmp.ge.f32.partialorder %v7516_v48, 0.0  ;;  %v9820_v17 = vmul.f32 0.2, %v7516_v48  ;;  %v17750_v53 = vsel %vm9614_vm6, %v17640_v63, %v9810_v42 }
 0x4fb   : > { %vm18937_vm12 = vcmask 520192   ;;  %v10465_v30 = vld [vmem:[#allocation4 + $0x2a] sm:$0x1f]  ;;  %v7517_v16 = vcombine.high %v6294_v39, %v6294_v39  ;;  %v7524_v36 = vrot.slane %v6294_v39, %v14210_v32  ;;  %v17755_v20 = vsel %vm9615_vm9, %v7466_v5, %v9811_v59  ;;  %v13181_v51 = vpop.f32.mrb[49].mxu0 }
 0x4fc   : > { %10550 = vst.msk [vmem:[#allocation5 + $0xe8] sm:$0x1f] %vm18937_vm12, %v10545_v31  ;;  %v17760_v41 = vsel %vm9616_vm15, %v17687_v50, %v9812_v25  ;;  %vm18938_vm5 = vmmov %vm18937_vm12  ;;  %v10625_v12 = vld [vmem:[#allocation4 + $0x2a] sm:$0x1f]  ;;  %vm9618_vm4 = vcmp.ge.f32.partialorder %v17681_v19, 0.0  ;;  %vm9619_vm6 = vcmp.ge.f32.partialorder %v7513_v23, 0.0  ;;  %v17772_v50 = vrot.slane %v9173_v26, %v14210_v32 }
 0x4fd   : > { %10470 = vst.msk [vmem:[#allocation5 + $0x118] sm:$0x1f] %vm18938_vm5, %v10465_v30  ;;  %v9814_v63 = vmul.f32 0.2, %v17681_v19  ;;  %v9815_v27 = vmul.f32 0.2, %v7513_v23  ;;  %vm18939_vm13 = vmmov %vm18938_vm5  ;;  %v7531_v5 = vrot.slane %v7517_v16, %v14210_v32  ;;  %v7532_v22 = vcombine.high %v7524_v36, %v7524_v36 }
 0x4fe   : > { %10630 = vst.msk [vmem:[#allocation5 + $0xb8] sm:$0x1f] %vm18939_vm13, %v10625_v12  ;;  %v17768_v43 = vrot.slane %v7524_v36, %v14210_v32  ;;  %vm9622_vm15 = vcmp.ge.f32.partialorder %v17690_v46, 0.0  ;;  %vm9623_vm1 = vcmp.ge.f32.partialorder %v17735_v2, 0.0  ;;  %v9818_v25 = vmul.f32 0.2, %v17690_v46 }
 0x4ff   : > { %v17777_v57 = vsel %vm9620_vm7, %v7515_v1, %v9816_v61  ;;  %v7533_v60 = vcombine.high %v7531_v5, %v7531_v5  ;;  %v7547_v42 = vrot.slane %v7531_v5, %v14210_v32  ;;  %v17781_v37 = vrot.slane %v7532_v22, %v14210_v32 }
 0x500   : > { %v7858_v9 = vcombine.high %v17768_v43, %v17768_v43  ;;  %v9819_v4 = vmul.f32 0.2, %v17735_v2  ;;  %v17789_v44 = vsel %vm9618_vm4, %v17681_v19, %v9814_v63  ;;  %v17792_v3 = vsel %vm9619_vm6, %v7513_v23, %v9815_v27 }
 0x501   : > { %v17795_v1 = vsel %vm9624_vm14, %v7516_v48, %v9820_v17  ;;  %v7561_v47 = vrot.slane %v7533_v60, %v14210_v32  ;;  %v7562_v59 = vcombine.high %v7547_v42, %v7547_v42  ;;  %v7563_v56 = vcombine.high %v17781_v37, %v17781_v37 }
 0x502   : > { %v9144_v61 = vcombine.low %v17768_v43, %v17781_v37  ;;  %v9172_v31 = vrot.slane %v7858_v9, %v14210_v32  ;;  %vm9625_vm9 = vcmp.ge.f32.partialorder %v17768_v43, 0.0  ;;  %v9821_v48 = vmul.f32 0.2, %v17768_v43 }
 0x503   : > { %v17809_v23 = vsel %vm9622_vm15, %v17690_v46, %v9818_v25  ;;  %v17812_v26 = vcombine.high %v7561_v47, %v7561_v47  ;;  %v9190_v39 = vcombine.low %v7563_v56, %v7547_v42  ;;  %v9191_v30 = vcombine.low %v7561_v47, %v7562_v59 }
 0x504   : > { %v9165_v17 = vrot.slane %v9144_v61, %v14210_v32  ;;  %vm9626_vm7 = vcmp.ge.f32.partialorder %v17781_v37, 0.0  ;;  %vm9627_vm14 = vcmp.ge.f32.partialorder %v7563_v56, 0.0  ;;  %vm9628_vm12 = vcmp.ge.f32.partialorder %v7547_v42, 0.0 }
 0x505   : > { %v10606_v28 = vpop.permute.xlu1 %10605  ;;  %vm9629_vm5 = vcmp.ge.f32.partialorder %v7561_v47, 0.0  ;;  %v9823_v16 = vmul.f32 0.2, %v7563_v56  ;;  %v9200_v12 = vrot.slane %v9190_v39, %v14210_v32  ;;  %v9207_v46 = vrot.slane %v9191_v30, %v14210_v32 }
 0x506   : > { %10619 = vst.msk [vmem:[#allocation5 + $0x70] sm:$0x1f] %vm10375_vm3, %v10606_v28  ;;  %v10646_v19 = vpop.permute.xlu0 %10645  ;;  %v9174_v51 = vcombine.low %v9165_v17, %v9172_v31  ;;  %vm9630_vm4 = vcmp.ge.f32.partialorder %v7562_v59, 0.0  ;;  %v9824_v27 = vmul.f32 0.2, %v7547_v42  ;;  %v17822_v25 = vsel %vm9623_vm1, %v17735_v2, %v9819_v4 }
 0x507   : > { %10659 = vst.msk [vmem:[#allocation5 + $0x78] sm:$0x1f] %vm10375_vm3, %v10646_v19  ;;  %v9825_v5 = vmul.f32 0.2, %v7561_v47  ;;  %v9826_v22 = vmul.f32 0.2, %v7562_v59  ;;  %v10019_v28 = vsel %vm9627_vm14, %v7563_v56, %v9823_v16  ;;  %v9222_v30 = vcombine.low %v9200_v12, %v9207_v46 }
 0x508   : > { %v9188_v60 = vrot.slane %v9174_v51, %v14210_v32  ;;  %vm9631_vm6 = vcmp.ge.f32.partialorder %v17812_v26, 0.0  ;;  %v9827_v9 = vmul.f32 0.2, %v17812_v26  ;;  %v6299_v61 = vpop.f32.mrb[50].mxu0  ;;  %v10020_v19 = vsel %vm9628_vm12, %v7547_v42, %v9824_v27 }
 0x509   : > { %v10361_v36 = vpop.permute.xlu1 %10360  ;;  %v10021_v31 = vsel %vm9629_vm5, %v7561_v47, %v9825_v5  ;;  %v10022_v17 = vsel %vm9630_vm4, %v7562_v59, %v9826_v22  ;;  %v10117_v2 = vmax.f32 %v17727_v24, %v10019_v28  ;;  %v13184_v4 = vpop.f32.mrb[51].mxu0  ;;  %v7565_v47 = vcombine.high %v6299_v61, %v6299_v61 }
 0x50a   : > { %10376 = vst.msk [vmem:[#allocation5] sm:$0x1f] %vm10375_vm3, %v10361_v36  ;;  %v10402_v63 = vpop.permute.xlu0 %10401  ;;  %v9189_v39 = vcombine.low %v17772_v50, %v9188_v60  ;;  %v10118_v36 = vmax.f32 %v17750_v53, %v10020_v19  ;;  %v10119_v51 = vmax.f32 %v17755_v20, %v10021_v31  ;;  %v10120_v56 = vmax.f32 %v17760_v41, %v10022_v17 }
 0x50b   : > { %10416 = vst.msk [vmem:[#allocation5 + $0x8] sm:$0x1f] %vm10375_vm3, %v10402_v63  ;;  %v10201_v16 = vmax.f32 %v17486_v40, %v10117_v2  ;;  %v7572_v59 = vrot.slane %v6299_v61, %v14210_v32  ;;  %v9822_v24 = vmul.f32 0.2, %v17781_v37  ;;  %v17848_v40 = vsel %vm9631_vm6, %v17812_v26, %v9827_v9 }
 0x50c   : > { %9440 = vst.msk [vmem:[%s14771_s12 + $0xc8] sm:$0x7f] %vm9415_vm11, %v9189_v39  ;;  %v10202_v50 = vmax.f32 %v17492_v33, %v10118_v36  ;;  %v10203_v53 = vmax.f32 %v17494_v52, %v10119_v51  ;;  %v10204_v20 = vmax.f32 %v17572_v8, %v10120_v56  ;;  %v7579_v41 = vrot.slane %v7565_v47, %v14210_v32 }
 0x50d   : > { %v10442_v63 = vpop.permute.xlu1 %10441  ;;  %v7580_v12 = vcombine.high %v7572_v59, %v7572_v59  ;;  %v7588_v46 = vrot.slane %v7572_v59, %v14210_v32  ;;  %v17854_v27 = vrot.slane %v9222_v30, %v14210_v32  ;;  %v17859_v33 = vsel %vm9625_vm9, %v17768_v43, %v9821_v48 }
 0x50e   : > { %10456 = vst.msk [vmem:[#allocation5 + $0x10] sm:$0x1f] %vm10375_vm3, %v10442_v63  ;;  %v10482_v42 = vpop.permute.xlu0 %10481  ;;  %v10245_v52 = vmax.f32 %v10201_v16, %v10202_v50  ;;  %v10121_v22 = vmax.f32 %v17740_v55, %v17848_v40  ;;  %v13420_v60 = vld [vmem:[#allocation5 + $0x70] ss:$8 sps:$4 sm:$0xff]   ;;  %v17863_v8 = vmax.f32 %v10203_v53, %v10204_v20  ;;  %v7581_v28 = vcombine.high %v7579_v41, %v7579_v41 }
 0x50f   : > { %10496 = vst.msk [vmem:[#allocation5 + $0x18] sm:$0x1f] %vm10375_vm3, %v10482_v42  ;;  %v17867_v61 = vrot.slane %v7579_v41, %v14210_v32  ;;  %v7602_v19 = vrot.slane %v7580_v12, %v14210_v32  ;;  %v7610_v43 = vcombine.high %v7588_v46, %v7588_v46  ;;  %v9192_v48 = vcombine.low %v17812_v26, %v7588_v46 }
 0x510   : > { %v9828_v31 = vmul.f32 0.2, %v7588_v46  ;;  %v17875_v17 = vsel %vm9626_vm7, %v17781_v37, %v9822_v24  ;;  %v10287_v2 = vmax.f32 %v10245_v52, %v17863_v8  ;;  %v17879_v4 = vrot.slane %v7581_v28, %v14210_v32 }
 0x511   : > { %v10365_v5 = vpop.permute.xlu1 %10364  ;;  %v17883_v39 = vcombine.high %v17867_v61, %v17867_v61  ;;  %v17885_v30 = vcombine.high %v7602_v19, %v7602_v19  ;;  %v9193_v51 = vcombine.low %v7602_v19, %v7610_v43  ;;  %v9214_v26 = vrot.slane %v9192_v48, %v14210_v32 }
 0x512   : > { %10378 = vst.msk [vmem:[#allocation5 + $0x80] sm:$0x1f] %vm10375_vm3, %v10365_v5  ;;  %v10367_v9 = vpop.permute.xlu0 %10366  ;;  %vm9632_vm13 = vcmp.ge.f32.partialorder %v7588_v46, 0.0  ;;  %v17889_v63 = vrot.slane %v13420_v60, %v14210_v32  ;;  %v17895_v56 = vcombine.high %v17879_v4, %v17879_v4  ;;  %vm9633_vm15 = vcmp.ge.f32.partialorder %v7602_v19, 0.0 }
 0x513   : > { %10379 = vst.msk [vmem:[#allocation5 + $0xc0] sm:$0x1f] %vm10375_vm3, %v10367_v9  ;;  %v9239_v16 = vcombine.low %v17885_v30, %v17867_v61  ;;  %vm9634_vm1 = vcmp.ge.f32.partialorder %v7610_v43, 0.0  ;;  %v9221_v42 = vrot.slane %v9193_v51, %v14210_v32  ;;  %vm9635_vm9 = vcmp.ge.f32.partialorder %v17885_v30, 0.0 }
 0x514   : > { %10308 = vst.msk [vmem:[#allocation4 + $0x31] sm:$0x1] %vm10302_vm0, %v10287_v2  ;;  %vm9636_vm7 = vcmp.ge.f32.partialorder %v17867_v61, 0.0  ;;  %vm9637_vm14 = vcmp.ge.f32.partialorder %v17879_v4, 0.0  ;;  %vm9638_vm12 = vcmp.ge.f32.partialorder %v17883_v39, 0.0  ;;  %v10024_v24 = vsel %vm9632_vm13, %v7588_v46, %v9828_v31 }
 0x515   : > { %v10406_v36 = vpop.permute.xlu1 %10405  ;;  %v9829_v47 = vmul.f32 0.2, %v7602_v19  ;;  %v9830_v59 = vmul.f32 0.2, %v7610_v43  ;;  %v9223_v53 = vcombine.low %v9214_v26, %v9221_v42  ;;  %v9831_v20 = vmul.f32 0.2, %v17885_v30 }
 0x516   : > { %10418 = vst.msk [vmem:[#allocation5 + $0x88] sm:$0x1f] %vm10375_vm3, %v10406_v36  ;;  %v10408_v37 = vpop.permute.xlu0 %10407  ;;  %v9832_v41 = vmul.f32 0.2, %v17867_v61  ;;  %v9833_v12 = vmul.f32 0.2, %v17879_v4  ;;  %v9240_v5 = vcombine.low %v17879_v4, %v17883_v39  ;;  %v10122_v51 = vmax.f32 %v17789_v44, %v10024_v24 }
 0x517   : > { %10419 = vst.msk [vmem:[#allocation5 + $0xc8] sm:$0x1f] %vm10375_vm3, %v10408_v37  ;;  %v9834_v60 = vmul.f32 0.2, %v17883_v39  ;;  %v10025_v9 = vsel %vm9633_vm15, %v7602_v19, %v9829_v47  ;;  %v10026_v46 = vsel %vm9634_vm1, %v7610_v43, %v9830_v59  ;;  %v9237_v28 = vrot.slane %v9223_v53, %v14210_v32  ;;  %v13406_v36 = vld [vmem:[#allocation5] ss:$8 sps:$4 sm:$0xff]  }
 0x518   : > { %v10027_v48 = vsel %vm9635_vm9, %v17885_v30, %v9831_v20  ;;  %v10028_v31 = vsel %vm9636_vm7, %v17867_v61, %v9832_v41  ;;  %v10029_v2 = vsel %vm9637_vm14, %v17879_v4, %v9833_v12  ;;  %v6304_v19 = vpop.f32.mrb[52].mxu0  ;;  %v10123_v26 = vmax.f32 %v17792_v3, %v10025_v9  ;;  %v13408_v42 = vld [vmem:[#allocation5 + $0x4] ss:$8 sps:$4 sm:$0x11]   ;;  %v13409_v47 = vld [vmem:[#allocation5 + $0x10] ss:$8 sps:$4 sm:$0xff]  }
 0x519   : > { %v10446_v50 = vpop.permute.xlu1 %10445  ;;  %v10030_v43 = vsel %vm9638_vm12, %v17883_v39, %v9834_v60  ;;  %v10124_v37 = vmax.f32 %v17777_v57, %v10026_v46  ;;  %v13187_v59 = vpop.f32.mrb[53].mxu0  ;;  %v10125_v53 = vmax.f32 %v17743_v7, %v10027_v48  ;;  %v10126_v20 = vmax.f32 %v17809_v23, %v10028_v31 }
 0x51a   : > { %10458 = vst.msk [vmem:[#allocation5 + $0x90] sm:$0x1f] %vm10375_vm3, %v10446_v50  ;;  %v10448_v52 = vpop.permute.xlu0 %10447  ;;  %v9238_v50 = vcombine.low %v17854_v27, %v9237_v28  ;;  %v10127_v41 = vmax.f32 %v17822_v25, %v10029_v2  ;;  %v10128_v44 = vmax.f32 %v17795_v1, %v10030_v43  ;;  %v10205_v57 = vmax.f32 %v17574_v62, %v10121_v22 }
 0x51b   : > { %10459 = vst.msk [vmem:[#allocation5 + $0xd0] sm:$0x1f] %vm10375_vm3, %v10448_v52  ;;  %v13411_v52 = vld [vmem:[#allocation5 + $0x14] ss:$8 sps:$4 sm:$0x11]   ;;  %v10206_v3 = vmax.f32 %v17576_v15, %v10122_v51  ;;  %v10207_v24 = vmax.f32 %v17579_v29, %v10123_v26  ;;  %v10208_v23 = vmax.f32 %v17581_v13, %v10124_v37  ;;  %v10209_v25 = vmax.f32 %v17583_v18, %v10125_v53 }
 0x51c   : > { %9441 = vst.msk [vmem:[%s14771_s12 + $0xd0] sm:$0xff] %vm6049_vm8, %v9238_v50  ;;  %v10210_v1 = vmax.f32 %v17585_v34, %v10126_v20  ;;  %v10211_v27 = vmax.f32 %v17612_v6, %v10127_v41  ;;  %v10212_v62 = vmax.f32 %v17658_v54, %v10128_v44  ;;  %v10757_v29 = vrot.slane %v13406_v36, %v14210_v32 }
 0x51d   : > { %v10486_v12 = vpop.permute.xlu1 %10485  ;;  %v10247_v15 = vmax.f32 %v10205_v57, %v10206_v3  ;;  %v10764_v55 = vrot.slane %v13408_v42, %v14210_v32  ;;  %v10248_v40 = vmax.f32 %v10207_v24, %v10208_v23  ;;  %v10771_v60 = vrot.slane %v13409_v47, %v14210_v32 }
 0x51e   : > { %10498 = vst.msk [vmem:[#allocation5 + $0x98] sm:$0x1f] %vm10375_vm3, %v10486_v12  ;;  %v10488_v7 = vpop.permute.xlu0 %10487  ;;  %v10249_v22 = vmax.f32 %v10209_v25, %v10210_v1  ;;  %v10778_v13 = vrot.slane %v13411_v52, %v14210_v32  ;;  %v17956_v18 = vmax.f32 %v10211_v27, %v10212_v62  ;;  %v10927_v6 = vcombine.low %v17730_v35, %v17889_v63 }
 0x51f   : > { %10499 = vst.msk [vmem:[#allocation5 + $0xd8] sm:$0x1f] %vm10375_vm3, %v10488_v7  ;;  %v10288_v34 = vmax.f32 %v17863_v8, %v10247_v15  ;;  %v7620_v54 = vrot.slane %v6304_v19, %v14210_v32  ;;  %v10289_v9 = vmax.f32 %v10247_v15, %v10248_v40  ;;  %v10807_v28 = vcombine.low %v10757_v29, %v10771_v60 }
 0x520   : > { %v10290_v46 = vmax.f32 %v10248_v40, %v10249_v22  ;;  %v10808_v48 = vcombine.high %v10757_v29, %v10771_v60  ;;  %v10291_v31 = vmax.f32 %v10249_v22, %v17956_v18  ;;  %v10809_v2 = vcombine.low %v10764_v55, %v10778_v13  ;;  %v18007_v40 = vld [vmem:[#allocation5 + $0x60] sm:$0x1f]  ;;  %v18009_v22 = vld [vmem:[#allocation5 + $0x68] sm:$0x1f] }
 0x521   : > { %10314 = vst.msk [vmem:[#allocation4 + $0x32] sm:$0x1] %vm10302_vm0, %v10288_v34  ;;  %v17965_v36 = vrot.slane %v10927_v6, %v14210_v32  ;;  %v17968_v43 = vrot.slane %v7620_v54, %v14210_v32  ;;  %10320 = vst.msk [vmem:[#allocation4 + $0x33] sm:$0x1] %vm10302_vm0, %v10289_v9  ;;  %v10819_v8 = vrot.slane %v10807_v28, %v14210_v32  ;;  %vm9639_vm5 = vcmp.ge.f32.partialorder %v17895_v56, 0.0 }
 0x522   : > { %10326 = vst.msk [vmem:[#allocation4 + $0x34] sm:$0x1] %vm10302_vm0, %v10290_v46  ;;  %v10833_v51 = vrot.slane %v10808_v48, %v14210_v32  ;;  %v7859_v26 = vcombine.high %v6304_v19, %v6304_v19  ;;  %v7867_v37 = vcombine.high %v7620_v54, %v7620_v54  ;;  %10332 = vst.msk [vmem:[#allocation4 + $0x35] sm:$0x1] %vm10302_vm0, %v10291_v31  ;;  %v9835_v55 = vmul.f32 0.2, %v17895_v56 }
 0x523   : > { %v10826_v42 = vrot.slane %v10809_v2, %v14210_v32  ;;  %v10973_v47 = vcombine.high %v17699_v0, %v17965_v36  ;;  %v9241_v59 = vcombine.low %v17895_v56, %v17968_v43  ;;  %v9248_v50 = vrot.slane %v9239_v16, %v14210_v32  ;;  %v13422_v54 = vld [vmem:[#allocation5 + $0x80] ss:$8 sps:$4 sm:$0xff]   ;;  %v13424_v31 = vld [vmem:[#allocation5 + $0x84] ss:$8 sps:$4 sm:$0x11]  }
 0x524   : > { %v12847_v53 = vcombine.low %v10819_v8, %v10833_v51  ;;  %v12849_v20 = vcombine.high %v10819_v8, %v10833_v51  ;;  %v7866_v19 = vrot.slane %v7859_v26, %v14210_v32  ;;  %v7882_v41 = vrot.slane %v7867_v37, %v14210_v32 }
 0x525   : > { %v12851_v12 = vcombine.low %v10826_v42, %v17699_v0  ;;  %v12853_v52 = vcombine.low %v17705_v49, %v10973_v47  ;;  %v9255_v44 = vrot.slane %v9240_v5, %v14210_v32  ;;  %v9262_v57 = vrot.slane %v9241_v59, %v14210_v32  ;;  %v13425_v2 = vld [vmem:[#allocation5 + $0x90] ss:$8 sps:$4 sm:$0xff]   ;;  %v13427_v37 = vld [vmem:[#allocation5 + $0x94] ss:$8 sps:$4 sm:$0x11]  }
 0x526   : > { %v11470_v61 = vrot.slane %v12847_v53, %v14210_v32  ;;  %v11484_v30 = vrot.slane %v12849_v20, %v14210_v32  ;;  %v7868_v16 = vcombine.high %v7866_v19, %v7866_v19  ;;  %v17996_v3 = vrot.slane %v7866_v19, %v14210_v32  ;;  %v13428_v53 = vld [vmem:[#allocation5 + $0xc0] ss:$8 sps:$4 sm:$0xff]   ;;  %v13430_v20 = vld [vmem:[#allocation5 + $0xd0] ss:$8 sps:$4 sm:$0xff]  }
 0x527   : > { %v11498_v24 = vrot.slane %v12851_v12, %v14210_v32  ;;  %v11512_v0 = vrot.slane %v12853_v52, %v14210_v32  ;;  %v9269_v7 = vrot.slane %v7882_v41, %v14210_v32  ;;  %v9270_v23 = vcombine.low %v9248_v50, %v9255_v44 }
 0x528   : > { %18940 = vst [vmem:[#allocation20_spill] sm:$0xff] %v17996_v3  ;;  %v11521_v25 = vcombine.high %v11470_v61, %v11484_v30  ;;  %v11520_v4 = vcombine.low %v11470_v61, %v11484_v30  ;;  %v18002_v39 = vrot.slane %v7868_v16, %v14210_v32  ;;  %v12843_v5 = vcombine.high %v17968_v43, %v7882_v41  ;;  %v10354_v30 = vld [vmem:[#allocation4 + $0x21] sm:$0x1f] }
 0x529   : > { %v11525_v1 = vcombine.high %v11498_v24, %v11512_v0  ;;  %v11524_v27 = vcombine.low %v11498_v24, %v11512_v0  ;;  %v9271_v62 = vcombine.low %v9262_v57, %v9269_v7  ;;  %v10586_v15 = vld [vmem:[#allocation4 + $0x30] sm:$0x1f]  ;;  %vm18942_vm4 = vcmask 520192   ;;  %v11440_v16 = vld [vmem:[#allocation6 + $0x380] sm:$0xff]  ;;  %v10678_v7 = vld [vmem:[#allocation5 + $0x78] sm:$0x1f] }
 0x52a   : > { %18941 = vst [vmem:[#allocation10_spill] sm:$0xff] %v18002_v39  ;;  %v10506_v29 = vld [vmem:[#allocation4 + $0x30] sm:$0x1f]  ;;  %v18012_v60 = vrot.slane %v11521_v25, %v14210_v32  ;;  %v18015_v13 = vrot.slane %v11520_v4, %v14210_v32  ;;  %v9288_v34 = vcombine.low %v17996_v3, %v18002_v39  ;;  %10591 = vst.msk [vmem:[#allocation5 + $0xf0] sm:$0x1f] %vm18942_vm4, %v10586_v15  ;;  %vm9640_vm13 = vcmp.ge.f32.partialorder %v17968_v43, 0.0 }
 0x52b   : > { %v10596_v6 = vld [vmem:[#allocation4 + $0x31] sm:$0x1f]  ;;  %vm18943_vm6 = vmmov %vm18942_vm4  ;;  %v18022_v9 = vrot.slane %v11525_v1, %v14210_v32  ;;  %v18025_v46 = vrot.slane %v11524_v27, %v14210_v32  ;;  %v9278_v28 = vrot.slane %v9270_v23, %v14210_v32  ;;  %v9285_v48 = vrot.slane %v9271_v62, %v14210_v32  ;;  %v11424_v0 = vld [vmem:[#allocation6 + $0x300] sm:$0xff] }
 0x52c   : > { %10511 = vst.msk [vmem:[#allocation5 + $0x120] sm:$0x1f] %vm18943_vm6, %v10506_v29  ;;  %10609 = vrot.lane.b32.xlu1 %v10596_v6, %s13519_s10  ;;  %v18031_v8 = vrot.slane %v12843_v5, %v14210_v32  ;;  %v18034_v51 = vrot.slane %v9288_v34, %v14210_v32  ;;  %v9836_v26 = vmul.f32 0.2, %v17968_v43  ;;  %v10031_v41 = vsel %vm9639_vm5, %v17895_v56, %v9835_v55  ;;  %v10587_v29 = vld [vmem:[#allocation4 + $0x38] sm:$0x1f]  ;;  %vm18946_vm15 = vmmov %vm18942_vm4 }
 0x52d   : > { %v11588_v42 = vcombine.low %v18012_v60, %v18022_v9  ;;  %v11584_v47 = vcombine.low %v18015_v13, %v18025_v46  ;;  %v9286_v50 = vcombine.low %v9278_v28, %v9285_v48  ;;  %v10928_v52 = vcombine.high %v17730_v35, %v17889_v63  ;;  %v10677_v55 = vld [vmem:[#allocation5 + $0x70] sm:$0x1f]  ;;  %10592 = vst.msk [vmem:[#allocation5 + $0x130] sm:$0x1f] %vm18946_vm15, %v10587_v29  ;;  %v10435_v28 = vld [vmem:[#allocation4 + $0x29] sm:$0x1f] }
 0x52e   : > { %18944 = vst [vmem:[#allocation11_spill] sm:$0xff] %v18031_v8  ;;  %18945 = vst [vmem:[#allocation14_spill] sm:$0xff] %v18034_v51  ;;  %v10032_v12 = vsel %vm9640_vm13, %v17968_v43, %v9836_v26  ;;  %v10129_v44 = vmax.f32 %v17859_v33, %v10031_v41  ;;  %v10991_v61 = vrot.slane %v13422_v54, %v14210_v32  ;;  %v11441_v33 = vld [vmem:[#allocation6 + $0x388] sm:$0xff]  ;;  %v10516_v41 = vld [vmem:[#allocation4 + $0x31] sm:$0x1f]  ;;  %vm18954_vm7 = vcmask 129120  }
 0x52f   : > { %12009 = vmatprep.mubr.f32.mxu1 %v11588_v42  ;;  %9442 = vst.msk [vmem:[%s14771_s12 + $0xd8] sm:$0x7f] %vm9415_vm11, %v9286_v50  ;;  %v10130_v57 = vmax.f32 %v17875_v17, %v10032_v12  ;;  %v10865_v24 = vcombine.high %v18007_v40, %v18009_v22  ;;  %v18060_v56 = vrot.slane %v10928_v52, %v14210_v32  ;;  %v11425_v17 = vld [vmem:[#allocation6 + $0x308] sm:$0xff]  ;;  %vm18955_vm14 = vcmask 161920   ;;  %v11395_v8 = vld [vmem:[#allocation6 + $0x218] sm:$0xff]  ;;  %v11412_v3 = vld [vmem:[#allocation6 + $0x2a0] sm:$0xff] }
 0x530   : > { %12010 = vmatmul.mubr.f32.vlgmr.msra.gmra.mrb[0].mxu1 %v11584_v47  ;;  %v10998_v35 = vrot.slane %v13424_v31, %v14210_v32  ;;  %v11005_v63 = vrot.slane %v13425_v2, %v14210_v32  ;;  %v11012_v43 = vrot.slane %v13427_v37, %v14210_v32  ;;  %v10213_v23 = vmax.f32 %v17660_v21, %v10129_v44  ;;  %v11413_v39 = vld [vmem:[#allocation6 + $0x2a8] sm:$0xff] }
 0x531   : > { %v10214_v25 = vmax.f32 %v17662_v38, %v10130_v57  ;;  %v18068_v4 = vrot.slane %v13428_v53, %v14210_v32  ;;  %v18071_v5 = vrot.slane %v13430_v20, %v14210_v32  ;;  %10368 = vrot.lane.b32.xlu1 %v10354_v30, %s13519_s10  ;;  %v10976_v1 = vcombine.high %v17705_v49, %v18060_v56  ;;  %v10597_v57 = vld [vmem:[#allocation4 + $0x39] sm:$0x1f] }
 0x532   : > { %v11041_v27 = vcombine.low %v10991_v61, %v11005_v63  ;;  %v11042_v62 = vcombine.high %v10991_v61, %v11005_v63  ;;  %v11043_v15 = vcombine.low %v10998_v35, %v11012_v43  ;;  %v18078_v38 = vpack.c.bf16 %v11441_v33, %v11440_v16  ;;  %v11442_v63 = vld [vmem:[#allocation6 + $0x390] sm:$0xff]  ;;  %v11443_v43 = vld [vmem:[#allocation6 + $0x398] sm:$0xff] }
 0x533   : > { %v10256_v40 = vmax.f32 %v10213_v23, %v10214_v25  ;;  %v11158_v21 = vcombine.low %v18068_v4, %v18071_v5  ;;  %v18080_v22 = vpack.c.bf16 %v11425_v17, %v11424_v0  ;;  %v12855_v54 = vcombine.low %v10976_v1, %v17733_v10  ;;  %v11426_v33 = vld [vmem:[#allocation6 + $0x310] sm:$0xff]  ;;  %v11427_v23 = vld [vmem:[#allocation6 + $0x318] sm:$0xff] }
 0x534   : > { %v11053_v34 = vrot.slane %v11041_v27, %v14210_v32  ;;  %v11067_v6 = vrot.slane %v11042_v62, %v14210_v32  ;;  %v10867_v48 = vcombine.high %v10677_v55, %v10678_v7  ;;  %v11060_v2 = vrot.slane %v11043_v15, %v14210_v32  ;;  %13303 = vmatprep.subr.bf16.mxu0 %v18078_v38  ;;  %v10512_v55 = vld [vmem:[#allocation4 + $0x11] sm:$0x1f] }
 0x535   : > { %v10292_v31 = vmax.f32 %v17956_v18, %v10256_v40  ;;  %v18089_v26 = vrot.slane %v11158_v21, %v14210_v32  ;;  %10449 = vrot.lane.b32.xlu1 %v10435_v28, %s13519_s10  ;;  %13305 = vmatpush3.bf16.msra.mxu0 %v18080_v22  ;;  %v11159_v18 = vcombine.high %v18068_v4, %v18071_v5  ;;  %v11376_v28 = vld [vmem:[#allocation6 + $0x180] sm:$0xff]  ;;  %vm18956_vm12 = vcmask 194720  }
 0x536   : > { %v12857_v37 = vcombine.low %v11053_v34, %v11067_v6  ;;  %v12859_v42 = vcombine.high %v11053_v34, %v11067_v6  ;;  %v11589_v50 = vcombine.high %v18012_v60, %v18022_v9  ;;  %v11606_v53 = vrot.slane %v12855_v54, %v14210_v32 }
 0x537   : > { %10338 = vst.msk [vmem:[#allocation4 + $0x36] sm:$0x1] %vm10302_vm0, %v10292_v31  ;;  %v12861_v47 = vcombine.low %v11060_v2, %v18089_v26  ;;  %v10909_v61 = vrot.slane %v10865_v24, %v14210_v32  ;;  %v10923_v30 = vrot.slane %v10867_v48, %v14210_v32  ;;  %v18109_v7 = vpack.c.bf16 %v11443_v43, %v11442_v63  ;;  %vm18947_vm0 = vmmov %vm18942_vm4  ;;  %v11377_v48 = vld [vmem:[#allocation6 + $0x188] sm:$0xff] }
 0x538   : > { %v11620_v20 = vrot.slane %v12857_v37, %v14210_v32  ;;  %v11634_v52 = vrot.slane %v12859_v42, %v14210_v32  ;;  %v18114_v27 = vpack.c.bf16 %v11427_v23, %v11426_v33  ;;  %vm18948_vm1 = vmmov %vm18947_vm0  ;;  %v13238_v37 = vpack.c.bf16 %v11377_v48, %v11376_v28  ;;  %v11360_v42 = vld [vmem:[#allocation6 + $0x100] sm:$0xff]  ;;  %v10475_v43 = vld [vmem:[#allocation4 + $0x2b] sm:$0x1f] }
 0x539   : > { %v11648_v44 = vrot.slane %v12861_v47, %v14210_v32  ;;  %10530 = vrot.lane.b32.xlu1 %v10516_v41, %s13519_s10  ;;  %v10929_v25 = vcombine.low %v10909_v61, %v10923_v30  ;;  %13307 = vmatprep.subr.bf16.mxu0 %v18109_v7  ;;  %v11361_v47 = vld [vmem:[#allocation6 + $0x108] sm:$0xff]  ;;  %v10395_v41 = vld [vmem:[#allocation4 + $0x23] sm:$0x1f]  ;;  %vm18949_vm9 = vmmov %vm18947_vm0  ;;  %vm18957_vm5 = vcmask 227520   ;;  %vm18958_vm4 = vcmask 260320  }
 0x53a   : > { %v11657_v16 = vcombine.high %v11606_v53, %v11620_v20  ;;  %v11656_v35 = vcombine.low %v11606_v53, %v11620_v20  ;;  %13309 = vmatpush3.bf16.msra.mxu0 %v18114_v27  ;;  %v10627_v53 = vld [vmem:[#allocation4 + $0x3a] sm:$0x1f]  ;;  %13239 = vmatprep.subr.bf16.mxu1 %v13238_v37  ;;  %v11362_v61 = vld [vmem:[#allocation6 + $0x110] sm:$0xff]  ;;  %v11364_v23 = vld [vmem:[#allocation6 + $0x120] sm:$0xff]  ;;  %vm18959_vm6 = vcmask 293120   ;;  %vm18960_vm13 = vcmask 325920  }
 0x53b   : > { %v11661_v0 = vcombine.high %v11634_v52, %v11648_v44  ;;  %v11660_v17 = vcombine.low %v11634_v52, %v11648_v44  ;;  %v10964_v21 = vrot.slane %v10929_v25, %v14210_v32  ;;  %v13240_v52 = vpack.c.bf16 %v11361_v47, %v11360_v42  ;;  %10632 = vst.msk [vmem:[#allocation5 + $0x138] sm:$0x1f] %vm18949_vm9, %v10627_v53  ;;  %v11378_v44 = vld [vmem:[#allocation6 + $0x190] sm:$0xff]  ;;  %v801_v33 = vld [vmem:[#allocation2 + $0x15b] sm:$0x7f] }
 0x53c   : > { %v18112_v1 = vrot.slane %v11657_v16, %v14210_v32  ;;  %v18120_v62 = vrot.slane %v11656_v35, %v14210_v32  ;;  %v10593_v35 = vld [vmem:[#allocation4 + $0x19] sm:$0x1f]  ;;  %v1165_v48 = vld [vmem:[#allocation2 + $0x171] sm:$0x7f]  ;;  %v18961_v51 = vcombine.low %v17705_v49, %v18060_v56  ;;  %v18962_v49 = vcombine.high %v18015_v13, %v18025_v46 }
 0x53d   : > { %v18117_v24 = vrot.slane %v11661_v0, %v14210_v32  ;;  %v18123_v15 = vrot.slane %v11660_v17, %v14210_v32  ;;  %10611 = vrot.lane.b32.xlu1 %v10597_v57, %s13519_s10  ;;  %v10974_v20 = vcombine.low %v17733_v10, %v10964_v21  ;;  %v11379_v57 = vld [vmem:[#allocation6 + $0x198] sm:$0xff]  ;;  %13241 = vmatpush3.bf16.msra.mxu1 %v13240_v52  ;;  %v11380_v0 = vld [vmem:[#allocation6 + $0x1a0] sm:$0xff]  ;;  %v11381_v17 = vld [vmem:[#allocation6 + $0x1a8] sm:$0xff]  ;;  %vm18966_vm15 = vcmask 391520  }
 0x53e   : > { %v10636_v29 = vld [vmem:[#allocation4 + $0x33] sm:$0x1f]  ;;  %v13242_v16 = vpack.c.bf16 %v11379_v57, %v11378_v44  ;;  %v11363_v10 = vld [vmem:[#allocation6 + $0x118] sm:$0xff]  ;;  %v13246_v25 = vpack.c.bf16 %v11381_v17, %v11380_v0 }
 0x53f   : > { %v10626_v40 = vld [vmem:[#allocation4 + $0x32] sm:$0x1f]  ;;  %v11724_v34 = vcombine.low %v18112_v1, %v18117_v24  ;;  %v11720_v6 = vcombine.low %v18120_v62, %v18123_v15  ;;  %10649 = vrot.lane.b32.xlu0 %v10636_v29, %s13519_s10  ;;  %v18144_v30 = vcombine.high %v18060_v56, %v10974_v20  ;;  %v13244_v63 = vpack.c.bf16 %v11363_v10, %v11362_v61  ;;  %v11365_v29 = vld [vmem:[#allocation6 + $0x128] sm:$0xff]  ;;  %v11383_v47 = vld [vmem:[#allocation6 + $0x1b8] sm:$0xff] }
 0x540   : > { %10631 = vst.msk [vmem:[#allocation5 + $0xf8] sm:$0x1f] %vm18947_vm0, %v10626_v40  ;;  %v10546_v54 = vld [vmem:[#allocation4 + $0x32] sm:$0x1f]  ;;  %13243 = vmatprep.subr.bf16.mxu1 %v13242_v16  ;;  %v11445_v40 = vld [vmem:[#allocation6 + $0x3a8] sm:$0xff]  ;;  %v13248_v21 = vpack.c.bf16 %v11365_v29, %v11364_v23  ;;  %v11384_v61 = vld [vmem:[#allocation6 + $0x1c0] sm:$0xff] }
 0x541   : > { %10551 = vst.msk [vmem:[#allocation5 + $0x128] sm:$0x1f] %vm18948_vm1, %v10546_v54  ;;  %12014 = vmatprep.mubr.f32.mxu1 %v11724_v34  ;;  %10522 = vrot.lane.b32.xlu1 %v10512_v55, %s13519_s10  ;;  %v11444_v55 = vld [vmem:[#allocation6 + $0x3a0] sm:$0xff]  ;;  %v11429_v54 = vld [vmem:[#allocation6 + $0x328] sm:$0xff]  ;;  %v10556_v28 = vld [vmem:[#allocation4 + $0x33] sm:$0x1f] }
 0x542   : > { %12015 = vmatmul.mubr.f32.gmra.mrb[2].mxu1 %v11720_v6  ;;  %v18149_v34 = vpack.c.bf16 %v11445_v40, %v11444_v55  ;;  %v11428_v6 = vld [vmem:[#allocation6 + $0x320] sm:$0xff]  ;;  %v11382_v42 = vld [vmem:[#allocation6 + $0x1b0] sm:$0xff]  ;;  %v10637_v52 = vld [vmem:[#allocation4 + $0x3b] sm:$0x1f]  ;;  %vm18967_vm0 = vcmask 457120   ;;  %vm18969_vm1 = vcmask 522720  }
 0x543   : > { %10409 = vrot.lane.b32.xlu0 %v10395_v41, %s13519_s10  ;;  %13245 = vmatpush3.bf16.msra.mxu1 %v13244_v63  ;;  %v18152_v37 = vpack.c.bf16 %v11429_v54, %v11428_v6  ;;  %v11366_v53 = vld [vmem:[#allocation6 + $0x130] sm:$0xff]  ;;  %v13250_v20 = vpack.c.bf16 %v11383_v47, %v11382_v42  ;;  %v11367_v41 = vld [vmem:[#allocation6 + $0x138] sm:$0xff]  ;;  %v11385_v16 = vld [vmem:[#allocation6 + $0x1c8] sm:$0xff] }
 0x544   : > { %13247 = vmatprep.subr.bf16.mxu1 %v13246_v25  ;;  %13311 = vmatprep.subr.bf16.mxu0 %v18149_v34  ;;  %v13252_v44 = vpack.c.bf16 %v11367_v41, %v11366_v53  ;;  %v1529_v57 = vld [vmem:[#allocation2 + $0x173] sm:$0x7f]  ;;  %v11368_v10 = vld [vmem:[#allocation6 + $0x140] sm:$0xff]  ;;  %v11369_v63 = vld [vmem:[#allocation6 + $0x148] sm:$0xff] }
 0x545   : > { %10603 = vrot.lane.b32.xlu1 %v10593_v35, %s13519_s10  ;;  %13313 = vmatpush3.bf16.msra.mxu0 %v18152_v37  ;;  %v13254_v35 = vpack.c.bf16 %v11385_v16, %v11384_v61  ;;  %v11386_v0 = vld [vmem:[#allocation6 + $0x1d0] sm:$0xff]  ;;  %v11387_v17 = vld [vmem:[#allocation6 + $0x1d8] sm:$0xff]  ;;  %v10514_v25 = vld [vmem:[#allocation4 + $0x21] sm:$0x1f] }
 0x546   : > { %v11370_v23 = vld [vmem:[#allocation6 + $0x150] sm:$0xff]  ;;  %v13258_v29 = vpack.c.bf16 %v11387_v17, %v11386_v0  ;;  %v11371_v55 = vld [vmem:[#allocation6 + $0x158] sm:$0xff]  ;;  %v11388_v54 = vld [vmem:[#allocation6 + $0x1e0] sm:$0xff] }
 0x547   : > { %10489 = vrot.lane.b32.xlu0 %v10475_v43, %s13519_s10  ;;  %13249 = vmatpush3.bf16.msra.mxu1 %v13248_v21  ;;  %v13256_v43 = vpack.c.bf16 %v11369_v63, %v11368_v10  ;;  %v10633_v40 = vld [vmem:[#allocation4 + $0x1b] sm:$0x1f]  ;;  %v13260_v21 = vpack.c.bf16 %v11371_v55, %v11370_v23  ;;  %v983_v6 = vld [vmem:[#allocation2 + $0x170] sm:$0x7f]  ;;  %v11373_v47 = vld [vmem:[#allocation6 + $0x168] sm:$0xff] }
 0x548   : > { %13251 = vmatprep.subr.bf16.mxu1 %v13250_v20  ;;  %v11446_v53 = vld [vmem:[#allocation6 + $0x3b0] sm:$0xff]  ;;  %v11447_v20 = vld [vmem:[#allocation6 + $0x3b8] sm:$0xff]  ;;  %v10595_v41 = vld [vmem:[#allocation4 + $0x29] sm:$0x1f] }
 0x549   : > { %890 = vrot.lane.b32.xlu1 %v801_v33, %s13503_s13  ;;  %v10552_v33 = vld [vmem:[#allocation4 + $0x13] sm:$0x1f]  ;;  %v11431_v61 = vld [vmem:[#allocation6 + $0x338] sm:$0xff]  ;;  %v1894_v16 = vld [vmem:[#allocation2 + $0x189] sm:$0x7f]  ;;  %s13351_s13 = smul.u32 40, %s18981_s16 }
 0x54a   : > { %v11391_v63 = vld [vmem:[#allocation6 + $0x1f8] sm:$0xff]  ;;  %v11409_v55 = vld [vmem:[#allocation6 + $0x288] sm:$0xff] }
 0x54b   : > { %10570 = vrot.lane.b32.xlu0 %v10556_v28, %s13519_s10  ;;  %13253 = vmatpush3.bf16.msra.mxu1 %v13252_v44  ;;  %v11389_v28 = vld [vmem:[#allocation6 + $0x1e8] sm:$0xff]  ;;  %v18163_v44 = vpack.c.bf16 %v11447_v20, %v11446_v53  ;;  %v11375_v0 = vld [vmem:[#allocation6 + $0x178] sm:$0xff]  ;;  %v11432_v53 = vld [vmem:[#allocation6 + $0x340] sm:$0xff] }
 0x54c   : > { %13255 = vmatprep.subr.bf16.mxu1 %v13254_v35  ;;  %v13262_v42 = vpack.c.bf16 %v11389_v28, %v11388_v54  ;;  %v11390_v35 = vld [vmem:[#allocation6 + $0x1f0] sm:$0xff]  ;;  %v11448_v54 = vld [vmem:[#allocation6 + $0x3c0] sm:$0xff]  ;;  %v11449_v28 = vld [vmem:[#allocation6 + $0x3c8] sm:$0xff] }
 0x54d   : > { %1254 = vrot.lane.b32.xlu1 %v1165_v48, %s13506_s18  ;;  %v11372_v48 = vld [vmem:[#allocation6 + $0x160] sm:$0xff]  ;;  %13315 = vmatprep.subr.bf16.mxu0 %v18163_v44  ;;  %v1347_v17 = vld [vmem:[#allocation2 + $0x172] sm:$0x7f]  ;;  %v11433_v20 = vld [vmem:[#allocation6 + $0x348] sm:$0xff]  ;;  %s18508_s18 = scalar_lea.vmem %s18560_s4, %s13351_s13 }
 0x54f   : > { %10651 = vrot.lane.b32.xlu0 %v10637_v52, %s13519_s10  ;;  %13257 = vmatpush3.bf16.msra.mxu1 %v13256_v43  ;;  %v13264_v52 = vpack.c.bf16 %v11373_v47, %v11372_v48  ;;  %v11374_v43 = vld [vmem:[#allocation6 + $0x170] sm:$0xff]  ;;  %v10554_v48 = vld [vmem:[#allocation4 + $0x23] sm:$0x1f] }
 0x550   : > { %13259 = vmatprep.subr.bf16.mxu1 %v13258_v29  ;;  %v13268_v23 = vpack.c.bf16 %v11375_v0, %v11374_v43  ;;  %v11408_v29 = vld [vmem:[#allocation6 + $0x280] sm:$0xff]  ;;  %v11450_v43 = vld [vmem:[#allocation6 + $0x3d0] sm:$0xff] }
 0x551   : > { %1618 = vrot.lane.b32.xlu1 %v1529_v57, %s13507_s19  ;;  %v11430_v57 = vld [vmem:[#allocation6 + $0x330] sm:$0xff]  ;;  %v2987_v47 = vld [vmem:[#allocation2 + $0x1a3] sm:$0x7f] }
 0x552   : > { %v18166_v10 = vpack.c.bf16 %v11431_v61, %v11430_v57  ;;  %v11434_v0 = vld [vmem:[#allocation6 + $0x350] sm:$0xff] }
 0x553   : > { %10562 = vrot.lane.b32.xlu0 %v10552_v33, %s13519_s10  ;;  %13261 = vmatpush3.bf16.msra.mxu1 %v13260_v21  ;;  %v13266_v33 = vpack.c.bf16 %v11391_v63, %v11390_v35  ;;  %v1712_v21 = vld [vmem:[#allocation2 + $0x188] sm:$0x7f]  ;;  %v2441_v35 = vld [vmem:[#allocation2 + $0x1a0] sm:$0x7f] }
 0x554   : > { %13263 = vmatprep.subr.bf16.mxu1 %v13262_v42  ;;  %13317 = vmatpush3.bf16.msra.mxu0 %v18166_v10  ;;  %v18176_v42 = vpack.c.bf16 %v11449_v28, %v11448_v54  ;;  %v2805_v63 = vld [vmem:[#allocation2 + $0x1a2] sm:$0x7f]  ;;  %v11454_v28 = vld [vmem:[#allocation6 + $0x3f0] sm:$0xff] }
 0x555   : > { %10526 = vrot.lane.b32.xlu1 %v10514_v25, %s13519_s10  ;;  %v2258_v25 = vld [vmem:[#allocation2 + $0x18b] sm:$0x7f] }
 0x556   : > { %13319 = vmatprep.subr.bf16.mxu0 %v18176_v42 }
 0x557   : > { %10643 = vrot.lane.b32.xlu0 %v10633_v40, %s13519_s10  ;;  %13265 = vmatpush3.bf16.msra.mxu1 %v13264_v52  ;;  %v13270_v40 = vpack.c.bf16 %v11409_v55, %v11408_v29  ;;  %v10635_v52 = vld [vmem:[#allocation4 + $0x2b] sm:$0x1f]  ;;  %v11452_v29 = vld [vmem:[#allocation6 + $0x3e0] sm:$0xff] }
 0x558   : > { %13267 = vmatprep.subr.bf16.mxu1 %v13266_v33  ;;  %v11451_v33 = vld [vmem:[#allocation6 + $0x3d8] sm:$0xff]  ;;  %v11453_v55 = vld [vmem:[#allocation6 + $0x3e8] sm:$0xff] }
 0x559   : > { %10607 = vrot.lane.b32.xlu1 %v10595_v41, %s13519_s10  ;;  %v18180_v41 = vpack.c.bf16 %v11433_v20, %v11432_v53  ;;  %v11438_v53 = vld [vmem:[#allocation6 + $0x370] sm:$0xff]  ;;  %v11439_v20 = vld [vmem:[#allocation6 + $0x378] sm:$0xff] }
 0x55b   : > { %1072 = vrot.lane.b32.xlu0 %v983_v6, %s13504_s14  ;;  %13269 = vmatpush3.bf16.msra.mxu1 %v13268_v23  ;;  %v2623_v6 = vld [vmem:[#allocation2 + $0x1a1] sm:$0x7f]  ;;  %v11435_v23 = vld [vmem:[#allocation6 + $0x358] sm:$0xff] }
 0x55c   : > { %13271 = vmatprep.subr.bf16.mxu1 %v13270_v40  ;;  %13321 = vmatpush3.bf16.msra.mxu0 %v18180_v41  ;;  %v18196_v40 = vpack.c.bf16 %v11453_v55, %v11452_v29  ;;  %v10689_v29 = vld [vmem:[#allocation5 + $0xd0] sm:$0x1f] }
 0x55d   : > { %1983 = vrot.lane.b32.xlu1 %v1894_v16, %s13509_s21  ;;  %v2076_v16 = vld [vmem:[#allocation2 + $0x18a] sm:$0x7f] }
 0x55e   : > { %18950 = vst [vmem:[#allocation15_spill] sm:$0xff] %v18196_v40 }
 0x55f   : > { %1436 = vrot.lane.b32.xlu0 %v1347_v17, %s13505_s17  ;;  %v18189_v17 = vpack.c.bf16 %v11451_v33, %v11450_v43  ;;  %v10690_v33 = vld [vmem:[#allocation5 + $0xd8] sm:$0x1f] }
 0x561   : > { %2347 = vrot.lane.b32.xlu1 %v2258_v25, %s13511_s23  ;;  %v18191_v25 = vpack.c.bf16 %v11435_v23, %v11434_v0  ;;  %13323 = vmatprep.subr.bf16.mxu0 %v18189_v17  ;;  %v10688_v23 = vld [vmem:[#allocation5 + $0xc8] sm:$0x1f] }
 0x563   : > { %1801 = vrot.lane.b32.xlu0 %v1712_v21, %s13508_s20  ;;  %13325 = vmatpush3.bf16.msra.mxu0 %v18191_v25  ;;  %v11436_v21 = vld [vmem:[#allocation6 + $0x360] sm:$0xff] }
 0x564   : > { %13327 = vmatprep.subr.bf16.mxu0 %v18196_v40 }
 0x565   : > { %2712 = vrot.lane.b32.xlu1 %v2623_v6, %s13513_s25  ;;  %v11437_v6 = vld [vmem:[#allocation6 + $0x368] sm:$0xff] }
 0x566   : > { %v18198_v54 = vpack.c.bf16 %v11437_v6, %v11436_v21  ;;  %v11097_v21 = vcombine.high %v10689_v29, %v10690_v33  ;;  %v10687_v6 = vld [vmem:[#allocation5 + $0xc0] sm:$0x1f] }
 0x567   : > { %10566 = vrot.lane.b32.xlu0 %v10554_v48, %s13519_s10  ;;  %v11455_v48 = vld [vmem:[#allocation6 + $0x3f8] sm:$0xff] }
 0x568   : > { %18951 = vst [vmem:[#allocation13_spill] sm:$0xff] %v18198_v54  ;;  %13329 = vmatpush3.bf16.msra.mxu0 %v18198_v54 }
 0x569   : > { %3076 = vrot.lane.b32.xlu1 %v2987_v47, %s13516_s9  ;;  %v18202_v47 = vpack.c.bf16 %v11455_v48, %v11454_v28  ;;  %v11095_v48 = vcombine.high %v10687_v6, %v10688_v23 }
 0x56b   : > { %10647 = vrot.lane.b32.xlu0 %v10635_v52, %s13519_s10  ;;  %v10529_v57 = vpop.permute.xlu1 %10528  ;;  %18952 = vst [vmem:[#allocation16_spill] sm:$0xff] %v18202_v47  ;;  %13331 = vmatprep.subr.bf16.mxu0 %v18202_v47  ;;  %v18205_v52 = vpack.c.bf16 %v11439_v20, %v11438_v53 }
 0x56c   : > { %v10569_v61 = vpop.permute.xlu0 %10568  ;;  %10540 = vst.msk [vmem:[#allocation5 + $0xe0] sm:$0x1f] %vm10375_vm3, %v10529_v57 }
 0x56d   : > { %10580 = vst.msk [vmem:[#allocation5 + $0xe8] sm:$0x1f] %vm10375_vm3, %v10569_v61  ;;  %18953 = vst [vmem:[#allocation9_spill] sm:$0xff] %v18205_v52  ;;  %13333 = vmatpush3.bf16.msra.mxu0 %v18205_v52 }
 0x56f   : > { %2165 = vrot.lane.b32.xlu0 %v2076_v16, %s13510_s22 }
 0x573   : > { %2530 = vrot.lane.b32.xlu0 %v2441_v35, %s13512_s24  ;;  %v10691_v56 = vld [vmem:[#allocation5 + $0xe0] sm:$0x1f] }
 0x574   : > { %v13432_v53 = vld [vmem:[#allocation5 + $0xe0] ss:$8 sps:$4 sm:$0xff]  }
 0x575   : > { %v10692_v52 = vld [vmem:[#allocation5 + $0xe8] sm:$0x1f] }
 0x577   : > { %2894 = vrot.lane.b32.xlu0 %v2805_v63, %s13514_s26 }
 0x59e   : > { %v10610_v57 = vpop.permute.xlu1 %10609 }
 0x59f   : > { %10621 = vst.msk [vmem:[#allocation5 + $0xf0] sm:$0x1f] %vm10375_vm3, %v10610_v57 }
 0x5a3   : > { %v10369_v61 = vpop.permute.xlu1 %10368 }
 0x5a4   : > { %10380 = vst.msk [vmem:[#allocation5 + $0x100] sm:$0x1f] %vm10375_vm3, %v10369_v61  ;;  %v11129_v61 = vrot.slane %v11097_v21, %v14210_v32  ;;  %v18228_v21 = vrot.slane %v11159_v18, %v14210_v32 }
 0x5a7   : > { %v10450_v16 = vpop.permute.xlu1 %10449 }
 0x5a8   : > { %10460 = vst.msk [vmem:[#allocation5 + $0x110] sm:$0x1f] %vm10375_vm3, %v10450_v16 }
 0x5ab   : > { %v10531_v35 = vpop.permute.xlu1 %10530 }
 0x5ac   : > { %10541 = vst.msk [vmem:[#allocation5 + $0x120] sm:$0x1f] %vm10375_vm3, %v10531_v35  ;;  %v11115_v35 = vrot.slane %v11095_v48, %v14210_v32 }
 0x5af   : > { %v10612_v63 = vpop.permute.xlu1 %10611 }
 0x5b0   : > { %10622 = vst.msk [vmem:[#allocation5 + $0x130] sm:$0x1f] %vm10375_vm3, %v10612_v63  ;;  %v11136_v63 = vrot.slane %v13432_v53, %v14210_v32  ;;  %v10697_v53 = vld [vmem:[#allocation5 + $0x110] sm:$0x1f] }
 0x5b1   : > { %v10650_v43 = vpop.permute.xlu0 %10649 }
 0x5b2   : > { %10661 = vst.msk [vmem:[#allocation5 + $0xf8] sm:$0x1f] %vm10375_vm3, %v10650_v43 }
 0x5b3   : > { %v10523_v0 = vpop.permute.xlu1 %10522 }
 0x5b4   : > { %10537 = vst.msk [vmem:[#allocation5 + $0x20] sm:$0x1f] %vm10375_vm3, %v10523_v0  ;;  %v11160_v0 = vcombine.low %v11115_v35, %v11129_v61 }
 0x5b5   : > { %v10410_v55 = vpop.permute.xlu0 %10409 }
 0x5b6   : > { %10420 = vst.msk [vmem:[#allocation5 + $0x108] sm:$0x1f] %vm10375_vm3, %v10410_v55 }
 0x5b7   : > { %v10604_v28 = vpop.permute.xlu1 %10603 }
 0x5b8   : > { %10618 = vst.msk [vmem:[#allocation5 + $0x30] sm:$0x1f] %vm10375_vm3, %v10604_v28 }
 0x5b9   : > { %v10490_v20 = vpop.permute.xlu0 %10489  ;;  %v13434_v57 = vld [vmem:[#allocation5 + $0xf0] ss:$8 sps:$4 sm:$0xff]  }
 0x5ba   : > { %10500 = vst.msk [vmem:[#allocation5 + $0x118] sm:$0x1f] %vm10375_vm3, %v10490_v20  ;;  %v11150_v43 = vrot.slane %v13434_v57, %v14210_v32 }
 0x5bb   : > { %v891_v16 = vpop.permute.xlu1 %890 }
 0x5bc   : > { %953 = vst.msk [vmem:[#allocation3 + $0xe8] sm:$0x7f] %vm18954_vm7, %v891_v16  ;;  %v11161_v23 = vcombine.low %v11136_v63, %v11150_v43  ;;  %v11162_v29 = vcombine.high %v11136_v63, %v11150_v43  ;;  %v18237_v16 = vrot.slane %v11160_v0, %v14210_v32  ;;  %v10695_v43 = vld [vmem:[#allocation5 + $0x100] sm:$0x1f] }
 0x5bd   : > { %v10571_v33 = vpop.permute.xlu0 %10570  ;;  %v13436_v48 = vld [vmem:[#allocation5 + $0x100] ss:$8 sps:$4 sm:$0xff]  }
 0x5be   : > { %10581 = vst.msk [vmem:[#allocation5 + $0x128] sm:$0x1f] %vm10375_vm3, %v10571_v33  ;;  %v18231_v6 = vrot.slane %v11161_v23, %v14210_v32  ;;  %v18234_v28 = vrot.slane %v11162_v29, %v14210_v32  ;;  %v10696_v57 = vld [vmem:[#allocation5 + $0x108] sm:$0x1f]  ;;  %v11225_v33 = vrot.slane %v13436_v48, %v14210_v32 }
 0x5bf   : > { %v1255_v55 = vpop.permute.xlu1 %1254  ;;  %v11212_v19 = vcombine.high %v10695_v43, %v10696_v57 }
 0x5c0   : > { %v11207_v35 = vcombine.high %v18089_v26, %v18231_v6  ;;  %v11210_v4 = vcombine.high %v18228_v21, %v18234_v28 }
 0x5c1   : > { %v10652_v20 = vpop.permute.xlu0 %10651  ;;  %v10698_v61 = vld [vmem:[#allocation5 + $0x118] sm:$0x1f]  ;;  %v11232_v57 = vrot.slane %v11212_v19, %v14210_v32 }
 0x5c2   : > { %v13438_v5 = vld [vmem:[#allocation5 + $0x110] ss:$8 sps:$4 sm:$0xff]   ;;  %10662 = vst.msk [vmem:[#allocation5 + $0x138] sm:$0x1f] %vm10375_vm3, %v10652_v20  ;;  %v11214_v18 = vcombine.high %v10697_v53, %v10698_v61  ;;  %v12863_v29 = vcombine.low %v18228_v21, %v11207_v35  ;;  %v12865_v0 = vcombine.low %v11210_v4, %v18237_v16 }
 0x5c3   : > { %v1619_v63 = vpop.permute.xlu1 %1618  ;;  %v11239_v23 = vrot.slane %v13438_v5, %v14210_v32 }
 0x5c4   : > { %v11742_v31 = vrot.slane %v12863_v29, %v14210_v32  ;;  %v11756_v53 = vrot.slane %v12865_v0, %v14210_v32  ;;  %v11246_v20 = vrot.slane %v11214_v18, %v14210_v32 }
 0x5c5   : > { %v10563_v11 = vpop.permute.xlu0 %10562  ;;  %v11275_v26 = vcombine.low %v11225_v33, %v11239_v23  ;;  %v11276_v2 = vcombine.high %v11225_v33, %v11239_v23  ;;  %v13440_v35 = vld [vmem:[#allocation5 + $0x124] ss:$8 sps:$4 sm:$0x11]  }
 0x5c6   : > { %10577 = vst.msk [vmem:[#allocation5 + $0x28] sm:$0x1f] %vm10375_vm3, %v10563_v11  ;;  %v11793_v23 = vcombine.high %v11742_v31, %v11756_v53  ;;  %v11792_v29 = vcombine.low %v11742_v31, %v11756_v53  ;;  %v11277_v0 = vcombine.low %v11232_v57, %v11246_v20  ;;  %v10700_v47 = vld [vmem:[#allocation5 + $0x128] sm:$0x1f] }
 0x5c7   : > { %v10527_v61 = vpop.permute.xlu1 %10526  ;;  %v11287_v48 = vrot.slane %v11275_v26, %v14210_v32  ;;  %v11301_v5 = vrot.slane %v11276_v2, %v14210_v32  ;;  %v11260_v2 = vrot.slane %v13440_v35, %v14210_v32 }
 0x5c8   : > { %10539 = vst.msk [vmem:[#allocation5 + $0xa0] sm:$0x1f] %vm10375_vm3, %v10527_v61  ;;  %v18264_v31 = vrot.slane %v11793_v23, %v14210_v32  ;;  %v11294_v53 = vrot.slane %v11277_v0, %v14210_v32  ;;  %v18272_v35 = vrot.slane %v11792_v29, %v14210_v32 }
 0x5c9   : > { %v10644_v4 = vpop.permute.xlu0 %10643  ;;  %v12867_v43 = vcombine.low %v11287_v48, %v11301_v5  ;;  %v12869_v33 = vcombine.high %v11287_v48, %v11301_v5  ;;  %v13442_v11 = vld [vmem:[#allocation5 + $0x134] ss:$8 sps:$4 sm:$0x11]  }
 0x5ca   : > { %10658 = vst.msk [vmem:[#allocation5 + $0x38] sm:$0x1f] %vm10375_vm3, %v10644_v4  ;;  %v11274_v61 = vrot.slane %v13442_v11, %v14210_v32 }
 0x5cb   : > { %v10608_v18 = vpop.permute.xlu1 %10607  ;;  %v11770_v59 = vrot.slane %v12867_v43, %v14210_v32  ;;  %v11784_v26 = vrot.slane %v12869_v33, %v14210_v32 }
 0x5cc   : > { %10620 = vst.msk [vmem:[#allocation5 + $0xb0] sm:$0x1f] %vm10375_vm3, %v10608_v18  ;;  %v11280_v5 = vcombine.low %v11260_v2, %v11274_v61 }
 0x5cd   : > { %v1073_v19 = vpop.permute.xlu0 %1072  ;;  %v11797_v12 = vcombine.high %v11770_v59, %v11784_v26  ;;  %v11796_v48 = vcombine.low %v11770_v59, %v11784_v26  ;;  %v13444_v4 = vld [vmem:[#allocation5 + $0x20] ss:$8 sps:$4 sm:$0xff]   ;;  %v13446_v43 = vld [vmem:[#allocation5 + $0x24] ss:$8 sps:$4 sm:$0x11]  }
 0x5ce   : > { %1135 = vst.msk [vmem:[#allocation3 + $0xe8] sm:$0x7f] %vm18955_vm14, %v1073_v19  ;;  %v18278_v59 = vrot.slane %v11280_v5, %v14210_v32  ;;  %v10785_v18 = vrot.slane %v13444_v4, %v14210_v32  ;;  %v10792_v2 = vrot.slane %v13446_v43, %v14210_v32 }
 0x5cf   : > { %1317 = vst.msk [vmem:[#allocation3 + $0xe8] sm:$0x7f] %vm18956_vm12, %v1255_v55  ;;  %v18269_v20 = vrot.slane %v11797_v12, %v14210_v32  ;;  %v18275_v57 = vrot.slane %v11796_v48, %v14210_v32 }
 0x5d0   : > { %v11325_v12 = vcombine.low %v11294_v53, %v18278_v59 }
 0x5d1   : > { %v1437_v33 = vpop.permute.xlu0 %1436  ;;  %v11860_v11 = vcombine.low %v18264_v31, %v18269_v20  ;;  %v11856_v55 = vcombine.low %v18272_v35, %v18275_v57  ;;  %v13447_v23 = vld [vmem:[#allocation5 + $0x30] ss:$8 sps:$4 sm:$0xff]   ;;  %v13449_v29 = vld [vmem:[#allocation5 + $0x34] ss:$8 sps:$4 sm:$0x11]  }
 0x5d2   : > { %1499 = vst.msk [vmem:[#allocation3 + $0xe8] sm:$0x7f] %vm18957_vm5, %v1437_v33  ;;  %v11871_v0 = vrot.slane %v11325_v12, %v14210_v32  ;;  %v10799_v26 = vrot.slane %v13447_v23, %v14210_v32  ;;  %v10806_v61 = vrot.slane %v13449_v29, %v14210_v32  ;;  %v1984_v33 = vpop.permute.xlu1 %1983  ;;  %v11392_v12 = vld [vmem:[#allocation6 + $0x200] sm:$0xff]  ;;  %v11393_v23 = vld [vmem:[#allocation6 + $0x208] sm:$0xff] }
 0x5d3   : > { %1681 = vst.msk [vmem:[#allocation3 + $0xe8] sm:$0x7f] %vm18958_vm4, %v1619_v63  ;;  %12019 = vmatprep.mubr.f32.mxu1 %v11860_v11 }
 0x5d4   : > { %12020 = vmatmul.mubr.f32.gmra.mrb[4].mxu1 %v11856_v55  ;;  %v11879_v48 = vcombine.high %v11871_v0, %v11871_v0  ;;  %v10810_v5 = vcombine.low %v10785_v18, %v10799_v26  ;;  %v10811_v53 = vcombine.high %v10785_v18, %v10799_v26  ;;  %v10812_v63 = vcombine.low %v10792_v2, %v10806_v61  ;;  %v11410_v26 = vld [vmem:[#allocation6 + $0x290] sm:$0xff]  ;;  %v11411_v2 = vld [vmem:[#allocation6 + $0x298] sm:$0xff] }
 0x5d5   : > { %v1802_v19 = vpop.permute.xlu0 %1801  ;;  %v18300_v43 = vrot.slane %v11871_v0, %v14210_v32  ;;  %v10694_v0 = vld [vmem:[#allocation5 + $0xf8] sm:$0x1f] }
 0x5d6   : > { %1864 = vst.msk [vmem:[#allocation3 + $0xe8] sm:$0x7f] %vm18959_vm6, %v1802_v19  ;;  %v18294_v11 = vrot.slane %v11879_v48, %v14210_v32  ;;  %v10840_v4 = vrot.slane %v10810_v5, %v14210_v32  ;;  %v10854_v55 = vrot.slane %v10811_v53, %v14210_v32  ;;  %v10847_v29 = vrot.slane %v10812_v63, %v14210_v32  ;;  %v11394_v48 = vld [vmem:[#allocation6 + $0x210] sm:$0xff] }
 0x5d7   : > { %2046 = vst.msk [vmem:[#allocation3 + $0xe8] sm:$0x7f] %vm18960_vm13, %v1984_v33  ;;  %v10701_v53 = vld [vmem:[#allocation5 + $0x130] sm:$0x1f]  ;;  %v10702_v33 = vld [vmem:[#allocation5 + $0x138] sm:$0x1f]  ;;  %v13272_v63 = vpack.c.bf16 %v11393_v23, %v11392_v12  ;;  %v18963_v12 = vcombine.high %v18112_v1, %v18117_v24  ;;  %v13276_v23 = vpack.c.bf16 %v11395_v8, %v11394_v48  ;;  %v11857_v48 = vcombine.high %v18272_v35, %v18275_v57 }
 0x5d8   : > { %12024 = vmatprep.mubr.f32.mxu1 %v18294_v11  ;;  %v12848_v61 = vcombine.low %v10840_v4, %v10854_v55  ;;  %v12850_v19 = vcombine.high %v10840_v4, %v10854_v55  ;;  %v12852_v5 = vcombine.low %v10847_v29, %v17965_v36  ;;  %v12854_v4 = vcombine.high %v18961_v51, %v17965_v36  ;;  %v2348_v55 = vpop.permute.xlu1 %2347  ;;  %v10693_v29 = vld [vmem:[#allocation5 + $0xf0] sm:$0x1f] }
 0x5d9   : > { %v10567_v18 = vpop.permute.xlu0 %10566  ;;  %12025 = vmatmul.mubr.f32.gmra.mrb[6].mxu1 %v18300_v43  ;;  %v11101_v36 = vcombine.high %v10693_v29, %v10694_v0  ;;  %v11217_v51 = vcombine.low %v10701_v53, %v10702_v33  ;;  %v11414_v0 = vld [vmem:[#allocation6 + $0x2b0] sm:$0xff]  ;;  %v11415_v53 = vld [vmem:[#allocation6 + $0x2b8] sm:$0xff] }
 0x5da   : > { %10579 = vst.msk [vmem:[#allocation5 + $0xa8] sm:$0x1f] %vm10375_vm3, %v10567_v18  ;;  %12094 = vmatprep.mubr.f32.mxu1 %v11589_v50  ;;  %v13274_v18 = vpack.c.bf16 %v11411_v2, %v11410_v26  ;;  %v18315_v40 = vrot.slane %v12848_v61, %v14210_v32  ;;  %v18318_v60 = vrot.slane %v12850_v19, %v14210_v32  ;;  %v10699_v50 = vld [vmem:[#allocation5 + $0x120] sm:$0x1f]  ;;  %v11397_v61 = vld [vmem:[#allocation6 + $0x228] sm:$0xff] }
 0x5db   : > { %v18321_v9 = vrot.slane %v12852_v5, %v14210_v32  ;;  %v18331_v26 = vrot.slane %v12854_v4, %v14210_v32  ;;  %v13278_v2 = vpack.c.bf16 %v11413_v39, %v11412_v3  ;;  %v11099_v19 = vcombine.high %v10691_v56, %v10692_v52 }
 0x5dc   : > { %v11215_v13 = vcombine.low %v10699_v50, %v10700_v47  ;;  %v11861_v5 = vcombine.high %v18264_v31, %v18269_v20  ;;  %v11523_v1 = vcombine.high %v18315_v40, %v18318_v60  ;;  %v18965_v3 = vcombine.high %v18120_v62, %v18123_v15  ;;  %v2713_v39 = vpop.permute.xlu1 %2712  ;;  %v11398_v31 = vld [vmem:[#allocation6 + $0x230] sm:$0xff]  ;;  %v11416_v62 = vld [vmem:[#allocation6 + $0x2c0] sm:$0xff] }
 0x5dd   : > { %v10648_v54 = vpop.permute.xlu0 %10647  ;;  %12095 = vmatmul.mubr.f32.vlgmr.msra.gmra.mrb[8].mxu1 %v18962_v49  ;;  %v11527_v8 = vcombine.high %v18321_v9, %v18331_v26  ;;  %v11157_v24 = vrot.slane %v11101_v36, %v14210_v32  ;;  %v11267_v47 = vrot.slane %v11217_v51, %v14210_v32  ;;  %v13282_v33 = vpack.c.bf16 %v11415_v53, %v11414_v0  ;;  %v11417_v51 = vld [vmem:[#allocation6 + $0x2c8] sm:$0xff] }
 0x5de   : > { %10660 = vst.msk [vmem:[#allocation5 + $0xb8] sm:$0x1f] %vm10375_vm3, %v10648_v54  ;;  %13273 = vmatpush3.bf16.msra.mxu1 %v13272_v63  ;;  %12099 = vmatprep.mubr.f32.mxu1 %v18963_v12  ;;  %v11396_v54 = vld [vmem:[#allocation6 + $0x220] sm:$0xff]  ;;  %vm18964_vm3 = vcmask 358720   ;;  %v11399_v63 = vld [vmem:[#allocation6 + $0x238] sm:$0xff]  ;;  %v11143_v4 = vrot.slane %v11099_v19, %v14210_v32  ;;  %v18353_v49 = vrot.slane %v11523_v1, %v14210_v32 }
 0x5df   : > { %13275 = vmatprep.subr.bf16.mxu1 %v13274_v18  ;;  %v13280_v52 = vpack.c.bf16 %v11397_v61, %v11396_v54  ;;  %v11253_v18 = vrot.slane %v11215_v13, %v14210_v32  ;;  %v18356_v36 = vrot.slane %v11527_v8, %v14210_v32  ;;  %v11909_v61 = vcombine.high %v18300_v43, %v18300_v43  ;;  %v11400_v13 = vld [vmem:[#allocation6 + $0x240] sm:$0xff]  ;;  %v11418_v8 = vld [vmem:[#allocation6 + $0x2d0] sm:$0xff] }
 0x5e0   : > { %v11163_v56 = vcombine.low %v11143_v4, %v11157_v24  ;;  %v3077_v54 = vpop.permute.xlu1 %3076  ;;  %v13286_v19 = vpack.c.bf16 %v11417_v51, %v11416_v62  ;;  %v11402_v62 = vld [vmem:[#allocation6 + $0x250] sm:$0xff] }
 0x5e1   : > { %v2166_v46 = vpop.permute.xlu0 %2165  ;;  %12100 = vmatmul.mubr.f32.gmra.mrb[10].mxu1 %v18965_v3  ;;  %v13450_v20 = vld [vmem:[#allocation5 + $0xa0] ss:$8 sps:$4 sm:$0xff]   ;;  %v13452_v15 = vld [vmem:[#allocation5 + $0xa4] ss:$8 sps:$4 sm:$0x11]   ;;  %v11278_v50 = vcombine.low %v11253_v18, %v11267_v47  ;;  %v11279_v12 = vcombine.high %v11253_v18, %v11267_v47  ;;  %v11590_v1 = vcombine.low %v18353_v49, %v18356_v36  ;;  %v11419_v3 = vld [vmem:[#allocation6 + $0x2d8] sm:$0xff] }
 0x5e2   : > { %2228 = vst.msk [vmem:[#allocation3 + $0xe8] sm:$0x7f] %vm18964_vm3, %v2166_v46  ;;  %13277 = vmatpush3.bf16.msra.mxu1 %v13276_v23  ;;  %12104 = vmatprep.mubr.f32.mxu1 %v11861_v5  ;;  %v11019_v23 = vrot.slane %v13450_v20, %v14210_v32  ;;  %v11401_v46 = vld [vmem:[#allocation6 + $0x248] sm:$0xff]  ;;  %v11026_v5 = vrot.slane %v13452_v15, %v14210_v32  ;;  %v11403_v15 = vld [vmem:[#allocation6 + $0x258] sm:$0xff]  ;;  %v11420_v18 = vld [vmem:[#allocation6 + $0x2e0] sm:$0xff] }
 0x5e3   : > { %2410 = vst.msk [vmem:[#allocation3 + $0xe8] sm:$0x7f] %vm18966_vm15, %v2348_v55  ;;  %13279 = vmatprep.subr.bf16.mxu1 %v13278_v2  ;;  %v11911_v55 = vcombine.high %v18294_v11, %v18294_v11  ;;  %v13284_v11 = vpack.c.bf16 %v11399_v63, %v11398_v31  ;;  %v11198_v43 = vrot.slane %v11163_v56, %v14210_v32 }
 0x5e4   : > { %v11322_v31 = vrot.slane %v11279_v12, %v14210_v32  ;;  %v13288_v20 = vpack.c.bf16 %v11401_v46, %v11400_v13  ;;  %v13290_v63 = vpack.c.bf16 %v11419_v3, %v11418_v8  ;;  %v11423_v13 = vld [vmem:[#allocation6 + $0x2f8] sm:$0xff]  ;;  %v11406_v46 = vld [vmem:[#allocation6 + $0x270] sm:$0xff] }
 0x5e5   : > { %v2531_v29 = vpop.permute.xlu0 %2530  ;;  %v13453_v35 = vld [vmem:[#allocation5 + $0xb0] ss:$8 sps:$4 sm:$0xff]   ;;  %12105 = vmatmul.mubr.f32.gmra.mrb[12].mxu1 %v11857_v48  ;;  %v13455_v57 = vld [vmem:[#allocation5 + $0xb4] ss:$8 sps:$4 sm:$0x11]   ;;  %v11208_v56 = vcombine.low %v18237_v16, %v11198_v43 }
 0x5e6   : > { %2593 = vst.msk [vmem:[#allocation3 + $0xe8] sm:$0x7f] %vm2564_vm2, %v2531_v29  ;;  %13281 = vmatpush3.bf16.msra.mxu1 %v13280_v52  ;;  %12109 = vmatprep.mubr.f32.mxu1 %v11911_v55  ;;  %v11033_v2 = vrot.slane %v13453_v35, %v14210_v32  ;;  %v11040_v0 = vrot.slane %v13455_v57, %v14210_v32  ;;  %vm18968_vm2 = vcmask 489920   ;;  %v11421_v29 = vld [vmem:[#allocation6 + $0x2e8] sm:$0xff] }
 0x5e7   : > { %2775 = vst.msk [vmem:[#allocation3 + $0xe8] sm:$0x7f] %vm18967_vm0, %v2713_v39  ;;  %13283 = vmatprep.subr.bf16.mxu1 %v13282_v33  ;;  %v11308_v52 = vrot.slane %v11278_v50, %v14210_v32  ;;  %v11209_v35 = vcombine.low %v18228_v21, %v18234_v28  ;;  %v11613_v21 = vrot.slane %v18144_v30, %v14210_v32 }
 0x5e8   : > { %v11044_v39 = vcombine.low %v11019_v23, %v11033_v2  ;;  %v11045_v24 = vcombine.high %v11019_v23, %v11033_v2  ;;  %v11046_v47 = vcombine.low %v11026_v5, %v11040_v0  ;;  %v13294_v23 = vpack.c.bf16 %v11421_v29, %v11420_v18  ;;  %v11404_v2 = vld [vmem:[#allocation6 + $0x260] sm:$0xff]  ;;  %v11407_v5 = vld [vmem:[#allocation6 + $0x278] sm:$0xff] }
 0x5e9   : > { %v2895_v53 = vpop.permute.xlu0 %2894  ;;  %12110 = vmatmul.mubr.f32.gmra.mrb[14].mxu1 %v11909_v61  ;;  %v12868_v50 = vcombine.low %v11308_v52, %v11322_v31  ;;  %v12870_v12 = vcombine.high %v11308_v52, %v11322_v31  ;;  %v11422_v61 = vld [vmem:[#allocation6 + $0x2f0] sm:$0xff]  ;;  %v11526_v52 = vcombine.low %v18321_v9, %v18331_v26  ;;  %v13300_v31 = vpack.c.bf16 %v11407_v5, %v11406_v46 }
 0x5ea   : > { %2957 = vst.msk [vmem:[#allocation3 + $0xe8] sm:$0x7f] %vm18968_vm2, %v2895_v53  ;;  %13285 = vmatpush3.bf16.msra.mxu1 %v13284_v11  ;;  %12179 = vmatprep.mubr.f32.mxu1 %v11590_v1  ;;  %v11074_v48 = vrot.slane %v11044_v39, %v14210_v32  ;;  %v11088_v33 = vrot.slane %v11045_v24, %v14210_v32 }
 0x5eb   : > { %3139 = vst.msk [vmem:[#allocation3 + $0xe8] sm:$0x7f] %vm18969_vm1, %v3077_v54  ;;  %13287 = vmatprep.subr.bf16.mxu1 %v13286_v19  ;;  %v11081_v4 = vrot.slane %v11046_v47, %v14210_v32  ;;  %v13292_v11 = vpack.c.bf16 %v11403_v15, %v11402_v62  ;;  %v11405_v54 = vld [vmem:[#allocation6 + $0x268] sm:$0xff]  ;;  %v12864_v53 = vcombine.high %v11209_v35, %v18231_v6 }
 0x5ec   : > { %v12858_v55 = vcombine.low %v11074_v48, %v11088_v33  ;;  %v12860_v51 = vcombine.high %v11074_v48, %v11088_v33  ;;  %v12866_v1 = vcombine.high %v18234_v28, %v11208_v56  ;;  %v11777_v8 = vrot.slane %v12868_v50, %v14210_v32 }
 0x5ed   : > { %v12862_v57 = vcombine.low %v11081_v4, %v18231_v6  ;;  %v11791_v3 = vrot.slane %v12870_v12, %v14210_v32  ;;  %v11522_v24 = vcombine.low %v18315_v40, %v18318_v60  ;;  %v13296_v47 = vpack.c.bf16 %v11405_v54, %v11404_v2 }
 0x5ee   : > { %13289 = vmatpush3.bf16.msra.mxu1 %v13288_v20  ;;  %v11627_v19 = vrot.slane %v12858_v55, %v14210_v32  ;;  %v11641_v0 = vrot.slane %v12860_v51, %v14210_v32  ;;  %v13298_v6 = vpack.c.bf16 %v11423_v13, %v11422_v61  ;;  %v11749_v40 = vrot.slane %v12864_v53, %v14210_v32 }
 0x5ef   : > { %13291 = vmatprep.subr.bf16.mxu1 %v13290_v63  ;;  %v11655_v16 = vrot.slane %v12862_v57, %v14210_v32  ;;  %v11763_v60 = vrot.slane %v12866_v1, %v14210_v32  ;;  %v11799_v62 = vcombine.high %v11777_v8, %v11791_v3  ;;  %v12871_v15 = vcombine.low %v18278_v59, %v18278_v59 }
 0x5f0   : > { %v11659_v28 = vcombine.high %v11613_v21, %v11627_v19  ;;  %v18401_v9 = vrot.slane %v11522_v24, %v14210_v32  ;;  %v18406_v29 = vrot.slane %v11526_v52, %v14210_v32  ;;  %v11658_v51 = vcombine.low %v11613_v21, %v11627_v19 }
 0x5f1   : > { %v11663_v20 = vcombine.high %v11641_v0, %v11655_v16  ;;  %v11662_v35 = vcombine.low %v11641_v0, %v11655_v16  ;;  %v11795_v12 = vcombine.high %v11749_v40, %v11763_v60  ;;  %v11878_v2 = vrot.slane %v12871_v15, %v14210_v32 }
 0x5f2   : > { %v3169_v39 = vld [vmem:[#allocation3 + $0xe8] sm:$0x7f]  ;;  %13293 = vmatpush3.bf16.msra.mxu1 %v13292_v11  ;;  %v18409_v55 = vrot.slane %v11659_v28, %v14210_v32  ;;  %v18970_v11 = vcombine.high %v17144_v58, %v17147_v45  ;;  %v11798_v13 = vcombine.low %v11777_v8, %v11791_v3  ;;  %v11586_v46 = vcombine.low %v18401_v9, %v18406_v29 }
 0x5f3   : > { %v4607_v43 = vcombine.high %v3169_v39, %v3169_v39  ;;  %v4614_v30 = vrot.slane %v3169_v39, %v14210_v32  ;;  %13295 = vmatprep.subr.bf16.mxu1 %v13294_v23  ;;  %v11719_v59 = vrot.slane %v11663_v20, %v14210_v32  ;;  %v11677_v5 = vrot.slane %v11658_v51, %v14210_v32 }
 0x5f4   : > { %v5996_v23 = vrot.slane %v18970_v11, %v14210_v32  ;;  %v11705_v21 = vrot.slane %v11662_v35, %v14210_v32  ;;  %v11855_v58 = vrot.slane %v11799_v62, %v14210_v32  ;;  %v11794_v1 = vcombine.low %v11749_v40, %v11763_v60  ;;  %v18972_v40 = vld [vmem:[#allocation13_spill] sm:$0xff] }
 0x5f5   : > { %v4621_v48 = vrot.slane %v4607_v43, %v14210_v32  ;;  %v4622_v33 = vcombine.high %v4614_v30, %v4614_v30  ;;  %v4630_v63 = vrot.slane %v4614_v30, %v14210_v32  ;;  %v11726_v45 = vcombine.low %v18409_v55, %v11719_v59  ;;  %v18974_v60 = vld [vmem:[#allocation9_spill] sm:$0xff] }
 0x5f6   : > { %13297 = vmatpush3.bf16.msra.mxu1 %v13296_v47  ;;  %v11827_v8 = vrot.slane %v11795_v12, %v14210_v32  ;;  %v11722_v3 = vcombine.low %v11677_v5, %v11705_v21  ;;  %v11841_v39 = vrot.slane %v11798_v13, %v14210_v32  ;;  %v11880_v24 = vcombine.high %v11878_v2, %v11878_v2 }
 0x5f7   : > { %v4623_v26 = vcombine.high %v4621_v48, %v4621_v48  ;;  %v4637_v4 = vrot.slane %v4621_v48, %v14210_v32  ;;  %v4644_v18 = vrot.slane %v4622_v33, %v14210_v32  ;;  %13299 = vmatprep.subr.bf16.mxu1 %v13298_v6  ;;  %v11813_v6 = vrot.slane %v11794_v1, %v14210_v32 }
 0x5f8   : > { %v11862_v47 = vcombine.low %v11827_v8, %v11855_v58  ;;  %v11908_v48 = vrot.slane %v11880_v24, %v14210_v32  ;;  %v11723_v62 = vcombine.high %v11677_v5, %v11705_v21 }
 0x5f9   : > { %v4651_v57 = vrot.slane %v4623_v26, %v14210_v32  ;;  %v5987_v56 = vcombine.low %v4630_v63, %v4644_v18  ;;  %v12789_v50 = vcombine.high %v4630_v63, %v4644_v18  ;;  %v4653_v53 = vcombine.high %v4637_v4, %v4637_v4 }
 0x5fa   : > { %13301 = vmatpush3.bf16.msra.mxu1 %v13300_v31  ;;  %v11727_v63 = vcombine.high %v18409_v55, %v11719_v59  ;;  %v11912_v15 = vcombine.high %v11908_v48, %v11908_v48 }
 0x5fb   : > { %v5989_v54 = vcombine.low %v4637_v4, %v4651_v57  ;;  %v6003_v61 = vrot.slane %v5987_v56, %v14210_v32  ;;  %v6010_v19 = vrot.slane %v12789_v50, %v14210_v32  ;;  %13334 = vmatprep.subr.bf16.mxu1 %v18078_v38  ;;  %v6041_v52 = vrot.slane %v4653_v53, %v14210_v32 }
 0x5fd   : > { %v6017_v0 = vrot.slane %v5989_v54, %v14210_v32  ;;  %v6018_v16 = vcombine.low %v5996_v23, %v6003_v61  ;;  %12180 = vmatmul.mubr.f32.vlgmr.msra.gmra.mrb[16].mxu1 %v11586_v46  ;;  %v6048_v33 = vrot.slane %v6041_v52, %v14210_v32 }
 0x5fe   : > { %12184 = vmatprep.mubr.f32.mxu1 %v11726_v45  ;;  %13342 = vmatpush3.bf16.msra.mxu1 %v18080_v22 }
 0x5ff   : > { %v6019_v38 = vcombine.low %v6010_v19, %v6017_v0  ;;  %13335 = vmatprep.subr.bf16.mxu1 %v18109_v7  ;;  %v6026_v43 = vrot.slane %v6018_v16, %v14210_v32  ;;  %v11858_v7 = vcombine.low %v11813_v6, %v11841_v39 }
 0x601   : > { %v6033_v30 = vrot.slane %v6019_v38, %v14210_v32  ;;  %12185 = vmatmul.mubr.f32.gmra.mrb[18].mxu1 %v11722_v3 }
 0x602   : > { %12189 = vmatprep.mubr.f32.mxu1 %v11862_v47  ;;  %13343 = vmatpush3.bf16.msra.mxu1 %v18114_v27  ;;  %v11894_v27 = vrot.slane %v11878_v2, %v14210_v32 }
 0x603   : > { %v12947_v22 = vpop.f32.mrb[0].mxu1  ;;  %v6034_v31 = vcombine.low %v6026_v43, %v6033_v30  ;;  %13336 = vmatprep.subr.bf16.mxu1 %v18149_v34  ;;  %v11591_v34 = vcombine.high %v18353_v49, %v18356_v36 }
 0x604   : > { %v12948_v28 = vpop.f32.mrb[1].mxu1 }
 0x605   : > { %v12949_v20 = vadd.f32 %v12948_v28, %v12947_v22  ;;  %13189 = vmatmul.mubr.msk.f32.gmra.mrb[54].mxu0 %vm6049_vm8, %v6034_v31  ;;  %12190 = vmatmul.mubr.f32.gmra.mrb[20].mxu1 %v11858_v7  ;;  %v18976_v22 = vld [vmem:[#allocation20_spill] sm:$0xff] }
 0x606   : > { %13191 = vmatprep.mubr.msk.f32.mxu0 %vm18619_vm10, %v18752_v14  ;;  %12194 = vmatprep.mubr.f32.mxu1 %v11908_v48  ;;  %v11587_v14 = vcombine.high %v18401_v9, %v18406_v29 }
 0x607   : > { %13344 = vmatpush3.bf16.msra.mxu1 %v18152_v37  ;;  %v18971_v37 = vld [vmem:[#allocation15_spill] sm:$0xff] }
 0x608   : > { %13337 = vmatprep.subr.bf16.mxu1 %v18163_v44 }
 0x609   : > { %13192 = vmatmul.mubr.msk.f32.gmra.mrb[56].mxu0 %vm6049_vm8, %v6048_v33  ;;  %12195 = vmatmul.mubr.f32.gmra.mrb[22].mxu1 %v11894_v27 }
 0x60a   : > { %12264 = vmatprep.mubr.f32.mxu0 %v11591_v34  ;;  %12269 = vmatprep.mubr.f32.mxu1 %v11727_v63 }
 0x60b   : > { %13345 = vmatpush3.bf16.msra.mxu1 %v18166_v10  ;;  %v18973_v10 = vld [vmem:[#allocation16_spill] sm:$0xff] }
 0x60c   : > { %13338 = vmatprep.subr.bf16.mxu1 %v18176_v42  ;;  %v11863_v42 = vcombine.high %v11827_v8, %v11855_v58 }
 0x60d   : > { %12265 = vmatmul.mubr.f32.vlgmr.msra.gmra.mrb[58].mxu0 %v11587_v14 }
 0x60f   : > { %13346 = vmatpush3.bf16.msra.mxu1 %v18180_v41  ;;  %v11859_v41 = vcombine.high %v11813_v6, %v11841_v39  ;;  %v18975_v6 = vld [vmem:[#allocation10_spill] sm:$0xff] }
 0x610   : > { %13339 = vmatprep.subr.bf16.mxu1 %v18189_v17  ;;  %v11910_v17 = vcombine.high %v11894_v27, %v11894_v27  ;;  %v12844_v31 = vcombine.high %v18976_v22, %v18975_v6 }
 0x613   : > { %13347 = vmatpush3.bf16.msra.mxu1 %v18191_v25 }
 0x614   : > { %13340 = vmatprep.subr.bf16.mxu1 %v18971_v37 }
 0x615   : > { %v12950_v44 = vpop.f32.mrb[2].mxu1 }
 0x616   : > { %v12951_v49 = vpop.f32.mrb[3].mxu1 }
 0x617   : > { %v12952_v36 = vadd.f32 %v12951_v49, %v12950_v44  ;;  %13348 = vmatpush3.bf16.msra.mxu1 %v18972_v40 }
 0x618   : > { %13341 = vmatprep.subr.bf16.mxu1 %v18973_v10 }
 0x61b   : > { %13349 = vmatpush3.bf16.msra.mxu1 %v18974_v60 }
 0x61e   : > { %12270 = vmatmul.mubr.f32.vlgmr.msra.gmra.mrb[24].mxu1 %v11723_v62  ;;  %v9311_v62 = vrot.slane %v12844_v31, %v14210_v32 }
 0x61f   : > { %12274 = vmatprep.mubr.f32.mxu1 %v11863_v42 }
 0x622   : > { %12275 = vmatmul.mubr.f32.gmra.mrb[26].mxu1 %v11859_v41 }
 0x623   : > { %12279 = vmatprep.mubr.f32.mxu1 %v11912_v15 }
 0x626   : > { %12280 = vmatmul.mubr.f32.gmra.mrb[28].mxu1 %v11910_v17 }
 0x6a7   : > { %v12953_v25 = vpop.f32.mrb[4].mxu1 }
 0x6a8   : > { %v12954_v9 = vpop.f32.mrb[5].mxu1 }
 0x6a9   : > { %v12955_v26 = vadd.f32 %v12954_v9, %v12953_v25 }
 0x6ac   : > { %v12956_v4 = vpop.f32.mrb[6].mxu1 }
 0x6ad   : > { %v12957_v18 = vpop.f32.mrb[7].mxu1 }
 0x6ae   : > { %v12958_v29 = vadd.f32 %v12957_v18, %v12956_v4 }
 0x6b0   : > { %v12991_v55 = vpop.f32.mrb[8].mxu1 }
 0x6b1   : > { %v12992_v51 = vpop.f32.mrb[9].mxu1 }
 0x6b2   : > { %v12993_v35 = vadd.f32 %v12992_v51, %v12991_v55 }
 0x6b4   : > { %v12097_v59 = vadd.f32 %v12993_v35, %v12949_v20  ;;  %v12994_v57 = vpop.f32.mrb[10].mxu1  ;;  %v18977_v35 = vld [vmem:[#allocation11_spill] sm:$0xff] }
 0x6b5   : > { %v12995_v56 = vpop.f32.mrb[11].mxu1 }
 0x6b6   : > { %v12996_v50 = vadd.f32 %v12995_v56, %v12994_v57 }
 0x6b8   : > { %v12102_v12 = vadd.f32 %v12996_v50, %v12952_v36  ;;  %v12997_v11 = vpop.f32.mrb[12].mxu1 }
 0x6b9   : > { %v12998_v23 = vpop.f32.mrb[13].mxu1 }
 0x6ba   : > { %v12999_v2 = vadd.f32 %v12998_v23, %v12997_v11 }
 0x6bc   : > { %v12107_v54 = vadd.f32 %v12999_v2, %v12955_v26  ;;  %v13000_v61 = vpop.f32.mrb[14].mxu1 }
 0x6bd   : > { %v13001_v19 = vpop.f32.mrb[15].mxu1 }
 0x6be   : > { %v13002_v13 = vadd.f32 %v13001_v19, %v13000_v61 }
 0x6c0   : > { %v12112_v46 = vadd.f32 %v13002_v13, %v12958_v29 }
 0x6d0   : > { %v13035_v5 = vpop.f32.mrb[16].mxu1 }
 0x6d1   : > { %v13036_v21 = vpop.f32.mrb[17].mxu1 }
 0x6d2   : > { %v13037_v58 = vadd.f32 %v13036_v21, %v13035_v5 }
 0x6d4   : > { %v12182_v45 = vadd.f32 %v13037_v58, %v12097_v59  ;;  %v13038_v0 = vpop.f32.mrb[18].mxu1  ;;  %v18978_v59 = vld [vmem:[#allocation14_spill] sm:$0xff] }
 0x6d5   : > { %v13039_v16 = vpop.f32.mrb[19].mxu1  ;;  %v18979_v57 = vcombine.low %v18977_v35, %v18978_v59 }
 0x6d6   : > { %v13040_v53 = vadd.f32 %v13039_v16, %v13038_v0 }
 0x6d7   : > { %v9327_v56 = vrot.slane %v18979_v57, %v14210_v32 }
 0x6d8   : > { %v6309_v1 = vpop.f32.mrb[54].mxu0  ;;  %v18461_v8 = vadd.f32 %v13040_v53, %v12102_v12  ;;  %v13041_v24 = vpop.f32.mrb[20].mxu1 }
 0x6d9   : > { %v7634_v38 = vrot.slane %v6309_v1, %v14210_v32  ;;  %v7894_v3 = vcombine.high %v6309_v1, %v6309_v1  ;;  %v13190_v39 = vpop.f32.mrb[55].mxu0  ;;  %v13042_v47 = vpop.f32.mrb[21].mxu1 }
 0x6da   : > { %v13043_v52 = vadd.f32 %v13042_v47, %v13041_v24 }
 0x6db   : > { %v7901_v43 = vrot.slane %v7894_v3, %v14210_v32  ;;  %v7902_v30 = vcombine.high %v7634_v38, %v7634_v38  ;;  %v7641_v7 = vrot.slane %v7634_v38, %v14210_v32 }
 0x6dc   : > { %v6314_v28 = vpop.f32.mrb[56].mxu0  ;;  %v18469_v33 = vadd.f32 %v13043_v52, %v12107_v54  ;;  %v13044_v27 = vpop.f32.mrb[22].mxu1 }
 0x6dd   : > { %v7903_v20 = vcombine.high %v7901_v43, %v7901_v43  ;;  %v7917_v48 = vrot.slane %v7902_v30, %v14210_v32  ;;  %v13193_v34 = vpop.f32.mrb[57].mxu0  ;;  %v7910_v63 = vrot.slane %v7901_v43, %v14210_v32  ;;  %v7648_v14 = vrot.slane %v6314_v28, %v14210_v32  ;;  %v13045_v37 = vpop.f32.mrb[23].mxu1 }
 0x6de   : > { %v13046_v40 = vadd.f32 %v13045_v37, %v13044_v27 }
 0x6df   : > { %v7924_v44 = vrot.slane %v7903_v20, %v14210_v32  ;;  %v9290_v49 = vcombine.low %v7641_v7, %v7917_v48  ;;  %v12845_v36 = vcombine.high %v7641_v7, %v7917_v48  ;;  %v7655_v10 = vrot.slane %v7648_v14, %v14210_v32 }
 0x6e0   : > { %v13079_v60 = vpop.f32.mrb[58].mxu0  ;;  %v18478_v9 = vadd.f32 %v13046_v40, %v12112_v46 }
 0x6e1   : > { %v9318_v42 = vrot.slane %v9290_v49, %v14210_v32  ;;  %v9337_v41 = vcombine.low %v7910_v63, %v7924_v44  ;;  %v12846_v15 = vcombine.high %v7910_v63, %v7924_v44  ;;  %v13080_v17 = vpop.f32.mrb[59].mxu0  ;;  %v9366_v25 = vrot.slane %v7655_v10, %v14210_v32 }
 0x6e2   : > { %v13081_v26 = vadd.f32 %v13080_v17, %v13079_v60  ;;  %v9345_v18 = vrot.slane %v12845_v36, %v14210_v32 }
 0x6e3   : > { %v9320_v4 = vcombine.low %v9311_v62, %v9318_v42  ;;  %v9352_v29 = vrot.slane %v9337_v41, %v14210_v32  ;;  %v9359_v55 = vrot.slane %v12846_v15, %v14210_v32 }
 0x6e4   : > { %v12267_v51 = vadd.f32 %v13081_v26, %v12182_v45 }
 0x6e5   : > { %v9334_v50 = vrot.slane %v9320_v4, %v14210_v32  ;;  %v9367_v12 = vcombine.low %v9345_v18, %v9352_v29  ;;  %v9368_v11 = vcombine.low %v9359_v55, %v9366_v25 }
 0x6e6   : > { %v12289_v23 = vcombine.high %v12267_v51, %v12267_v51  ;;  %v12296_v2 = vrot.slane %v12267_v51, %v14210_v32 }
 0x6e7   : > { %v9335_v54 = vcombine.low %v9327_v56, %v9334_v50  ;;  %v9375_v61 = vrot.slane %v9367_v12, %v14210_v32  ;;  %v9382_v19 = vrot.slane %v9368_v11, %v14210_v32 }
 0x6e8   : > { %v12303_v13 = vrot.slane %v12289_v23, %v14210_v32  ;;  %v12304_v46 = vcombine.high %v12296_v2, %v12296_v2  ;;  %v12312_v21 = vrot.slane %v12296_v2, %v14210_v32 }
 0x6e9   : > { %9443 = vst.msk [vmem:[%s14771_s12 + $0xe0] sm:$0xff] %vm6049_vm8, %v9335_v54  ;;  %v9383_v5 = vcombine.low %v9375_v61, %v9382_v19 }
 0x6ea   : > { %v12319_v58 = vrot.slane %v12303_v13, %v14210_v32  ;;  %v12326_v45 = vrot.slane %v12304_v46, %v14210_v32  ;;  %v12305_v3 = vcombine.high %v12303_v13, %v12303_v13 }
 0x6eb   : > { %9444 = vst.msk [vmem:[%s14771_s12 + $0xe8] sm:$0x7f] %vm9415_vm11, %v9383_v5 }
 0x6ec   : > { %v12450_v0 = vcombine.low %v12312_v21, %v12326_v45  ;;  %v12872_v16 = vcombine.high %v12312_v21, %v12326_v45  ;;  %v12472_v38 = vrot.slane %v12319_v58, %v14210_v32  ;;  %v12333_v6 = vrot.slane %v12305_v3, %v14210_v32 }
 0x6ed   : > { %v12335_v22 = vcombine.high %v12319_v58, %v12319_v58 }
 0x6ee   : > { %v12458_v53 = vrot.slane %v12450_v0, %v14210_v32  ;;  %v12465_v1 = vrot.slane %v12872_v16, %v14210_v32  ;;  %v12487_v43 = vrot.slane %v12472_v38, %v14210_v32  ;;  %v12337_v14 = vcombine.high %v12333_v6, %v12333_v6 }
 0x6ef   : > { %v12489_v63 = vcombine.low %v12333_v6, %v12335_v22 }
 0x6f0   : > { %v12473_v39 = vcombine.low %v12458_v53, %v12465_v1 }
 0x6f1   : > { %v13082_v24 = vpop.f32.mrb[24].mxu1  ;;  %v12497_v41 = vrot.slane %v12489_v63, %v14210_v32 }
 0x6f2   : > { %v12480_v47 = vrot.slane %v12473_v39, %v14210_v32  ;;  %v13083_v30 = vpop.f32.mrb[25].mxu1 }
 0x6f3   : > { %v13084_v52 = vadd.f32 %v13083_v30, %v13082_v24 }
 0x6f4   : > { %v12488_v31 = vcombine.low %v12480_v47, %v12487_v43 }
 0x6f5   : > { %v12272_v28 = vadd.f32 %v13084_v52, %v18461_v8  ;;  %v13085_v7 = vpop.f32.mrb[26].mxu1 }
 0x6f6   : > { %12650 = vst [vmem:[%s18508_s18] sm:$0x1f] %v12488_v31  ;;  %v13086_v20 = vpop.f32.mrb[27].mxu1 }
 0x6f7   : > { %v12338_v48 = vcombine.high %v12272_v28, %v12272_v28  ;;  %v12345_v27 = vrot.slane %v12272_v28, %v14210_v32  ;;  %v13087_v34 = vadd.f32 %v13086_v20, %v13085_v7 }
 0x6f9   : > { %v12352_v37 = vrot.slane %v12338_v48, %v14210_v32  ;;  %v12353_v44 = vcombine.high %v12345_v27, %v12345_v27  ;;  %v12361_v49 = vrot.slane %v12345_v27, %v14210_v32  ;;  %v12277_v36 = vadd.f32 %v13087_v34, %v18469_v33  ;;  %v13088_v40 = vpop.f32.mrb[28].mxu1 }
 0x6fa   : > { %v13089_v10 = vpop.f32.mrb[29].mxu1 }
 0x6fb   : > { %v12354_v60 = vcombine.high %v12352_v37, %v12352_v37  ;;  %v12368_v8 = vrot.slane %v12352_v37, %v14210_v32  ;;  %v12375_v62 = vrot.slane %v12353_v44, %v14210_v32  ;;  %v12490_v42 = vcombine.low %v12337_v14, %v12361_v49 }
 0x6fc   : > { %v12387_v15 = vcombine.high %v12277_v36, %v12277_v36  ;;  %v12394_v17 = vrot.slane %v12277_v36, %v14210_v32  ;;  %v13090_v25 = vadd.f32 %v13089_v10, %v13088_v40 }
 0x6fd   : > { %v12382_v26 = vrot.slane %v12354_v60, %v14210_v32  ;;  %v12384_v4 = vcombine.high %v12368_v8, %v12368_v8  ;;  %v12504_v18 = vrot.slane %v12490_v42, %v14210_v32  ;;  %v12511_v33 = vrot.slane %v12375_v62, %v14210_v32 }
 0x6fe   : > { %v12873_v29 = vcombine.high %v12361_v49, %v12375_v62  ;;  %v12401_v55 = vrot.slane %v12387_v15, %v14210_v32  ;;  %v12402_v51 = vcombine.high %v12394_v17, %v12394_v17  ;;  %v12410_v35 = vrot.slane %v12394_v17, %v14210_v32 }
 0x6ff   : > { %v12512_v59 = vcombine.low %v12497_v41, %v12504_v18  ;;  %v12526_v57 = vrot.slane %v12511_v33, %v14210_v32  ;;  %v12529_v56 = vcombine.low %v12368_v8, %v12382_v26  ;;  %v12550_v12 = vrot.slane %v12384_v4, %v14210_v32 }
 0x700   : > { %v12536_v50 = vrot.slane %v12873_v29, %v14210_v32  ;;  %v12386_v11 = vcombine.high %v12382_v26, %v12382_v26  ;;  %v12403_v23 = vcombine.high %v12401_v55, %v12401_v55  ;;  %v12417_v61 = vrot.slane %v12401_v55, %v14210_v32 }
 0x701   : > { %v12519_v2 = vrot.slane %v12512_v59, %v14210_v32  ;;  %v12543_v54 = vrot.slane %v12529_v56, %v14210_v32  ;;  %v12424_v19 = vrot.slane %v12402_v51, %v14210_v32  ;;  %v12432_v46 = vcombine.high %v12410_v35, %v12410_v35 }
 0x702   : > { %v12431_v13 = vrot.slane %v12403_v23, %v14210_v32  ;;  %v12567_v5 = vcombine.low %v12386_v11, %v12410_v35  ;;  %v12282_v21 = vadd.f32 %v13090_v25, %v18478_v9  ;;  %v12565_v39 = vrot.slane %v12550_v12, %v14210_v32 }
 0x703   : > { %v12527_v58 = vcombine.low %v12519_v2, %v12526_v57  ;;  %v12551_v45 = vcombine.low %v12536_v50, %v12543_v54  ;;  %v12434_v0 = vcombine.high %v12424_v19, %v12424_v19  ;;  %v12568_v16 = vcombine.low %v12424_v19, %v12432_v46 }
 0x704   : > { %v12575_v53 = vrot.slane %v12567_v5, %v14210_v32  ;;  %v12606_v1 = vcombine.low %v12417_v61, %v12431_v13  ;;  %v12874_v38 = vcombine.high %v12417_v61, %v12431_v13  ;;  %v12442_v24 = vrot.slane %v12282_v21, %v14210_v32 }
 0x705   : > { %v12558_v3 = vrot.slane %v12551_v45, %v14210_v32  ;;  %12651 = vst [vmem:[%s18508_s18 + $0x8] sm:$0x1f] %v12527_v58  ;;  %v12582_v47 = vrot.slane %v12568_v16, %v14210_v32  ;;  %v12589_v9 = vrot.slane %v12434_v0, %v14210_v32 }
 0x706   : > { %v12614_v43 = vrot.slane %v12606_v1, %v14210_v32  ;;  %v12621_v30 = vrot.slane %v12874_v38, %v14210_v32  ;;  %v12449_v6 = vrot.slane %v12442_v24, %v14210_v32 }
 0x707   : > { %v12566_v52 = vcombine.low %v12558_v3, %v12565_v39  ;;  %v12590_v22 = vcombine.low %v12575_v53, %v12582_v47  ;;  %v12604_v20 = vrot.slane %v12589_v9, %v14210_v32 }
 0x708   : > { %v12629_v31 = vcombine.low %v12614_v43, %v12621_v30  ;;  %v12628_v28 = vrot.slane %v12449_v6, %v14210_v32 }
 0x709   : > { %12652 = vst [vmem:[%s18508_s18 + $0x10] sm:$0x1f] %v12566_v52  ;;  %v12597_v7 = vrot.slane %v12590_v22, %v14210_v32 }
 0x70a   : > { %v12636_v48 = vrot.slane %v12629_v31, %v14210_v32  ;;  %v12643_v27 = vrot.slane %v12628_v28, %v14210_v32 }
 0x70b   : > { %v12605_v34 = vcombine.low %v12597_v7, %v12604_v20 }
 0x70c   : > { %v12644_v63 = vcombine.low %v12636_v48, %v12643_v27 }
 0x70d   : > { %12653 = vst [vmem:[%s18508_s18 + $0x18] sm:$0x1f] %v12605_v34 }
 0x70e   : > { %12654 = vst [vmem:[%s18508_s18 + $0x20] sm:$0x1f] %v12644_v63 }
 0x70f PF: > { %s16_s15 = sadd.s32 1, %s13495_s15  }
 0x710   : > { %p13_p3 = scmp.ge.s32.totalorder %s16_s15, 4  }
 0x712   :  { %15 = sbr.rel (!%p13_p3) target bundleno = 1 (0x1), region = 85 }
 0x719   :  { %12692 = vsyncpa [#allocation7], 1 }
 0x71a   :  { %12694 = vsyncpa [#allocation7 + $0x1], 1 }

</bundles_post_ra>
